<compile_context>
chip_gen: v7x
topology: tpu7x:2x2x1
jax: 0.10.0
libtpu: 0.0.40
codegen_flags: <defaults>
</compile_context>

<pallas_src>
import functools
import math

import jax
import jax.numpy as jnp
from jax import lax
from jax.experimental import pallas as pl
from jax.experimental.pallas import tpu as pltpu


# ----------------------------------------------------------------------------
# In-kernel helpers (traced inside the fused Pallas kernels)
# ----------------------------------------------------------------------------

def _causal_mask(lq, lk):
    # additive mask: -BIG where col > row (== torch.triu(ones, 1) -> -inf)
    row = lax.broadcasted_iota(jnp.int32, (lq, lk), 0)
    col = lax.broadcasted_iota(jnp.int32, (lq, lk), 1)
    return jnp.where(col > row, jnp.float32(-1e30), jnp.float32(0.0))


def _layernorm(z, g, b):
    mu = jnp.mean(z, axis=-1, keepdims=True)
    var = jnp.mean((z - mu) ** 2, axis=-1, keepdims=True)
    return (z - mu) * lax.rsqrt(var + 1e-5) * g + b


def _softmax(s):
    mx = jnp.max(s, axis=-1, keepdims=True)
    p = jnp.exp(s - mx)
    return p * pl.reciprocal(jnp.sum(p, axis=-1, keepdims=True), approx=True)


def _load_heads(ref, nheads):
    """Read all per-head slices of a (1, nheads, ...) layer block once."""
    return [ref[0, h] for h in range(nheads)]


def _load_attn(refs, nheads):
    """refs = (wq, wk, wv, bq, bk, bv, wo, bo) layer-block refs -> loaded arrays."""
    wq_r, wk_r, wv_r, bq_r, bk_r, bv_r, wo_r, bo_r = refs
    return dict(
        wq=_load_heads(wq_r, nheads), wk=_load_heads(wk_r, nheads),
        wv=_load_heads(wv_r, nheads),
        bq=_load_heads(bq_r, nheads), bk=_load_heads(bk_r, nheads),
        bv=_load_heads(bv_r, nheads),
        wo=_load_heads(wo_r, nheads), bo=bo_r[0])


def _mha(x_q, x_kv, w, mask, scale):
    """Multi-head attention for one batch element.

    x_q: (Lq, E), x_kv: (Lk, E).  w holds pre-loaded per-head weights.
    Returns (Lq, E), output projection (bias included) applied.
    """
    acc = None
    for h in range(len(w["wq"])):
        q = jnp.dot(x_q, w["wq"][h],
                    preferred_element_type=jnp.float32) + w["bq"][h]
        k = jnp.dot(x_kv, w["wk"][h],
                    preferred_element_type=jnp.float32) + w["bk"][h]
        v = jnp.dot(x_kv, w["wv"][h],
                    preferred_element_type=jnp.float32) + w["bv"][h]
        s = lax.dot_general(q * scale, k, (((1,), (1,)), ((), ())),
                            preferred_element_type=jnp.float32) + mask
        p = _softmax(s)
        o = jnp.dot(p, v, preferred_element_type=jnp.float32)        # (Lq, hd)
        c = jnp.dot(o, w["wo"][h],
                    preferred_element_type=jnp.float32)              # (Lq, E)
        acc = c if acc is None else acc + c
    return acc + w["bo"]


# ----------------------------------------------------------------------------
# Fused encoder-stack kernel (grid = encoder layers)
# ----------------------------------------------------------------------------

def _enc_stack_kernel(x_ref,
                      wq_ref, wk_ref, wv_ref, bq_ref, bk_ref, bv_ref,
                      wo_ref, bo_ref, ln1g_ref, ln1b_ref,
                      w1_ref, b1_ref, w2_ref, b2_ref, ln2g_ref, ln2b_ref,
                      fng_ref, fnb_ref,
                      out_ref, x_sc, *, N, S, E, nheads):
    hd = E // nheads
    scale = 1.0 / math.sqrt(hd)
    mask = _causal_mask(S, S)                      # src_mask (causal over S)

    @pl.when(pl.program_id(0) == 0)
    def _init():
        x_sc[...] = x_ref[...]

    attn_w = _load_attn((wq_ref, wk_ref, wv_ref, bq_ref, bk_ref, bv_ref,
                         wo_ref, bo_ref), nheads)
    ln1g, ln1b = ln1g_ref[0], ln1b_ref[0]
    ln2g, ln2b = ln2g_ref[0], ln2b_ref[0]
    w1, b1 = w1_ref[0], b1_ref[0]
    w2, b2 = w2_ref[0], b2_ref[0]

    for n in range(N):
        x_n = x_sc[n]                                                # (S, E)
        attn = _mha(x_n, x_n, attn_w, mask, scale)
        x2 = _layernorm(x_n + attn, ln1g, ln1b)
        hmid = jnp.maximum(
            jnp.dot(x2, w1, preferred_element_type=jnp.float32) + b1, 0.0)
        ffn = jnp.dot(hmid, w2, preferred_element_type=jnp.float32) + b2
        x_sc[n] = _layernorm(x2 + ffn, ln2g, ln2b)

    @pl.when(pl.program_id(0) == pl.num_programs(0) - 1)
    def _finalize():
        g, b = fng_ref[...], fnb_ref[...]
        for n in range(N):
            out_ref[n] = _layernorm(x_sc[n], g, b)   # final encoder LayerNorm


# ----------------------------------------------------------------------------
# Fused decoder-stack kernel (grid = decoder layers), incl. final LN + fc_out
# ----------------------------------------------------------------------------

def _dec_stack_kernel(y_ref, mem_ref,
                      swq_ref, swk_ref, swv_ref, sbq_ref, sbk_ref, sbv_ref,
                      swo_ref, sbo_ref, ln1g_ref, ln1b_ref,
                      cwq_ref, cwk_ref, cwv_ref, cbq_ref, cbk_ref, cbv_ref,
                      cwo_ref, cbo_ref, ln2g_ref, ln2b_ref,
                      w1_ref, b1_ref, w2_ref, b2_ref, ln3g_ref, ln3b_ref,
                      fng_ref, fnb_ref, fcw_ref, fcb_ref,
                      out_ref, y_sc, *, N, T, S, E, nheads):
    hd = E // nheads
    scale = 1.0 / math.sqrt(hd)
    tgt_mask = _causal_mask(T, T)                  # trg_mask
    mem_mask = _causal_mask(T, S)                  # memory_mask (T x S)

    @pl.when(pl.program_id(0) == 0)
    def _init():
        y_sc[...] = y_ref[...]

    self_w = _load_attn((swq_ref, swk_ref, swv_ref, sbq_ref, sbk_ref, sbv_ref,
                         swo_ref, sbo_ref), nheads)
    cross_w = _load_attn((cwq_ref, cwk_ref, cwv_ref, cbq_ref, cbk_ref, cbv_ref,
                          cwo_ref, cbo_ref), nheads)
    ln1g, ln1b = ln1g_ref[0], ln1b_ref[0]
    ln2g, ln2b = ln2g_ref[0], ln2b_ref[0]
    ln3g, ln3b = ln3g_ref[0], ln3b_ref[0]
    w1, b1 = w1_ref[0], b1_ref[0]
    w2, b2 = w2_ref[0], b2_ref[0]

    for n in range(N):
        y_n = y_sc[n]                                                # (T, E)
        m_n = mem_ref[n]                                             # (S, E)

        # --- masked self-attention + add&norm ---
        sa = _mha(y_n, y_n, self_w, tgt_mask, scale)
        y2 = _layernorm(y_n + sa, ln1g, ln1b)

        # --- cross-attention over encoder memory + add&norm ---
        ca = _mha(y2, m_n, cross_w, mem_mask, scale)
        y3 = _layernorm(y2 + ca, ln2g, ln2b)

        # --- feed-forward + add&norm ---
        hmid = jnp.maximum(
            jnp.dot(y3, w1, preferred_element_type=jnp.float32) + b1, 0.0)
        ffn = jnp.dot(hmid, w2, preferred_element_type=jnp.float32) + b2
        y_sc[n] = _layernorm(y3 + ffn, ln3g, ln3b)

    @pl.when(pl.program_id(0) == pl.num_programs(0) - 1)
    def _finalize():
        g, b = fng_ref[...], fnb_ref[...]
        fcw, fcb = fcw_ref[...], fcb_ref[...]       # fcw: (1, E), fcb: (1, 1)
        for n in range(N):
            yf = _layernorm(y_sc[n], g, b)          # final decoder LayerNorm
            # fc_out: Linear(hidden, 1) fused in (lane reduction, no extra call)
            out_ref[n] = jnp.sum(yf * fcw, axis=-1, keepdims=True) + fcb


# ----------------------------------------------------------------------------
# pallas_call wrappers
# ----------------------------------------------------------------------------

def _resident(shape):
    """Whole-array block, same block every grid step (stays VMEM-resident)."""
    return pl.BlockSpec(shape, lambda l, _n=len(shape): (0,) * _n)


def _per_layer(tail):
    """One layer-slice (leading dim) of a stacked parameter per grid step."""
    return pl.BlockSpec((1,) + tuple(tail),
                        lambda l, _n=len(tail): (l,) + (0,) * _n)


def _attn_specs(nheads, E, hd):
    return [
        _per_layer((nheads, E, hd)), _per_layer((nheads, E, hd)),
        _per_layer((nheads, E, hd)),
        _per_layer((nheads, 1, hd)), _per_layer((nheads, 1, hd)),
        _per_layer((nheads, 1, hd)),
        _per_layer((nheads, hd, E)), _per_layer((1, E)),
    ]


def run_encoder_stack(x, enc, enc_norm_g, enc_norm_b, nheads):
    N, S, E = x.shape
    L = enc["wq"].shape[0]
    hd = E // nheads
    F = enc["w1"].shape[2]

    kernel = functools.partial(_enc_stack_kernel, N=N, S=S, E=E, nheads=nheads)
    return pl.pallas_call(
        kernel,
        out_shape=jax.ShapeDtypeStruct((N, S, E), jnp.float32),
        grid=(L,),
        in_specs=(
            [_resident((N, S, E))]
            + _attn_specs(nheads, E, hd)
            + [_per_layer((1, E)), _per_layer((1, E)),        # ln1 g/b
               _per_layer((E, F)), _per_layer((1, F)),        # w1, b1
               _per_layer((F, E)), _per_layer((1, E)),        # w2, b2
               _per_layer((1, E)), _per_layer((1, E)),        # ln2 g/b
               _resident((1, E)), _resident((1, E))]          # final enc norm
        ),
        out_specs=_resident((N, S, E)),
        scratch_shapes=[pltpu.VMEM((N, S, E), jnp.float32)],
        compiler_params=pltpu.CompilerParams(
            dimension_semantics=("arbitrary",)),
    )(x,
      enc["wq"], enc["wk"], enc["wv"], enc["bq"], enc["bk"], enc["bv"],
      enc["wo"], enc["bo"], enc["ln1g"], enc["ln1b"],
      enc["w1"], enc["b1"], enc["w2"], enc["b2"], enc["ln2g"], enc["ln2b"],
      enc_norm_g, enc_norm_b)


def run_decoder_stack(y, memory, dec, dec_norm_g, dec_norm_b, fc_w, fc_b,
                      nheads):
    N, T, E = y.shape
    S = memory.shape[1]
    L = dec["s_wq"].shape[0]
    hd = E // nheads
    F = dec["w1"].shape[2]

    kernel = functools.partial(_dec_stack_kernel, N=N, T=T, S=S, E=E,
                               nheads=nheads)
    return pl.pallas_call(
        kernel,
        out_shape=jax.ShapeDtypeStruct((N, T, 1), jnp.float32),
        grid=(L,),
        in_specs=(
            [_resident((N, T, E)), _resident((N, S, E))]
            + _attn_specs(nheads, E, hd)                       # self-attn
            + [_per_layer((1, E)), _per_layer((1, E))]         # ln1 g/b
            + _attn_specs(nheads, E, hd)                       # cross-attn
            + [_per_layer((1, E)), _per_layer((1, E)),         # ln2 g/b
               _per_layer((E, F)), _per_layer((1, F)),         # w1, b1
               _per_layer((F, E)), _per_layer((1, E)),         # w2, b2
               _per_layer((1, E)), _per_layer((1, E)),         # ln3 g/b
               _resident((1, E)), _resident((1, E)),           # final dec norm
               _resident((1, E)), _resident((1, 1))]           # fc_w, fc_b
        ),
        out_specs=_resident((N, T, 1)),
        scratch_shapes=[pltpu.VMEM((N, T, E), jnp.float32)],
        compiler_params=pltpu.CompilerParams(
            dimension_semantics=("arbitrary",)),
    )(y, memory,
      dec["s_wq"], dec["s_wk"], dec["s_wv"], dec["s_bq"], dec["s_bk"],
      dec["s_bv"], dec["s_wo"], dec["s_bo"], dec["ln1g"], dec["ln1b"],
      dec["c_wq"], dec["c_wk"], dec["c_wv"], dec["c_bq"], dec["c_bk"],
      dec["c_bv"], dec["c_wo"], dec["c_bo"], dec["ln2g"], dec["ln2b"],
      dec["w1"], dec["b1"], dec["w2"], dec["b2"], dec["ln3g"], dec["ln3b"],
      dec_norm_g, dec_norm_b, fc_w, fc_b)


# ----------------------------------------------------------------------------
# Model glue (embeddings + positional encoding) in plain JAX
# ----------------------------------------------------------------------------

def make_positional_encoding(d_model, max_len=5000):
    position = jnp.arange(max_len, dtype=jnp.float32)[:, None]
    div_term = jnp.exp(jnp.arange(0, d_model, 2, dtype=jnp.float32)
                       * (-math.log(10000.0) / d_model))
    pe = jnp.zeros((max_len, d_model), jnp.float32)
    pe = pe.at[:, 0::2].set(jnp.sin(position * div_term))
    pe = pe.at[:, 1::2].set(jnp.cos(position * div_term))
    return pe[:, None, :]   # (max_len, 1, d_model)


def transformer_forward(params, part_arr, src_tok, trg_tok, ts, user_answer,
                        nheads):
    S, N = src_tok.shape
    T = trg_tok.shape[0]
    pe = params["pe"]

    # --- embeddings (gathers; dropout = identity) ---
    part_emb = params["part_embedding"][part_arr[src_tok] - 1]        # (S,N,E)
    ts_emb = params["ts_embedding"][ts]                               # (S,N,E)
    ua_emb = params["user_answer_embedding"][user_answer]             # (T,N,E)

    src = params["encoder_emb"][src_tok] + part_emb + ts_emb
    src = src + params["pos_scale_enc"] * pe[:S]

    trg = params["decoder_emb"][trg_tok] + ua_emb
    trg = trg + params["pos_scale_dec"] * pe[:T]

    # (L, N, E) -> (N, L, E) for the batch-major fused kernels
    x = jnp.transpose(src, (1, 0, 2))
    y = jnp.transpose(trg, (1, 0, 2))

    memory = run_encoder_stack(x, params["enc"],
                               params["enc_norm_g"], params["enc_norm_b"],
                               nheads)                                 # (N,S,E)
    logits = run_decoder_stack(y, memory, params["dec"],
                               params["dec_norm_g"], params["dec_norm_b"],
                               params["fc_w"], params["fc_b"],
                               nheads)                                 # (N,T,1)
    return jnp.transpose(logits, (1, 0, 2))                           # (T,N,1)


# ----------------------------------------------------------------------------
# Deterministic parameter construction (stacked per layer, per-head attention)
# ----------------------------------------------------------------------------

def init_params(key, intoken, hidden, nheads, ff_model, enc_layers, dec_layers,
                ts_unique):
    keys = iter(jax.random.split(key, 256))
    E, F = hidden, ff_model
    hd = E // nheads

    def nrm(shape, s=0.05):
        return s * jax.random.normal(next(keys), shape, jnp.float32)

    def ones(shape):
        return jnp.ones(shape, jnp.float32)

    def zeros(shape):
        return jnp.zeros(shape, jnp.float32)

    def attn_block(L):
        return {
            "wq": nrm((L, nheads, E, hd)), "wk": nrm((L, nheads, E, hd)),
            "wv": nrm((L, nheads, E, hd)),
            "bq": zeros((L, nheads, 1, hd)), "bk": zeros((L, nheads, 1, hd)),
            "bv": zeros((L, nheads, 1, hd)),
            "wo": nrm((L, nheads, hd, E)), "bo": zeros((L, 1, E)),
        }

    enc = dict(attn_block(enc_layers))
    enc.update({
        "ln1g": ones((enc_layers, 1, E)), "ln1b": zeros((enc_layers, 1, E)),
        "w1": nrm((enc_layers, E, F)), "b1": zeros((enc_layers, 1, F)),
        "w2": nrm((enc_layers, F, E)), "b2": zeros((enc_layers, 1, E)),
        "ln2g": ones((enc_layers, 1, E)), "ln2b": zeros((enc_layers, 1, E)),
    })

    sa = attn_block(dec_layers)
    ca = attn_block(dec_layers)
    dec = {("s_" + k): v for k, v in sa.items()}
    dec.update({("c_" + k): v for k, v in ca.items()})
    dec.update({
        "ln1g": ones((dec_layers, 1, E)), "ln1b": zeros((dec_layers, 1, E)),
        "ln2g": ones((dec_layers, 1, E)), "ln2b": zeros((dec_layers, 1, E)),
        "w1": nrm((dec_layers, E, F)), "b1": zeros((dec_layers, 1, F)),
        "w2": nrm((dec_layers, F, E)), "b2": zeros((dec_layers, 1, E)),
        "ln3g": ones((dec_layers, 1, E)), "ln3b": zeros((dec_layers, 1, E)),
    })

    params = {
        "encoder_emb": nrm((intoken, E), 1.0),
        "decoder_emb": nrm((3, E), 1.0),
        "part_embedding": nrm((7, E), 1.0),
        "ts_embedding": nrm((ts_unique, E), 1.0),
        "user_answer_embedding": nrm((5, E), 1.0),
        "pos_scale_enc": jnp.ones((1,), jnp.float32),
        "pos_scale_dec": jnp.ones((1,), jnp.float32),
        "pe": make_positional_encoding(E),
        "enc": enc,
        "enc_norm_g": ones((1, E)), "enc_norm_b": zeros((1, E)),
        "dec": dec,
        "dec_norm_g": ones((1, E)), "dec_norm_b": zeros((1, E)),
        "fc_w": nrm((1, E)),      # fc_out weight stored row-major as (1, E)
        "fc_b": zeros((1, 1)),
    }
    return params


# ----------------------------------------------------------------------------
# Main
# ----------------------------------------------------------------------------

if __name__ == "__main__":
    intoken = 40
    hidden = 32
    nheads = 4
    ff_model = 64
    enc_layers = 2
    dec_layers = 2
    ts_unique = 70
    S, T, N = 10, 8, 2          # src seq len, trg seq len, batch

    key = jax.random.PRNGKey(0)
    k1, k2, k3, k4, k5, kp = jax.random.split(key, 6)

    src_tok = jax.random.randint(k1, (S, N), 0, intoken, dtype=jnp.int32)
    trg_tok = jax.random.randint(k2, (T, N), 0, 3, dtype=jnp.int32)
    ts = jax.random.randint(k3, (S, N), 0, ts_unique, dtype=jnp.int32)
    user_answer = jax.random.randint(k4, (T, N), 0, 5, dtype=jnp.int32)
    # part_arr maps each token id to a part in 1..7 (module does part_arr[src]-1)
    part_arr = jax.random.randint(k5, (intoken,), 1, 8, dtype=jnp.int32)

    params = init_params(kp, intoken, hidden, nheads, ff_model,
                         enc_layers, dec_layers, ts_unique)

    fwd = jax.jit(functools.partial(transformer_forward, nheads=nheads))
    out = fwd(params, part_arr, src_tok, trg_tok, ts, user_answer)
    out = jax.block_until_ready(out)

    assert out.shape == (T, N, 1), out.shape
    assert bool(jnp.all(jnp.isfinite(out)))
    print("KERNEL_OK")
</pallas_src>

<mosaic_0001>
module attributes {stable_mosaic.version = 11 : i64} {
  func.func @_enc_stack_kernel(%arg0: i32, %arg1: memref<2x10x32xf32, #tpu.memory_space<vmem>>, %arg2: memref<1x4x32x8xf32, #tpu.memory_space<vmem>>, %arg3: memref<1x4x32x8xf32, #tpu.memory_space<vmem>>, %arg4: memref<1x4x32x8xf32, #tpu.memory_space<vmem>>, %arg5: memref<1x4x1x8xf32, #tpu.memory_space<vmem>>, %arg6: memref<1x4x1x8xf32, #tpu.memory_space<vmem>>, %arg7: memref<1x4x1x8xf32, #tpu.memory_space<vmem>>, %arg8: memref<1x4x8x32xf32, #tpu.memory_space<vmem>>, %arg9: memref<1x1x32xf32, #tpu.memory_space<vmem>>, %arg10: memref<1x1x32xf32, #tpu.memory_space<vmem>>, %arg11: memref<1x1x32xf32, #tpu.memory_space<vmem>>, %arg12: memref<1x32x64xf32, #tpu.memory_space<vmem>>, %arg13: memref<1x1x64xf32, #tpu.memory_space<vmem>>, %arg14: memref<1x64x32xf32, #tpu.memory_space<vmem>>, %arg15: memref<1x1x32xf32, #tpu.memory_space<vmem>>, %arg16: memref<1x1x32xf32, #tpu.memory_space<vmem>>, %arg17: memref<1x1x32xf32, #tpu.memory_space<vmem>>, %arg18: memref<1x32xf32, #tpu.memory_space<vmem>>, %arg19: memref<1x32xf32, #tpu.memory_space<vmem>>, %arg20: memref<2x10x32xf32, #tpu.memory_space<vmem>>, %arg21: memref<2x10x32xf32, #tpu.memory_space<vmem>>) attributes {dimension_semantics = [#tpu.dimension_semantics<arbitrary>], iteration_bounds = array<i64: 2>, scalar_prefetch = 0 : i64, scratch_operands = 1 : i64, tpu.core_type = #tpu.core_type<tc>, window_params = [{pipeline_mode = #tpu.pipeline_mode<synchronous>, transform_indices = @transform_0, window_bounds = array<i64: 2, 10, 32>}, {transform_indices = @transform_1, window_bounds = array<i64: 1, 4, 32, 8>}, {transform_indices = @transform_2, window_bounds = array<i64: 1, 4, 32, 8>}, {transform_indices = @transform_3, window_bounds = array<i64: 1, 4, 32, 8>}, {transform_indices = @transform_4, window_bounds = array<i64: 1, 4, 1, 8>}, {transform_indices = @transform_5, window_bounds = array<i64: 1, 4, 1, 8>}, {transform_indices = @transform_6, window_bounds = array<i64: 1, 4, 1, 8>}, {transform_indices = @transform_7, window_bounds = array<i64: 1, 4, 8, 32>}, {transform_indices = @transform_8, window_bounds = array<i64: 1, 1, 32>}, {transform_indices = @transform_9, window_bounds = array<i64: 1, 1, 32>}, {transform_indices = @transform_10, window_bounds = array<i64: 1, 1, 32>}, {transform_indices = @transform_11, window_bounds = array<i64: 1, 32, 64>}, {transform_indices = @transform_12, window_bounds = array<i64: 1, 1, 64>}, {transform_indices = @transform_13, window_bounds = array<i64: 1, 64, 32>}, {transform_indices = @transform_14, window_bounds = array<i64: 1, 1, 32>}, {transform_indices = @transform_15, window_bounds = array<i64: 1, 1, 32>}, {transform_indices = @transform_16, window_bounds = array<i64: 1, 1, 32>}, {pipeline_mode = #tpu.pipeline_mode<synchronous>, transform_indices = @transform_17, window_bounds = array<i64: 1, 32>}, {pipeline_mode = #tpu.pipeline_mode<synchronous>, transform_indices = @transform_18, window_bounds = array<i64: 1, 32>}, {pipeline_mode = #tpu.pipeline_mode<synchronous>, transform_indices = @transform_19, window_bounds = array<i64: 2, 10, 32>}]} {
    %0 = tpu.iota {dimensions = array<i32: 0>} : vector<10x10xi32>
    %1 = tpu.iota {dimensions = array<i32: 1>} : vector<10x10xi32>
    %2 = arith.cmpi sgt, %1, %0 : vector<10x10xi32>
    %cst = arith.constant -1.000000e+30 : f32
    %cst_0 = arith.constant 0.000000e+00 : f32
    %3 = vector.broadcast %cst : f32 to vector<10x10xf32>
    %4 = vector.broadcast %cst_0 : f32 to vector<10x10xf32>
    %5 = arith.select %2, %3, %4 : vector<10x10xi1>, vector<10x10xf32>
    %c0_i32 = arith.constant 0 : i32
    %6 = arith.cmpi eq, %arg0, %c0_i32 : i32
    %7 = arith.extui %6 : i1 to i32
    %c0_i32_1 = arith.constant 0 : i32
    %8 = arith.cmpi ne, %7, %c0_i32_1 : i32
    scf.if %8 {
      %c0_248 = arith.constant 0 : index
      %c0_249 = arith.constant 0 : index
      %c0_250 = arith.constant 0 : index
      %414 = vector.load %arg1[%c0_248, %c0_249, %c0_250] : memref<2x10x32xf32, #tpu.memory_space<vmem>>, vector<2x10x32xf32>
      %c0_251 = arith.constant 0 : index
      %c0_252 = arith.constant 0 : index
      %c0_253 = arith.constant 0 : index
      %415 = vector.load %arg21[%c0_251, %c0_252, %c0_253] : memref<2x10x32xf32, #tpu.memory_space<vmem>>, vector<2x10x32xf32>
      tpu.vector_store %arg21[%c0_251, %c0_252, %c0_253], %414 {strides = array<i32>} : memref<2x10x32xf32, #tpu.memory_space<vmem>>, vector<2x10x32xf32>,
    } else {
    }
    %c0 = arith.constant 0 : index
    %c0_2 = arith.constant 0 : index
    %c0_3 = arith.constant 0 : index
    %c0_4 = arith.constant 0 : index
    %9 = vector.load %arg2[%c0, %c0_2, %c0_3, %c0_4] : memref<1x4x32x8xf32, #tpu.memory_space<vmem>>, vector<1x1x32x8xf32>
    %10 = vector.shape_cast %9 : vector<1x1x32x8xf32> to vector<32x8xf32>
    %c0_5 = arith.constant 0 : index
    %c1 = arith.constant 1 : index
    %c0_6 = arith.constant 0 : index
    %c0_7 = arith.constant 0 : index
    %11 = vector.load %arg2[%c0_5, %c1, %c0_6, %c0_7] : memref<1x4x32x8xf32, #tpu.memory_space<vmem>>, vector<1x1x32x8xf32>
    %12 = vector.shape_cast %11 : vector<1x1x32x8xf32> to vector<32x8xf32>
    %c0_8 = arith.constant 0 : index
    %c2 = arith.constant 2 : index
    %c0_9 = arith.constant 0 : index
    %c0_10 = arith.constant 0 : index
    %13 = vector.load %arg2[%c0_8, %c2, %c0_9, %c0_10] : memref<1x4x32x8xf32, #tpu.memory_space<vmem>>, vector<1x1x32x8xf32>
    %14 = vector.shape_cast %13 : vector<1x1x32x8xf32> to vector<32x8xf32>
    %c0_11 = arith.constant 0 : index
    %c3 = arith.constant 3 : index
    %c0_12 = arith.constant 0 : index
    %c0_13 = arith.constant 0 : index
    %15 = vector.load %arg2[%c0_11, %c3, %c0_12, %c0_13] : memref<1x4x32x8xf32, #tpu.memory_space<vmem>>, vector<1x1x32x8xf32>
    %16 = vector.shape_cast %15 : vector<1x1x32x8xf32> to vector<32x8xf32>
    %c0_14 = arith.constant 0 : index
    %c0_15 = arith.constant 0 : index
    %c0_16 = arith.constant 0 : index
    %c0_17 = arith.constant 0 : index
    %17 = vector.load %arg3[%c0_14, %c0_15, %c0_16, %c0_17] : memref<1x4x32x8xf32, #tpu.memory_space<vmem>>, vector<1x1x32x8xf32>
    %18 = vector.shape_cast %17 : vector<1x1x32x8xf32> to vector<32x8xf32>
    %c0_18 = arith.constant 0 : index
    %c1_19 = arith.constant 1 : index
    %c0_20 = arith.constant 0 : index
    %c0_21 = arith.constant 0 : index
    %19 = vector.load %arg3[%c0_18, %c1_19, %c0_20, %c0_21] : memref<1x4x32x8xf32, #tpu.memory_space<vmem>>, vector<1x1x32x8xf32>
    %20 = vector.shape_cast %19 : vector<1x1x32x8xf32> to vector<32x8xf32>
    %c0_22 = arith.constant 0 : index
    %c2_23 = arith.constant 2 : index
    %c0_24 = arith.constant 0 : index
    %c0_25 = arith.constant 0 : index
    %21 = vector.load %arg3[%c0_22, %c2_23, %c0_24, %c0_25] : memref<1x4x32x8xf32, #tpu.memory_space<vmem>>, vector<1x1x32x8xf32>
    %22 = vector.shape_cast %21 : vector<1x1x32x8xf32> to vector<32x8xf32>
    %c0_26 = arith.constant 0 : index
    %c3_27 = arith.constant 3 : index
    %c0_28 = arith.constant 0 : index
    %c0_29 = arith.constant 0 : index
    %23 = vector.load %arg3[%c0_26, %c3_27, %c0_28, %c0_29] : memref<1x4x32x8xf32, #tpu.memory_space<vmem>>, vector<1x1x32x8xf32>
    %24 = vector.shape_cast %23 : vector<1x1x32x8xf32> to vector<32x8xf32>
    %c0_30 = arith.constant 0 : index
    %c0_31 = arith.constant 0 : index
    %c0_32 = arith.constant 0 : index
    %c0_33 = arith.constant 0 : index
    %25 = vector.load %arg4[%c0_30, %c0_31, %c0_32, %c0_33] : memref<1x4x32x8xf32, #tpu.memory_space<vmem>>, vector<1x1x32x8xf32>
    %26 = vector.shape_cast %25 : vector<1x1x32x8xf32> to vector<32x8xf32>
    %c0_34 = arith.constant 0 : index
    %c1_35 = arith.constant 1 : index
    %c0_36 = arith.constant 0 : index
    %c0_37 = arith.constant 0 : index
    %27 = vector.load %arg4[%c0_34, %c1_35, %c0_36, %c0_37] : memref<1x4x32x8xf32, #tpu.memory_space<vmem>>, vector<1x1x32x8xf32>
    %28 = vector.shape_cast %27 : vector<1x1x32x8xf32> to vector<32x8xf32>
    %c0_38 = arith.constant 0 : index
    %c2_39 = arith.constant 2 : index
    %c0_40 = arith.constant 0 : index
    %c0_41 = arith.constant 0 : index
    %29 = vector.load %arg4[%c0_38, %c2_39, %c0_40, %c0_41] : memref<1x4x32x8xf32, #tpu.memory_space<vmem>>, vector<1x1x32x8xf32>
    %30 = vector.shape_cast %29 : vector<1x1x32x8xf32> to vector<32x8xf32>
    %c0_42 = arith.constant 0 : index
    %c3_43 = arith.constant 3 : index
    %c0_44 = arith.constant 0 : index
    %c0_45 = arith.constant 0 : index
    %31 = vector.load %arg4[%c0_42, %c3_43, %c0_44, %c0_45] : memref<1x4x32x8xf32, #tpu.memory_space<vmem>>, vector<1x1x32x8xf32>
    %32 = vector.shape_cast %31 : vector<1x1x32x8xf32> to vector<32x8xf32>
    %c0_46 = arith.constant 0 : index
    %c0_47 = arith.constant 0 : index
    %c0_48 = arith.constant 0 : index
    %c0_49 = arith.constant 0 : index
    %33 = vector.load %arg5[%c0_46, %c0_47, %c0_48, %c0_49] : memref<1x4x1x8xf32, #tpu.memory_space<vmem>>, vector<1x1x1x8xf32>
    %34 = vector.shape_cast %33 : vector<1x1x1x8xf32> to vector<1x8xf32>
    %c0_50 = arith.constant 0 : index
    %c1_51 = arith.constant 1 : index
    %c0_52 = arith.constant 0 : index
    %c0_53 = arith.constant 0 : index
    %35 = vector.load %arg5[%c0_50, %c1_51, %c0_52, %c0_53] : memref<1x4x1x8xf32, #tpu.memory_space<vmem>>, vector<1x1x1x8xf32>
    %36 = vector.shape_cast %35 : vector<1x1x1x8xf32> to vector<1x8xf32>
    %c0_54 = arith.constant 0 : index
    %c2_55 = arith.constant 2 : index
    %c0_56 = arith.constant 0 : index
    %c0_57 = arith.constant 0 : index
    %37 = vector.load %arg5[%c0_54, %c2_55, %c0_56, %c0_57] : memref<1x4x1x8xf32, #tpu.memory_space<vmem>>, vector<1x1x1x8xf32>
    %38 = vector.shape_cast %37 : vector<1x1x1x8xf32> to vector<1x8xf32>
    %c0_58 = arith.constant 0 : index
    %c3_59 = arith.constant 3 : index
    %c0_60 = arith.constant 0 : index
    %c0_61 = arith.constant 0 : index
    %39 = vector.load %arg5[%c0_58, %c3_59, %c0_60, %c0_61] : memref<1x4x1x8xf32, #tpu.memory_space<vmem>>, vector<1x1x1x8xf32>
    %40 = vector.shape_cast %39 : vector<1x1x1x8xf32> to vector<1x8xf32>
    %c0_62 = arith.constant 0 : index
    %c0_63 = arith.constant 0 : index
    %c0_64 = arith.constant 0 : index
    %c0_65 = arith.constant 0 : index
    %41 = vector.load %arg6[%c0_62, %c0_63, %c0_64, %c0_65] : memref<1x4x1x8xf32, #tpu.memory_space<vmem>>, vector<1x1x1x8xf32>
    %42 = vector.shape_cast %41 : vector<1x1x1x8xf32> to vector<1x8xf32>
    %c0_66 = arith.constant 0 : index
    %c1_67 = arith.constant 1 : index
    %c0_68 = arith.constant 0 : index
    %c0_69 = arith.constant 0 : index
    %43 = vector.load %arg6[%c0_66, %c1_67, %c0_68, %c0_69] : memref<1x4x1x8xf32, #tpu.memory_space<vmem>>, vector<1x1x1x8xf32>
    %44 = vector.shape_cast %43 : vector<1x1x1x8xf32> to vector<1x8xf32>
    %c0_70 = arith.constant 0 : index
    %c2_71 = arith.constant 2 : index
    %c0_72 = arith.constant 0 : index
    %c0_73 = arith.constant 0 : index
    %45 = vector.load %arg6[%c0_70, %c2_71, %c0_72, %c0_73] : memref<1x4x1x8xf32, #tpu.memory_space<vmem>>, vector<1x1x1x8xf32>
    %46 = vector.shape_cast %45 : vector<1x1x1x8xf32> to vector<1x8xf32>
    %c0_74 = arith.constant 0 : index
    %c3_75 = arith.constant 3 : index
    %c0_76 = arith.constant 0 : index
    %c0_77 = arith.constant 0 : index
    %47 = vector.load %arg6[%c0_74, %c3_75, %c0_76, %c0_77] : memref<1x4x1x8xf32, #tpu.memory_space<vmem>>, vector<1x1x1x8xf32>
    %48 = vector.shape_cast %47 : vector<1x1x1x8xf32> to vector<1x8xf32>
    %c0_78 = arith.constant 0 : index
    %c0_79 = arith.constant 0 : index
    %c0_80 = arith.constant 0 : index
    %c0_81 = arith.constant 0 : index
    %49 = vector.load %arg7[%c0_78, %c0_79, %c0_80, %c0_81] : memref<1x4x1x8xf32, #tpu.memory_space<vmem>>, vector<1x1x1x8xf32>
    %50 = vector.shape_cast %49 : vector<1x1x1x8xf32> to vector<1x8xf32>
    %c0_82 = arith.constant 0 : index
    %c1_83 = arith.constant 1 : index
    %c0_84 = arith.constant 0 : index
    %c0_85 = arith.constant 0 : index
    %51 = vector.load %arg7[%c0_82, %c1_83, %c0_84, %c0_85] : memref<1x4x1x8xf32, #tpu.memory_space<vmem>>, vector<1x1x1x8xf32>
    %52 = vector.shape_cast %51 : vector<1x1x1x8xf32> to vector<1x8xf32>
    %c0_86 = arith.constant 0 : index
    %c2_87 = arith.constant 2 : index
    %c0_88 = arith.constant 0 : index
    %c0_89 = arith.constant 0 : index
    %53 = vector.load %arg7[%c0_86, %c2_87, %c0_88, %c0_89] : memref<1x4x1x8xf32, #tpu.memory_space<vmem>>, vector<1x1x1x8xf32>
    %54 = vector.shape_cast %53 : vector<1x1x1x8xf32> to vector<1x8xf32>
    %c0_90 = arith.constant 0 : index
    %c3_91 = arith.constant 3 : index
    %c0_92 = arith.constant 0 : index
    %c0_93 = arith.constant 0 : index
    %55 = vector.load %arg7[%c0_90, %c3_91, %c0_92, %c0_93] : memref<1x4x1x8xf32, #tpu.memory_space<vmem>>, vector<1x1x1x8xf32>
    %56 = vector.shape_cast %55 : vector<1x1x1x8xf32> to vector<1x8xf32>
    %c0_94 = arith.constant 0 : index
    %c0_95 = arith.constant 0 : index
    %c0_96 = arith.constant 0 : index
    %c0_97 = arith.constant 0 : index
    %57 = vector.load %arg8[%c0_94, %c0_95, %c0_96, %c0_97] : memref<1x4x8x32xf32, #tpu.memory_space<vmem>>, vector<1x1x8x32xf32>
    %58 = vector.shape_cast %57 : vector<1x1x8x32xf32> to vector<8x32xf32>
    %c0_98 = arith.constant 0 : index
    %c1_99 = arith.constant 1 : index
    %c0_100 = arith.constant 0 : index
    %c0_101 = arith.constant 0 : index
    %59 = vector.load %arg8[%c0_98, %c1_99, %c0_100, %c0_101] : memref<1x4x8x32xf32, #tpu.memory_space<vmem>>, vector<1x1x8x32xf32>
    %60 = vector.shape_cast %59 : vector<1x1x8x32xf32> to vector<8x32xf32>
    %c0_102 = arith.constant 0 : index
    %c2_103 = arith.constant 2 : index
    %c0_104 = arith.constant 0 : index
    %c0_105 = arith.constant 0 : index
    %61 = vector.load %arg8[%c0_102, %c2_103, %c0_104, %c0_105] : memref<1x4x8x32xf32, #tpu.memory_space<vmem>>, vector<1x1x8x32xf32>
    %62 = vector.shape_cast %61 : vector<1x1x8x32xf32> to vector<8x32xf32>
    %c0_106 = arith.constant 0 : index
    %c3_107 = arith.constant 3 : index
    %c0_108 = arith.constant 0 : index
    %c0_109 = arith.constant 0 : index
    %63 = vector.load %arg8[%c0_106, %c3_107, %c0_108, %c0_109] : memref<1x4x8x32xf32, #tpu.memory_space<vmem>>, vector<1x1x8x32xf32>
    %64 = vector.shape_cast %63 : vector<1x1x8x32xf32> to vector<8x32xf32>
    %c0_110 = arith.constant 0 : index
    %c0_111 = arith.constant 0 : index
    %c0_112 = arith.constant 0 : index
    %65 = vector.load %arg9[%c0_110, %c0_111, %c0_112] : memref<1x1x32xf32, #tpu.memory_space<vmem>>, vector<1x1x32xf32>
    %66 = vector.shape_cast %65 : vector<1x1x32xf32> to vector<1x32xf32>
    %c0_113 = arith.constant 0 : index
    %c0_114 = arith.constant 0 : index
    %c0_115 = arith.constant 0 : index
    %67 = vector.load %arg10[%c0_113, %c0_114, %c0_115] : memref<1x1x32xf32, #tpu.memory_space<vmem>>, vector<1x1x32xf32>
    %68 = vector.shape_cast %67 : vector<1x1x32xf32> to vector<1x32xf32>
    %c0_116 = arith.constant 0 : index
    %c0_117 = arith.constant 0 : index
    %c0_118 = arith.constant 0 : index
    %69 = vector.load %arg11[%c0_116, %c0_117, %c0_118] : memref<1x1x32xf32, #tpu.memory_space<vmem>>, vector<1x1x32xf32>
    %70 = vector.shape_cast %69 : vector<1x1x32xf32> to vector<1x32xf32>
    %c0_119 = arith.constant 0 : index
    %c0_120 = arith.constant 0 : index
    %c0_121 = arith.constant 0 : index
    %71 = vector.load %arg16[%c0_119, %c0_120, %c0_121] : memref<1x1x32xf32, #tpu.memory_space<vmem>>, vector<1x1x32xf32>
    %72 = vector.shape_cast %71 : vector<1x1x32xf32> to vector<1x32xf32>
    %c0_122 = arith.constant 0 : index
    %c0_123 = arith.constant 0 : index
    %c0_124 = arith.constant 0 : index
    %73 = vector.load %arg17[%c0_122, %c0_123, %c0_124] : memref<1x1x32xf32, #tpu.memory_space<vmem>>, vector<1x1x32xf32>
    %74 = vector.shape_cast %73 : vector<1x1x32xf32> to vector<1x32xf32>
    %c0_125 = arith.constant 0 : index
    %c0_126 = arith.constant 0 : index
    %c0_127 = arith.constant 0 : index
    %75 = vector.load %arg12[%c0_125, %c0_126, %c0_127] : memref<1x32x64xf32, #tpu.memory_space<vmem>>, vector<1x32x64xf32>
    %76 = vector.shape_cast %75 : vector<1x32x64xf32> to vector<32x64xf32>
    %c0_128 = arith.constant 0 : index
    %c0_129 = arith.constant 0 : index
    %c0_130 = arith.constant 0 : index
    %77 = vector.load %arg13[%c0_128, %c0_129, %c0_130] : memref<1x1x64xf32, #tpu.memory_space<vmem>>, vector<1x1x64xf32>
    %78 = vector.shape_cast %77 : vector<1x1x64xf32> to vector<1x64xf32>
    %c0_131 = arith.constant 0 : index
    %c0_132 = arith.constant 0 : index
    %c0_133 = arith.constant 0 : index
    %79 = vector.load %arg14[%c0_131, %c0_132, %c0_133] : memref<1x64x32xf32, #tpu.memory_space<vmem>>, vector<1x64x32xf32>
    %80 = vector.shape_cast %79 : vector<1x64x32xf32> to vector<64x32xf32>
    %c0_134 = arith.constant 0 : index
    %c0_135 = arith.constant 0 : index
    %c0_136 = arith.constant 0 : index
    %81 = vector.load %arg15[%c0_134, %c0_135, %c0_136] : memref<1x1x32xf32, #tpu.memory_space<vmem>>, vector<1x1x32xf32>
    %82 = vector.shape_cast %81 : vector<1x1x32xf32> to vector<1x32xf32>
    %c0_137 = arith.constant 0 : index
    %c0_138 = arith.constant 0 : index
    %c0_139 = arith.constant 0 : index
    %83 = vector.load %arg21[%c0_137, %c0_138, %c0_139] : memref<2x10x32xf32, #tpu.memory_space<vmem>>, vector<1x10x32xf32>
    %84 = vector.shape_cast %83 : vector<1x10x32xf32> to vector<10x32xf32>
    %cst_140 = arith.constant dense<0.000000e+00> : vector<10x8xf32>
    %85 = tpu.matmul %84, %10, %cst_140 {dimension_numbers = #tpu.dot_dimension_numbers<[1], [0], [0], [1], [0, 0, 1, 1], [], []>} : vector<10x32xf32>, vector<32x8xf32>, vector<10x8xf32> -> vector<10x8xf32>
    %86 = vector.broadcast %34 : vector<1x8xf32> to vector<10x8xf32>
    %87 = arith.addf %85, %86 : vector<10x8xf32>
    %cst_141 = arith.constant dense<0.000000e+00> : vector<10x8xf32>
    %88 = tpu.matmul %84, %18, %cst_141 {dimension_numbers = #tpu.dot_dimension_numbers<[1], [0], [0], [1], [0, 0, 1, 1], [], []>} : vector<10x32xf32>, vector<32x8xf32>, vector<10x8xf32> -> vector<10x8xf32>
    %89 = vector.broadcast %42 : vector<1x8xf32> to vector<10x8xf32>
    %90 = arith.addf %88, %89 : vector<10x8xf32>
    %cst_142 = arith.constant dense<0.000000e+00> : vector<10x8xf32>
    %91 = tpu.matmul %84, %26, %cst_142 {dimension_numbers = #tpu.dot_dimension_numbers<[1], [0], [0], [1], [0, 0, 1, 1], [], []>} : vector<10x32xf32>, vector<32x8xf32>, vector<10x8xf32> -> vector<10x8xf32>
    %92 = vector.broadcast %50 : vector<1x8xf32> to vector<10x8xf32>
    %93 = arith.addf %91, %92 : vector<10x8xf32>
    %cst_143 = arith.constant 0.353553385 : f32
    %94 = vector.broadcast %cst_143 : f32 to vector<10x8xf32>
    %95 = arith.mulf %87, %94 : vector<10x8xf32>
    %cst_144 = arith.constant dense<0.000000e+00> : vector<10x10xf32>
    %96 = tpu.matmul %95, %90, %cst_144 {dimension_numbers = #tpu.dot_dimension_numbers<[1], [1], [0], [0], [0, 0, 1, 0], [], []>} : vector<10x8xf32>, vector<10x8xf32>, vector<10x10xf32> -> vector<10x10xf32>
    %97 = arith.addf %96, %5 : vector<10x10xf32>
    %cst_145 = arith.constant dense<0xFF800000> : vector<10xf32>
    %98 = vector.multi_reduction <maximumf>, %97, %cst_145 [1] : vector<10x10xf32> to vector<10xf32>
    %99 = vector.shape_cast %98 : vector<10xf32> to vector<10x1xf32>
    %100 = vector.broadcast %99 : vector<10x1xf32> to vector<10x10xf32>
    %101 = arith.subf %97, %100 : vector<10x10xf32>
    %102 = math.exp %101 : vector<10x10xf32>
    %cst_146 = arith.constant dense<0.000000e+00> : vector<10xf32>
    %103 = vector.multi_reduction <add>, %102, %cst_146 [1] : vector<10x10xf32> to vector<10xf32>
    %104 = vector.shape_cast %103 : vector<10xf32> to vector<10x1xf32>
    %105 = tpu.reciprocal %104 {approx = true} : vector<10x1xf32> -> vector<10x1xf32>
    %106 = vector.broadcast %105 : vector<10x1xf32> to vector<10x10xf32>
    %107 = arith.mulf %102, %106 : vector<10x10xf32>
    %cst_147 = arith.constant dense<0.000000e+00> : vector<10x8xf32>
    %108 = tpu.matmul %107, %93, %cst_147 {dimension_numbers = #tpu.dot_dimension_numbers<[1], [0], [0], [1], [0, 0, 1, 1], [], []>} : vector<10x10xf32>, vector<10x8xf32>, vector<10x8xf32> -> vector<10x8xf32>
    %cst_148 = arith.constant dense<0.000000e+00> : vector<10x32xf32>
    %109 = tpu.matmul %108, %58, %cst_148 {dimension_numbers = #tpu.dot_dimension_numbers<[1], [0], [0], [1], [0, 0, 1, 1], [], []>} : vector<10x8xf32>, vector<8x32xf32>, vector<10x32xf32> -> vector<10x32xf32>
    %cst_149 = arith.constant dense<0.000000e+00> : vector<10x8xf32>
    %110 = tpu.matmul %84, %12, %cst_149 {dimension_numbers = #tpu.dot_dimension_numbers<[1], [0], [0], [1], [0, 0, 1, 1], [], []>} : vector<10x32xf32>, vector<32x8xf32>, vector<10x8xf32> -> vector<10x8xf32>
    %111 = vector.broadcast %36 : vector<1x8xf32> to vector<10x8xf32>
    %112 = arith.addf %110, %111 : vector<10x8xf32>
    %cst_150 = arith.constant dense<0.000000e+00> : vector<10x8xf32>
    %113 = tpu.matmul %84, %20, %cst_150 {dimension_numbers = #tpu.dot_dimension_numbers<[1], [0], [0], [1], [0, 0, 1, 1], [], []>} : vector<10x32xf32>, vector<32x8xf32>, vector<10x8xf32> -> vector<10x8xf32>
    %114 = vector.broadcast %44 : vector<1x8xf32> to vector<10x8xf32>
    %115 = arith.addf %113, %114 : vector<10x8xf32>
    %cst_151 = arith.constant dense<0.000000e+00> : vector<10x8xf32>
    %116 = tpu.matmul %84, %28, %cst_151 {dimension_numbers = #tpu.dot_dimension_numbers<[1], [0], [0], [1], [0, 0, 1, 1], [], []>} : vector<10x32xf32>, vector<32x8xf32>, vector<10x8xf32> -> vector<10x8xf32>
    %117 = vector.broadcast %52 : vector<1x8xf32> to vector<10x8xf32>
    %118 = arith.addf %116, %117 : vector<10x8xf32>
    %cst_152 = arith.constant 0.353553385 : f32
    %119 = vector.broadcast %cst_152 : f32 to vector<10x8xf32>
    %120 = arith.mulf %112, %119 : vector<10x8xf32>
    %cst_153 = arith.constant dense<0.000000e+00> : vector<10x10xf32>
    %121 = tpu.matmul %120, %115, %cst_153 {dimension_numbers = #tpu.dot_dimension_numbers<[1], [1], [0], [0], [0, 0, 1, 0], [], []>} : vector<10x8xf32>, vector<10x8xf32>, vector<10x10xf32> -> vector<10x10xf32>
    %122 = arith.addf %121, %5 : vector<10x10xf32>
    %cst_154 = arith.constant dense<0xFF800000> : vector<10xf32>
    %123 = vector.multi_reduction <maximumf>, %122, %cst_154 [1] : vector<10x10xf32> to vector<10xf32>
    %124 = vector.shape_cast %123 : vector<10xf32> to vector<10x1xf32>
    %125 = vector.broadcast %124 : vector<10x1xf32> to vector<10x10xf32>
    %126 = arith.subf %122, %125 : vector<10x10xf32>
    %127 = math.exp %126 : vector<10x10xf32>
    %cst_155 = arith.constant dense<0.000000e+00> : vector<10xf32>
    %128 = vector.multi_reduction <add>, %127, %cst_155 [1] : vector<10x10xf32> to vector<10xf32>
    %129 = vector.shape_cast %128 : vector<10xf32> to vector<10x1xf32>
    %130 = tpu.reciprocal %129 {approx = true} : vector<10x1xf32> -> vector<10x1xf32>
    %131 = vector.broadcast %130 : vector<10x1xf32> to vector<10x10xf32>
    %132 = arith.mulf %127, %131 : vector<10x10xf32>
    %cst_156 = arith.constant dense<0.000000e+00> : vector<10x8xf32>
    %133 = tpu.matmul %132, %118, %cst_156 {dimension_numbers = #tpu.dot_dimension_numbers<[1], [0], [0], [1], [0, 0, 1, 1], [], []>} : vector<10x10xf32>, vector<10x8xf32>, vector<10x8xf32> -> vector<10x8xf32>
    %cst_157 = arith.constant dense<0.000000e+00> : vector<10x32xf32>
    %134 = tpu.matmul %133, %60, %cst_157 {dimension_numbers = #tpu.dot_dimension_numbers<[1], [0], [0], [1], [0, 0, 1, 1], [], []>} : vector<10x8xf32>, vector<8x32xf32>, vector<10x32xf32> -> vector<10x32xf32>
    %135 = arith.addf %109, %134 : vector<10x32xf32>
    %cst_158 = arith.constant dense<0.000000e+00> : vector<10x8xf32>
    %136 = tpu.matmul %84, %14, %cst_158 {dimension_numbers = #tpu.dot_dimension_numbers<[1], [0], [0], [1], [0, 0, 1, 1], [], []>} : vector<10x32xf32>, vector<32x8xf32>, vector<10x8xf32> -> vector<10x8xf32>
    %137 = vector.broadcast %38 : vector<1x8xf32> to vector<10x8xf32>
    %138 = arith.addf %136, %137 : vector<10x8xf32>
    %cst_159 = arith.constant dense<0.000000e+00> : vector<10x8xf32>
    %139 = tpu.matmul %84, %22, %cst_159 {dimension_numbers = #tpu.dot_dimension_numbers<[1], [0], [0], [1], [0, 0, 1, 1], [], []>} : vector<10x32xf32>, vector<32x8xf32>, vector<10x8xf32> -> vector<10x8xf32>
    %140 = vector.broadcast %46 : vector<1x8xf32> to vector<10x8xf32>
    %141 = arith.addf %139, %140 : vector<10x8xf32>
    %cst_160 = arith.constant dense<0.000000e+00> : vector<10x8xf32>
    %142 = tpu.matmul %84, %30, %cst_160 {dimension_numbers = #tpu.dot_dimension_numbers<[1], [0], [0], [1], [0, 0, 1, 1], [], []>} : vector<10x32xf32>, vector<32x8xf32>, vector<10x8xf32> -> vector<10x8xf32>
    %143 = vector.broadcast %54 : vector<1x8xf32> to vector<10x8xf32>
    %144 = arith.addf %142, %143 : vector<10x8xf32>
    %cst_161 = arith.constant 0.353553385 : f32
    %145 = vector.broadcast %cst_161 : f32 to vector<10x8xf32>
    %146 = arith.mulf %138, %145 : vector<10x8xf32>
    %cst_162 = arith.constant dense<0.000000e+00> : vector<10x10xf32>
    %147 = tpu.matmul %146, %141, %cst_162 {dimension_numbers = #tpu.dot_dimension_numbers<[1], [1], [0], [0], [0, 0, 1, 0], [], []>} : vector<10x8xf32>, vector<10x8xf32>, vector<10x10xf32> -> vector<10x10xf32>
    %148 = arith.addf %147, %5 : vector<10x10xf32>
    %cst_163 = arith.constant dense<0xFF800000> : vector<10xf32>
    %149 = vector.multi_reduction <maximumf>, %148, %cst_163 [1] : vector<10x10xf32> to vector<10xf32>
    %150 = vector.shape_cast %149 : vector<10xf32> to vector<10x1xf32>
    %151 = vector.broadcast %150 : vector<10x1xf32> to vector<10x10xf32>
    %152 = arith.subf %148, %151 : vector<10x10xf32>
    %153 = math.exp %152 : vector<10x10xf32>
    %cst_164 = arith.constant dense<0.000000e+00> : vector<10xf32>
    %154 = vector.multi_reduction <add>, %153, %cst_164 [1] : vector<10x10xf32> to vector<10xf32>
    %155 = vector.shape_cast %154 : vector<10xf32> to vector<10x1xf32>
    %156 = tpu.reciprocal %155 {approx = true} : vector<10x1xf32> -> vector<10x1xf32>
    %157 = vector.broadcast %156 : vector<10x1xf32> to vector<10x10xf32>
    %158 = arith.mulf %153, %157 : vector<10x10xf32>
    %cst_165 = arith.constant dense<0.000000e+00> : vector<10x8xf32>
    %159 = tpu.matmul %158, %144, %cst_165 {dimension_numbers = #tpu.dot_dimension_numbers<[1], [0], [0], [1], [0, 0, 1, 1], [], []>} : vector<10x10xf32>, vector<10x8xf32>, vector<10x8xf32> -> vector<10x8xf32>
    %cst_166 = arith.constant dense<0.000000e+00> : vector<10x32xf32>
    %160 = tpu.matmul %159, %62, %cst_166 {dimension_numbers = #tpu.dot_dimension_numbers<[1], [0], [0], [1], [0, 0, 1, 1], [], []>} : vector<10x8xf32>, vector<8x32xf32>, vector<10x32xf32> -> vector<10x32xf32>
    %161 = arith.addf %135, %160 : vector<10x32xf32>
    %cst_167 = arith.constant dense<0.000000e+00> : vector<10x8xf32>
    %162 = tpu.matmul %84, %16, %cst_167 {dimension_numbers = #tpu.dot_dimension_numbers<[1], [0], [0], [1], [0, 0, 1, 1], [], []>} : vector<10x32xf32>, vector<32x8xf32>, vector<10x8xf32> -> vector<10x8xf32>
    %163 = vector.broadcast %40 : vector<1x8xf32> to vector<10x8xf32>
    %164 = arith.addf %162, %163 : vector<10x8xf32>
    %cst_168 = arith.constant dense<0.000000e+00> : vector<10x8xf32>
    %165 = tpu.matmul %84, %24, %cst_168 {dimension_numbers = #tpu.dot_dimension_numbers<[1], [0], [0], [1], [0, 0, 1, 1], [], []>} : vector<10x32xf32>, vector<32x8xf32>, vector<10x8xf32> -> vector<10x8xf32>
    %166 = vector.broadcast %48 : vector<1x8xf32> to vector<10x8xf32>
    %167 = arith.addf %165, %166 : vector<10x8xf32>
    %cst_169 = arith.constant dense<0.000000e+00> : vector<10x8xf32>
    %168 = tpu.matmul %84, %32, %cst_169 {dimension_numbers = #tpu.dot_dimension_numbers<[1], [0], [0], [1], [0, 0, 1, 1], [], []>} : vector<10x32xf32>, vector<32x8xf32>, vector<10x8xf32> -> vector<10x8xf32>
    %169 = vector.broadcast %56 : vector<1x8xf32> to vector<10x8xf32>
    %170 = arith.addf %168, %169 : vector<10x8xf32>
    %cst_170 = arith.constant 0.353553385 : f32
    %171 = vector.broadcast %cst_170 : f32 to vector<10x8xf32>
    %172 = arith.mulf %164, %171 : vector<10x8xf32>
    %cst_171 = arith.constant dense<0.000000e+00> : vector<10x10xf32>
    %173 = tpu.matmul %172, %167, %cst_171 {dimension_numbers = #tpu.dot_dimension_numbers<[1], [1], [0], [0], [0, 0, 1, 0], [], []>} : vector<10x8xf32>, vector<10x8xf32>, vector<10x10xf32> -> vector<10x10xf32>
    %174 = arith.addf %173, %5 : vector<10x10xf32>
    %cst_172 = arith.constant dense<0xFF800000> : vector<10xf32>
    %175 = vector.multi_reduction <maximumf>, %174, %cst_172 [1] : vector<10x10xf32> to vector<10xf32>
    %176 = vector.shape_cast %175 : vector<10xf32> to vector<10x1xf32>
    %177 = vector.broadcast %176 : vector<10x1xf32> to vector<10x10xf32>
    %178 = arith.subf %174, %177 : vector<10x10xf32>
    %179 = math.exp %178 : vector<10x10xf32>
    %cst_173 = arith.constant dense<0.000000e+00> : vector<10xf32>
    %180 = vector.multi_reduction <add>, %179, %cst_173 [1] : vector<10x10xf32> to vector<10xf32>
    %181 = vector.shape_cast %180 : vector<10xf32> to vector<10x1xf32>
    %182 = tpu.reciprocal %181 {approx = true} : vector<10x1xf32> -> vector<10x1xf32>
    %183 = vector.broadcast %182 : vector<10x1xf32> to vector<10x10xf32>
    %184 = arith.mulf %179, %183 : vector<10x10xf32>
    %cst_174 = arith.constant dense<0.000000e+00> : vector<10x8xf32>
    %185 = tpu.matmul %184, %170, %cst_174 {dimension_numbers = #tpu.dot_dimension_numbers<[1], [0], [0], [1], [0, 0, 1, 1], [], []>} : vector<10x10xf32>, vector<10x8xf32>, vector<10x8xf32> -> vector<10x8xf32>
    %cst_175 = arith.constant dense<0.000000e+00> : vector<10x32xf32>
    %186 = tpu.matmul %185, %64, %cst_175 {dimension_numbers = #tpu.dot_dimension_numbers<[1], [0], [0], [1], [0, 0, 1, 1], [], []>} : vector<10x8xf32>, vector<8x32xf32>, vector<10x32xf32> -> vector<10x32xf32>
    %187 = arith.addf %161, %186 : vector<10x32xf32>
    %188 = vector.broadcast %66 : vector<1x32xf32> to vector<10x32xf32>
    %189 = arith.addf %187, %188 : vector<10x32xf32>
    %190 = arith.addf %84, %189 : vector<10x32xf32>
    %cst_176 = arith.constant dense<0.000000e+00> : vector<10xf32>
    %191 = vector.multi_reduction <add>, %190, %cst_176 [1] : vector<10x32xf32> to vector<10xf32>
    %192 = vector.shape_cast %191 : vector<10xf32> to vector<10x1xf32>
    %cst_177 = arith.constant 3.200000e+01 : f32
    %193 = vector.broadcast %cst_177 : f32 to vector<10x1xf32>
    %194 = arith.divf %192, %193 : vector<10x1xf32>
    %195 = vector.broadcast %194 : vector<10x1xf32> to vector<10x32xf32>
    %196 = arith.subf %190, %195 : vector<10x32xf32>
    %197 = arith.mulf %196, %196 : vector<10x32xf32>
    %cst_178 = arith.constant dense<0.000000e+00> : vector<10xf32>
    %198 = vector.multi_reduction <add>, %197, %cst_178 [1] : vector<10x32xf32> to vector<10xf32>
    %199 = vector.shape_cast %198 : vector<10xf32> to vector<10x1xf32>
    %cst_179 = arith.constant 3.200000e+01 : f32
    %200 = vector.broadcast %cst_179 : f32 to vector<10x1xf32>
    %201 = arith.divf %199, %200 : vector<10x1xf32>
    %202 = vector.broadcast %194 : vector<10x1xf32> to vector<10x32xf32>
    %203 = arith.subf %190, %202 : vector<10x32xf32>
    %cst_180 = arith.constant 9.99999974E-6 : f32
    %204 = vector.broadcast %cst_180 : f32 to vector<10x1xf32>
    %205 = arith.addf %201, %204 : vector<10x1xf32>
    %206 = math.rsqrt %205 : vector<10x1xf32>
    %207 = vector.broadcast %206 : vector<10x1xf32> to vector<10x32xf32>
    %208 = arith.mulf %203, %207 : vector<10x32xf32>
    %209 = vector.broadcast %68 : vector<1x32xf32> to vector<10x32xf32>
    %210 = arith.mulf %208, %209 : vector<10x32xf32>
    %211 = vector.broadcast %70 : vector<1x32xf32> to vector<10x32xf32>
    %212 = arith.addf %210, %211 : vector<10x32xf32>
    %cst_181 = arith.constant dense<0.000000e+00> : vector<10x64xf32>
    %213 = tpu.matmul %212, %76, %cst_181 {dimension_numbers = #tpu.dot_dimension_numbers<[1], [0], [0], [1], [0, 0, 1, 1], [], []>} : vector<10x32xf32>, vector<32x64xf32>, vector<10x64xf32> -> vector<10x64xf32>
    %214 = vector.broadcast %78 : vector<1x64xf32> to vector<10x64xf32>
    %215 = arith.addf %213, %214 : vector<10x64xf32>
    %cst_182 = arith.constant 0.000000e+00 : f32
    %216 = vector.broadcast %cst_182 : f32 to vector<10x64xf32>
    %217 = arith.maximumf %215, %216 : vector<10x64xf32>
    %cst_183 = arith.constant dense<0.000000e+00> : vector<10x32xf32>
    %218 = tpu.matmul %217, %80, %cst_183 {dimension_numbers = #tpu.dot_dimension_numbers<[1], [0], [0], [1], [0, 0, 1, 1], [], []>} : vector<10x64xf32>, vector<64x32xf32>, vector<10x32xf32> -> vector<10x32xf32>
    %219 = vector.broadcast %82 : vector<1x32xf32> to vector<10x32xf32>
    %220 = arith.addf %218, %219 : vector<10x32xf32>
    %221 = arith.addf %212, %220 : vector<10x32xf32>
    %cst_184 = arith.constant dense<0.000000e+00> : vector<10xf32>
    %222 = vector.multi_reduction <add>, %221, %cst_184 [1] : vector<10x32xf32> to vector<10xf32>
    %223 = vector.shape_cast %222 : vector<10xf32> to vector<10x1xf32>
    %cst_185 = arith.constant 3.200000e+01 : f32
    %224 = vector.broadcast %cst_185 : f32 to vector<10x1xf32>
    %225 = arith.divf %223, %224 : vector<10x1xf32>
    %226 = vector.broadcast %225 : vector<10x1xf32> to vector<10x32xf32>
    %227 = arith.subf %221, %226 : vector<10x32xf32>
    %228 = arith.mulf %227, %227 : vector<10x32xf32>
    %cst_186 = arith.constant dense<0.000000e+00> : vector<10xf32>
    %229 = vector.multi_reduction <add>, %228, %cst_186 [1] : vector<10x32xf32> to vector<10xf32>
    %230 = vector.shape_cast %229 : vector<10xf32> to vector<10x1xf32>
    %cst_187 = arith.constant 3.200000e+01 : f32
    %231 = vector.broadcast %cst_187 : f32 to vector<10x1xf32>
    %232 = arith.divf %230, %231 : vector<10x1xf32>
    %233 = vector.broadcast %225 : vector<10x1xf32> to vector<10x32xf32>
    %234 = arith.subf %221, %233 : vector<10x32xf32>
    %cst_188 = arith.constant 9.99999974E-6 : f32
    %235 = vector.broadcast %cst_188 : f32 to vector<10x1xf32>
    %236 = arith.addf %232, %235 : vector<10x1xf32>
    %237 = math.rsqrt %236 : vector<10x1xf32>
    %238 = vector.broadcast %237 : vector<10x1xf32> to vector<10x32xf32>
    %239 = arith.mulf %234, %238 : vector<10x32xf32>
    %240 = vector.broadcast %72 : vector<1x32xf32> to vector<10x32xf32>
    %241 = arith.mulf %239, %240 : vector<10x32xf32>
    %242 = vector.broadcast %74 : vector<1x32xf32> to vector<10x32xf32>
    %243 = arith.addf %241, %242 : vector<10x32xf32>
    %c0_189 = arith.constant 0 : index
    %c0_190 = arith.constant 0 : index
    %c0_191 = arith.constant 0 : index
    %244 = vector.load %arg21[%c0_189, %c0_190, %c0_191] : memref<2x10x32xf32, #tpu.memory_space<vmem>>, vector<1x10x32xf32>
    %245 = vector.shape_cast %244 : vector<1x10x32xf32> to vector<10x32xf32>
    %246 = vector.shape_cast %243 : vector<10x32xf32> to vector<1x10x32xf32>
    tpu.vector_store %arg21[%c0_189, %c0_190, %c0_191], %246 {strides = array<i32>} : memref<2x10x32xf32, #tpu.memory_space<vmem>>, vector<1x10x32xf32>,
    %c1_192 = arith.constant 1 : index
    %c0_193 = arith.constant 0 : index
    %c0_194 = arith.constant 0 : index
    %247 = vector.load %arg21[%c1_192, %c0_193, %c0_194] : memref<2x10x32xf32, #tpu.memory_space<vmem>>, vector<1x10x32xf32>
    %248 = vector.shape_cast %247 : vector<1x10x32xf32> to vector<10x32xf32>
    %cst_195 = arith.constant dense<0.000000e+00> : vector<10x8xf32>
    %249 = tpu.matmul %248, %10, %cst_195 {dimension_numbers = #tpu.dot_dimension_numbers<[1], [0], [0], [1], [0, 0, 1, 1], [], []>} : vector<10x32xf32>, vector<32x8xf32>, vector<10x8xf32> -> vector<10x8xf32>
    %250 = vector.broadcast %34 : vector<1x8xf32> to vector<10x8xf32>
    %251 = arith.addf %249, %250 : vector<10x8xf32>
    %cst_196 = arith.constant dense<0.000000e+00> : vector<10x8xf32>
    %252 = tpu.matmul %248, %18, %cst_196 {dimension_numbers = #tpu.dot_dimension_numbers<[1], [0], [0], [1], [0, 0, 1, 1], [], []>} : vector<10x32xf32>, vector<32x8xf32>, vector<10x8xf32> -> vector<10x8xf32>
    %253 = vector.broadcast %42 : vector<1x8xf32> to vector<10x8xf32>
    %254 = arith.addf %252, %253 : vector<10x8xf32>
    %cst_197 = arith.constant dense<0.000000e+00> : vector<10x8xf32>
    %255 = tpu.matmul %248, %26, %cst_197 {dimension_numbers = #tpu.dot_dimension_numbers<[1], [0], [0], [1], [0, 0, 1, 1], [], []>} : vector<10x32xf32>, vector<32x8xf32>, vector<10x8xf32> -> vector<10x8xf32>
    %256 = vector.broadcast %50 : vector<1x8xf32> to vector<10x8xf32>
    %257 = arith.addf %255, %256 : vector<10x8xf32>
    %cst_198 = arith.constant 0.353553385 : f32
    %258 = vector.broadcast %cst_198 : f32 to vector<10x8xf32>
    %259 = arith.mulf %251, %258 : vector<10x8xf32>
    %cst_199 = arith.constant dense<0.000000e+00> : vector<10x10xf32>
    %260 = tpu.matmul %259, %254, %cst_199 {dimension_numbers = #tpu.dot_dimension_numbers<[1], [1], [0], [0], [0, 0, 1, 0], [], []>} : vector<10x8xf32>, vector<10x8xf32>, vector<10x10xf32> -> vector<10x10xf32>
    %261 = arith.addf %260, %5 : vector<10x10xf32>
    %cst_200 = arith.constant dense<0xFF800000> : vector<10xf32>
    %262 = vector.multi_reduction <maximumf>, %261, %cst_200 [1] : vector<10x10xf32> to vector<10xf32>
    %263 = vector.shape_cast %262 : vector<10xf32> to vector<10x1xf32>
    %264 = vector.broadcast %263 : vector<10x1xf32> to vector<10x10xf32>
    %265 = arith.subf %261, %264 : vector<10x10xf32>
    %266 = math.exp %265 : vector<10x10xf32>
    %cst_201 = arith.constant dense<0.000000e+00> : vector<10xf32>
    %267 = vector.multi_reduction <add>, %266, %cst_201 [1] : vector<10x10xf32> to vector<10xf32>
    %268 = vector.shape_cast %267 : vector<10xf32> to vector<10x1xf32>
    %269 = tpu.reciprocal %268 {approx = true} : vector<10x1xf32> -> vector<10x1xf32>
    %270 = vector.broadcast %269 : vector<10x1xf32> to vector<10x10xf32>
    %271 = arith.mulf %266, %270 : vector<10x10xf32>
    %cst_202 = arith.constant dense<0.000000e+00> : vector<10x8xf32>
    %272 = tpu.matmul %271, %257, %cst_202 {dimension_numbers = #tpu.dot_dimension_numbers<[1], [0], [0], [1], [0, 0, 1, 1], [], []>} : vector<10x10xf32>, vector<10x8xf32>, vector<10x8xf32> -> vector<10x8xf32>
    %cst_203 = arith.constant dense<0.000000e+00> : vector<10x32xf32>
    %273 = tpu.matmul %272, %58, %cst_203 {dimension_numbers = #tpu.dot_dimension_numbers<[1], [0], [0], [1], [0, 0, 1, 1], [], []>} : vector<10x8xf32>, vector<8x32xf32>, vector<10x32xf32> -> vector<10x32xf32>
    %cst_204 = arith.constant dense<0.000000e+00> : vector<10x8xf32>
    %274 = tpu.matmul %248, %12, %cst_204 {dimension_numbers = #tpu.dot_dimension_numbers<[1], [0], [0], [1], [0, 0, 1, 1], [], []>} : vector<10x32xf32>, vector<32x8xf32>, vector<10x8xf32> -> vector<10x8xf32>
    %275 = vector.broadcast %36 : vector<1x8xf32> to vector<10x8xf32>
    %276 = arith.addf %274, %275 : vector<10x8xf32>
    %cst_205 = arith.constant dense<0.000000e+00> : vector<10x8xf32>
    %277 = tpu.matmul %248, %20, %cst_205 {dimension_numbers = #tpu.dot_dimension_numbers<[1], [0], [0], [1], [0, 0, 1, 1], [], []>} : vector<10x32xf32>, vector<32x8xf32>, vector<10x8xf32> -> vector<10x8xf32>
    %278 = vector.broadcast %44 : vector<1x8xf32> to vector<10x8xf32>
    %279 = arith.addf %277, %278 : vector<10x8xf32>
    %cst_206 = arith.constant dense<0.000000e+00> : vector<10x8xf32>
    %280 = tpu.matmul %248, %28, %cst_206 {dimension_numbers = #tpu.dot_dimension_numbers<[1], [0], [0], [1], [0, 0, 1, 1], [], []>} : vector<10x32xf32>, vector<32x8xf32>, vector<10x8xf32> -> vector<10x8xf32>
    %281 = vector.broadcast %52 : vector<1x8xf32> to vector<10x8xf32>
    %282 = arith.addf %280, %281 : vector<10x8xf32>
    %cst_207 = arith.constant 0.353553385 : f32
    %283 = vector.broadcast %cst_207 : f32 to vector<10x8xf32>
    %284 = arith.mulf %276, %283 : vector<10x8xf32>
    %cst_208 = arith.constant dense<0.000000e+00> : vector<10x10xf32>
    %285 = tpu.matmul %284, %279, %cst_208 {dimension_numbers = #tpu.dot_dimension_numbers<[1], [1], [0], [0], [0, 0, 1, 0], [], []>} : vector<10x8xf32>, vector<10x8xf32>, vector<10x10xf32> -> vector<10x10xf32>
    %286 = arith.addf %285, %5 : vector<10x10xf32>
    %cst_209 = arith.constant dense<0xFF800000> : vector<10xf32>
    %287 = vector.multi_reduction <maximumf>, %286, %cst_209 [1] : vector<10x10xf32> to vector<10xf32>
    %288 = vector.shape_cast %287 : vector<10xf32> to vector<10x1xf32>
    %289 = vector.broadcast %288 : vector<10x1xf32> to vector<10x10xf32>
    %290 = arith.subf %286, %289 : vector<10x10xf32>
    %291 = math.exp %290 : vector<10x10xf32>
    %cst_210 = arith.constant dense<0.000000e+00> : vector<10xf32>
    %292 = vector.multi_reduction <add>, %291, %cst_210 [1] : vector<10x10xf32> to vector<10xf32>
    %293 = vector.shape_cast %292 : vector<10xf32> to vector<10x1xf32>
    %294 = tpu.reciprocal %293 {approx = true} : vector<10x1xf32> -> vector<10x1xf32>
    %295 = vector.broadcast %294 : vector<10x1xf32> to vector<10x10xf32>
    %296 = arith.mulf %291, %295 : vector<10x10xf32>
    %cst_211 = arith.constant dense<0.000000e+00> : vector<10x8xf32>
    %297 = tpu.matmul %296, %282, %cst_211 {dimension_numbers = #tpu.dot_dimension_numbers<[1], [0], [0], [1], [0, 0, 1, 1], [], []>} : vector<10x10xf32>, vector<10x8xf32>, vector<10x8xf32> -> vector<10x8xf32>
    %cst_212 = arith.constant dense<0.000000e+00> : vector<10x32xf32>
    %298 = tpu.matmul %297, %60, %cst_212 {dimension_numbers = #tpu.dot_dimension_numbers<[1], [0], [0], [1], [0, 0, 1, 1], [], []>} : vector<10x8xf32>, vector<8x32xf32>, vector<10x32xf32> -> vector<10x32xf32>
    %299 = arith.addf %273, %298 : vector<10x32xf32>
    %cst_213 = arith.constant dense<0.000000e+00> : vector<10x8xf32>
    %300 = tpu.matmul %248, %14, %cst_213 {dimension_numbers = #tpu.dot_dimension_numbers<[1], [0], [0], [1], [0, 0, 1, 1], [], []>} : vector<10x32xf32>, vector<32x8xf32>, vector<10x8xf32> -> vector<10x8xf32>
    %301 = vector.broadcast %38 : vector<1x8xf32> to vector<10x8xf32>
    %302 = arith.addf %300, %301 : vector<10x8xf32>
    %cst_214 = arith.constant dense<0.000000e+00> : vector<10x8xf32>
    %303 = tpu.matmul %248, %22, %cst_214 {dimension_numbers = #tpu.dot_dimension_numbers<[1], [0], [0], [1], [0, 0, 1, 1], [], []>} : vector<10x32xf32>, vector<32x8xf32>, vector<10x8xf32> -> vector<10x8xf32>
    %304 = vector.broadcast %46 : vector<1x8xf32> to vector<10x8xf32>
    %305 = arith.addf %303, %304 : vector<10x8xf32>
    %cst_215 = arith.constant dense<0.000000e+00> : vector<10x8xf32>
    %306 = tpu.matmul %248, %30, %cst_215 {dimension_numbers = #tpu.dot_dimension_numbers<[1], [0], [0], [1], [0, 0, 1, 1], [], []>} : vector<10x32xf32>, vector<32x8xf32>, vector<10x8xf32> -> vector<10x8xf32>
    %307 = vector.broadcast %54 : vector<1x8xf32> to vector<10x8xf32>
    %308 = arith.addf %306, %307 : vector<10x8xf32>
    %cst_216 = arith.constant 0.353553385 : f32
    %309 = vector.broadcast %cst_216 : f32 to vector<10x8xf32>
    %310 = arith.mulf %302, %309 : vector<10x8xf32>
    %cst_217 = arith.constant dense<0.000000e+00> : vector<10x10xf32>
    %311 = tpu.matmul %310, %305, %cst_217 {dimension_numbers = #tpu.dot_dimension_numbers<[1], [1], [0], [0], [0, 0, 1, 0], [], []>} : vector<10x8xf32>, vector<10x8xf32>, vector<10x10xf32> -> vector<10x10xf32>
    %312 = arith.addf %311, %5 : vector<10x10xf32>
    %cst_218 = arith.constant dense<0xFF800000> : vector<10xf32>
    %313 = vector.multi_reduction <maximumf>, %312, %cst_218 [1] : vector<10x10xf32> to vector<10xf32>
    %314 = vector.shape_cast %313 : vector<10xf32> to vector<10x1xf32>
    %315 = vector.broadcast %314 : vector<10x1xf32> to vector<10x10xf32>
    %316 = arith.subf %312, %315 : vector<10x10xf32>
    %317 = math.exp %316 : vector<10x10xf32>
    %cst_219 = arith.constant dense<0.000000e+00> : vector<10xf32>
    %318 = vector.multi_reduction <add>, %317, %cst_219 [1] : vector<10x10xf32> to vector<10xf32>
    %319 = vector.shape_cast %318 : vector<10xf32> to vector<10x1xf32>
    %320 = tpu.reciprocal %319 {approx = true} : vector<10x1xf32> -> vector<10x1xf32>
    %321 = vector.broadcast %320 : vector<10x1xf32> to vector<10x10xf32>
    %322 = arith.mulf %317, %321 : vector<10x10xf32>
    %cst_220 = arith.constant dense<0.000000e+00> : vector<10x8xf32>
    %323 = tpu.matmul %322, %308, %cst_220 {dimension_numbers = #tpu.dot_dimension_numbers<[1], [0], [0], [1], [0, 0, 1, 1], [], []>} : vector<10x10xf32>, vector<10x8xf32>, vector<10x8xf32> -> vector<10x8xf32>
    %cst_221 = arith.constant dense<0.000000e+00> : vector<10x32xf32>
    %324 = tpu.matmul %323, %62, %cst_221 {dimension_numbers = #tpu.dot_dimension_numbers<[1], [0], [0], [1], [0, 0, 1, 1], [], []>} : vector<10x8xf32>, vector<8x32xf32>, vector<10x32xf32> -> vector<10x32xf32>
    %325 = arith.addf %299, %324 : vector<10x32xf32>
    %cst_222 = arith.constant dense<0.000000e+00> : vector<10x8xf32>
    %326 = tpu.matmul %248, %16, %cst_222 {dimension_numbers = #tpu.dot_dimension_numbers<[1], [0], [0], [1], [0, 0, 1, 1], [], []>} : vector<10x32xf32>, vector<32x8xf32>, vector<10x8xf32> -> vector<10x8xf32>
    %327 = vector.broadcast %40 : vector<1x8xf32> to vector<10x8xf32>
    %328 = arith.addf %326, %327 : vector<10x8xf32>
    %cst_223 = arith.constant dense<0.000000e+00> : vector<10x8xf32>
    %329 = tpu.matmul %248, %24, %cst_223 {dimension_numbers = #tpu.dot_dimension_numbers<[1], [0], [0], [1], [0, 0, 1, 1], [], []>} : vector<10x32xf32>, vector<32x8xf32>, vector<10x8xf32> -> vector<10x8xf32>
    %330 = vector.broadcast %48 : vector<1x8xf32> to vector<10x8xf32>
    %331 = arith.addf %329, %330 : vector<10x8xf32>
    %cst_224 = arith.constant dense<0.000000e+00> : vector<10x8xf32>
    %332 = tpu.matmul %248, %32, %cst_224 {dimension_numbers = #tpu.dot_dimension_numbers<[1], [0], [0], [1], [0, 0, 1, 1], [], []>} : vector<10x32xf32>, vector<32x8xf32>, vector<10x8xf32> -> vector<10x8xf32>
    %333 = vector.broadcast %56 : vector<1x8xf32> to vector<10x8xf32>
    %334 = arith.addf %332, %333 : vector<10x8xf32>
    %cst_225 = arith.constant 0.353553385 : f32
    %335 = vector.broadcast %cst_225 : f32 to vector<10x8xf32>
    %336 = arith.mulf %328, %335 : vector<10x8xf32>
    %cst_226 = arith.constant dense<0.000000e+00> : vector<10x10xf32>
    %337 = tpu.matmul %336, %331, %cst_226 {dimension_numbers = #tpu.dot_dimension_numbers<[1], [1], [0], [0], [0, 0, 1, 0], [], []>} : vector<10x8xf32>, vector<10x8xf32>, vector<10x10xf32> -> vector<10x10xf32>
    %338 = arith.addf %337, %5 : vector<10x10xf32>
    %cst_227 = arith.constant dense<0xFF800000> : vector<10xf32>
    %339 = vector.multi_reduction <maximumf>, %338, %cst_227 [1] : vector<10x10xf32> to vector<10xf32>
    %340 = vector.shape_cast %339 : vector<10xf32> to vector<10x1xf32>
    %341 = vector.broadcast %340 : vector<10x1xf32> to vector<10x10xf32>
    %342 = arith.subf %338, %341 : vector<10x10xf32>
    %343 = math.exp %342 : vector<10x10xf32>
    %cst_228 = arith.constant dense<0.000000e+00> : vector<10xf32>
    %344 = vector.multi_reduction <add>, %343, %cst_228 [1] : vector<10x10xf32> to vector<10xf32>
    %345 = vector.shape_cast %344 : vector<10xf32> to vector<10x1xf32>
    %346 = tpu.reciprocal %345 {approx = true} : vector<10x1xf32> -> vector<10x1xf32>
    %347 = vector.broadcast %346 : vector<10x1xf32> to vector<10x10xf32>
    %348 = arith.mulf %343, %347 : vector<10x10xf32>
    %cst_229 = arith.constant dense<0.000000e+00> : vector<10x8xf32>
    %349 = tpu.matmul %348, %334, %cst_229 {dimension_numbers = #tpu.dot_dimension_numbers<[1], [0], [0], [1], [0, 0, 1, 1], [], []>} : vector<10x10xf32>, vector<10x8xf32>, vector<10x8xf32> -> vector<10x8xf32>
    %cst_230 = arith.constant dense<0.000000e+00> : vector<10x32xf32>
    %350 = tpu.matmul %349, %64, %cst_230 {dimension_numbers = #tpu.dot_dimension_numbers<[1], [0], [0], [1], [0, 0, 1, 1], [], []>} : vector<10x8xf32>, vector<8x32xf32>, vector<10x32xf32> -> vector<10x32xf32>
    %351 = arith.addf %325, %350 : vector<10x32xf32>
    %352 = vector.broadcast %66 : vector<1x32xf32> to vector<10x32xf32>
    %353 = arith.addf %351, %352 : vector<10x32xf32>
    %354 = arith.addf %248, %353 : vector<10x32xf32>
    %cst_231 = arith.constant dense<0.000000e+00> : vector<10xf32>
    %355 = vector.multi_reduction <add>, %354, %cst_231 [1] : vector<10x32xf32> to vector<10xf32>
    %356 = vector.shape_cast %355 : vector<10xf32> to vector<10x1xf32>
    %cst_232 = arith.constant 3.200000e+01 : f32
    %357 = vector.broadcast %cst_232 : f32 to vector<10x1xf32>
    %358 = arith.divf %356, %357 : vector<10x1xf32>
    %359 = vector.broadcast %358 : vector<10x1xf32> to vector<10x32xf32>
    %360 = arith.subf %354, %359 : vector<10x32xf32>
    %361 = arith.mulf %360, %360 : vector<10x32xf32>
    %cst_233 = arith.constant dense<0.000000e+00> : vector<10xf32>
    %362 = vector.multi_reduction <add>, %361, %cst_233 [1] : vector<10x32xf32> to vector<10xf32>
    %363 = vector.shape_cast %362 : vector<10xf32> to vector<10x1xf32>
    %cst_234 = arith.constant 3.200000e+01 : f32
    %364 = vector.broadcast %cst_234 : f32 to vector<10x1xf32>
    %365 = arith.divf %363, %364 : vector<10x1xf32>
    %366 = vector.broadcast %358 : vector<10x1xf32> to vector<10x32xf32>
    %367 = arith.subf %354, %366 : vector<10x32xf32>
    %cst_235 = arith.constant 9.99999974E-6 : f32
    %368 = vector.broadcast %cst_235 : f32 to vector<10x1xf32>
    %369 = arith.addf %365, %368 : vector<10x1xf32>
    %370 = math.rsqrt %369 : vector<10x1xf32>
    %371 = vector.broadcast %370 : vector<10x1xf32> to vector<10x32xf32>
    %372 = arith.mulf %367, %371 : vector<10x32xf32>
    %373 = vector.broadcast %68 : vector<1x32xf32> to vector<10x32xf32>
    %374 = arith.mulf %372, %373 : vector<10x32xf32>
    %375 = vector.broadcast %70 : vector<1x32xf32> to vector<10x32xf32>
    %376 = arith.addf %374, %375 : vector<10x32xf32>
    %cst_236 = arith.constant dense<0.000000e+00> : vector<10x64xf32>
    %377 = tpu.matmul %376, %76, %cst_236 {dimension_numbers = #tpu.dot_dimension_numbers<[1], [0], [0], [1], [0, 0, 1, 1], [], []>} : vector<10x32xf32>, vector<32x64xf32>, vector<10x64xf32> -> vector<10x64xf32>
    %378 = vector.broadcast %78 : vector<1x64xf32> to vector<10x64xf32>
    %379 = arith.addf %377, %378 : vector<10x64xf32>
    %cst_237 = arith.constant 0.000000e+00 : f32
    %380 = vector.broadcast %cst_237 : f32 to vector<10x64xf32>
    %381 = arith.maximumf %379, %380 : vector<10x64xf32>
    %cst_238 = arith.constant dense<0.000000e+00> : vector<10x32xf32>
    %382 = tpu.matmul %381, %80, %cst_238 {dimension_numbers = #tpu.dot_dimension_numbers<[1], [0], [0], [1], [0, 0, 1, 1], [], []>} : vector<10x64xf32>, vector<64x32xf32>, vector<10x32xf32> -> vector<10x32xf32>
    %383 = vector.broadcast %82 : vector<1x32xf32> to vector<10x32xf32>
    %384 = arith.addf %382, %383 : vector<10x32xf32>
    %385 = arith.addf %376, %384 : vector<10x32xf32>
    %cst_239 = arith.constant dense<0.000000e+00> : vector<10xf32>
    %386 = vector.multi_reduction <add>, %385, %cst_239 [1] : vector<10x32xf32> to vector<10xf32>
    %387 = vector.shape_cast %386 : vector<10xf32> to vector<10x1xf32>
    %cst_240 = arith.constant 3.200000e+01 : f32
    %388 = vector.broadcast %cst_240 : f32 to vector<10x1xf32>
    %389 = arith.divf %387, %388 : vector<10x1xf32>
    %390 = vector.broadcast %389 : vector<10x1xf32> to vector<10x32xf32>
    %391 = arith.subf %385, %390 : vector<10x32xf32>
    %392 = arith.mulf %391, %391 : vector<10x32xf32>
    %cst_241 = arith.constant dense<0.000000e+00> : vector<10xf32>
    %393 = vector.multi_reduction <add>, %392, %cst_241 [1] : vector<10x32xf32> to vector<10xf32>
    %394 = vector.shape_cast %393 : vector<10xf32> to vector<10x1xf32>
    %cst_242 = arith.constant 3.200000e+01 : f32
    %395 = vector.broadcast %cst_242 : f32 to vector<10x1xf32>
    %396 = arith.divf %394, %395 : vector<10x1xf32>
    %397 = vector.broadcast %389 : vector<10x1xf32> to vector<10x32xf32>
    %398 = arith.subf %385, %397 : vector<10x32xf32>
    %cst_243 = arith.constant 9.99999974E-6 : f32
    %399 = vector.broadcast %cst_243 : f32 to vector<10x1xf32>
    %400 = arith.addf %396, %399 : vector<10x1xf32>
    %401 = math.rsqrt %400 : vector<10x1xf32>
    %402 = vector.broadcast %401 : vector<10x1xf32> to vector<10x32xf32>
    %403 = arith.mulf %398, %402 : vector<10x32xf32>
    %404 = vector.broadcast %72 : vector<1x32xf32> to vector<10x32xf32>
    %405 = arith.mulf %403, %404 : vector<10x32xf32>
    %406 = vector.broadcast %74 : vector<1x32xf32> to vector<10x32xf32>
    %407 = arith.addf %405, %406 : vector<10x32xf32>
    %c1_244 = arith.constant 1 : index
    %c0_245 = arith.constant 0 : index
    %c0_246 = arith.constant 0 : index
    %408 = vector.load %arg21[%c1_244, %c0_245, %c0_246] : memref<2x10x32xf32, #tpu.memory_space<vmem>>, vector<1x10x32xf32>
    %409 = vector.shape_cast %408 : vector<1x10x32xf32> to vector<10x32xf32>
    %410 = vector.shape_cast %407 : vector<10x32xf32> to vector<1x10x32xf32>
    tpu.vector_store %arg21[%c1_244, %c0_245, %c0_246], %410 {strides = array<i32>} : memref<2x10x32xf32, #tpu.memory_space<vmem>>, vector<1x10x32xf32>,
    %c1_i32 = arith.constant 1 : i32
    %411 = arith.cmpi eq, %arg0, %c1_i32 : i32
    %412 = arith.extui %411 : i1 to i32
    %c0_i32_247 = arith.constant 0 : i32
    %413 = arith.cmpi ne, %412, %c0_i32_247 : i32
    scf.if %413 {
      %c0_248 = arith.constant 0 : index
      %c0_249 = arith.constant 0 : index
      %414 = vector.load %arg18[%c0_248, %c0_249] : memref<1x32xf32, #tpu.memory_space<vmem>>, vector<1x32xf32>
      %c0_250 = arith.constant 0 : index
      %c0_251 = arith.constant 0 : index
      %415 = vector.load %arg19[%c0_250, %c0_251] : memref<1x32xf32, #tpu.memory_space<vmem>>, vector<1x32xf32>
      %c0_252 = arith.constant 0 : index
      %c0_253 = arith.constant 0 : index
      %c0_254 = arith.constant 0 : index
      %416 = vector.load %arg21[%c0_252, %c0_253, %c0_254] : memref<2x10x32xf32, #tpu.memory_space<vmem>>, vector<1x10x32xf32>
      %417 = vector.shape_cast %416 : vector<1x10x32xf32> to vector<10x32xf32>
      %cst_255 = arith.constant dense<0.000000e+00> : vector<10xf32>
      %418 = vector.multi_reduction <add>, %417, %cst_255 [1] : vector<10x32xf32> to vector<10xf32>
      %419 = vector.shape_cast %418 : vector<10xf32> to vector<10x1xf32>
      %cst_256 = arith.constant 3.200000e+01 : f32
      %420 = vector.broadcast %cst_256 : f32 to vector<10x1xf32>
      %421 = arith.divf %419, %420 : vector<10x1xf32>
      %422 = vector.broadcast %421 : vector<10x1xf32> to vector<10x32xf32>
      %423 = arith.subf %417, %422 : vector<10x32xf32>
      %424 = arith.mulf %423, %423 : vector<10x32xf32>
      %cst_257 = arith.constant dense<0.000000e+00> : vector<10xf32>
      %425 = vector.multi_reduction <add>, %424, %cst_257 [1] : vector<10x32xf32> to vector<10xf32>
      %426 = vector.shape_cast %425 : vector<10xf32> to vector<10x1xf32>
      %cst_258 = arith.constant 3.200000e+01 : f32
      %427 = vector.broadcast %cst_258 : f32 to vector<10x1xf32>
      %428 = arith.divf %426, %427 : vector<10x1xf32>
      %429 = vector.broadcast %421 : vector<10x1xf32> to vector<10x32xf32>
      %430 = arith.subf %417, %429 : vector<10x32xf32>
      %cst_259 = arith.constant 9.99999974E-6 : f32
      %431 = vector.broadcast %cst_259 : f32 to vector<10x1xf32>
      %432 = arith.addf %428, %431 : vector<10x1xf32>
      %433 = math.rsqrt %432 : vector<10x1xf32>
      %434 = vector.broadcast %433 : vector<10x1xf32> to vector<10x32xf32>
      %435 = arith.mulf %430, %434 : vector<10x32xf32>
      %436 = vector.broadcast %414 : vector<1x32xf32> to vector<10x32xf32>
      %437 = arith.mulf %435, %436 : vector<10x32xf32>
      %438 = vector.broadcast %415 : vector<1x32xf32> to vector<10x32xf32>
      %439 = arith.addf %437, %438 : vector<10x32xf32>
      %c0_260 = arith.constant 0 : index
      %c0_261 = arith.constant 0 : index
      %c0_262 = arith.constant 0 : index
      %440 = vector.load %arg20[%c0_260, %c0_261, %c0_262] : memref<2x10x32xf32, #tpu.memory_space<vmem>>, vector<1x10x32xf32>
      %441 = vector.shape_cast %440 : vector<1x10x32xf32> to vector<10x32xf32>
      %442 = vector.shape_cast %439 : vector<10x32xf32> to vector<1x10x32xf32>
      tpu.vector_store %arg20[%c0_260, %c0_261, %c0_262], %442 {strides = array<i32>} : memref<2x10x32xf32, #tpu.memory_space<vmem>>, vector<1x10x32xf32>,
      %c1_263 = arith.constant 1 : index
      %c0_264 = arith.constant 0 : index
      %c0_265 = arith.constant 0 : index
      %443 = vector.load %arg21[%c1_263, %c0_264, %c0_265] : memref<2x10x32xf32, #tpu.memory_space<vmem>>, vector<1x10x32xf32>
      %444 = vector.shape_cast %443 : vector<1x10x32xf32> to vector<10x32xf32>
      %cst_266 = arith.constant dense<0.000000e+00> : vector<10xf32>
      %445 = vector.multi_reduction <add>, %444, %cst_266 [1] : vector<10x32xf32> to vector<10xf32>
      %446 = vector.shape_cast %445 : vector<10xf32> to vector<10x1xf32>
      %cst_267 = arith.constant 3.200000e+01 : f32
      %447 = vector.broadcast %cst_267 : f32 to vector<10x1xf32>
      %448 = arith.divf %446, %447 : vector<10x1xf32>
      %449 = vector.broadcast %448 : vector<10x1xf32> to vector<10x32xf32>
      %450 = arith.subf %444, %449 : vector<10x32xf32>
      %451 = arith.mulf %450, %450 : vector<10x32xf32>
      %cst_268 = arith.constant dense<0.000000e+00> : vector<10xf32>
      %452 = vector.multi_reduction <add>, %451, %cst_268 [1] : vector<10x32xf32> to vector<10xf32>
      %453 = vector.shape_cast %452 : vector<10xf32> to vector<10x1xf32>
      %cst_269 = arith.constant 3.200000e+01 : f32
      %454 = vector.broadcast %cst_269 : f32 to vector<10x1xf32>
      %455 = arith.divf %453, %454 : vector<10x1xf32>
      %456 = vector.broadcast %448 : vector<10x1xf32> to vector<10x32xf32>
      %457 = arith.subf %444, %456 : vector<10x32xf32>
      %cst_270 = arith.constant 9.99999974E-6 : f32
      %458 = vector.broadcast %cst_270 : f32 to vector<10x1xf32>
      %459 = arith.addf %455, %458 : vector<10x1xf32>
      %460 = math.rsqrt %459 : vector<10x1xf32>
      %461 = vector.broadcast %460 : vector<10x1xf32> to vector<10x32xf32>
      %462 = arith.mulf %457, %461 : vector<10x32xf32>
      %463 = vector.broadcast %414 : vector<1x32xf32> to vector<10x32xf32>
      %464 = arith.mulf %462, %463 : vector<10x32xf32>
      %465 = vector.broadcast %415 : vector<1x32xf32> to vector<10x32xf32>
      %466 = arith.addf %464, %465 : vector<10x32xf32>
      %c1_271 = arith.constant 1 : index
      %c0_272 = arith.constant 0 : index
      %c0_273 = arith.constant 0 : index
      %467 = vector.load %arg20[%c1_271, %c0_272, %c0_273] : memref<2x10x32xf32, #tpu.memory_space<vmem>>, vector<1x10x32xf32>
      %468 = vector.shape_cast %467 : vector<1x10x32xf32> to vector<10x32xf32>
      %469 = vector.shape_cast %466 : vector<10x32xf32> to vector<1x10x32xf32>
      tpu.vector_store %arg20[%c1_271, %c0_272, %c0_273], %469 {strides = array<i32>} : memref<2x10x32xf32, #tpu.memory_space<vmem>>, vector<1x10x32xf32>,
    } else {
    }
    return
  }
  func.func @transform_0(%arg0: i32) -> (i32, i32, i32) {
    %c0_i32 = arith.constant 0 : i32
    %c0_i32_0 = arith.constant 0 : i32
    %c0_i32_1 = arith.constant 0 : i32
    %c0_i32_2 = arith.constant 0 : i32
    return %c0_i32, %c0_i32_0, %c0_i32_1 : i32, i32, i32
  }
  func.func @transform_1(%arg0: i32) -> (i32, i32, i32, i32) {
    %c0_i32 = arith.constant 0 : i32
    %c0_i32_0 = arith.constant 0 : i32
    %c0_i32_1 = arith.constant 0 : i32
    %c0_i32_2 = arith.constant 0 : i32
    return %arg0, %c0_i32, %c0_i32_0, %c0_i32_1 : i32, i32, i32, i32
  }
  func.func @transform_2(%arg0: i32) -> (i32, i32, i32, i32) {
    %c0_i32 = arith.constant 0 : i32
    %c0_i32_0 = arith.constant 0 : i32
    %c0_i32_1 = arith.constant 0 : i32
    %c0_i32_2 = arith.constant 0 : i32
    return %arg0, %c0_i32, %c0_i32_0, %c0_i32_1 : i32, i32, i32, i32
  }
  func.func @transform_3(%arg0: i32) -> (i32, i32, i32, i32) {
    %c0_i32 = arith.constant 0 : i32
    %c0_i32_0 = arith.constant 0 : i32
    %c0_i32_1 = arith.constant 0 : i32
    %c0_i32_2 = arith.constant 0 : i32
    return %arg0, %c0_i32, %c0_i32_0, %c0_i32_1 : i32, i32, i32, i32
  }
  func.func @transform_4(%arg0: i32) -> (i32, i32, i32, i32) {
    %c0_i32 = arith.constant 0 : i32
    %c0_i32_0 = arith.constant 0 : i32
    %c0_i32_1 = arith.constant 0 : i32
    %c0_i32_2 = arith.constant 0 : i32
    return %arg0, %c0_i32, %c0_i32_0, %c0_i32_1 : i32, i32, i32, i32
  }
  func.func @transform_5(%arg0: i32) -> (i32, i32, i32, i32) {
    %c0_i32 = arith.constant 0 : i32
    %c0_i32_0 = arith.constant 0 : i32
    %c0_i32_1 = arith.constant 0 : i32
    %c0_i32_2 = arith.constant 0 : i32
    return %arg0, %c0_i32, %c0_i32_0, %c0_i32_1 : i32, i32, i32, i32
  }
  func.func @transform_6(%arg0: i32) -> (i32, i32, i32, i32) {
    %c0_i32 = arith.constant 0 : i32
    %c0_i32_0 = arith.constant 0 : i32
    %c0_i32_1 = arith.constant 0 : i32
    %c0_i32_2 = arith.constant 0 : i32
    return %arg0, %c0_i32, %c0_i32_0, %c0_i32_1 : i32, i32, i32, i32
  }
  func.func @transform_7(%arg0: i32) -> (i32, i32, i32, i32) {
    %c0_i32 = arith.constant 0 : i32
    %c0_i32_0 = arith.constant 0 : i32
    %c0_i32_1 = arith.constant 0 : i32
    %c0_i32_2 = arith.constant 0 : i32
    return %arg0, %c0_i32, %c0_i32_0, %c0_i32_1 : i32, i32, i32, i32
  }
  func.func @transform_8(%arg0: i32) -> (i32, i32, i32) {
    %c0_i32 = arith.constant 0 : i32
    %c0_i32_0 = arith.constant 0 : i32
    %c0_i32_1 = arith.constant 0 : i32
    return %arg0, %c0_i32, %c0_i32_0 : i32, i32, i32
  }
  func.func @transform_9(%arg0: i32) -> (i32, i32, i32) {
    %c0_i32 = arith.constant 0 : i32
    %c0_i32_0 = arith.constant 0 : i32
    %c0_i32_1 = arith.constant 0 : i32
    return %arg0, %c0_i32, %c0_i32_0 : i32, i32, i32
  }
  func.func @transform_10(%arg0: i32) -> (i32, i32, i32) {
    %c0_i32 = arith.constant 0 : i32
    %c0_i32_0 = arith.constant 0 : i32
    %c0_i32_1 = arith.constant 0 : i32
    return %arg0, %c0_i32, %c0_i32_0 : i32, i32, i32
  }
  func.func @transform_11(%arg0: i32) -> (i32, i32, i32) {
    %c0_i32 = arith.constant 0 : i32
    %c0_i32_0 = arith.constant 0 : i32
    %c0_i32_1 = arith.constant 0 : i32
    return %arg0, %c0_i32, %c0_i32_0 : i32, i32, i32
  }
  func.func @transform_12(%arg0: i32) -> (i32, i32, i32) {
    %c0_i32 = arith.constant 0 : i32
    %c0_i32_0 = arith.constant 0 : i32
    %c0_i32_1 = arith.constant 0 : i32
    return %arg0, %c0_i32, %c0_i32_0 : i32, i32, i32
  }
  func.func @transform_13(%arg0: i32) -> (i32, i32, i32) {
    %c0_i32 = arith.constant 0 : i32
    %c0_i32_0 = arith.constant 0 : i32
    %c0_i32_1 = arith.constant 0 : i32
    return %arg0, %c0_i32, %c0_i32_0 : i32, i32, i32
  }
  func.func @transform_14(%arg0: i32) -> (i32, i32, i32) {
    %c0_i32 = arith.constant 0 : i32
    %c0_i32_0 = arith.constant 0 : i32
    %c0_i32_1 = arith.constant 0 : i32
    return %arg0, %c0_i32, %c0_i32_0 : i32, i32, i32
  }
  func.func @transform_15(%arg0: i32) -> (i32, i32, i32) {
    %c0_i32 = arith.constant 0 : i32
    %c0_i32_0 = arith.constant 0 : i32
    %c0_i32_1 = arith.constant 0 : i32
    return %arg0, %c0_i32, %c0_i32_0 : i32, i32, i32
  }
  func.func @transform_16(%arg0: i32) -> (i32, i32, i32) {
    %c0_i32 = arith.constant 0 : i32
    %c0_i32_0 = arith.constant 0 : i32
    %c0_i32_1 = arith.constant 0 : i32
    return %arg0, %c0_i32, %c0_i32_0 : i32, i32, i32
  }
  func.func @transform_17(%arg0: i32) -> (i32, i32) {
    %c0_i32 = arith.constant 0 : i32
    %c0_i32_0 = arith.constant 0 : i32
    %c0_i32_1 = arith.constant 0 : i32
    return %c0_i32, %c0_i32_0 : i32, i32
  }
  func.func @transform_18(%arg0: i32) -> (i32, i32) {
    %c0_i32 = arith.constant 0 : i32
    %c0_i32_0 = arith.constant 0 : i32
    %c0_i32_1 = arith.constant 0 : i32
    return %c0_i32, %c0_i32_0 : i32, i32
  }
  func.func @transform_19(%arg0: i32) -> (i32, i32, i32) {
    %c0_i32 = arith.constant 0 : i32
    %c0_i32_0 = arith.constant 0 : i32
    %c0_i32_1 = arith.constant 0 : i32
    %c0_i32_2 = arith.constant 0 : i32
    return %c0_i32, %c0_i32_0, %c0_i32_1 : i32, i32, i32
  }
}

module attributes {stable_mosaic.version = 11 : i64} {
  func.func @_dec_stack_kernel(%arg0: i32, %arg1: memref<2x8x32xf32, #tpu.memory_space<vmem>>, %arg2: memref<2x10x32xf32, #tpu.memory_space<vmem>>, %arg3: memref<1x4x32x8xf32, #tpu.memory_space<vmem>>, %arg4: memref<1x4x32x8xf32, #tpu.memory_space<vmem>>, %arg5: memref<1x4x32x8xf32, #tpu.memory_space<vmem>>, %arg6: memref<1x4x1x8xf32, #tpu.memory_space<vmem>>, %arg7: memref<1x4x1x8xf32, #tpu.memory_space<vmem>>, %arg8: memref<1x4x1x8xf32, #tpu.memory_space<vmem>>, %arg9: memref<1x4x8x32xf32, #tpu.memory_space<vmem>>, %arg10: memref<1x1x32xf32, #tpu.memory_space<vmem>>, %arg11: memref<1x1x32xf32, #tpu.memory_space<vmem>>, %arg12: memref<1x1x32xf32, #tpu.memory_space<vmem>>, %arg13: memref<1x4x32x8xf32, #tpu.memory_space<vmem>>, %arg14: memref<1x4x32x8xf32, #tpu.memory_space<vmem>>, %arg15: memref<1x4x32x8xf32, #tpu.memory_space<vmem>>, %arg16: memref<1x4x1x8xf32, #tpu.memory_space<vmem>>, %arg17: memref<1x4x1x8xf32, #tpu.memory_space<vmem>>, %arg18: memref<1x4x1x8xf32, #tpu.memory_space<vmem>>, %arg19: memref<1x4x8x32xf32, #tpu.memory_space<vmem>>, %arg20: memref<1x1x32xf32, #tpu.memory_space<vmem>>, %arg21: memref<1x1x32xf32, #tpu.memory_space<vmem>>, %arg22: memref<1x1x32xf32, #tpu.memory_space<vmem>>, %arg23: memref<1x32x64xf32, #tpu.memory_space<vmem>>, %arg24: memref<1x1x64xf32, #tpu.memory_space<vmem>>, %arg25: memref<1x64x32xf32, #tpu.memory_space<vmem>>, %arg26: memref<1x1x32xf32, #tpu.memory_space<vmem>>, %arg27: memref<1x1x32xf32, #tpu.memory_space<vmem>>, %arg28: memref<1x1x32xf32, #tpu.memory_space<vmem>>, %arg29: memref<1x32xf32, #tpu.memory_space<vmem>>, %arg30: memref<1x32xf32, #tpu.memory_space<vmem>>, %arg31: memref<1x32xf32, #tpu.memory_space<vmem>>, %arg32: memref<1x1xf32, #tpu.memory_space<vmem>>, %arg33: memref<2x8x1xf32, #tpu.memory_space<vmem>>, %arg34: memref<2x8x32xf32, #tpu.memory_space<vmem>>) attributes {dimension_semantics = [#tpu.dimension_semantics<arbitrary>], iteration_bounds = array<i64: 2>, scalar_prefetch = 0 : i64, scratch_operands = 1 : i64, tpu.core_type = #tpu.core_type<tc>, window_params = [{pipeline_mode = #tpu.pipeline_mode<synchronous>, transform_indices = @transform_0, window_bounds = array<i64: 2, 8, 32>}, {pipeline_mode = #tpu.pipeline_mode<synchronous>, transform_indices = @transform_1, window_bounds = array<i64: 2, 10, 32>}, {transform_indices = @transform_2, window_bounds = array<i64: 1, 4, 32, 8>}, {transform_indices = @transform_3, window_bounds = array<i64: 1, 4, 32, 8>}, {transform_indices = @transform_4, window_bounds = array<i64: 1, 4, 32, 8>}, {transform_indices = @transform_5, window_bounds = array<i64: 1, 4, 1, 8>}, {transform_indices = @transform_6, window_bounds = array<i64: 1, 4, 1, 8>}, {transform_indices = @transform_7, window_bounds = array<i64: 1, 4, 1, 8>}, {transform_indices = @transform_8, window_bounds = array<i64: 1, 4, 8, 32>}, {transform_indices = @transform_9, window_bounds = array<i64: 1, 1, 32>}, {transform_indices = @transform_10, window_bounds = array<i64: 1, 1, 32>}, {transform_indices = @transform_11, window_bounds = array<i64: 1, 1, 32>}, {transform_indices = @transform_12, window_bounds = array<i64: 1, 4, 32, 8>}, {transform_indices = @transform_13, window_bounds = array<i64: 1, 4, 32, 8>}, {transform_indices = @transform_14, window_bounds = array<i64: 1, 4, 32, 8>}, {transform_indices = @transform_15, window_bounds = array<i64: 1, 4, 1, 8>}, {transform_indices = @transform_16, window_bounds = array<i64: 1, 4, 1, 8>}, {transform_indices = @transform_17, window_bounds = array<i64: 1, 4, 1, 8>}, {transform_indices = @transform_18, window_bounds = array<i64: 1, 4, 8, 32>}, {transform_indices = @transform_19, window_bounds = array<i64: 1, 1, 32>}, {transform_indices = @transform_20, window_bounds = array<i64: 1, 1, 32>}, {transform_indices = @transform_21, window_bounds = array<i64: 1, 1, 32>}, {transform_indices = @transform_22, window_bounds = array<i64: 1, 32, 64>}, {transform_indices = @transform_23, window_bounds = array<i64: 1, 1, 64>}, {transform_indices = @transform_24, window_bounds = array<i64: 1, 64, 32>}, {transform_indices = @transform_25, window_bounds = array<i64: 1, 1, 32>}, {transform_indices = @transform_26, window_bounds = array<i64: 1, 1, 32>}, {transform_indices = @transform_27, window_bounds = array<i64: 1, 1, 32>}, {pipeline_mode = #tpu.pipeline_mode<synchronous>, transform_indices = @transform_28, window_bounds = array<i64: 1, 32>}, {pipeline_mode = #tpu.pipeline_mode<synchronous>, transform_indices = @transform_29, window_bounds = array<i64: 1, 32>}, {pipeline_mode = #tpu.pipeline_mode<synchronous>, transform_indices = @transform_30, window_bounds = array<i64: 1, 32>}, {pipeline_mode = #tpu.pipeline_mode<synchronous>, transform_indices = @transform_31, window_bounds = array<i64: 1, 1>}, {pipeline_mode = #tpu.pipeline_mode<synchronous>, transform_indices = @transform_32, window_bounds = array<i64: 2, 8, 1>}]} {
    %0 = tpu.iota {dimensions = array<i32: 0>} : vector<8x8xi32>
    %1 = tpu.iota {dimensions = array<i32: 1>} : vector<8x8xi32>
    %2 = arith.cmpi sgt, %1, %0 : vector<8x8xi32>
    %cst = arith.constant -1.000000e+30 : f32
    %cst_0 = arith.constant 0.000000e+00 : f32
    %3 = vector.broadcast %cst : f32 to vector<8x8xf32>
    %4 = vector.broadcast %cst_0 : f32 to vector<8x8xf32>
    %5 = arith.select %2, %3, %4 : vector<8x8xi1>, vector<8x8xf32>
    %6 = tpu.iota {dimensions = array<i32: 0>} : vector<8x10xi32>
    %7 = tpu.iota {dimensions = array<i32: 1>} : vector<8x10xi32>
    %8 = arith.cmpi sgt, %7, %6 : vector<8x10xi32>
    %cst_1 = arith.constant -1.000000e+30 : f32
    %cst_2 = arith.constant 0.000000e+00 : f32
    %9 = vector.broadcast %cst_1 : f32 to vector<8x10xf32>
    %10 = vector.broadcast %cst_2 : f32 to vector<8x10xf32>
    %11 = arith.select %8, %9, %10 : vector<8x10xi1>, vector<8x10xf32>
    %c0_i32 = arith.constant 0 : i32
    %12 = arith.cmpi eq, %arg0, %c0_i32 : i32
    %13 = arith.extui %12 : i1 to i32
    %c0_i32_3 = arith.constant 0 : i32
    %14 = arith.cmpi ne, %13, %c0_i32_3 : i32
    scf.if %14 {
      %c0_459 = arith.constant 0 : index
      %c0_460 = arith.constant 0 : index
      %c0_461 = arith.constant 0 : index
      %742 = vector.load %arg1[%c0_459, %c0_460, %c0_461] : memref<2x8x32xf32, #tpu.memory_space<vmem>>, vector<2x8x32xf32>
      %c0_462 = arith.constant 0 : index
      %c0_463 = arith.constant 0 : index
      %c0_464 = arith.constant 0 : index
      %743 = vector.load %arg34[%c0_462, %c0_463, %c0_464] : memref<2x8x32xf32, #tpu.memory_space<vmem>>, vector<2x8x32xf32>
      tpu.vector_store %arg34[%c0_462, %c0_463, %c0_464], %742 {strides = array<i32>} : memref<2x8x32xf32, #tpu.memory_space<vmem>>, vector<2x8x32xf32>,
    } else {
    }
    %c0 = arith.constant 0 : index
    %c0_4 = arith.constant 0 : index
    %c0_5 = arith.constant 0 : index
    %c0_6 = arith.constant 0 : index
    %15 = vector.load %arg3[%c0, %c0_4, %c0_5, %c0_6] : memref<1x4x32x8xf32, #tpu.memory_space<vmem>>, vector<1x1x32x8xf32>
    %16 = vector.shape_cast %15 : vector<1x1x32x8xf32> to vector<32x8xf32>
    %c0_7 = arith.constant 0 : index
    %c1 = arith.constant 1 : index
    %c0_8 = arith.constant 0 : index
    %c0_9 = arith.constant 0 : index
    %17 = vector.load %arg3[%c0_7, %c1, %c0_8, %c0_9] : memref<1x4x32x8xf32, #tpu.memory_space<vmem>>, vector<1x1x32x8xf32>
    %18 = vector.shape_cast %17 : vector<1x1x32x8xf32> to vector<32x8xf32>
    %c0_10 = arith.constant 0 : index
    %c2 = arith.constant 2 : index
    %c0_11 = arith.constant 0 : index
    %c0_12 = arith.constant 0 : index
    %19 = vector.load %arg3[%c0_10, %c2, %c0_11, %c0_12] : memref<1x4x32x8xf32, #tpu.memory_space<vmem>>, vector<1x1x32x8xf32>
    %20 = vector.shape_cast %19 : vector<1x1x32x8xf32> to vector<32x8xf32>
    %c0_13 = arith.constant 0 : index
    %c3 = arith.constant 3 : index
    %c0_14 = arith.constant 0 : index
    %c0_15 = arith.constant 0 : index
    %21 = vector.load %arg3[%c0_13, %c3, %c0_14, %c0_15] : memref<1x4x32x8xf32, #tpu.memory_space<vmem>>, vector<1x1x32x8xf32>
    %22 = vector.shape_cast %21 : vector<1x1x32x8xf32> to vector<32x8xf32>
    %c0_16 = arith.constant 0 : index
    %c0_17 = arith.constant 0 : index
    %c0_18 = arith.constant 0 : index
    %c0_19 = arith.constant 0 : index
    %23 = vector.load %arg4[%c0_16, %c0_17, %c0_18, %c0_19] : memref<1x4x32x8xf32, #tpu.memory_space<vmem>>, vector<1x1x32x8xf32>
    %24 = vector.shape_cast %23 : vector<1x1x32x8xf32> to vector<32x8xf32>
    %c0_20 = arith.constant 0 : index
    %c1_21 = arith.constant 1 : index
    %c0_22 = arith.constant 0 : index
    %c0_23 = arith.constant 0 : index
    %25 = vector.load %arg4[%c0_20, %c1_21, %c0_22, %c0_23] : memref<1x4x32x8xf32, #tpu.memory_space<vmem>>, vector<1x1x32x8xf32>
    %26 = vector.shape_cast %25 : vector<1x1x32x8xf32> to vector<32x8xf32>
    %c0_24 = arith.constant 0 : index
    %c2_25 = arith.constant 2 : index
    %c0_26 = arith.constant 0 : index
    %c0_27 = arith.constant 0 : index
    %27 = vector.load %arg4[%c0_24, %c2_25, %c0_26, %c0_27] : memref<1x4x32x8xf32, #tpu.memory_space<vmem>>, vector<1x1x32x8xf32>
    %28 = vector.shape_cast %27 : vector<1x1x32x8xf32> to vector<32x8xf32>
    %c0_28 = arith.constant 0 : index
    %c3_29 = arith.constant 3 : index
    %c0_30 = arith.constant 0 : index
    %c0_31 = arith.constant 0 : index
    %29 = vector.load %arg4[%c0_28, %c3_29, %c0_30, %c0_31] : memref<1x4x32x8xf32, #tpu.memory_space<vmem>>, vector<1x1x32x8xf32>
    %30 = vector.shape_cast %29 : vector<1x1x32x8xf32> to vector<32x8xf32>
    %c0_32 = arith.constant 0 : index
    %c0_33 = arith.constant 0 : index
    %c0_34 = arith.constant 0 : index
    %c0_35 = arith.constant 0 : index
    %31 = vector.load %arg5[%c0_32, %c0_33, %c0_34, %c0_35] : memref<1x4x32x8xf32, #tpu.memory_space<vmem>>, vector<1x1x32x8xf32>
    %32 = vector.shape_cast %31 : vector<1x1x32x8xf32> to vector<32x8xf32>
    %c0_36 = arith.constant 0 : index
    %c1_37 = arith.constant 1 : index
    %c0_38 = arith.constant 0 : index
    %c0_39 = arith.constant 0 : index
    %33 = vector.load %arg5[%c0_36, %c1_37, %c0_38, %c0_39] : memref<1x4x32x8xf32, #tpu.memory_space<vmem>>, vector<1x1x32x8xf32>
    %34 = vector.shape_cast %33 : vector<1x1x32x8xf32> to vector<32x8xf32>
    %c0_40 = arith.constant 0 : index
    %c2_41 = arith.constant 2 : index
    %c0_42 = arith.constant 0 : index
    %c0_43 = arith.constant 0 : index
    %35 = vector.load %arg5[%c0_40, %c2_41, %c0_42, %c0_43] : memref<1x4x32x8xf32, #tpu.memory_space<vmem>>, vector<1x1x32x8xf32>
    %36 = vector.shape_cast %35 : vector<1x1x32x8xf32> to vector<32x8xf32>
    %c0_44 = arith.constant 0 : index
    %c3_45 = arith.constant 3 : index
    %c0_46 = arith.constant 0 : index
    %c0_47 = arith.constant 0 : index
    %37 = vector.load %arg5[%c0_44, %c3_45, %c0_46, %c0_47] : memref<1x4x32x8xf32, #tpu.memory_space<vmem>>, vector<1x1x32x8xf32>
    %38 = vector.shape_cast %37 : vector<1x1x32x8xf32> to vector<32x8xf32>
    %c0_48 = arith.constant 0 : index
    %c0_49 = arith.constant 0 : index
    %c0_50 = arith.constant 0 : index
    %c0_51 = arith.constant 0 : index
    %39 = vector.load %arg6[%c0_48, %c0_49, %c0_50, %c0_51] : memref<1x4x1x8xf32, #tpu.memory_space<vmem>>, vector<1x1x1x8xf32>
    %40 = vector.shape_cast %39 : vector<1x1x1x8xf32> to vector<1x8xf32>
    %c0_52 = arith.constant 0 : index
    %c1_53 = arith.constant 1 : index
    %c0_54 = arith.constant 0 : index
    %c0_55 = arith.constant 0 : index
    %41 = vector.load %arg6[%c0_52, %c1_53, %c0_54, %c0_55] : memref<1x4x1x8xf32, #tpu.memory_space<vmem>>, vector<1x1x1x8xf32>
    %42 = vector.shape_cast %41 : vector<1x1x1x8xf32> to vector<1x8xf32>
    %c0_56 = arith.constant 0 : index
    %c2_57 = arith.constant 2 : index
    %c0_58 = arith.constant 0 : index
    %c0_59 = arith.constant 0 : index
    %43 = vector.load %arg6[%c0_56, %c2_57, %c0_58, %c0_59] : memref<1x4x1x8xf32, #tpu.memory_space<vmem>>, vector<1x1x1x8xf32>
    %44 = vector.shape_cast %43 : vector<1x1x1x8xf32> to vector<1x8xf32>
    %c0_60 = arith.constant 0 : index
    %c3_61 = arith.constant 3 : index
    %c0_62 = arith.constant 0 : index
    %c0_63 = arith.constant 0 : index
    %45 = vector.load %arg6[%c0_60, %c3_61, %c0_62, %c0_63] : memref<1x4x1x8xf32, #tpu.memory_space<vmem>>, vector<1x1x1x8xf32>
    %46 = vector.shape_cast %45 : vector<1x1x1x8xf32> to vector<1x8xf32>
    %c0_64 = arith.constant 0 : index
    %c0_65 = arith.constant 0 : index
    %c0_66 = arith.constant 0 : index
    %c0_67 = arith.constant 0 : index
    %47 = vector.load %arg7[%c0_64, %c0_65, %c0_66, %c0_67] : memref<1x4x1x8xf32, #tpu.memory_space<vmem>>, vector<1x1x1x8xf32>
    %48 = vector.shape_cast %47 : vector<1x1x1x8xf32> to vector<1x8xf32>
    %c0_68 = arith.constant 0 : index
    %c1_69 = arith.constant 1 : index
    %c0_70 = arith.constant 0 : index
    %c0_71 = arith.constant 0 : index
    %49 = vector.load %arg7[%c0_68, %c1_69, %c0_70, %c0_71] : memref<1x4x1x8xf32, #tpu.memory_space<vmem>>, vector<1x1x1x8xf32>
    %50 = vector.shape_cast %49 : vector<1x1x1x8xf32> to vector<1x8xf32>
    %c0_72 = arith.constant 0 : index
    %c2_73 = arith.constant 2 : index
    %c0_74 = arith.constant 0 : index
    %c0_75 = arith.constant 0 : index
    %51 = vector.load %arg7[%c0_72, %c2_73, %c0_74, %c0_75] : memref<1x4x1x8xf32, #tpu.memory_space<vmem>>, vector<1x1x1x8xf32>
    %52 = vector.shape_cast %51 : vector<1x1x1x8xf32> to vector<1x8xf32>
    %c0_76 = arith.constant 0 : index
    %c3_77 = arith.constant 3 : index
    %c0_78 = arith.constant 0 : index
    %c0_79 = arith.constant 0 : index
    %53 = vector.load %arg7[%c0_76, %c3_77, %c0_78, %c0_79] : memref<1x4x1x8xf32, #tpu.memory_space<vmem>>, vector<1x1x1x8xf32>
    %54 = vector.shape_cast %53 : vector<1x1x1x8xf32> to vector<1x8xf32>
    %c0_80 = arith.constant 0 : index
    %c0_81 = arith.constant 0 : index
    %c0_82 = arith.constant 0 : index
    %c0_83 = arith.constant 0 : index
    %55 = vector.load %arg8[%c0_80, %c0_81, %c0_82, %c0_83] : memref<1x4x1x8xf32, #tpu.memory_space<vmem>>, vector<1x1x1x8xf32>
    %56 = vector.shape_cast %55 : vector<1x1x1x8xf32> to vector<1x8xf32>
    %c0_84 = arith.constant 0 : index
    %c1_85 = arith.constant 1 : index
    %c0_86 = arith.constant 0 : index
    %c0_87 = arith.constant 0 : index
    %57 = vector.load %arg8[%c0_84, %c1_85, %c0_86, %c0_87] : memref<1x4x1x8xf32, #tpu.memory_space<vmem>>, vector<1x1x1x8xf32>
    %58 = vector.shape_cast %57 : vector<1x1x1x8xf32> to vector<1x8xf32>
    %c0_88 = arith.constant 0 : index
    %c2_89 = arith.constant 2 : index
    %c0_90 = arith.constant 0 : index
    %c0_91 = arith.constant 0 : index
    %59 = vector.load %arg8[%c0_88, %c2_89, %c0_90, %c0_91] : memref<1x4x1x8xf32, #tpu.memory_space<vmem>>, vector<1x1x1x8xf32>
    %60 = vector.shape_cast %59 : vector<1x1x1x8xf32> to vector<1x8xf32>
    %c0_92 = arith.constant 0 : index
    %c3_93 = arith.constant 3 : index
    %c0_94 = arith.constant 0 : index
    %c0_95 = arith.constant 0 : index
    %61 = vector.load %arg8[%c0_92, %c3_93, %c0_94, %c0_95] : memref<1x4x1x8xf32, #tpu.memory_space<vmem>>, vector<1x1x1x8xf32>
    %62 = vector.shape_cast %61 : vector<1x1x1x8xf32> to vector<1x8xf32>
    %c0_96 = arith.constant 0 : index
    %c0_97 = arith.constant 0 : index
    %c0_98 = arith.constant 0 : index
    %c0_99 = arith.constant 0 : index
    %63 = vector.load %arg9[%c0_96, %c0_97, %c0_98, %c0_99] : memref<1x4x8x32xf32, #tpu.memory_space<vmem>>, vector<1x1x8x32xf32>
    %64 = vector.shape_cast %63 : vector<1x1x8x32xf32> to vector<8x32xf32>
    %c0_100 = arith.constant 0 : index
    %c1_101 = arith.constant 1 : index
    %c0_102 = arith.constant 0 : index
    %c0_103 = arith.constant 0 : index
    %65 = vector.load %arg9[%c0_100, %c1_101, %c0_102, %c0_103] : memref<1x4x8x32xf32, #tpu.memory_space<vmem>>, vector<1x1x8x32xf32>
    %66 = vector.shape_cast %65 : vector<1x1x8x32xf32> to vector<8x32xf32>
    %c0_104 = arith.constant 0 : index
    %c2_105 = arith.constant 2 : index
    %c0_106 = arith.constant 0 : index
    %c0_107 = arith.constant 0 : index
    %67 = vector.load %arg9[%c0_104, %c2_105, %c0_106, %c0_107] : memref<1x4x8x32xf32, #tpu.memory_space<vmem>>, vector<1x1x8x32xf32>
    %68 = vector.shape_cast %67 : vector<1x1x8x32xf32> to vector<8x32xf32>
    %c0_108 = arith.constant 0 : index
    %c3_109 = arith.constant 3 : index
    %c0_110 = arith.constant 0 : index
    %c0_111 = arith.constant 0 : index
    %69 = vector.load %arg9[%c0_108, %c3_109, %c0_110, %c0_111] : memref<1x4x8x32xf32, #tpu.memory_space<vmem>>, vector<1x1x8x32xf32>
    %70 = vector.shape_cast %69 : vector<1x1x8x32xf32> to vector<8x32xf32>
    %c0_112 = arith.constant 0 : index
    %c0_113 = arith.constant 0 : index
    %c0_114 = arith.constant 0 : index
    %71 = vector.load %arg10[%c0_112, %c0_113, %c0_114] : memref<1x1x32xf32, #tpu.memory_space<vmem>>, vector<1x1x32xf32>
    %72 = vector.shape_cast %71 : vector<1x1x32xf32> to vector<1x32xf32>
    %c0_115 = arith.constant 0 : index
    %c0_116 = arith.constant 0 : index
    %c0_117 = arith.constant 0 : index
    %c0_118 = arith.constant 0 : index
    %73 = vector.load %arg13[%c0_115, %c0_116, %c0_117, %c0_118] : memref<1x4x32x8xf32, #tpu.memory_space<vmem>>, vector<1x1x32x8xf32>
    %74 = vector.shape_cast %73 : vector<1x1x32x8xf32> to vector<32x8xf32>
    %c0_119 = arith.constant 0 : index
    %c1_120 = arith.constant 1 : index
    %c0_121 = arith.constant 0 : index
    %c0_122 = arith.constant 0 : index
    %75 = vector.load %arg13[%c0_119, %c1_120, %c0_121, %c0_122] : memref<1x4x32x8xf32, #tpu.memory_space<vmem>>, vector<1x1x32x8xf32>
    %76 = vector.shape_cast %75 : vector<1x1x32x8xf32> to vector<32x8xf32>
    %c0_123 = arith.constant 0 : index
    %c2_124 = arith.constant 2 : index
    %c0_125 = arith.constant 0 : index
    %c0_126 = arith.constant 0 : index
    %77 = vector.load %arg13[%c0_123, %c2_124, %c0_125, %c0_126] : memref<1x4x32x8xf32, #tpu.memory_space<vmem>>, vector<1x1x32x8xf32>
    %78 = vector.shape_cast %77 : vector<1x1x32x8xf32> to vector<32x8xf32>
    %c0_127 = arith.constant 0 : index
    %c3_128 = arith.constant 3 : index
    %c0_129 = arith.constant 0 : index
    %c0_130 = arith.constant 0 : index
    %79 = vector.load %arg13[%c0_127, %c3_128, %c0_129, %c0_130] : memref<1x4x32x8xf32, #tpu.memory_space<vmem>>, vector<1x1x32x8xf32>
    %80 = vector.shape_cast %79 : vector<1x1x32x8xf32> to vector<32x8xf32>
    %c0_131 = arith.constant 0 : index
    %c0_132 = arith.constant 0 : index
    %c0_133 = arith.constant 0 : index
    %c0_134 = arith.constant 0 : index
    %81 = vector.load %arg14[%c0_131, %c0_132, %c0_133, %c0_134] : memref<1x4x32x8xf32, #tpu.memory_space<vmem>>, vector<1x1x32x8xf32>
    %82 = vector.shape_cast %81 : vector<1x1x32x8xf32> to vector<32x8xf32>
    %c0_135 = arith.constant 0 : index
    %c1_136 = arith.constant 1 : index
    %c0_137 = arith.constant 0 : index
    %c0_138 = arith.constant 0 : index
    %83 = vector.load %arg14[%c0_135, %c1_136, %c0_137, %c0_138] : memref<1x4x32x8xf32, #tpu.memory_space<vmem>>, vector<1x1x32x8xf32>
    %84 = vector.shape_cast %83 : vector<1x1x32x8xf32> to vector<32x8xf32>
    %c0_139 = arith.constant 0 : index
    %c2_140 = arith.constant 2 : index
    %c0_141 = arith.constant 0 : index
    %c0_142 = arith.constant 0 : index
    %85 = vector.load %arg14[%c0_139, %c2_140, %c0_141, %c0_142] : memref<1x4x32x8xf32, #tpu.memory_space<vmem>>, vector<1x1x32x8xf32>
    %86 = vector.shape_cast %85 : vector<1x1x32x8xf32> to vector<32x8xf32>
    %c0_143 = arith.constant 0 : index
    %c3_144 = arith.constant 3 : index
    %c0_145 = arith.constant 0 : index
    %c0_146 = arith.constant 0 : index
    %87 = vector.load %arg14[%c0_143, %c3_144, %c0_145, %c0_146] : memref<1x4x32x8xf32, #tpu.memory_space<vmem>>, vector<1x1x32x8xf32>
    %88 = vector.shape_cast %87 : vector<1x1x32x8xf32> to vector<32x8xf32>
    %c0_147 = arith.constant 0 : index
    %c0_148 = arith.constant 0 : index
    %c0_149 = arith.constant 0 : index
    %c0_150 = arith.constant 0 : index
    %89 = vector.load %arg15[%c0_147, %c0_148, %c0_149, %c0_150] : memref<1x4x32x8xf32, #tpu.memory_space<vmem>>, vector<1x1x32x8xf32>
    %90 = vector.shape_cast %89 : vector<1x1x32x8xf32> to vector<32x8xf32>
    %c0_151 = arith.constant 0 : index
    %c1_152 = arith.constant 1 : index
    %c0_153 = arith.constant 0 : index
    %c0_154 = arith.constant 0 : index
    %91 = vector.load %arg15[%c0_151, %c1_152, %c0_153, %c0_154] : memref<1x4x32x8xf32, #tpu.memory_space<vmem>>, vector<1x1x32x8xf32>
    %92 = vector.shape_cast %91 : vector<1x1x32x8xf32> to vector<32x8xf32>
    %c0_155 = arith.constant 0 : index
    %c2_156 = arith.constant 2 : index
    %c0_157 = arith.constant 0 : index
    %c0_158 = arith.constant 0 : index
    %93 = vector.load %arg15[%c0_155, %c2_156, %c0_157, %c0_158] : memref<1x4x32x8xf32, #tpu.memory_space<vmem>>, vector<1x1x32x8xf32>
    %94 = vector.shape_cast %93 : vector<1x1x32x8xf32> to vector<32x8xf32>
    %c0_159 = arith.constant 0 : index
    %c3_160 = arith.constant 3 : index
    %c0_161 = arith.constant 0 : index
    %c0_162 = arith.constant 0 : index
    %95 = vector.load %arg15[%c0_159, %c3_160, %c0_161, %c0_162] : memref<1x4x32x8xf32, #tpu.memory_space<vmem>>, vector<1x1x32x8xf32>
    %96 = vector.shape_cast %95 : vector<1x1x32x8xf32> to vector<32x8xf32>
    %c0_163 = arith.constant 0 : index
    %c0_164 = arith.constant 0 : index
    %c0_165 = arith.constant 0 : index
    %c0_166 = arith.constant 0 : index
    %97 = vector.load %arg16[%c0_163, %c0_164, %c0_165, %c0_166] : memref<1x4x1x8xf32, #tpu.memory_space<vmem>>, vector<1x1x1x8xf32>
    %98 = vector.shape_cast %97 : vector<1x1x1x8xf32> to vector<1x8xf32>
    %c0_167 = arith.constant 0 : index
    %c1_168 = arith.constant 1 : index
    %c0_169 = arith.constant 0 : index
    %c0_170 = arith.constant 0 : index
    %99 = vector.load %arg16[%c0_167, %c1_168, %c0_169, %c0_170] : memref<1x4x1x8xf32, #tpu.memory_space<vmem>>, vector<1x1x1x8xf32>
    %100 = vector.shape_cast %99 : vector<1x1x1x8xf32> to vector<1x8xf32>
    %c0_171 = arith.constant 0 : index
    %c2_172 = arith.constant 2 : index
    %c0_173 = arith.constant 0 : index
    %c0_174 = arith.constant 0 : index
    %101 = vector.load %arg16[%c0_171, %c2_172, %c0_173, %c0_174] : memref<1x4x1x8xf32, #tpu.memory_space<vmem>>, vector<1x1x1x8xf32>
    %102 = vector.shape_cast %101 : vector<1x1x1x8xf32> to vector<1x8xf32>
    %c0_175 = arith.constant 0 : index
    %c3_176 = arith.constant 3 : index
    %c0_177 = arith.constant 0 : index
    %c0_178 = arith.constant 0 : index
    %103 = vector.load %arg16[%c0_175, %c3_176, %c0_177, %c0_178] : memref<1x4x1x8xf32, #tpu.memory_space<vmem>>, vector<1x1x1x8xf32>
    %104 = vector.shape_cast %103 : vector<1x1x1x8xf32> to vector<1x8xf32>
    %c0_179 = arith.constant 0 : index
    %c0_180 = arith.constant 0 : index
    %c0_181 = arith.constant 0 : index
    %c0_182 = arith.constant 0 : index
    %105 = vector.load %arg17[%c0_179, %c0_180, %c0_181, %c0_182] : memref<1x4x1x8xf32, #tpu.memory_space<vmem>>, vector<1x1x1x8xf32>
    %106 = vector.shape_cast %105 : vector<1x1x1x8xf32> to vector<1x8xf32>
    %c0_183 = arith.constant 0 : index
    %c1_184 = arith.constant 1 : index
    %c0_185 = arith.constant 0 : index
    %c0_186 = arith.constant 0 : index
    %107 = vector.load %arg17[%c0_183, %c1_184, %c0_185, %c0_186] : memref<1x4x1x8xf32, #tpu.memory_space<vmem>>, vector<1x1x1x8xf32>
    %108 = vector.shape_cast %107 : vector<1x1x1x8xf32> to vector<1x8xf32>
    %c0_187 = arith.constant 0 : index
    %c2_188 = arith.constant 2 : index
    %c0_189 = arith.constant 0 : index
    %c0_190 = arith.constant 0 : index
    %109 = vector.load %arg17[%c0_187, %c2_188, %c0_189, %c0_190] : memref<1x4x1x8xf32, #tpu.memory_space<vmem>>, vector<1x1x1x8xf32>
    %110 = vector.shape_cast %109 : vector<1x1x1x8xf32> to vector<1x8xf32>
    %c0_191 = arith.constant 0 : index
    %c3_192 = arith.constant 3 : index
    %c0_193 = arith.constant 0 : index
    %c0_194 = arith.constant 0 : index
    %111 = vector.load %arg17[%c0_191, %c3_192, %c0_193, %c0_194] : memref<1x4x1x8xf32, #tpu.memory_space<vmem>>, vector<1x1x1x8xf32>
    %112 = vector.shape_cast %111 : vector<1x1x1x8xf32> to vector<1x8xf32>
    %c0_195 = arith.constant 0 : index
    %c0_196 = arith.constant 0 : index
    %c0_197 = arith.constant 0 : index
    %c0_198 = arith.constant 0 : index
    %113 = vector.load %arg18[%c0_195, %c0_196, %c0_197, %c0_198] : memref<1x4x1x8xf32, #tpu.memory_space<vmem>>, vector<1x1x1x8xf32>
    %114 = vector.shape_cast %113 : vector<1x1x1x8xf32> to vector<1x8xf32>
    %c0_199 = arith.constant 0 : index
    %c1_200 = arith.constant 1 : index
    %c0_201 = arith.constant 0 : index
    %c0_202 = arith.constant 0 : index
    %115 = vector.load %arg18[%c0_199, %c1_200, %c0_201, %c0_202] : memref<1x4x1x8xf32, #tpu.memory_space<vmem>>, vector<1x1x1x8xf32>
    %116 = vector.shape_cast %115 : vector<1x1x1x8xf32> to vector<1x8xf32>
    %c0_203 = arith.constant 0 : index
    %c2_204 = arith.constant 2 : index
    %c0_205 = arith.constant 0 : index
    %c0_206 = arith.constant 0 : index
    %117 = vector.load %arg18[%c0_203, %c2_204, %c0_205, %c0_206] : memref<1x4x1x8xf32, #tpu.memory_space<vmem>>, vector<1x1x1x8xf32>
    %118 = vector.shape_cast %117 : vector<1x1x1x8xf32> to vector<1x8xf32>
    %c0_207 = arith.constant 0 : index
    %c3_208 = arith.constant 3 : index
    %c0_209 = arith.constant 0 : index
    %c0_210 = arith.constant 0 : index
    %119 = vector.load %arg18[%c0_207, %c3_208, %c0_209, %c0_210] : memref<1x4x1x8xf32, #tpu.memory_space<vmem>>, vector<1x1x1x8xf32>
    %120 = vector.shape_cast %119 : vector<1x1x1x8xf32> to vector<1x8xf32>
    %c0_211 = arith.constant 0 : index
    %c0_212 = arith.constant 0 : index
    %c0_213 = arith.constant 0 : index
    %c0_214 = arith.constant 0 : index
    %121 = vector.load %arg19[%c0_211, %c0_212, %c0_213, %c0_214] : memref<1x4x8x32xf32, #tpu.memory_space<vmem>>, vector<1x1x8x32xf32>
    %122 = vector.shape_cast %121 : vector<1x1x8x32xf32> to vector<8x32xf32>
    %c0_215 = arith.constant 0 : index
    %c1_216 = arith.constant 1 : index
    %c0_217 = arith.constant 0 : index
    %c0_218 = arith.constant 0 : index
    %123 = vector.load %arg19[%c0_215, %c1_216, %c0_217, %c0_218] : memref<1x4x8x32xf32, #tpu.memory_space<vmem>>, vector<1x1x8x32xf32>
    %124 = vector.shape_cast %123 : vector<1x1x8x32xf32> to vector<8x32xf32>
    %c0_219 = arith.constant 0 : index
    %c2_220 = arith.constant 2 : index
    %c0_221 = arith.constant 0 : index
    %c0_222 = arith.constant 0 : index
    %125 = vector.load %arg19[%c0_219, %c2_220, %c0_221, %c0_222] : memref<1x4x8x32xf32, #tpu.memory_space<vmem>>, vector<1x1x8x32xf32>
    %126 = vector.shape_cast %125 : vector<1x1x8x32xf32> to vector<8x32xf32>
    %c0_223 = arith.constant 0 : index
    %c3_224 = arith.constant 3 : index
    %c0_225 = arith.constant 0 : index
    %c0_226 = arith.constant 0 : index
    %127 = vector.load %arg19[%c0_223, %c3_224, %c0_225, %c0_226] : memref<1x4x8x32xf32, #tpu.memory_space<vmem>>, vector<1x1x8x32xf32>
    %128 = vector.shape_cast %127 : vector<1x1x8x32xf32> to vector<8x32xf32>
    %c0_227 = arith.constant 0 : index
    %c0_228 = arith.constant 0 : index
    %c0_229 = arith.constant 0 : index
    %129 = vector.load %arg20[%c0_227, %c0_228, %c0_229] : memref<1x1x32xf32, #tpu.memory_space<vmem>>, vector<1x1x32xf32>
    %130 = vector.shape_cast %129 : vector<1x1x32xf32> to vector<1x32xf32>
    %c0_230 = arith.constant 0 : index
    %c0_231 = arith.constant 0 : index
    %c0_232 = arith.constant 0 : index
    %131 = vector.load %arg11[%c0_230, %c0_231, %c0_232] : memref<1x1x32xf32, #tpu.memory_space<vmem>>, vector<1x1x32xf32>
    %132 = vector.shape_cast %131 : vector<1x1x32xf32> to vector<1x32xf32>
    %c0_233 = arith.constant 0 : index
    %c0_234 = arith.constant 0 : index
    %c0_235 = arith.constant 0 : index
    %133 = vector.load %arg12[%c0_233, %c0_234, %c0_235] : memref<1x1x32xf32, #tpu.memory_space<vmem>>, vector<1x1x32xf32>
    %134 = vector.shape_cast %133 : vector<1x1x32xf32> to vector<1x32xf32>
    %c0_236 = arith.constant 0 : index
    %c0_237 = arith.constant 0 : index
    %c0_238 = arith.constant 0 : index
    %135 = vector.load %arg21[%c0_236, %c0_237, %c0_238] : memref<1x1x32xf32, #tpu.memory_space<vmem>>, vector<1x1x32xf32>
    %136 = vector.shape_cast %135 : vector<1x1x32xf32> to vector<1x32xf32>
    %c0_239 = arith.constant 0 : index
    %c0_240 = arith.constant 0 : index
    %c0_241 = arith.constant 0 : index
    %137 = vector.load %arg22[%c0_239, %c0_240, %c0_241] : memref<1x1x32xf32, #tpu.memory_space<vmem>>, vector<1x1x32xf32>
    %138 = vector.shape_cast %137 : vector<1x1x32xf32> to vector<1x32xf32>
    %c0_242 = arith.constant 0 : index
    %c0_243 = arith.constant 0 : index
    %c0_244 = arith.constant 0 : index
    %139 = vector.load %arg27[%c0_242, %c0_243, %c0_244] : memref<1x1x32xf32, #tpu.memory_space<vmem>>, vector<1x1x32xf32>
    %140 = vector.shape_cast %139 : vector<1x1x32xf32> to vector<1x32xf32>
    %c0_245 = arith.constant 0 : index
    %c0_246 = arith.constant 0 : index
    %c0_247 = arith.constant 0 : index
    %141 = vector.load %arg28[%c0_245, %c0_246, %c0_247] : memref<1x1x32xf32, #tpu.memory_space<vmem>>, vector<1x1x32xf32>
    %142 = vector.shape_cast %141 : vector<1x1x32xf32> to vector<1x32xf32>
    %c0_248 = arith.constant 0 : index
    %c0_249 = arith.constant 0 : index
    %c0_250 = arith.constant 0 : index
    %143 = vector.load %arg23[%c0_248, %c0_249, %c0_250] : memref<1x32x64xf32, #tpu.memory_space<vmem>>, vector<1x32x64xf32>
    %144 = vector.shape_cast %143 : vector<1x32x64xf32> to vector<32x64xf32>
    %c0_251 = arith.constant 0 : index
    %c0_252 = arith.constant 0 : index
    %c0_253 = arith.constant 0 : index
    %145 = vector.load %arg24[%c0_251, %c0_252, %c0_253] : memref<1x1x64xf32, #tpu.memory_space<vmem>>, vector<1x1x64xf32>
    %146 = vector.shape_cast %145 : vector<1x1x64xf32> to vector<1x64xf32>
    %c0_254 = arith.constant 0 : index
    %c0_255 = arith.constant 0 : index
    %c0_256 = arith.constant 0 : index
    %147 = vector.load %arg25[%c0_254, %c0_255, %c0_256] : memref<1x64x32xf32, #tpu.memory_space<vmem>>, vector<1x64x32xf32>
    %148 = vector.shape_cast %147 : vector<1x64x32xf32> to vector<64x32xf32>
    %c0_257 = arith.constant 0 : index
    %c0_258 = arith.constant 0 : index
    %c0_259 = arith.constant 0 : index
    %149 = vector.load %arg26[%c0_257, %c0_258, %c0_259] : memref<1x1x32xf32, #tpu.memory_space<vmem>>, vector<1x1x32xf32>
    %150 = vector.shape_cast %149 : vector<1x1x32xf32> to vector<1x32xf32>
    %c0_260 = arith.constant 0 : index
    %c0_261 = arith.constant 0 : index
    %c0_262 = arith.constant 0 : index
    %151 = vector.load %arg34[%c0_260, %c0_261, %c0_262] : memref<2x8x32xf32, #tpu.memory_space<vmem>>, vector<1x8x32xf32>
    %152 = vector.shape_cast %151 : vector<1x8x32xf32> to vector<8x32xf32>
    %c0_263 = arith.constant 0 : index
    %c0_264 = arith.constant 0 : index
    %c0_265 = arith.constant 0 : index
    %153 = vector.load %arg2[%c0_263, %c0_264, %c0_265] : memref<2x10x32xf32, #tpu.memory_space<vmem>>, vector<1x10x32xf32>
    %154 = vector.shape_cast %153 : vector<1x10x32xf32> to vector<10x32xf32>
    %cst_266 = arith.constant dense<0.000000e+00> : vector<8x8xf32>
    %155 = tpu.matmul %152, %16, %cst_266 {dimension_numbers = #tpu.dot_dimension_numbers<[1], [0], [0], [1], [0, 0, 1, 1], [], []>} : vector<8x32xf32>, vector<32x8xf32>, vector<8x8xf32> -> vector<8x8xf32>
    %156 = vector.broadcast %40 : vector<1x8xf32> to vector<8x8xf32>
    %157 = arith.addf %155, %156 : vector<8x8xf32>
    %cst_267 = arith.constant dense<0.000000e+00> : vector<8x8xf32>
    %158 = tpu.matmul %152, %24, %cst_267 {dimension_numbers = #tpu.dot_dimension_numbers<[1], [0], [0], [1], [0, 0, 1, 1], [], []>} : vector<8x32xf32>, vector<32x8xf32>, vector<8x8xf32> -> vector<8x8xf32>
    %159 = vector.broadcast %48 : vector<1x8xf32> to vector<8x8xf32>
    %160 = arith.addf %158, %159 : vector<8x8xf32>
    %cst_268 = arith.constant dense<0.000000e+00> : vector<8x8xf32>
    %161 = tpu.matmul %152, %32, %cst_268 {dimension_numbers = #tpu.dot_dimension_numbers<[1], [0], [0], [1], [0, 0, 1, 1], [], []>} : vector<8x32xf32>, vector<32x8xf32>, vector<8x8xf32> -> vector<8x8xf32>
    %162 = vector.broadcast %56 : vector<1x8xf32> to vector<8x8xf32>
    %163 = arith.addf %161, %162 : vector<8x8xf32>
    %cst_269 = arith.constant 0.353553385 : f32
    %164 = vector.broadcast %cst_269 : f32 to vector<8x8xf32>
    %165 = arith.mulf %157, %164 : vector<8x8xf32>
    %cst_270 = arith.constant dense<0.000000e+00> : vector<8x8xf32>
    %166 = tpu.matmul %165, %160, %cst_270 {dimension_numbers = #tpu.dot_dimension_numbers<[1], [1], [0], [0], [0, 0, 1, 0], [], []>} : vector<8x8xf32>, vector<8x8xf32>, vector<8x8xf32> -> vector<8x8xf32>
    %167 = arith.addf %166, %5 : vector<8x8xf32>
    %cst_271 = arith.constant dense<0xFF800000> : vector<8xf32>
    %168 = vector.multi_reduction <maximumf>, %167, %cst_271 [1] : vector<8x8xf32> to vector<8xf32>
    %169 = vector.shape_cast %168 : vector<8xf32> to vector<8x1xf32>
    %170 = vector.broadcast %169 : vector<8x1xf32> to vector<8x8xf32>
    %171 = arith.subf %167, %170 : vector<8x8xf32>
    %172 = math.exp %171 : vector<8x8xf32>
    %cst_272 = arith.constant dense<0.000000e+00> : vector<8xf32>
    %173 = vector.multi_reduction <add>, %172, %cst_272 [1] : vector<8x8xf32> to vector<8xf32>
    %174 = vector.shape_cast %173 : vector<8xf32> to vector<8x1xf32>
    %175 = tpu.reciprocal %174 {approx = true} : vector<8x1xf32> -> vector<8x1xf32>
    %176 = vector.broadcast %175 : vector<8x1xf32> to vector<8x8xf32>
    %177 = arith.mulf %172, %176 : vector<8x8xf32>
    %cst_273 = arith.constant dense<0.000000e+00> : vector<8x8xf32>
    %178 = tpu.matmul %177, %163, %cst_273 {dimension_numbers = #tpu.dot_dimension_numbers<[1], [0], [0], [1], [0, 0, 1, 1], [], []>} : vector<8x8xf32>, vector<8x8xf32>, vector<8x8xf32> -> vector<8x8xf32>
    %cst_274 = arith.constant dense<0.000000e+00> : vector<8x32xf32>
    %179 = tpu.matmul %178, %64, %cst_274 {dimension_numbers = #tpu.dot_dimension_numbers<[1], [0], [0], [1], [0, 0, 1, 1], [], []>} : vector<8x8xf32>, vector<8x32xf32>, vector<8x32xf32> -> vector<8x32xf32>
    %cst_275 = arith.constant dense<0.000000e+00> : vector<8x8xf32>
    %180 = tpu.matmul %152, %18, %cst_275 {dimension_numbers = #tpu.dot_dimension_numbers<[1], [0], [0], [1], [0, 0, 1, 1], [], []>} : vector<8x32xf32>, vector<32x8xf32>, vector<8x8xf32> -> vector<8x8xf32>
    %181 = vector.broadcast %42 : vector<1x8xf32> to vector<8x8xf32>
    %182 = arith.addf %180, %181 : vector<8x8xf32>
    %cst_276 = arith.constant dense<0.000000e+00> : vector<8x8xf32>
    %183 = tpu.matmul %152, %26, %cst_276 {dimension_numbers = #tpu.dot_dimension_numbers<[1], [0], [0], [1], [0, 0, 1, 1], [], []>} : vector<8x32xf32>, vector<32x8xf32>, vector<8x8xf32> -> vector<8x8xf32>
    %184 = vector.broadcast %50 : vector<1x8xf32> to vector<8x8xf32>
    %185 = arith.addf %183, %184 : vector<8x8xf32>
    %cst_277 = arith.constant dense<0.000000e+00> : vector<8x8xf32>
    %186 = tpu.matmul %152, %34, %cst_277 {dimension_numbers = #tpu.dot_dimension_numbers<[1], [0], [0], [1], [0, 0, 1, 1], [], []>} : vector<8x32xf32>, vector<32x8xf32>, vector<8x8xf32> -> vector<8x8xf32>
    %187 = vector.broadcast %58 : vector<1x8xf32> to vector<8x8xf32>
    %188 = arith.addf %186, %187 : vector<8x8xf32>
    %cst_278 = arith.constant 0.353553385 : f32
    %189 = vector.broadcast %cst_278 : f32 to vector<8x8xf32>
    %190 = arith.mulf %182, %189 : vector<8x8xf32>
    %cst_279 = arith.constant dense<0.000000e+00> : vector<8x8xf32>
    %191 = tpu.matmul %190, %185, %cst_279 {dimension_numbers = #tpu.dot_dimension_numbers<[1], [1], [0], [0], [0, 0, 1, 0], [], []>} : vector<8x8xf32>, vector<8x8xf32>, vector<8x8xf32> -> vector<8x8xf32>
    %192 = arith.addf %191, %5 : vector<8x8xf32>
    %cst_280 = arith.constant dense<0xFF800000> : vector<8xf32>
    %193 = vector.multi_reduction <maximumf>, %192, %cst_280 [1] : vector<8x8xf32> to vector<8xf32>
    %194 = vector.shape_cast %193 : vector<8xf32> to vector<8x1xf32>
    %195 = vector.broadcast %194 : vector<8x1xf32> to vector<8x8xf32>
    %196 = arith.subf %192, %195 : vector<8x8xf32>
    %197 = math.exp %196 : vector<8x8xf32>
    %cst_281 = arith.constant dense<0.000000e+00> : vector<8xf32>
    %198 = vector.multi_reduction <add>, %197, %cst_281 [1] : vector<8x8xf32> to vector<8xf32>
    %199 = vector.shape_cast %198 : vector<8xf32> to vector<8x1xf32>
    %200 = tpu.reciprocal %199 {approx = true} : vector<8x1xf32> -> vector<8x1xf32>
    %201 = vector.broadcast %200 : vector<8x1xf32> to vector<8x8xf32>
    %202 = arith.mulf %197, %201 : vector<8x8xf32>
    %cst_282 = arith.constant dense<0.000000e+00> : vector<8x8xf32>
    %203 = tpu.matmul %202, %188, %cst_282 {dimension_numbers = #tpu.dot_dimension_numbers<[1], [0], [0], [1], [0, 0, 1, 1], [], []>} : vector<8x8xf32>, vector<8x8xf32>, vector<8x8xf32> -> vector<8x8xf32>
    %cst_283 = arith.constant dense<0.000000e+00> : vector<8x32xf32>
    %204 = tpu.matmul %203, %66, %cst_283 {dimension_numbers = #tpu.dot_dimension_numbers<[1], [0], [0], [1], [0, 0, 1, 1], [], []>} : vector<8x8xf32>, vector<8x32xf32>, vector<8x32xf32> -> vector<8x32xf32>
    %205 = arith.addf %179, %204 : vector<8x32xf32>
    %cst_284 = arith.constant dense<0.000000e+00> : vector<8x8xf32>
    %206 = tpu.matmul %152, %20, %cst_284 {dimension_numbers = #tpu.dot_dimension_numbers<[1], [0], [0], [1], [0, 0, 1, 1], [], []>} : vector<8x32xf32>, vector<32x8xf32>, vector<8x8xf32> -> vector<8x8xf32>
    %207 = vector.broadcast %44 : vector<1x8xf32> to vector<8x8xf32>
    %208 = arith.addf %206, %207 : vector<8x8xf32>
    %cst_285 = arith.constant dense<0.000000e+00> : vector<8x8xf32>
    %209 = tpu.matmul %152, %28, %cst_285 {dimension_numbers = #tpu.dot_dimension_numbers<[1], [0], [0], [1], [0, 0, 1, 1], [], []>} : vector<8x32xf32>, vector<32x8xf32>, vector<8x8xf32> -> vector<8x8xf32>
    %210 = vector.broadcast %52 : vector<1x8xf32> to vector<8x8xf32>
    %211 = arith.addf %209, %210 : vector<8x8xf32>
    %cst_286 = arith.constant dense<0.000000e+00> : vector<8x8xf32>
    %212 = tpu.matmul %152, %36, %cst_286 {dimension_numbers = #tpu.dot_dimension_numbers<[1], [0], [0], [1], [0, 0, 1, 1], [], []>} : vector<8x32xf32>, vector<32x8xf32>, vector<8x8xf32> -> vector<8x8xf32>
    %213 = vector.broadcast %60 : vector<1x8xf32> to vector<8x8xf32>
    %214 = arith.addf %212, %213 : vector<8x8xf32>
    %cst_287 = arith.constant 0.353553385 : f32
    %215 = vector.broadcast %cst_287 : f32 to vector<8x8xf32>
    %216 = arith.mulf %208, %215 : vector<8x8xf32>
    %cst_288 = arith.constant dense<0.000000e+00> : vector<8x8xf32>
    %217 = tpu.matmul %216, %211, %cst_288 {dimension_numbers = #tpu.dot_dimension_numbers<[1], [1], [0], [0], [0, 0, 1, 0], [], []>} : vector<8x8xf32>, vector<8x8xf32>, vector<8x8xf32> -> vector<8x8xf32>
    %218 = arith.addf %217, %5 : vector<8x8xf32>
    %cst_289 = arith.constant dense<0xFF800000> : vector<8xf32>
    %219 = vector.multi_reduction <maximumf>, %218, %cst_289 [1] : vector<8x8xf32> to vector<8xf32>
    %220 = vector.shape_cast %219 : vector<8xf32> to vector<8x1xf32>
    %221 = vector.broadcast %220 : vector<8x1xf32> to vector<8x8xf32>
    %222 = arith.subf %218, %221 : vector<8x8xf32>
    %223 = math.exp %222 : vector<8x8xf32>
    %cst_290 = arith.constant dense<0.000000e+00> : vector<8xf32>
    %224 = vector.multi_reduction <add>, %223, %cst_290 [1] : vector<8x8xf32> to vector<8xf32>
    %225 = vector.shape_cast %224 : vector<8xf32> to vector<8x1xf32>
    %226 = tpu.reciprocal %225 {approx = true} : vector<8x1xf32> -> vector<8x1xf32>
    %227 = vector.broadcast %226 : vector<8x1xf32> to vector<8x8xf32>
    %228 = arith.mulf %223, %227 : vector<8x8xf32>
    %cst_291 = arith.constant dense<0.000000e+00> : vector<8x8xf32>
    %229 = tpu.matmul %228, %214, %cst_291 {dimension_numbers = #tpu.dot_dimension_numbers<[1], [0], [0], [1], [0, 0, 1, 1], [], []>} : vector<8x8xf32>, vector<8x8xf32>, vector<8x8xf32> -> vector<8x8xf32>
    %cst_292 = arith.constant dense<0.000000e+00> : vector<8x32xf32>
    %230 = tpu.matmul %229, %68, %cst_292 {dimension_numbers = #tpu.dot_dimension_numbers<[1], [0], [0], [1], [0, 0, 1, 1], [], []>} : vector<8x8xf32>, vector<8x32xf32>, vector<8x32xf32> -> vector<8x32xf32>
    %231 = arith.addf %205, %230 : vector<8x32xf32>
    %cst_293 = arith.constant dense<0.000000e+00> : vector<8x8xf32>
    %232 = tpu.matmul %152, %22, %cst_293 {dimension_numbers = #tpu.dot_dimension_numbers<[1], [0], [0], [1], [0, 0, 1, 1], [], []>} : vector<8x32xf32>, vector<32x8xf32>, vector<8x8xf32> -> vector<8x8xf32>
    %233 = vector.broadcast %46 : vector<1x8xf32> to vector<8x8xf32>
    %234 = arith.addf %232, %233 : vector<8x8xf32>
    %cst_294 = arith.constant dense<0.000000e+00> : vector<8x8xf32>
    %235 = tpu.matmul %152, %30, %cst_294 {dimension_numbers = #tpu.dot_dimension_numbers<[1], [0], [0], [1], [0, 0, 1, 1], [], []>} : vector<8x32xf32>, vector<32x8xf32>, vector<8x8xf32> -> vector<8x8xf32>
    %236 = vector.broadcast %54 : vector<1x8xf32> to vector<8x8xf32>
    %237 = arith.addf %235, %236 : vector<8x8xf32>
    %cst_295 = arith.constant dense<0.000000e+00> : vector<8x8xf32>
    %238 = tpu.matmul %152, %38, %cst_295 {dimension_numbers = #tpu.dot_dimension_numbers<[1], [0], [0], [1], [0, 0, 1, 1], [], []>} : vector<8x32xf32>, vector<32x8xf32>, vector<8x8xf32> -> vector<8x8xf32>
    %239 = vector.broadcast %62 : vector<1x8xf32> to vector<8x8xf32>
    %240 = arith.addf %238, %239 : vector<8x8xf32>
    %cst_296 = arith.constant 0.353553385 : f32
    %241 = vector.broadcast %cst_296 : f32 to vector<8x8xf32>
    %242 = arith.mulf %234, %241 : vector<8x8xf32>
    %cst_297 = arith.constant dense<0.000000e+00> : vector<8x8xf32>
    %243 = tpu.matmul %242, %237, %cst_297 {dimension_numbers = #tpu.dot_dimension_numbers<[1], [1], [0], [0], [0, 0, 1, 0], [], []>} : vector<8x8xf32>, vector<8x8xf32>, vector<8x8xf32> -> vector<8x8xf32>
    %244 = arith.addf %243, %5 : vector<8x8xf32>
    %cst_298 = arith.constant dense<0xFF800000> : vector<8xf32>
    %245 = vector.multi_reduction <maximumf>, %244, %cst_298 [1] : vector<8x8xf32> to vector<8xf32>
    %246 = vector.shape_cast %245 : vector<8xf32> to vector<8x1xf32>
    %247 = vector.broadcast %246 : vector<8x1xf32> to vector<8x8xf32>
    %248 = arith.subf %244, %247 : vector<8x8xf32>
    %249 = math.exp %248 : vector<8x8xf32>
    %cst_299 = arith.constant dense<0.000000e+00> : vector<8xf32>
    %250 = vector.multi_reduction <add>, %249, %cst_299 [1] : vector<8x8xf32> to vector<8xf32>
    %251 = vector.shape_cast %250 : vector<8xf32> to vector<8x1xf32>
    %252 = tpu.reciprocal %251 {approx = true} : vector<8x1xf32> -> vector<8x1xf32>
    %253 = vector.broadcast %252 : vector<8x1xf32> to vector<8x8xf32>
    %254 = arith.mulf %249, %253 : vector<8x8xf32>
    %cst_300 = arith.constant dense<0.000000e+00> : vector<8x8xf32>
    %255 = tpu.matmul %254, %240, %cst_300 {dimension_numbers = #tpu.dot_dimension_numbers<[1], [0], [0], [1], [0, 0, 1, 1], [], []>} : vector<8x8xf32>, vector<8x8xf32>, vector<8x8xf32> -> vector<8x8xf32>
    %cst_301 = arith.constant dense<0.000000e+00> : vector<8x32xf32>
    %256 = tpu.matmul %255, %70, %cst_301 {dimension_numbers = #tpu.dot_dimension_numbers<[1], [0], [0], [1], [0, 0, 1, 1], [], []>} : vector<8x8xf32>, vector<8x32xf32>, vector<8x32xf32> -> vector<8x32xf32>
    %257 = arith.addf %231, %256 : vector<8x32xf32>
    %258 = vector.broadcast %72 : vector<1x32xf32> to vector<8x32xf32>
    %259 = arith.addf %257, %258 : vector<8x32xf32>
    %260 = arith.addf %152, %259 : vector<8x32xf32>
    %cst_302 = arith.constant dense<0.000000e+00> : vector<8xf32>
    %261 = vector.multi_reduction <add>, %260, %cst_302 [1] : vector<8x32xf32> to vector<8xf32>
    %262 = vector.shape_cast %261 : vector<8xf32> to vector<8x1xf32>
    %cst_303 = arith.constant 3.200000e+01 : f32
    %263 = vector.broadcast %cst_303 : f32 to vector<8x1xf32>
    %264 = arith.divf %262, %263 : vector<8x1xf32>
    %265 = vector.broadcast %264 : vector<8x1xf32> to vector<8x32xf32>
    %266 = arith.subf %260, %265 : vector<8x32xf32>
    %267 = arith.mulf %266, %266 : vector<8x32xf32>
    %cst_304 = arith.constant dense<0.000000e+00> : vector<8xf32>
    %268 = vector.multi_reduction <add>, %267, %cst_304 [1] : vector<8x32xf32> to vector<8xf32>
    %269 = vector.shape_cast %268 : vector<8xf32> to vector<8x1xf32>
    %cst_305 = arith.constant 3.200000e+01 : f32
    %270 = vector.broadcast %cst_305 : f32 to vector<8x1xf32>
    %271 = arith.divf %269, %270 : vector<8x1xf32>
    %272 = vector.broadcast %264 : vector<8x1xf32> to vector<8x32xf32>
    %273 = arith.subf %260, %272 : vector<8x32xf32>
    %cst_306 = arith.constant 9.99999974E-6 : f32
    %274 = vector.broadcast %cst_306 : f32 to vector<8x1xf32>
    %275 = arith.addf %271, %274 : vector<8x1xf32>
    %276 = math.rsqrt %275 : vector<8x1xf32>
    %277 = vector.broadcast %276 : vector<8x1xf32> to vector<8x32xf32>
    %278 = arith.mulf %273, %277 : vector<8x32xf32>
    %279 = vector.broadcast %132 : vector<1x32xf32> to vector<8x32xf32>
    %280 = arith.mulf %278, %279 : vector<8x32xf32>
    %281 = vector.broadcast %134 : vector<1x32xf32> to vector<8x32xf32>
    %282 = arith.addf %280, %281 : vector<8x32xf32>
    %cst_307 = arith.constant dense<0.000000e+00> : vector<8x8xf32>
    %283 = tpu.matmul %282, %74, %cst_307 {dimension_numbers = #tpu.dot_dimension_numbers<[1], [0], [0], [1], [0, 0, 1, 1], [], []>} : vector<8x32xf32>, vector<32x8xf32>, vector<8x8xf32> -> vector<8x8xf32>
    %284 = vector.broadcast %98 : vector<1x8xf32> to vector<8x8xf32>
    %285 = arith.addf %283, %284 : vector<8x8xf32>
    %cst_308 = arith.constant dense<0.000000e+00> : vector<10x8xf32>
    %286 = tpu.matmul %154, %82, %cst_308 {dimension_numbers = #tpu.dot_dimension_numbers<[1], [0], [0], [1], [0, 0, 1, 1], [], []>} : vector<10x32xf32>, vector<32x8xf32>, vector<10x8xf32> -> vector<10x8xf32>
    %287 = vector.broadcast %106 : vector<1x8xf32> to vector<10x8xf32>
    %288 = arith.addf %286, %287 : vector<10x8xf32>
    %cst_309 = arith.constant dense<0.000000e+00> : vector<10x8xf32>
    %289 = tpu.matmul %154, %90, %cst_309 {dimension_numbers = #tpu.dot_dimension_numbers<[1], [0], [0], [1], [0, 0, 1, 1], [], []>} : vector<10x32xf32>, vector<32x8xf32>, vector<10x8xf32> -> vector<10x8xf32>
    %290 = vector.broadcast %114 : vector<1x8xf32> to vector<10x8xf32>
    %291 = arith.addf %289, %290 : vector<10x8xf32>
    %cst_310 = arith.constant 0.353553385 : f32
    %292 = vector.broadcast %cst_310 : f32 to vector<8x8xf32>
    %293 = arith.mulf %285, %292 : vector<8x8xf32>
    %cst_311 = arith.constant dense<0.000000e+00> : vector<8x10xf32>
    %294 = tpu.matmul %293, %288, %cst_311 {dimension_numbers = #tpu.dot_dimension_numbers<[1], [1], [0], [0], [0, 0, 1, 0], [], []>} : vector<8x8xf32>, vector<10x8xf32>, vector<8x10xf32> -> vector<8x10xf32>
    %295 = arith.addf %294, %11 : vector<8x10xf32>
    %cst_312 = arith.constant dense<0xFF800000> : vector<8xf32>
    %296 = vector.multi_reduction <maximumf>, %295, %cst_312 [1] : vector<8x10xf32> to vector<8xf32>
    %297 = vector.shape_cast %296 : vector<8xf32> to vector<8x1xf32>
    %298 = vector.broadcast %297 : vector<8x1xf32> to vector<8x10xf32>
    %299 = arith.subf %295, %298 : vector<8x10xf32>
    %300 = math.exp %299 : vector<8x10xf32>
    %cst_313 = arith.constant dense<0.000000e+00> : vector<8xf32>
    %301 = vector.multi_reduction <add>, %300, %cst_313 [1] : vector<8x10xf32> to vector<8xf32>
    %302 = vector.shape_cast %301 : vector<8xf32> to vector<8x1xf32>
    %303 = tpu.reciprocal %302 {approx = true} : vector<8x1xf32> -> vector<8x1xf32>
    %304 = vector.broadcast %303 : vector<8x1xf32> to vector<8x10xf32>
    %305 = arith.mulf %300, %304 : vector<8x10xf32>
    %cst_314 = arith.constant dense<0.000000e+00> : vector<8x8xf32>
    %306 = tpu.matmul %305, %291, %cst_314 {dimension_numbers = #tpu.dot_dimension_numbers<[1], [0], [0], [1], [0, 0, 1, 1], [], []>} : vector<8x10xf32>, vector<10x8xf32>, vector<8x8xf32> -> vector<8x8xf32>
    %cst_315 = arith.constant dense<0.000000e+00> : vector<8x32xf32>
    %307 = tpu.matmul %306, %122, %cst_315 {dimension_numbers = #tpu.dot_dimension_numbers<[1], [0], [0], [1], [0, 0, 1, 1], [], []>} : vector<8x8xf32>, vector<8x32xf32>, vector<8x32xf32> -> vector<8x32xf32>
    %cst_316 = arith.constant dense<0.000000e+00> : vector<8x8xf32>
    %308 = tpu.matmul %282, %76, %cst_316 {dimension_numbers = #tpu.dot_dimension_numbers<[1], [0], [0], [1], [0, 0, 1, 1], [], []>} : vector<8x32xf32>, vector<32x8xf32>, vector<8x8xf32> -> vector<8x8xf32>
    %309 = vector.broadcast %100 : vector<1x8xf32> to vector<8x8xf32>
    %310 = arith.addf %308, %309 : vector<8x8xf32>
    %cst_317 = arith.constant dense<0.000000e+00> : vector<10x8xf32>
    %311 = tpu.matmul %154, %84, %cst_317 {dimension_numbers = #tpu.dot_dimension_numbers<[1], [0], [0], [1], [0, 0, 1, 1], [], []>} : vector<10x32xf32>, vector<32x8xf32>, vector<10x8xf32> -> vector<10x8xf32>
    %312 = vector.broadcast %108 : vector<1x8xf32> to vector<10x8xf32>
    %313 = arith.addf %311, %312 : vector<10x8xf32>
    %cst_318 = arith.constant dense<0.000000e+00> : vector<10x8xf32>
    %314 = tpu.matmul %154, %92, %cst_318 {dimension_numbers = #tpu.dot_dimension_numbers<[1], [0], [0], [1], [0, 0, 1, 1], [], []>} : vector<10x32xf32>, vector<32x8xf32>, vector<10x8xf32> -> vector<10x8xf32>
    %315 = vector.broadcast %116 : vector<1x8xf32> to vector<10x8xf32>
    %316 = arith.addf %314, %315 : vector<10x8xf32>
    %cst_319 = arith.constant 0.353553385 : f32
    %317 = vector.broadcast %cst_319 : f32 to vector<8x8xf32>
    %318 = arith.mulf %310, %317 : vector<8x8xf32>
    %cst_320 = arith.constant dense<0.000000e+00> : vector<8x10xf32>
    %319 = tpu.matmul %318, %313, %cst_320 {dimension_numbers = #tpu.dot_dimension_numbers<[1], [1], [0], [0], [0, 0, 1, 0], [], []>} : vector<8x8xf32>, vector<10x8xf32>, vector<8x10xf32> -> vector<8x10xf32>
    %320 = arith.addf %319, %11 : vector<8x10xf32>
    %cst_321 = arith.constant dense<0xFF800000> : vector<8xf32>
    %321 = vector.multi_reduction <maximumf>, %320, %cst_321 [1] : vector<8x10xf32> to vector<8xf32>
    %322 = vector.shape_cast %321 : vector<8xf32> to vector<8x1xf32>
    %323 = vector.broadcast %322 : vector<8x1xf32> to vector<8x10xf32>
    %324 = arith.subf %320, %323 : vector<8x10xf32>
    %325 = math.exp %324 : vector<8x10xf32>
    %cst_322 = arith.constant dense<0.000000e+00> : vector<8xf32>
    %326 = vector.multi_reduction <add>, %325, %cst_322 [1] : vector<8x10xf32> to vector<8xf32>
    %327 = vector.shape_cast %326 : vector<8xf32> to vector<8x1xf32>
    %328 = tpu.reciprocal %327 {approx = true} : vector<8x1xf32> -> vector<8x1xf32>
    %329 = vector.broadcast %328 : vector<8x1xf32> to vector<8x10xf32>
    %330 = arith.mulf %325, %329 : vector<8x10xf32>
    %cst_323 = arith.constant dense<0.000000e+00> : vector<8x8xf32>
    %331 = tpu.matmul %330, %316, %cst_323 {dimension_numbers = #tpu.dot_dimension_numbers<[1], [0], [0], [1], [0, 0, 1, 1], [], []>} : vector<8x10xf32>, vector<10x8xf32>, vector<8x8xf32> -> vector<8x8xf32>
    %cst_324 = arith.constant dense<0.000000e+00> : vector<8x32xf32>
    %332 = tpu.matmul %331, %124, %cst_324 {dimension_numbers = #tpu.dot_dimension_numbers<[1], [0], [0], [1], [0, 0, 1, 1], [], []>} : vector<8x8xf32>, vector<8x32xf32>, vector<8x32xf32> -> vector<8x32xf32>
    %333 = arith.addf %307, %332 : vector<8x32xf32>
    %cst_325 = arith.constant dense<0.000000e+00> : vector<8x8xf32>
    %334 = tpu.matmul %282, %78, %cst_325 {dimension_numbers = #tpu.dot_dimension_numbers<[1], [0], [0], [1], [0, 0, 1, 1], [], []>} : vector<8x32xf32>, vector<32x8xf32>, vector<8x8xf32> -> vector<8x8xf32>
    %335 = vector.broadcast %102 : vector<1x8xf32> to vector<8x8xf32>
    %336 = arith.addf %334, %335 : vector<8x8xf32>
    %cst_326 = arith.constant dense<0.000000e+00> : vector<10x8xf32>
    %337 = tpu.matmul %154, %86, %cst_326 {dimension_numbers = #tpu.dot_dimension_numbers<[1], [0], [0], [1], [0, 0, 1, 1], [], []>} : vector<10x32xf32>, vector<32x8xf32>, vector<10x8xf32> -> vector<10x8xf32>
    %338 = vector.broadcast %110 : vector<1x8xf32> to vector<10x8xf32>
    %339 = arith.addf %337, %338 : vector<10x8xf32>
    %cst_327 = arith.constant dense<0.000000e+00> : vector<10x8xf32>
    %340 = tpu.matmul %154, %94, %cst_327 {dimension_numbers = #tpu.dot_dimension_numbers<[1], [0], [0], [1], [0, 0, 1, 1], [], []>} : vector<10x32xf32>, vector<32x8xf32>, vector<10x8xf32> -> vector<10x8xf32>
    %341 = vector.broadcast %118 : vector<1x8xf32> to vector<10x8xf32>
    %342 = arith.addf %340, %341 : vector<10x8xf32>
    %cst_328 = arith.constant 0.353553385 : f32
    %343 = vector.broadcast %cst_328 : f32 to vector<8x8xf32>
    %344 = arith.mulf %336, %343 : vector<8x8xf32>
    %cst_329 = arith.constant dense<0.000000e+00> : vector<8x10xf32>
    %345 = tpu.matmul %344, %339, %cst_329 {dimension_numbers = #tpu.dot_dimension_numbers<[1], [1], [0], [0], [0, 0, 1, 0], [], []>} : vector<8x8xf32>, vector<10x8xf32>, vector<8x10xf32> -> vector<8x10xf32>
    %346 = arith.addf %345, %11 : vector<8x10xf32>
    %cst_330 = arith.constant dense<0xFF800000> : vector<8xf32>
    %347 = vector.multi_reduction <maximumf>, %346, %cst_330 [1] : vector<8x10xf32> to vector<8xf32>
    %348 = vector.shape_cast %347 : vector<8xf32> to vector<8x1xf32>
    %349 = vector.broadcast %348 : vector<8x1xf32> to vector<8x10xf32>
    %350 = arith.subf %346, %349 : vector<8x10xf32>
    %351 = math.exp %350 : vector<8x10xf32>
    %cst_331 = arith.constant dense<0.000000e+00> : vector<8xf32>
    %352 = vector.multi_reduction <add>, %351, %cst_331 [1] : vector<8x10xf32> to vector<8xf32>
    %353 = vector.shape_cast %352 : vector<8xf32> to vector<8x1xf32>
    %354 = tpu.reciprocal %353 {approx = true} : vector<8x1xf32> -> vector<8x1xf32>
    %355 = vector.broadcast %354 : vector<8x1xf32> to vector<8x10xf32>
    %356 = arith.mulf %351, %355 : vector<8x10xf32>
    %cst_332 = arith.constant dense<0.000000e+00> : vector<8x8xf32>
    %357 = tpu.matmul %356, %342, %cst_332 {dimension_numbers = #tpu.dot_dimension_numbers<[1], [0], [0], [1], [0, 0, 1, 1], [], []>} : vector<8x10xf32>, vector<10x8xf32>, vector<8x8xf32> -> vector<8x8xf32>
    %cst_333 = arith.constant dense<0.000000e+00> : vector<8x32xf32>
    %358 = tpu.matmul %357, %126, %cst_333 {dimension_numbers = #tpu.dot_dimension_numbers<[1], [0], [0], [1], [0, 0, 1, 1], [], []>} : vector<8x8xf32>, vector<8x32xf32>, vector<8x32xf32> -> vector<8x32xf32>
    %359 = arith.addf %333, %358 : vector<8x32xf32>
    %cst_334 = arith.constant dense<0.000000e+00> : vector<8x8xf32>
    %360 = tpu.matmul %282, %80, %cst_334 {dimension_numbers = #tpu.dot_dimension_numbers<[1], [0], [0], [1], [0, 0, 1, 1], [], []>} : vector<8x32xf32>, vector<32x8xf32>, vector<8x8xf32> -> vector<8x8xf32>
    %361 = vector.broadcast %104 : vector<1x8xf32> to vector<8x8xf32>
    %362 = arith.addf %360, %361 : vector<8x8xf32>
    %cst_335 = arith.constant dense<0.000000e+00> : vector<10x8xf32>
    %363 = tpu.matmul %154, %88, %cst_335 {dimension_numbers = #tpu.dot_dimension_numbers<[1], [0], [0], [1], [0, 0, 1, 1], [], []>} : vector<10x32xf32>, vector<32x8xf32>, vector<10x8xf32> -> vector<10x8xf32>
    %364 = vector.broadcast %112 : vector<1x8xf32> to vector<10x8xf32>
    %365 = arith.addf %363, %364 : vector<10x8xf32>
    %cst_336 = arith.constant dense<0.000000e+00> : vector<10x8xf32>
    %366 = tpu.matmul %154, %96, %cst_336 {dimension_numbers = #tpu.dot_dimension_numbers<[1], [0], [0], [1], [0, 0, 1, 1], [], []>} : vector<10x32xf32>, vector<32x8xf32>, vector<10x8xf32> -> vector<10x8xf32>
    %367 = vector.broadcast %120 : vector<1x8xf32> to vector<10x8xf32>
    %368 = arith.addf %366, %367 : vector<10x8xf32>
    %cst_337 = arith.constant 0.353553385 : f32
    %369 = vector.broadcast %cst_337 : f32 to vector<8x8xf32>
    %370 = arith.mulf %362, %369 : vector<8x8xf32>
    %cst_338 = arith.constant dense<0.000000e+00> : vector<8x10xf32>
    %371 = tpu.matmul %370, %365, %cst_338 {dimension_numbers = #tpu.dot_dimension_numbers<[1], [1], [0], [0], [0, 0, 1, 0], [], []>} : vector<8x8xf32>, vector<10x8xf32>, vector<8x10xf32> -> vector<8x10xf32>
    %372 = arith.addf %371, %11 : vector<8x10xf32>
    %cst_339 = arith.constant dense<0xFF800000> : vector<8xf32>
    %373 = vector.multi_reduction <maximumf>, %372, %cst_339 [1] : vector<8x10xf32> to vector<8xf32>
    %374 = vector.shape_cast %373 : vector<8xf32> to vector<8x1xf32>
    %375 = vector.broadcast %374 : vector<8x1xf32> to vector<8x10xf32>
    %376 = arith.subf %372, %375 : vector<8x10xf32>
    %377 = math.exp %376 : vector<8x10xf32>
    %cst_340 = arith.constant dense<0.000000e+00> : vector<8xf32>
    %378 = vector.multi_reduction <add>, %377, %cst_340 [1] : vector<8x10xf32> to vector<8xf32>
    %379 = vector.shape_cast %378 : vector<8xf32> to vector<8x1xf32>
    %380 = tpu.reciprocal %379 {approx = true} : vector<8x1xf32> -> vector<8x1xf32>
    %381 = vector.broadcast %380 : vector<8x1xf32> to vector<8x10xf32>
    %382 = arith.mulf %377, %381 : vector<8x10xf32>
    %cst_341 = arith.constant dense<0.000000e+00> : vector<8x8xf32>
    %383 = tpu.matmul %382, %368, %cst_341 {dimension_numbers = #tpu.dot_dimension_numbers<[1], [0], [0], [1], [0, 0, 1, 1], [], []>} : vector<8x10xf32>, vector<10x8xf32>, vector<8x8xf32> -> vector<8x8xf32>
    %cst_342 = arith.constant dense<0.000000e+00> : vector<8x32xf32>
    %384 = tpu.matmul %383, %128, %cst_342 {dimension_numbers = #tpu.dot_dimension_numbers<[1], [0], [0], [1], [0, 0, 1, 1], [], []>} : vector<8x8xf32>, vector<8x32xf32>, vector<8x32xf32> -> vector<8x32xf32>
    %385 = arith.addf %359, %384 : vector<8x32xf32>
    %386 = vector.broadcast %130 : vector<1x32xf32> to vector<8x32xf32>
    %387 = arith.addf %385, %386 : vector<8x32xf32>
    %388 = arith.addf %282, %387 : vector<8x32xf32>
    %cst_343 = arith.constant dense<0.000000e+00> : vector<8xf32>
    %389 = vector.multi_reduction <add>, %388, %cst_343 [1] : vector<8x32xf32> to vector<8xf32>
    %390 = vector.shape_cast %389 : vector<8xf32> to vector<8x1xf32>
    %cst_344 = arith.constant 3.200000e+01 : f32
    %391 = vector.broadcast %cst_344 : f32 to vector<8x1xf32>
    %392 = arith.divf %390, %391 : vector<8x1xf32>
    %393 = vector.broadcast %392 : vector<8x1xf32> to vector<8x32xf32>
    %394 = arith.subf %388, %393 : vector<8x32xf32>
    %395 = arith.mulf %394, %394 : vector<8x32xf32>
    %cst_345 = arith.constant dense<0.000000e+00> : vector<8xf32>
    %396 = vector.multi_reduction <add>, %395, %cst_345 [1] : vector<8x32xf32> to vector<8xf32>
    %397 = vector.shape_cast %396 : vector<8xf32> to vector<8x1xf32>
    %cst_346 = arith.constant 3.200000e+01 : f32
    %398 = vector.broadcast %cst_346 : f32 to vector<8x1xf32>
    %399 = arith.divf %397, %398 : vector<8x1xf32>
    %400 = vector.broadcast %392 : vector<8x1xf32> to vector<8x32xf32>
    %401 = arith.subf %388, %400 : vector<8x32xf32>
    %cst_347 = arith.constant 9.99999974E-6 : f32
    %402 = vector.broadcast %cst_347 : f32 to vector<8x1xf32>
    %403 = arith.addf %399, %402 : vector<8x1xf32>
    %404 = math.rsqrt %403 : vector<8x1xf32>
    %405 = vector.broadcast %404 : vector<8x1xf32> to vector<8x32xf32>
    %406 = arith.mulf %401, %405 : vector<8x32xf32>
    %407 = vector.broadcast %136 : vector<1x32xf32> to vector<8x32xf32>
    %408 = arith.mulf %406, %407 : vector<8x32xf32>
    %409 = vector.broadcast %138 : vector<1x32xf32> to vector<8x32xf32>
    %410 = arith.addf %408, %409 : vector<8x32xf32>
    %cst_348 = arith.constant dense<0.000000e+00> : vector<8x64xf32>
    %411 = tpu.matmul %410, %144, %cst_348 {dimension_numbers = #tpu.dot_dimension_numbers<[1], [0], [0], [1], [0, 0, 1, 1], [], []>} : vector<8x32xf32>, vector<32x64xf32>, vector<8x64xf32> -> vector<8x64xf32>
    %412 = vector.broadcast %146 : vector<1x64xf32> to vector<8x64xf32>
    %413 = arith.addf %411, %412 : vector<8x64xf32>
    %cst_349 = arith.constant 0.000000e+00 : f32
    %414 = vector.broadcast %cst_349 : f32 to vector<8x64xf32>
    %415 = arith.maximumf %413, %414 : vector<8x64xf32>
    %cst_350 = arith.constant dense<0.000000e+00> : vector<8x32xf32>
    %416 = tpu.matmul %415, %148, %cst_350 {dimension_numbers = #tpu.dot_dimension_numbers<[1], [0], [0], [1], [0, 0, 1, 1], [], []>} : vector<8x64xf32>, vector<64x32xf32>, vector<8x32xf32> -> vector<8x32xf32>
    %417 = vector.broadcast %150 : vector<1x32xf32> to vector<8x32xf32>
    %418 = arith.addf %416, %417 : vector<8x32xf32>
    %419 = arith.addf %410, %418 : vector<8x32xf32>
    %cst_351 = arith.constant dense<0.000000e+00> : vector<8xf32>
    %420 = vector.multi_reduction <add>, %419, %cst_351 [1] : vector<8x32xf32> to vector<8xf32>
    %421 = vector.shape_cast %420 : vector<8xf32> to vector<8x1xf32>
    %cst_352 = arith.constant 3.200000e+01 : f32
    %422 = vector.broadcast %cst_352 : f32 to vector<8x1xf32>
    %423 = arith.divf %421, %422 : vector<8x1xf32>
    %424 = vector.broadcast %423 : vector<8x1xf32> to vector<8x32xf32>
    %425 = arith.subf %419, %424 : vector<8x32xf32>
    %426 = arith.mulf %425, %425 : vector<8x32xf32>
    %cst_353 = arith.constant dense<0.000000e+00> : vector<8xf32>
    %427 = vector.multi_reduction <add>, %426, %cst_353 [1] : vector<8x32xf32> to vector<8xf32>
    %428 = vector.shape_cast %427 : vector<8xf32> to vector<8x1xf32>
    %cst_354 = arith.constant 3.200000e+01 : f32
    %429 = vector.broadcast %cst_354 : f32 to vector<8x1xf32>
    %430 = arith.divf %428, %429 : vector<8x1xf32>
    %431 = vector.broadcast %423 : vector<8x1xf32> to vector<8x32xf32>
    %432 = arith.subf %419, %431 : vector<8x32xf32>
    %cst_355 = arith.constant 9.99999974E-6 : f32
    %433 = vector.broadcast %cst_355 : f32 to vector<8x1xf32>
    %434 = arith.addf %430, %433 : vector<8x1xf32>
    %435 = math.rsqrt %434 : vector<8x1xf32>
    %436 = vector.broadcast %435 : vector<8x1xf32> to vector<8x32xf32>
    %437 = arith.mulf %432, %436 : vector<8x32xf32>
    %438 = vector.broadcast %140 : vector<1x32xf32> to vector<8x32xf32>
    %439 = arith.mulf %437, %438 : vector<8x32xf32>
    %440 = vector.broadcast %142 : vector<1x32xf32> to vector<8x32xf32>
    %441 = arith.addf %439, %440 : vector<8x32xf32>
    %c0_356 = arith.constant 0 : index
    %c0_357 = arith.constant 0 : index
    %c0_358 = arith.constant 0 : index
    %442 = vector.load %arg34[%c0_356, %c0_357, %c0_358] : memref<2x8x32xf32, #tpu.memory_space<vmem>>, vector<1x8x32xf32>
    %443 = vector.shape_cast %442 : vector<1x8x32xf32> to vector<8x32xf32>
    %444 = vector.shape_cast %441 : vector<8x32xf32> to vector<1x8x32xf32>
    tpu.vector_store %arg34[%c0_356, %c0_357, %c0_358], %444 {strides = array<i32>} : memref<2x8x32xf32, #tpu.memory_space<vmem>>, vector<1x8x32xf32>,
    %c1_359 = arith.constant 1 : index
    %c0_360 = arith.constant 0 : index
    %c0_361 = arith.constant 0 : index
    %445 = vector.load %arg34[%c1_359, %c0_360, %c0_361] : memref<2x8x32xf32, #tpu.memory_space<vmem>>, vector<1x8x32xf32>
    %446 = vector.shape_cast %445 : vector<1x8x32xf32> to vector<8x32xf32>
    %c1_362 = arith.constant 1 : index
    %c0_363 = arith.constant 0 : index
    %c0_364 = arith.constant 0 : index
    %447 = vector.load %arg2[%c1_362, %c0_363, %c0_364] : memref<2x10x32xf32, #tpu.memory_space<vmem>>, vector<1x10x32xf32>
    %448 = vector.shape_cast %447 : vector<1x10x32xf32> to vector<10x32xf32>
    %cst_365 = arith.constant dense<0.000000e+00> : vector<8x8xf32>
    %449 = tpu.matmul %446, %16, %cst_365 {dimension_numbers = #tpu.dot_dimension_numbers<[1], [0], [0], [1], [0, 0, 1, 1], [], []>} : vector<8x32xf32>, vector<32x8xf32>, vector<8x8xf32> -> vector<8x8xf32>
    %450 = vector.broadcast %40 : vector<1x8xf32> to vector<8x8xf32>
    %451 = arith.addf %449, %450 : vector<8x8xf32>
    %cst_366 = arith.constant dense<0.000000e+00> : vector<8x8xf32>
    %452 = tpu.matmul %446, %24, %cst_366 {dimension_numbers = #tpu.dot_dimension_numbers<[1], [0], [0], [1], [0, 0, 1, 1], [], []>} : vector<8x32xf32>, vector<32x8xf32>, vector<8x8xf32> -> vector<8x8xf32>
    %453 = vector.broadcast %48 : vector<1x8xf32> to vector<8x8xf32>
    %454 = arith.addf %452, %453 : vector<8x8xf32>
    %cst_367 = arith.constant dense<0.000000e+00> : vector<8x8xf32>
    %455 = tpu.matmul %446, %32, %cst_367 {dimension_numbers = #tpu.dot_dimension_numbers<[1], [0], [0], [1], [0, 0, 1, 1], [], []>} : vector<8x32xf32>, vector<32x8xf32>, vector<8x8xf32> -> vector<8x8xf32>
    %456 = vector.broadcast %56 : vector<1x8xf32> to vector<8x8xf32>
    %457 = arith.addf %455, %456 : vector<8x8xf32>
    %cst_368 = arith.constant 0.353553385 : f32
    %458 = vector.broadcast %cst_368 : f32 to vector<8x8xf32>
    %459 = arith.mulf %451, %458 : vector<8x8xf32>
    %cst_369 = arith.constant dense<0.000000e+00> : vector<8x8xf32>
    %460 = tpu.matmul %459, %454, %cst_369 {dimension_numbers = #tpu.dot_dimension_numbers<[1], [1], [0], [0], [0, 0, 1, 0], [], []>} : vector<8x8xf32>, vector<8x8xf32>, vector<8x8xf32> -> vector<8x8xf32>
    %461 = arith.addf %460, %5 : vector<8x8xf32>
    %cst_370 = arith.constant dense<0xFF800000> : vector<8xf32>
    %462 = vector.multi_reduction <maximumf>, %461, %cst_370 [1] : vector<8x8xf32> to vector<8xf32>
    %463 = vector.shape_cast %462 : vector<8xf32> to vector<8x1xf32>
    %464 = vector.broadcast %463 : vector<8x1xf32> to vector<8x8xf32>
    %465 = arith.subf %461, %464 : vector<8x8xf32>
    %466 = math.exp %465 : vector<8x8xf32>
    %cst_371 = arith.constant dense<0.000000e+00> : vector<8xf32>
    %467 = vector.multi_reduction <add>, %466, %cst_371 [1] : vector<8x8xf32> to vector<8xf32>
    %468 = vector.shape_cast %467 : vector<8xf32> to vector<8x1xf32>
    %469 = tpu.reciprocal %468 {approx = true} : vector<8x1xf32> -> vector<8x1xf32>
    %470 = vector.broadcast %469 : vector<8x1xf32> to vector<8x8xf32>
    %471 = arith.mulf %466, %470 : vector<8x8xf32>
    %cst_372 = arith.constant dense<0.000000e+00> : vector<8x8xf32>
    %472 = tpu.matmul %471, %457, %cst_372 {dimension_numbers = #tpu.dot_dimension_numbers<[1], [0], [0], [1], [0, 0, 1, 1], [], []>} : vector<8x8xf32>, vector<8x8xf32>, vector<8x8xf32> -> vector<8x8xf32>
    %cst_373 = arith.constant dense<0.000000e+00> : vector<8x32xf32>
    %473 = tpu.matmul %472, %64, %cst_373 {dimension_numbers = #tpu.dot_dimension_numbers<[1], [0], [0], [1], [0, 0, 1, 1], [], []>} : vector<8x8xf32>, vector<8x32xf32>, vector<8x32xf32> -> vector<8x32xf32>
    %cst_374 = arith.constant dense<0.000000e+00> : vector<8x8xf32>
    %474 = tpu.matmul %446, %18, %cst_374 {dimension_numbers = #tpu.dot_dimension_numbers<[1], [0], [0], [1], [0, 0, 1, 1], [], []>} : vector<8x32xf32>, vector<32x8xf32>, vector<8x8xf32> -> vector<8x8xf32>
    %475 = vector.broadcast %42 : vector<1x8xf32> to vector<8x8xf32>
    %476 = arith.addf %474, %475 : vector<8x8xf32>
    %cst_375 = arith.constant dense<0.000000e+00> : vector<8x8xf32>
    %477 = tpu.matmul %446, %26, %cst_375 {dimension_numbers = #tpu.dot_dimension_numbers<[1], [0], [0], [1], [0, 0, 1, 1], [], []>} : vector<8x32xf32>, vector<32x8xf32>, vector<8x8xf32> -> vector<8x8xf32>
    %478 = vector.broadcast %50 : vector<1x8xf32> to vector<8x8xf32>
    %479 = arith.addf %477, %478 : vector<8x8xf32>
    %cst_376 = arith.constant dense<0.000000e+00> : vector<8x8xf32>
    %480 = tpu.matmul %446, %34, %cst_376 {dimension_numbers = #tpu.dot_dimension_numbers<[1], [0], [0], [1], [0, 0, 1, 1], [], []>} : vector<8x32xf32>, vector<32x8xf32>, vector<8x8xf32> -> vector<8x8xf32>
    %481 = vector.broadcast %58 : vector<1x8xf32> to vector<8x8xf32>
    %482 = arith.addf %480, %481 : vector<8x8xf32>
    %cst_377 = arith.constant 0.353553385 : f32
    %483 = vector.broadcast %cst_377 : f32 to vector<8x8xf32>
    %484 = arith.mulf %476, %483 : vector<8x8xf32>
    %cst_378 = arith.constant dense<0.000000e+00> : vector<8x8xf32>
    %485 = tpu.matmul %484, %479, %cst_378 {dimension_numbers = #tpu.dot_dimension_numbers<[1], [1], [0], [0], [0, 0, 1, 0], [], []>} : vector<8x8xf32>, vector<8x8xf32>, vector<8x8xf32> -> vector<8x8xf32>
    %486 = arith.addf %485, %5 : vector<8x8xf32>
    %cst_379 = arith.constant dense<0xFF800000> : vector<8xf32>
    %487 = vector.multi_reduction <maximumf>, %486, %cst_379 [1] : vector<8x8xf32> to vector<8xf32>
    %488 = vector.shape_cast %487 : vector<8xf32> to vector<8x1xf32>
    %489 = vector.broadcast %488 : vector<8x1xf32> to vector<8x8xf32>
    %490 = arith.subf %486, %489 : vector<8x8xf32>
    %491 = math.exp %490 : vector<8x8xf32>
    %cst_380 = arith.constant dense<0.000000e+00> : vector<8xf32>
    %492 = vector.multi_reduction <add>, %491, %cst_380 [1] : vector<8x8xf32> to vector<8xf32>
    %493 = vector.shape_cast %492 : vector<8xf32> to vector<8x1xf32>
    %494 = tpu.reciprocal %493 {approx = true} : vector<8x1xf32> -> vector<8x1xf32>
    %495 = vector.broadcast %494 : vector<8x1xf32> to vector<8x8xf32>
    %496 = arith.mulf %491, %495 : vector<8x8xf32>
    %cst_381 = arith.constant dense<0.000000e+00> : vector<8x8xf32>
    %497 = tpu.matmul %496, %482, %cst_381 {dimension_numbers = #tpu.dot_dimension_numbers<[1], [0], [0], [1], [0, 0, 1, 1], [], []>} : vector<8x8xf32>, vector<8x8xf32>, vector<8x8xf32> -> vector<8x8xf32>
    %cst_382 = arith.constant dense<0.000000e+00> : vector<8x32xf32>
    %498 = tpu.matmul %497, %66, %cst_382 {dimension_numbers = #tpu.dot_dimension_numbers<[1], [0], [0], [1], [0, 0, 1, 1], [], []>} : vector<8x8xf32>, vector<8x32xf32>, vector<8x32xf32> -> vector<8x32xf32>
    %499 = arith.addf %473, %498 : vector<8x32xf32>
    %cst_383 = arith.constant dense<0.000000e+00> : vector<8x8xf32>
    %500 = tpu.matmul %446, %20, %cst_383 {dimension_numbers = #tpu.dot_dimension_numbers<[1], [0], [0], [1], [0, 0, 1, 1], [], []>} : vector<8x32xf32>, vector<32x8xf32>, vector<8x8xf32> -> vector<8x8xf32>
    %501 = vector.broadcast %44 : vector<1x8xf32> to vector<8x8xf32>
    %502 = arith.addf %500, %501 : vector<8x8xf32>
    %cst_384 = arith.constant dense<0.000000e+00> : vector<8x8xf32>
    %503 = tpu.matmul %446, %28, %cst_384 {dimension_numbers = #tpu.dot_dimension_numbers<[1], [0], [0], [1], [0, 0, 1, 1], [], []>} : vector<8x32xf32>, vector<32x8xf32>, vector<8x8xf32> -> vector<8x8xf32>
    %504 = vector.broadcast %52 : vector<1x8xf32> to vector<8x8xf32>
    %505 = arith.addf %503, %504 : vector<8x8xf32>
    %cst_385 = arith.constant dense<0.000000e+00> : vector<8x8xf32>
    %506 = tpu.matmul %446, %36, %cst_385 {dimension_numbers = #tpu.dot_dimension_numbers<[1], [0], [0], [1], [0, 0, 1, 1], [], []>} : vector<8x32xf32>, vector<32x8xf32>, vector<8x8xf32> -> vector<8x8xf32>
    %507 = vector.broadcast %60 : vector<1x8xf32> to vector<8x8xf32>
    %508 = arith.addf %506, %507 : vector<8x8xf32>
    %cst_386 = arith.constant 0.353553385 : f32
    %509 = vector.broadcast %cst_386 : f32 to vector<8x8xf32>
    %510 = arith.mulf %502, %509 : vector<8x8xf32>
    %cst_387 = arith.constant dense<0.000000e+00> : vector<8x8xf32>
    %511 = tpu.matmul %510, %505, %cst_387 {dimension_numbers = #tpu.dot_dimension_numbers<[1], [1], [0], [0], [0, 0, 1, 0], [], []>} : vector<8x8xf32>, vector<8x8xf32>, vector<8x8xf32> -> vector<8x8xf32>
    %512 = arith.addf %511, %5 : vector<8x8xf32>
    %cst_388 = arith.constant dense<0xFF800000> : vector<8xf32>
    %513 = vector.multi_reduction <maximumf>, %512, %cst_388 [1] : vector<8x8xf32> to vector<8xf32>
    %514 = vector.shape_cast %513 : vector<8xf32> to vector<8x1xf32>
    %515 = vector.broadcast %514 : vector<8x1xf32> to vector<8x8xf32>
    %516 = arith.subf %512, %515 : vector<8x8xf32>
    %517 = math.exp %516 : vector<8x8xf32>
    %cst_389 = arith.constant dense<0.000000e+00> : vector<8xf32>
    %518 = vector.multi_reduction <add>, %517, %cst_389 [1] : vector<8x8xf32> to vector<8xf32>
    %519 = vector.shape_cast %518 : vector<8xf32> to vector<8x1xf32>
    %520 = tpu.reciprocal %519 {approx = true} : vector<8x1xf32> -> vector<8x1xf32>
    %521 = vector.broadcast %520 : vector<8x1xf32> to vector<8x8xf32>
    %522 = arith.mulf %517, %521 : vector<8x8xf32>
    %cst_390 = arith.constant dense<0.000000e+00> : vector<8x8xf32>
    %523 = tpu.matmul %522, %508, %cst_390 {dimension_numbers = #tpu.dot_dimension_numbers<[1], [0], [0], [1], [0, 0, 1, 1], [], []>} : vector<8x8xf32>, vector<8x8xf32>, vector<8x8xf32> -> vector<8x8xf32>
    %cst_391 = arith.constant dense<0.000000e+00> : vector<8x32xf32>
    %524 = tpu.matmul %523, %68, %cst_391 {dimension_numbers = #tpu.dot_dimension_numbers<[1], [0], [0], [1], [0, 0, 1, 1], [], []>} : vector<8x8xf32>, vector<8x32xf32>, vector<8x32xf32> -> vector<8x32xf32>
    %525 = arith.addf %499, %524 : vector<8x32xf32>
    %cst_392 = arith.constant dense<0.000000e+00> : vector<8x8xf32>
    %526 = tpu.matmul %446, %22, %cst_392 {dimension_numbers = #tpu.dot_dimension_numbers<[1], [0], [0], [1], [0, 0, 1, 1], [], []>} : vector<8x32xf32>, vector<32x8xf32>, vector<8x8xf32> -> vector<8x8xf32>
    %527 = vector.broadcast %46 : vector<1x8xf32> to vector<8x8xf32>
    %528 = arith.addf %526, %527 : vector<8x8xf32>
    %cst_393 = arith.constant dense<0.000000e+00> : vector<8x8xf32>
    %529 = tpu.matmul %446, %30, %cst_393 {dimension_numbers = #tpu.dot_dimension_numbers<[1], [0], [0], [1], [0, 0, 1, 1], [], []>} : vector<8x32xf32>, vector<32x8xf32>, vector<8x8xf32> -> vector<8x8xf32>
    %530 = vector.broadcast %54 : vector<1x8xf32> to vector<8x8xf32>
    %531 = arith.addf %529, %530 : vector<8x8xf32>
    %cst_394 = arith.constant dense<0.000000e+00> : vector<8x8xf32>
    %532 = tpu.matmul %446, %38, %cst_394 {dimension_numbers = #tpu.dot_dimension_numbers<[1], [0], [0], [1], [0, 0, 1, 1], [], []>} : vector<8x32xf32>, vector<32x8xf32>, vector<8x8xf32> -> vector<8x8xf32>
    %533 = vector.broadcast %62 : vector<1x8xf32> to vector<8x8xf32>
    %534 = arith.addf %532, %533 : vector<8x8xf32>
    %cst_395 = arith.constant 0.353553385 : f32
    %535 = vector.broadcast %cst_395 : f32 to vector<8x8xf32>
    %536 = arith.mulf %528, %535 : vector<8x8xf32>
    %cst_396 = arith.constant dense<0.000000e+00> : vector<8x8xf32>
    %537 = tpu.matmul %536, %531, %cst_396 {dimension_numbers = #tpu.dot_dimension_numbers<[1], [1], [0], [0], [0, 0, 1, 0], [], []>} : vector<8x8xf32>, vector<8x8xf32>, vector<8x8xf32> -> vector<8x8xf32>
    %538 = arith.addf %537, %5 : vector<8x8xf32>
    %cst_397 = arith.constant dense<0xFF800000> : vector<8xf32>
    %539 = vector.multi_reduction <maximumf>, %538, %cst_397 [1] : vector<8x8xf32> to vector<8xf32>
    %540 = vector.shape_cast %539 : vector<8xf32> to vector<8x1xf32>
    %541 = vector.broadcast %540 : vector<8x1xf32> to vector<8x8xf32>
    %542 = arith.subf %538, %541 : vector<8x8xf32>
    %543 = math.exp %542 : vector<8x8xf32>
    %cst_398 = arith.constant dense<0.000000e+00> : vector<8xf32>
    %544 = vector.multi_reduction <add>, %543, %cst_398 [1] : vector<8x8xf32> to vector<8xf32>
    %545 = vector.shape_cast %544 : vector<8xf32> to vector<8x1xf32>
    %546 = tpu.reciprocal %545 {approx = true} : vector<8x1xf32> -> vector<8x1xf32>
    %547 = vector.broadcast %546 : vector<8x1xf32> to vector<8x8xf32>
    %548 = arith.mulf %543, %547 : vector<8x8xf32>
    %cst_399 = arith.constant dense<0.000000e+00> : vector<8x8xf32>
    %549 = tpu.matmul %548, %534, %cst_399 {dimension_numbers = #tpu.dot_dimension_numbers<[1], [0], [0], [1], [0, 0, 1, 1], [], []>} : vector<8x8xf32>, vector<8x8xf32>, vector<8x8xf32> -> vector<8x8xf32>
    %cst_400 = arith.constant dense<0.000000e+00> : vector<8x32xf32>
    %550 = tpu.matmul %549, %70, %cst_400 {dimension_numbers = #tpu.dot_dimension_numbers<[1], [0], [0], [1], [0, 0, 1, 1], [], []>} : vector<8x8xf32>, vector<8x32xf32>, vector<8x32xf32> -> vector<8x32xf32>
    %551 = arith.addf %525, %550 : vector<8x32xf32>
    %552 = vector.broadcast %72 : vector<1x32xf32> to vector<8x32xf32>
    %553 = arith.addf %551, %552 : vector<8x32xf32>
    %554 = arith.addf %446, %553 : vector<8x32xf32>
    %cst_401 = arith.constant dense<0.000000e+00> : vector<8xf32>
    %555 = vector.multi_reduction <add>, %554, %cst_401 [1] : vector<8x32xf32> to vector<8xf32>
    %556 = vector.shape_cast %555 : vector<8xf32> to vector<8x1xf32>
    %cst_402 = arith.constant 3.200000e+01 : f32
    %557 = vector.broadcast %cst_402 : f32 to vector<8x1xf32>
    %558 = arith.divf %556, %557 : vector<8x1xf32>
    %559 = vector.broadcast %558 : vector<8x1xf32> to vector<8x32xf32>
    %560 = arith.subf %554, %559 : vector<8x32xf32>
    %561 = arith.mulf %560, %560 : vector<8x32xf32>
    %cst_403 = arith.constant dense<0.000000e+00> : vector<8xf32>
    %562 = vector.multi_reduction <add>, %561, %cst_403 [1] : vector<8x32xf32> to vector<8xf32>
    %563 = vector.shape_cast %562 : vector<8xf32> to vector<8x1xf32>
    %cst_404 = arith.constant 3.200000e+01 : f32
    %564 = vector.broadcast %cst_404 : f32 to vector<8x1xf32>
    %565 = arith.divf %563, %564 : vector<8x1xf32>
    %566 = vector.broadcast %558 : vector<8x1xf32> to vector<8x32xf32>
    %567 = arith.subf %554, %566 : vector<8x32xf32>
    %cst_405 = arith.constant 9.99999974E-6 : f32
    %568 = vector.broadcast %cst_405 : f32 to vector<8x1xf32>
    %569 = arith.addf %565, %568 : vector<8x1xf32>
    %570 = math.rsqrt %569 : vector<8x1xf32>
    %571 = vector.broadcast %570 : vector<8x1xf32> to vector<8x32xf32>
    %572 = arith.mulf %567, %571 : vector<8x32xf32>
    %573 = vector.broadcast %132 : vector<1x32xf32> to vector<8x32xf32>
    %574 = arith.mulf %572, %573 : vector<8x32xf32>
    %575 = vector.broadcast %134 : vector<1x32xf32> to vector<8x32xf32>
    %576 = arith.addf %574, %575 : vector<8x32xf32>
    %cst_406 = arith.constant dense<0.000000e+00> : vector<8x8xf32>
    %577 = tpu.matmul %576, %74, %cst_406 {dimension_numbers = #tpu.dot_dimension_numbers<[1], [0], [0], [1], [0, 0, 1, 1], [], []>} : vector<8x32xf32>, vector<32x8xf32>, vector<8x8xf32> -> vector<8x8xf32>
    %578 = vector.broadcast %98 : vector<1x8xf32> to vector<8x8xf32>
    %579 = arith.addf %577, %578 : vector<8x8xf32>
    %cst_407 = arith.constant dense<0.000000e+00> : vector<10x8xf32>
    %580 = tpu.matmul %448, %82, %cst_407 {dimension_numbers = #tpu.dot_dimension_numbers<[1], [0], [0], [1], [0, 0, 1, 1], [], []>} : vector<10x32xf32>, vector<32x8xf32>, vector<10x8xf32> -> vector<10x8xf32>
    %581 = vector.broadcast %106 : vector<1x8xf32> to vector<10x8xf32>
    %582 = arith.addf %580, %581 : vector<10x8xf32>
    %cst_408 = arith.constant dense<0.000000e+00> : vector<10x8xf32>
    %583 = tpu.matmul %448, %90, %cst_408 {dimension_numbers = #tpu.dot_dimension_numbers<[1], [0], [0], [1], [0, 0, 1, 1], [], []>} : vector<10x32xf32>, vector<32x8xf32>, vector<10x8xf32> -> vector<10x8xf32>
    %584 = vector.broadcast %114 : vector<1x8xf32> to vector<10x8xf32>
    %585 = arith.addf %583, %584 : vector<10x8xf32>
    %cst_409 = arith.constant 0.353553385 : f32
    %586 = vector.broadcast %cst_409 : f32 to vector<8x8xf32>
    %587 = arith.mulf %579, %586 : vector<8x8xf32>
    %cst_410 = arith.constant dense<0.000000e+00> : vector<8x10xf32>
    %588 = tpu.matmul %587, %582, %cst_410 {dimension_numbers = #tpu.dot_dimension_numbers<[1], [1], [0], [0], [0, 0, 1, 0], [], []>} : vector<8x8xf32>, vector<10x8xf32>, vector<8x10xf32> -> vector<8x10xf32>
    %589 = arith.addf %588, %11 : vector<8x10xf32>
    %cst_411 = arith.constant dense<0xFF800000> : vector<8xf32>
    %590 = vector.multi_reduction <maximumf>, %589, %cst_411 [1] : vector<8x10xf32> to vector<8xf32>
    %591 = vector.shape_cast %590 : vector<8xf32> to vector<8x1xf32>
    %592 = vector.broadcast %591 : vector<8x1xf32> to vector<8x10xf32>
    %593 = arith.subf %589, %592 : vector<8x10xf32>
    %594 = math.exp %593 : vector<8x10xf32>
    %cst_412 = arith.constant dense<0.000000e+00> : vector<8xf32>
    %595 = vector.multi_reduction <add>, %594, %cst_412 [1] : vector<8x10xf32> to vector<8xf32>
    %596 = vector.shape_cast %595 : vector<8xf32> to vector<8x1xf32>
    %597 = tpu.reciprocal %596 {approx = true} : vector<8x1xf32> -> vector<8x1xf32>
    %598 = vector.broadcast %597 : vector<8x1xf32> to vector<8x10xf32>
    %599 = arith.mulf %594, %598 : vector<8x10xf32>
    %cst_413 = arith.constant dense<0.000000e+00> : vector<8x8xf32>
    %600 = tpu.matmul %599, %585, %cst_413 {dimension_numbers = #tpu.dot_dimension_numbers<[1], [0], [0], [1], [0, 0, 1, 1], [], []>} : vector<8x10xf32>, vector<10x8xf32>, vector<8x8xf32> -> vector<8x8xf32>
    %cst_414 = arith.constant dense<0.000000e+00> : vector<8x32xf32>
    %601 = tpu.matmul %600, %122, %cst_414 {dimension_numbers = #tpu.dot_dimension_numbers<[1], [0], [0], [1], [0, 0, 1, 1], [], []>} : vector<8x8xf32>, vector<8x32xf32>, vector<8x32xf32> -> vector<8x32xf32>
    %cst_415 = arith.constant dense<0.000000e+00> : vector<8x8xf32>
    %602 = tpu.matmul %576, %76, %cst_415 {dimension_numbers = #tpu.dot_dimension_numbers<[1], [0], [0], [1], [0, 0, 1, 1], [], []>} : vector<8x32xf32>, vector<32x8xf32>, vector<8x8xf32> -> vector<8x8xf32>
    %603 = vector.broadcast %100 : vector<1x8xf32> to vector<8x8xf32>
    %604 = arith.addf %602, %603 : vector<8x8xf32>
    %cst_416 = arith.constant dense<0.000000e+00> : vector<10x8xf32>
    %605 = tpu.matmul %448, %84, %cst_416 {dimension_numbers = #tpu.dot_dimension_numbers<[1], [0], [0], [1], [0, 0, 1, 1], [], []>} : vector<10x32xf32>, vector<32x8xf32>, vector<10x8xf32> -> vector<10x8xf32>
    %606 = vector.broadcast %108 : vector<1x8xf32> to vector<10x8xf32>
    %607 = arith.addf %605, %606 : vector<10x8xf32>
    %cst_417 = arith.constant dense<0.000000e+00> : vector<10x8xf32>
    %608 = tpu.matmul %448, %92, %cst_417 {dimension_numbers = #tpu.dot_dimension_numbers<[1], [0], [0], [1], [0, 0, 1, 1], [], []>} : vector<10x32xf32>, vector<32x8xf32>, vector<10x8xf32> -> vector<10x8xf32>
    %609 = vector.broadcast %116 : vector<1x8xf32> to vector<10x8xf32>
    %610 = arith.addf %608, %609 : vector<10x8xf32>
    %cst_418 = arith.constant 0.353553385 : f32
    %611 = vector.broadcast %cst_418 : f32 to vector<8x8xf32>
    %612 = arith.mulf %604, %611 : vector<8x8xf32>
    %cst_419 = arith.constant dense<0.000000e+00> : vector<8x10xf32>
    %613 = tpu.matmul %612, %607, %cst_419 {dimension_numbers = #tpu.dot_dimension_numbers<[1], [1], [0], [0], [0, 0, 1, 0], [], []>} : vector<8x8xf32>, vector<10x8xf32>, vector<8x10xf32> -> vector<8x10xf32>
    %614 = arith.addf %613, %11 : vector<8x10xf32>
    %cst_420 = arith.constant dense<0xFF800000> : vector<8xf32>
    %615 = vector.multi_reduction <maximumf>, %614, %cst_420 [1] : vector<8x10xf32> to vector<8xf32>
    %616 = vector.shape_cast %615 : vector<8xf32> to vector<8x1xf32>
    %617 = vector.broadcast %616 : vector<8x1xf32> to vector<8x10xf32>
    %618 = arith.subf %614, %617 : vector<8x10xf32>
    %619 = math.exp %618 : vector<8x10xf32>
    %cst_421 = arith.constant dense<0.000000e+00> : vector<8xf32>
    %620 = vector.multi_reduction <add>, %619, %cst_421 [1] : vector<8x10xf32> to vector<8xf32>
    %621 = vector.shape_cast %620 : vector<8xf32> to vector<8x1xf32>
    %622 = tpu.reciprocal %621 {approx = true} : vector<8x1xf32> -> vector<8x1xf32>
    %623 = vector.broadcast %622 : vector<8x1xf32> to vector<8x10xf32>
    %624 = arith.mulf %619, %623 : vector<8x10xf32>
    %cst_422 = arith.constant dense<0.000000e+00> : vector<8x8xf32>
    %625 = tpu.matmul %624, %610, %cst_422 {dimension_numbers = #tpu.dot_dimension_numbers<[1], [0], [0], [1], [0, 0, 1, 1], [], []>} : vector<8x10xf32>, vector<10x8xf32>, vector<8x8xf32> -> vector<8x8xf32>
    %cst_423 = arith.constant dense<0.000000e+00> : vector<8x32xf32>
    %626 = tpu.matmul %625, %124, %cst_423 {dimension_numbers = #tpu.dot_dimension_numbers<[1], [0], [0], [1], [0, 0, 1, 1], [], []>} : vector<8x8xf32>, vector<8x32xf32>, vector<8x32xf32> -> vector<8x32xf32>
    %627 = arith.addf %601, %626 : vector<8x32xf32>
    %cst_424 = arith.constant dense<0.000000e+00> : vector<8x8xf32>
    %628 = tpu.matmul %576, %78, %cst_424 {dimension_numbers = #tpu.dot_dimension_numbers<[1], [0], [0], [1], [0, 0, 1, 1], [], []>} : vector<8x32xf32>, vector<32x8xf32>, vector<8x8xf32> -> vector<8x8xf32>
    %629 = vector.broadcast %102 : vector<1x8xf32> to vector<8x8xf32>
    %630 = arith.addf %628, %629 : vector<8x8xf32>
    %cst_425 = arith.constant dense<0.000000e+00> : vector<10x8xf32>
    %631 = tpu.matmul %448, %86, %cst_425 {dimension_numbers = #tpu.dot_dimension_numbers<[1], [0], [0], [1], [0, 0, 1, 1], [], []>} : vector<10x32xf32>, vector<32x8xf32>, vector<10x8xf32> -> vector<10x8xf32>
    %632 = vector.broadcast %110 : vector<1x8xf32> to vector<10x8xf32>
    %633 = arith.addf %631, %632 : vector<10x8xf32>
    %cst_426 = arith.constant dense<0.000000e+00> : vector<10x8xf32>
    %634 = tpu.matmul %448, %94, %cst_426 {dimension_numbers = #tpu.dot_dimension_numbers<[1], [0], [0], [1], [0, 0, 1, 1], [], []>} : vector<10x32xf32>, vector<32x8xf32>, vector<10x8xf32> -> vector<10x8xf32>
    %635 = vector.broadcast %118 : vector<1x8xf32> to vector<10x8xf32>
    %636 = arith.addf %634, %635 : vector<10x8xf32>
    %cst_427 = arith.constant 0.353553385 : f32
    %637 = vector.broadcast %cst_427 : f32 to vector<8x8xf32>
    %638 = arith.mulf %630, %637 : vector<8x8xf32>
    %cst_428 = arith.constant dense<0.000000e+00> : vector<8x10xf32>
    %639 = tpu.matmul %638, %633, %cst_428 {dimension_numbers = #tpu.dot_dimension_numbers<[1], [1], [0], [0], [0, 0, 1, 0], [], []>} : vector<8x8xf32>, vector<10x8xf32>, vector<8x10xf32> -> vector<8x10xf32>
    %640 = arith.addf %639, %11 : vector<8x10xf32>
    %cst_429 = arith.constant dense<0xFF800000> : vector<8xf32>
    %641 = vector.multi_reduction <maximumf>, %640, %cst_429 [1] : vector<8x10xf32> to vector<8xf32>
    %642 = vector.shape_cast %641 : vector<8xf32> to vector<8x1xf32>
    %643 = vector.broadcast %642 : vector<8x1xf32> to vector<8x10xf32>
    %644 = arith.subf %640, %643 : vector<8x10xf32>
    %645 = math.exp %644 : vector<8x10xf32>
    %cst_430 = arith.constant dense<0.000000e+00> : vector<8xf32>
    %646 = vector.multi_reduction <add>, %645, %cst_430 [1] : vector<8x10xf32> to vector<8xf32>
    %647 = vector.shape_cast %646 : vector<8xf32> to vector<8x1xf32>
    %648 = tpu.reciprocal %647 {approx = true} : vector<8x1xf32> -> vector<8x1xf32>
    %649 = vector.broadcast %648 : vector<8x1xf32> to vector<8x10xf32>
    %650 = arith.mulf %645, %649 : vector<8x10xf32>
    %cst_431 = arith.constant dense<0.000000e+00> : vector<8x8xf32>
    %651 = tpu.matmul %650, %636, %cst_431 {dimension_numbers = #tpu.dot_dimension_numbers<[1], [0], [0], [1], [0, 0, 1, 1], [], []>} : vector<8x10xf32>, vector<10x8xf32>, vector<8x8xf32> -> vector<8x8xf32>
    %cst_432 = arith.constant dense<0.000000e+00> : vector<8x32xf32>
    %652 = tpu.matmul %651, %126, %cst_432 {dimension_numbers = #tpu.dot_dimension_numbers<[1], [0], [0], [1], [0, 0, 1, 1], [], []>} : vector<8x8xf32>, vector<8x32xf32>, vector<8x32xf32> -> vector<8x32xf32>
    %653 = arith.addf %627, %652 : vector<8x32xf32>
    %cst_433 = arith.constant dense<0.000000e+00> : vector<8x8xf32>
    %654 = tpu.matmul %576, %80, %cst_433 {dimension_numbers = #tpu.dot_dimension_numbers<[1], [0], [0], [1], [0, 0, 1, 1], [], []>} : vector<8x32xf32>, vector<32x8xf32>, vector<8x8xf32> -> vector<8x8xf32>
    %655 = vector.broadcast %104 : vector<1x8xf32> to vector<8x8xf32>
    %656 = arith.addf %654, %655 : vector<8x8xf32>
    %cst_434 = arith.constant dense<0.000000e+00> : vector<10x8xf32>
    %657 = tpu.matmul %448, %88, %cst_434 {dimension_numbers = #tpu.dot_dimension_numbers<[1], [0], [0], [1], [0, 0, 1, 1], [], []>} : vector<10x32xf32>, vector<32x8xf32>, vector<10x8xf32> -> vector<10x8xf32>
    %658 = vector.broadcast %112 : vector<1x8xf32> to vector<10x8xf32>
    %659 = arith.addf %657, %658 : vector<10x8xf32>
    %cst_435 = arith.constant dense<0.000000e+00> : vector<10x8xf32>
    %660 = tpu.matmul %448, %96, %cst_435 {dimension_numbers = #tpu.dot_dimension_numbers<[1], [0], [0], [1], [0, 0, 1, 1], [], []>} : vector<10x32xf32>, vector<32x8xf32>, vector<10x8xf32> -> vector<10x8xf32>
    %661 = vector.broadcast %120 : vector<1x8xf32> to vector<10x8xf32>
    %662 = arith.addf %660, %661 : vector<10x8xf32>
    %cst_436 = arith.constant 0.353553385 : f32
    %663 = vector.broadcast %cst_436 : f32 to vector<8x8xf32>
    %664 = arith.mulf %656, %663 : vector<8x8xf32>
    %cst_437 = arith.constant dense<0.000000e+00> : vector<8x10xf32>
    %665 = tpu.matmul %664, %659, %cst_437 {dimension_numbers = #tpu.dot_dimension_numbers<[1], [1], [0], [0], [0, 0, 1, 0], [], []>} : vector<8x8xf32>, vector<10x8xf32>, vector<8x10xf32> -> vector<8x10xf32>
    %666 = arith.addf %665, %11 : vector<8x10xf32>
    %cst_438 = arith.constant dense<0xFF800000> : vector<8xf32>
    %667 = vector.multi_reduction <maximumf>, %666, %cst_438 [1] : vector<8x10xf32> to vector<8xf32>
    %668 = vector.shape_cast %667 : vector<8xf32> to vector<8x1xf32>
    %669 = vector.broadcast %668 : vector<8x1xf32> to vector<8x10xf32>
    %670 = arith.subf %666, %669 : vector<8x10xf32>
    %671 = math.exp %670 : vector<8x10xf32>
    %cst_439 = arith.constant dense<0.000000e+00> : vector<8xf32>
    %672 = vector.multi_reduction <add>, %671, %cst_439 [1] : vector<8x10xf32> to vector<8xf32>
    %673 = vector.shape_cast %672 : vector<8xf32> to vector<8x1xf32>
    %674 = tpu.reciprocal %673 {approx = true} : vector<8x1xf32> -> vector<8x1xf32>
    %675 = vector.broadcast %674 : vector<8x1xf32> to vector<8x10xf32>
    %676 = arith.mulf %671, %675 : vector<8x10xf32>
    %cst_440 = arith.constant dense<0.000000e+00> : vector<8x8xf32>
    %677 = tpu.matmul %676, %662, %cst_440 {dimension_numbers = #tpu.dot_dimension_numbers<[1], [0], [0], [1], [0, 0, 1, 1], [], []>} : vector<8x10xf32>, vector<10x8xf32>, vector<8x8xf32> -> vector<8x8xf32>
    %cst_441 = arith.constant dense<0.000000e+00> : vector<8x32xf32>
    %678 = tpu.matmul %677, %128, %cst_441 {dimension_numbers = #tpu.dot_dimension_numbers<[1], [0], [0], [1], [0, 0, 1, 1], [], []>} : vector<8x8xf32>, vector<8x32xf32>, vector<8x32xf32> -> vector<8x32xf32>
    %679 = arith.addf %653, %678 : vector<8x32xf32>
    %680 = vector.broadcast %130 : vector<1x32xf32> to vector<8x32xf32>
    %681 = arith.addf %679, %680 : vector<8x32xf32>
    %682 = arith.addf %576, %681 : vector<8x32xf32>
    %cst_442 = arith.constant dense<0.000000e+00> : vector<8xf32>
    %683 = vector.multi_reduction <add>, %682, %cst_442 [1] : vector<8x32xf32> to vector<8xf32>
    %684 = vector.shape_cast %683 : vector<8xf32> to vector<8x1xf32>
    %cst_443 = arith.constant 3.200000e+01 : f32
    %685 = vector.broadcast %cst_443 : f32 to vector<8x1xf32>
    %686 = arith.divf %684, %685 : vector<8x1xf32>
    %687 = vector.broadcast %686 : vector<8x1xf32> to vector<8x32xf32>
    %688 = arith.subf %682, %687 : vector<8x32xf32>
    %689 = arith.mulf %688, %688 : vector<8x32xf32>
    %cst_444 = arith.constant dense<0.000000e+00> : vector<8xf32>
    %690 = vector.multi_reduction <add>, %689, %cst_444 [1] : vector<8x32xf32> to vector<8xf32>
    %691 = vector.shape_cast %690 : vector<8xf32> to vector<8x1xf32>
    %cst_445 = arith.constant 3.200000e+01 : f32
    %692 = vector.broadcast %cst_445 : f32 to vector<8x1xf32>
    %693 = arith.divf %691, %692 : vector<8x1xf32>
    %694 = vector.broadcast %686 : vector<8x1xf32> to vector<8x32xf32>
    %695 = arith.subf %682, %694 : vector<8x32xf32>
    %cst_446 = arith.constant 9.99999974E-6 : f32
    %696 = vector.broadcast %cst_446 : f32 to vector<8x1xf32>
    %697 = arith.addf %693, %696 : vector<8x1xf32>
    %698 = math.rsqrt %697 : vector<8x1xf32>
    %699 = vector.broadcast %698 : vector<8x1xf32> to vector<8x32xf32>
    %700 = arith.mulf %695, %699 : vector<8x32xf32>
    %701 = vector.broadcast %136 : vector<1x32xf32> to vector<8x32xf32>
    %702 = arith.mulf %700, %701 : vector<8x32xf32>
    %703 = vector.broadcast %138 : vector<1x32xf32> to vector<8x32xf32>
    %704 = arith.addf %702, %703 : vector<8x32xf32>
    %cst_447 = arith.constant dense<0.000000e+00> : vector<8x64xf32>
    %705 = tpu.matmul %704, %144, %cst_447 {dimension_numbers = #tpu.dot_dimension_numbers<[1], [0], [0], [1], [0, 0, 1, 1], [], []>} : vector<8x32xf32>, vector<32x64xf32>, vector<8x64xf32> -> vector<8x64xf32>
    %706 = vector.broadcast %146 : vector<1x64xf32> to vector<8x64xf32>
    %707 = arith.addf %705, %706 : vector<8x64xf32>
    %cst_448 = arith.constant 0.000000e+00 : f32
    %708 = vector.broadcast %cst_448 : f32 to vector<8x64xf32>
    %709 = arith.maximumf %707, %708 : vector<8x64xf32>
    %cst_449 = arith.constant dense<0.000000e+00> : vector<8x32xf32>
    %710 = tpu.matmul %709, %148, %cst_449 {dimension_numbers = #tpu.dot_dimension_numbers<[1], [0], [0], [1], [0, 0, 1, 1], [], []>} : vector<8x64xf32>, vector<64x32xf32>, vector<8x32xf32> -> vector<8x32xf32>
    %711 = vector.broadcast %150 : vector<1x32xf32> to vector<8x32xf32>
    %712 = arith.addf %710, %711 : vector<8x32xf32>
    %713 = arith.addf %704, %712 : vector<8x32xf32>
    %cst_450 = arith.constant dense<0.000000e+00> : vector<8xf32>
    %714 = vector.multi_reduction <add>, %713, %cst_450 [1] : vector<8x32xf32> to vector<8xf32>
    %715 = vector.shape_cast %714 : vector<8xf32> to vector<8x1xf32>
    %cst_451 = arith.constant 3.200000e+01 : f32
    %716 = vector.broadcast %cst_451 : f32 to vector<8x1xf32>
    %717 = arith.divf %715, %716 : vector<8x1xf32>
    %718 = vector.broadcast %717 : vector<8x1xf32> to vector<8x32xf32>
    %719 = arith.subf %713, %718 : vector<8x32xf32>
    %720 = arith.mulf %719, %719 : vector<8x32xf32>
    %cst_452 = arith.constant dense<0.000000e+00> : vector<8xf32>
    %721 = vector.multi_reduction <add>, %720, %cst_452 [1] : vector<8x32xf32> to vector<8xf32>
    %722 = vector.shape_cast %721 : vector<8xf32> to vector<8x1xf32>
    %cst_453 = arith.constant 3.200000e+01 : f32
    %723 = vector.broadcast %cst_453 : f32 to vector<8x1xf32>
    %724 = arith.divf %722, %723 : vector<8x1xf32>
    %725 = vector.broadcast %717 : vector<8x1xf32> to vector<8x32xf32>
    %726 = arith.subf %713, %725 : vector<8x32xf32>
    %cst_454 = arith.constant 9.99999974E-6 : f32
    %727 = vector.broadcast %cst_454 : f32 to vector<8x1xf32>
    %728 = arith.addf %724, %727 : vector<8x1xf32>
    %729 = math.rsqrt %728 : vector<8x1xf32>
    %730 = vector.broadcast %729 : vector<8x1xf32> to vector<8x32xf32>
    %731 = arith.mulf %726, %730 : vector<8x32xf32>
    %732 = vector.broadcast %140 : vector<1x32xf32> to vector<8x32xf32>
    %733 = arith.mulf %731, %732 : vector<8x32xf32>
    %734 = vector.broadcast %142 : vector<1x32xf32> to vector<8x32xf32>
    %735 = arith.addf %733, %734 : vector<8x32xf32>
    %c1_455 = arith.constant 1 : index
    %c0_456 = arith.constant 0 : index
    %c0_457 = arith.constant 0 : index
    %736 = vector.load %arg34[%c1_455, %c0_456, %c0_457] : memref<2x8x32xf32, #tpu.memory_space<vmem>>, vector<1x8x32xf32>
    %737 = vector.shape_cast %736 : vector<1x8x32xf32> to vector<8x32xf32>
    %738 = vector.shape_cast %735 : vector<8x32xf32> to vector<1x8x32xf32>
    tpu.vector_store %arg34[%c1_455, %c0_456, %c0_457], %738 {strides = array<i32>} : memref<2x8x32xf32, #tpu.memory_space<vmem>>, vector<1x8x32xf32>,
    %c1_i32 = arith.constant 1 : i32
    %739 = arith.cmpi eq, %arg0, %c1_i32 : i32
    %740 = arith.extui %739 : i1 to i32
    %c0_i32_458 = arith.constant 0 : i32
    %741 = arith.cmpi ne, %740, %c0_i32_458 : i32
    scf.if %741 {
      %c0_459 = arith.constant 0 : index
      %c0_460 = arith.constant 0 : index
      %742 = vector.load %arg29[%c0_459, %c0_460] : memref<1x32xf32, #tpu.memory_space<vmem>>, vector<1x32xf32>
      %c0_461 = arith.constant 0 : index
      %c0_462 = arith.constant 0 : index
      %743 = vector.load %arg30[%c0_461, %c0_462] : memref<1x32xf32, #tpu.memory_space<vmem>>, vector<1x32xf32>
      %c0_463 = arith.constant 0 : index
      %c0_464 = arith.constant 0 : index
      %744 = vector.load %arg31[%c0_463, %c0_464] : memref<1x32xf32, #tpu.memory_space<vmem>>, vector<1x32xf32>
      %c0_465 = arith.constant 0 : index
      %c0_466 = arith.constant 0 : index
      %745 = vector.load %arg32[%c0_465, %c0_466] : memref<1x1xf32, #tpu.memory_space<vmem>>, vector<1x1xf32>
      %c0_467 = arith.constant 0 : index
      %c0_468 = arith.constant 0 : index
      %c0_469 = arith.constant 0 : index
      %746 = vector.load %arg34[%c0_467, %c0_468, %c0_469] : memref<2x8x32xf32, #tpu.memory_space<vmem>>, vector<1x8x32xf32>
      %747 = vector.shape_cast %746 : vector<1x8x32xf32> to vector<8x32xf32>
      %cst_470 = arith.constant dense<0.000000e+00> : vector<8xf32>
      %748 = vector.multi_reduction <add>, %747, %cst_470 [1] : vector<8x32xf32> to vector<8xf32>
      %749 = vector.shape_cast %748 : vector<8xf32> to vector<8x1xf32>
      %cst_471 = arith.constant 3.200000e+01 : f32
      %750 = vector.broadcast %cst_471 : f32 to vector<8x1xf32>
      %751 = arith.divf %749, %750 : vector<8x1xf32>
      %752 = vector.broadcast %751 : vector<8x1xf32> to vector<8x32xf32>
      %753 = arith.subf %747, %752 : vector<8x32xf32>
      %754 = arith.mulf %753, %753 : vector<8x32xf32>
      %cst_472 = arith.constant dense<0.000000e+00> : vector<8xf32>
      %755 = vector.multi_reduction <add>, %754, %cst_472 [1] : vector<8x32xf32> to vector<8xf32>
      %756 = vector.shape_cast %755 : vector<8xf32> to vector<8x1xf32>
      %cst_473 = arith.constant 3.200000e+01 : f32
      %757 = vector.broadcast %cst_473 : f32 to vector<8x1xf32>
      %758 = arith.divf %756, %757 : vector<8x1xf32>
      %759 = vector.broadcast %751 : vector<8x1xf32> to vector<8x32xf32>
      %760 = arith.subf %747, %759 : vector<8x32xf32>
      %cst_474 = arith.constant 9.99999974E-6 : f32
      %761 = vector.broadcast %cst_474 : f32 to vector<8x1xf32>
      %762 = arith.addf %758, %761 : vector<8x1xf32>
      %763 = math.rsqrt %762 : vector<8x1xf32>
      %764 = vector.broadcast %763 : vector<8x1xf32> to vector<8x32xf32>
      %765 = arith.mulf %760, %764 : vector<8x32xf32>
      %766 = vector.broadcast %742 : vector<1x32xf32> to vector<8x32xf32>
      %767 = arith.mulf %765, %766 : vector<8x32xf32>
      %768 = vector.broadcast %743 : vector<1x32xf32> to vector<8x32xf32>
      %769 = arith.addf %767, %768 : vector<8x32xf32>
      %770 = vector.broadcast %744 : vector<1x32xf32> to vector<8x32xf32>
      %771 = arith.mulf %769, %770 : vector<8x32xf32>
      %cst_475 = arith.constant dense<0.000000e+00> : vector<8xf32>
      %772 = vector.multi_reduction <add>, %771, %cst_475 [1] : vector<8x32xf32> to vector<8xf32>
      %773 = vector.shape_cast %772 : vector<8xf32> to vector<8x1xf32>
      %774 = vector.broadcast %745 : vector<1x1xf32> to vector<8x1xf32>
      %775 = arith.addf %773, %774 : vector<8x1xf32>
      %c0_476 = arith.constant 0 : index
      %c0_477 = arith.constant 0 : index
      %c0_478 = arith.constant 0 : index
      %776 = vector.load %arg33[%c0_476, %c0_477, %c0_478] : memref<2x8x1xf32, #tpu.memory_space<vmem>>, vector<1x8x1xf32>
      %777 = vector.shape_cast %776 : vector<1x8x1xf32> to vector<8x1xf32>
      %778 = vector.shape_cast %775 : vector<8x1xf32> to vector<1x8x1xf32>
      tpu.vector_store %arg33[%c0_476, %c0_477, %c0_478], %778 {strides = array<i32>} : memref<2x8x1xf32, #tpu.memory_space<vmem>>, vector<1x8x1xf32>,
      %c1_479 = arith.constant 1 : index
      %c0_480 = arith.constant 0 : index
      %c0_481 = arith.constant 0 : index
      %779 = vector.load %arg34[%c1_479, %c0_480, %c0_481] : memref<2x8x32xf32, #tpu.memory_space<vmem>>, vector<1x8x32xf32>
      %780 = vector.shape_cast %779 : vector<1x8x32xf32> to vector<8x32xf32>
      %cst_482 = arith.constant dense<0.000000e+00> : vector<8xf32>
      %781 = vector.multi_reduction <add>, %780, %cst_482 [1] : vector<8x32xf32> to vector<8xf32>
      %782 = vector.shape_cast %781 : vector<8xf32> to vector<8x1xf32>
      %cst_483 = arith.constant 3.200000e+01 : f32
      %783 = vector.broadcast %cst_483 : f32 to vector<8x1xf32>
      %784 = arith.divf %782, %783 : vector<8x1xf32>
      %785 = vector.broadcast %784 : vector<8x1xf32> to vector<8x32xf32>
      %786 = arith.subf %780, %785 : vector<8x32xf32>
      %787 = arith.mulf %786, %786 : vector<8x32xf32>
      %cst_484 = arith.constant dense<0.000000e+00> : vector<8xf32>
      %788 = vector.multi_reduction <add>, %787, %cst_484 [1] : vector<8x32xf32> to vector<8xf32>
      %789 = vector.shape_cast %788 : vector<8xf32> to vector<8x1xf32>
      %cst_485 = arith.constant 3.200000e+01 : f32
      %790 = vector.broadcast %cst_485 : f32 to vector<8x1xf32>
      %791 = arith.divf %789, %790 : vector<8x1xf32>
      %792 = vector.broadcast %784 : vector<8x1xf32> to vector<8x32xf32>
      %793 = arith.subf %780, %792 : vector<8x32xf32>
      %cst_486 = arith.constant 9.99999974E-6 : f32
      %794 = vector.broadcast %cst_486 : f32 to vector<8x1xf32>
      %795 = arith.addf %791, %794 : vector<8x1xf32>
      %796 = math.rsqrt %795 : vector<8x1xf32>
      %797 = vector.broadcast %796 : vector<8x1xf32> to vector<8x32xf32>
      %798 = arith.mulf %793, %797 : vector<8x32xf32>
      %799 = vector.broadcast %742 : vector<1x32xf32> to vector<8x32xf32>
      %800 = arith.mulf %798, %799 : vector<8x32xf32>
      %801 = vector.broadcast %743 : vector<1x32xf32> to vector<8x32xf32>
      %802 = arith.addf %800, %801 : vector<8x32xf32>
      %803 = vector.broadcast %744 : vector<1x32xf32> to vector<8x32xf32>
      %804 = arith.mulf %802, %803 : vector<8x32xf32>
      %cst_487 = arith.constant dense<0.000000e+00> : vector<8xf32>
      %805 = vector.multi_reduction <add>, %804, %cst_487 [1] : vector<8x32xf32> to vector<8xf32>
      %806 = vector.shape_cast %805 : vector<8xf32> to vector<8x1xf32>
      %807 = vector.broadcast %745 : vector<1x1xf32> to vector<8x1xf32>
      %808 = arith.addf %806, %807 : vector<8x1xf32>
      %c1_488 = arith.constant 1 : index
      %c0_489 = arith.constant 0 : index
      %c0_490 = arith.constant 0 : index
      %809 = vector.load %arg33[%c1_488, %c0_489, %c0_490] : memref<2x8x1xf32, #tpu.memory_space<vmem>>, vector<1x8x1xf32>
      %810 = vector.shape_cast %809 : vector<1x8x1xf32> to vector<8x1xf32>
      %811 = vector.shape_cast %808 : vector<8x1xf32> to vector<1x8x1xf32>
      tpu.vector_store %arg33[%c1_488, %c0_489, %c0_490], %811 {strides = array<i32>} : memref<2x8x1xf32, #tpu.memory_space<vmem>>, vector<1x8x1xf32>,
    } else {
    }
    return
  }
  func.func @transform_0(%arg0: i32) -> (i32, i32, i32) {
    %c0_i32 = arith.constant 0 : i32
    %c0_i32_0 = arith.constant 0 : i32
    %c0_i32_1 = arith.constant 0 : i32
    %c0_i32_2 = arith.constant 0 : i32
    return %c0_i32, %c0_i32_0, %c0_i32_1 : i32, i32, i32
  }
  func.func @transform_1(%arg0: i32) -> (i32, i32, i32) {
    %c0_i32 = arith.constant 0 : i32
    %c0_i32_0 = arith.constant 0 : i32
    %c0_i32_1 = arith.constant 0 : i32
    %c0_i32_2 = arith.constant 0 : i32
    return %c0_i32, %c0_i32_0, %c0_i32_1 : i32, i32, i32
  }
  func.func @transform_2(%arg0: i32) -> (i32, i32, i32, i32) {
    %c0_i32 = arith.constant 0 : i32
    %c0_i32_0 = arith.constant 0 : i32
    %c0_i32_1 = arith.constant 0 : i32
    %c0_i32_2 = arith.constant 0 : i32
    return %arg0, %c0_i32, %c0_i32_0, %c0_i32_1 : i32, i32, i32, i32
  }
  func.func @transform_3(%arg0: i32) -> (i32, i32, i32, i32) {
    %c0_i32 = arith.constant 0 : i32
    %c0_i32_0 = arith.constant 0 : i32
    %c0_i32_1 = arith.constant 0 : i32
    %c0_i32_2 = arith.constant 0 : i32
    return %arg0, %c0_i32, %c0_i32_0, %c0_i32_1 : i32, i32, i32, i32
  }
  func.func @transform_4(%arg0: i32) -> (i32, i32, i32, i32) {
    %c0_i32 = arith.constant 0 : i32
    %c0_i32_0 = arith.constant 0 : i32
    %c0_i32_1 = arith.constant 0 : i32
    %c0_i32_2 = arith.constant 0 : i32
    return %arg0, %c0_i32, %c0_i32_0, %c0_i32_1 : i32, i32, i32, i32
  }
  func.func @transform_5(%arg0: i32) -> (i32, i32, i32, i32) {
    %c0_i32 = arith.constant 0 : i32
    %c0_i32_0 = arith.constant 0 : i32
    %c0_i32_1 = arith.constant 0 : i32
    %c0_i32_2 = arith.constant 0 : i32
    return %arg0, %c0_i32, %c0_i32_0, %c0_i32_1 : i32, i32, i32, i32
  }
  func.func @transform_6(%arg0: i32) -> (i32, i32, i32, i32) {
    %c0_i32 = arith.constant 0 : i32
    %c0_i32_0 = arith.constant 0 : i32
    %c0_i32_1 = arith.constant 0 : i32
    %c0_i32_2 = arith.constant 0 : i32
    return %arg0, %c0_i32, %c0_i32_0, %c0_i32_1 : i32, i32, i32, i32
  }
  func.func @transform_7(%arg0: i32) -> (i32, i32, i32, i32) {
    %c0_i32 = arith.constant 0 : i32
    %c0_i32_0 = arith.constant 0 : i32
    %c0_i32_1 = arith.constant 0 : i32
    %c0_i32_2 = arith.constant 0 : i32
    return %arg0, %c0_i32, %c0_i32_0, %c0_i32_1 : i32, i32, i32, i32
  }
  func.func @transform_8(%arg0: i32) -> (i32, i32, i32, i32) {
    %c0_i32 = arith.constant 0 : i32
    %c0_i32_0 = arith.constant 0 : i32
    %c0_i32_1 = arith.constant 0 : i32
    %c0_i32_2 = arith.constant 0 : i32
    return %arg0, %c0_i32, %c0_i32_0, %c0_i32_1 : i32, i32, i32, i32
  }
  func.func @transform_9(%arg0: i32) -> (i32, i32, i32) {
    %c0_i32 = arith.constant 0 : i32
    %c0_i32_0 = arith.constant 0 : i32
    %c0_i32_1 = arith.constant 0 : i32
    return %arg0, %c0_i32, %c0_i32_0 : i32, i32, i32
  }
  func.func @transform_10(%arg0: i32) -> (i32, i32, i32) {
    %c0_i32 = arith.constant 0 : i32
    %c0_i32_0 = arith.constant 0 : i32
    %c0_i32_1 = arith.constant 0 : i32
    return %arg0, %c0_i32, %c0_i32_0 : i32, i32, i32
  }
  func.func @transform_11(%arg0: i32) -> (i32, i32, i32) {
    %c0_i32 = arith.constant 0 : i32
    %c0_i32_0 = arith.constant 0 : i32
    %c0_i32_1 = arith.constant 0 : i32
    return %arg0, %c0_i32, %c0_i32_0 : i32, i32, i32
  }
  func.func @transform_12(%arg0: i32) -> (i32, i32, i32, i32) {
    %c0_i32 = arith.constant 0 : i32
    %c0_i32_0 = arith.constant 0 : i32
    %c0_i32_1 = arith.constant 0 : i32
    %c0_i32_2 = arith.constant 0 : i32
    return %arg0, %c0_i32, %c0_i32_0, %c0_i32_1 : i32, i32, i32, i32
  }
  func.func @transform_13(%arg0: i32) -> (i32, i32, i32, i32) {
    %c0_i32 = arith.constant 0 : i32
    %c0_i32_0 = arith.constant 0 : i32
    %c0_i32_1 = arith.constant 0 : i32
    %c0_i32_2 = arith.constant 0 : i32
    return %arg0, %c0_i32, %c0_i32_0, %c0_i32_1 : i32, i32, i32, i32
  }
  func.func @transform_14(%arg0: i32) -> (i32, i32, i32, i32) {
    %c0_i32 = arith.constant 0 : i32
    %c0_i32_0 = arith.constant 0 : i32
    %c0_i32_1 = arith.constant 0 : i32
    %c0_i32_2 = arith.constant 0 : i32
    return %arg0, %c0_i32, %c0_i32_0, %c0_i32_1 : i32, i32, i32, i32
  }
  func.func @transform_15(%arg0: i32) -> (i32, i32, i32, i32) {
    %c0_i32 = arith.constant 0 : i32
    %c0_i32_0 = arith.constant 0 : i32
    %c0_i32_1 = arith.constant 0 : i32
    %c0_i32_2 = arith.constant 0 : i32
    return %arg0, %c0_i32, %c0_i32_0, %c0_i32_1 : i32, i32, i32, i32
  }
  func.func @transform_16(%arg0: i32) -> (i32, i32, i32, i32) {
    %c0_i32 = arith.constant 0 : i32
    %c0_i32_0 = arith.constant 0 : i32
    %c0_i32_1 = arith.constant 0 : i32
    %c0_i32_2 = arith.constant 0 : i32
    return %arg0, %c0_i32, %c0_i32_0, %c0_i32_1 : i32, i32, i32, i32
  }
  func.func @transform_17(%arg0: i32) -> (i32, i32, i32, i32) {
    %c0_i32 = arith.constant 0 : i32
    %c0_i32_0 = arith.constant 0 : i32
    %c0_i32_1 = arith.constant 0 : i32
    %c0_i32_2 = arith.constant 0 : i32
    return %arg0, %c0_i32, %c0_i32_0, %c0_i32_1 : i32, i32, i32, i32
  }
  func.func @transform_18(%arg0: i32) -> (i32, i32, i32, i32) {
    %c0_i32 = arith.constant 0 : i32
    %c0_i32_0 = arith.constant 0 : i32
    %c0_i32_1 = arith.constant 0 : i32
    %c0_i32_2 = arith.constant 0 : i32
    return %arg0, %c0_i32, %c0_i32_0, %c0_i32_1 : i32, i32, i32, i32
  }
  func.func @transform_19(%arg0: i32) -> (i32, i32, i32) {
    %c0_i32 = arith.constant 0 : i32
    %c0_i32_0 = arith.constant 0 : i32
    %c0_i32_1 = arith.constant 0 : i32
    return %arg0, %c0_i32, %c0_i32_0 : i32, i32, i32
  }
  func.func @transform_20(%arg0: i32) -> (i32, i32, i32) {
    %c0_i32 = arith.constant 0 : i32
    %c0_i32_0 = arith.constant 0 : i32
    %c0_i32_1 = arith.constant 0 : i32
    return %arg0, %c0_i32, %c0_i32_0 : i32, i32, i32
  }
  func.func @transform_21(%arg0: i32) -> (i32, i32, i32) {
    %c0_i32 = arith.constant 0 : i32
    %c0_i32_0 = arith.constant 0 : i32
    %c0_i32_1 = arith.constant 0 : i32
    return %arg0, %c0_i32, %c0_i32_0 : i32, i32, i32
  }
  func.func @transform_22(%arg0: i32) -> (i32, i32, i32) {
    %c0_i32 = arith.constant 0 : i32
    %c0_i32_0 = arith.constant 0 : i32
    %c0_i32_1 = arith.constant 0 : i32
    return %arg0, %c0_i32, %c0_i32_0 : i32, i32, i32
  }
  func.func @transform_23(%arg0: i32) -> (i32, i32, i32) {
    %c0_i32 = arith.constant 0 : i32
    %c0_i32_0 = arith.constant 0 : i32
    %c0_i32_1 = arith.constant 0 : i32
    return %arg0, %c0_i32, %c0_i32_0 : i32, i32, i32
  }
  func.func @transform_24(%arg0: i32) -> (i32, i32, i32) {
    %c0_i32 = arith.constant 0 : i32
    %c0_i32_0 = arith.constant 0 : i32
    %c0_i32_1 = arith.constant 0 : i32
    return %arg0, %c0_i32, %c0_i32_0 : i32, i32, i32
  }
  func.func @transform_25(%arg0: i32) -> (i32, i32, i32) {
    %c0_i32 = arith.constant 0 : i32
    %c0_i32_0 = arith.constant 0 : i32
    %c0_i32_1 = arith.constant 0 : i32
    return %arg0, %c0_i32, %c0_i32_0 : i32, i32, i32
  }
  func.func @transform_26(%arg0: i32) -> (i32, i32, i32) {
    %c0_i32 = arith.constant 0 : i32
    %c0_i32_0 = arith.constant 0 : i32
    %c0_i32_1 = arith.constant 0 : i32
    return %arg0, %c0_i32, %c0_i32_0 : i32, i32, i32
  }
  func.func @transform_27(%arg0: i32) -> (i32, i32, i32) {
    %c0_i32 = arith.constant 0 : i32
    %c0_i32_0 = arith.constant 0 : i32
    %c0_i32_1 = arith.constant 0 : i32
    return %arg0, %c0_i32, %c0_i32_0 : i32, i32, i32
  }
  func.func @transform_28(%arg0: i32) -> (i32, i32) {
    %c0_i32 = arith.constant 0 : i32
    %c0_i32_0 = arith.constant 0 : i32
    %c0_i32_1 = arith.constant 0 : i32
    return %c0_i32, %c0_i32_0 : i32, i32
  }
  func.func @transform_29(%arg0: i32) -> (i32, i32) {
    %c0_i32 = arith.constant 0 : i32
    %c0_i32_0 = arith.constant 0 : i32
    %c0_i32_1 = arith.constant 0 : i32
    return %c0_i32, %c0_i32_0 : i32, i32
  }
  func.func @transform_30(%arg0: i32) -> (i32, i32) {
    %c0_i32 = arith.constant 0 : i32
    %c0_i32_0 = arith.constant 0 : i32
    %c0_i32_1 = arith.constant 0 : i32
    return %c0_i32, %c0_i32_0 : i32, i32
  }
  func.func @transform_31(%arg0: i32) -> (i32, i32) {
    %c0_i32 = arith.constant 0 : i32
    %c0_i32_0 = arith.constant 0 : i32
    %c0_i32_1 = arith.constant 0 : i32
    return %c0_i32, %c0_i32_0 : i32, i32
  }
  func.func @transform_32(%arg0: i32) -> (i32, i32, i32) {
    %c0_i32 = arith.constant 0 : i32
    %c0_i32_0 = arith.constant 0 : i32
    %c0_i32_1 = arith.constant 0 : i32
    %c0_i32_2 = arith.constant 0 : i32
    return %c0_i32, %c0_i32_0, %c0_i32_1 : i32, i32, i32
  }
}

</mosaic_0001>

<bundles_post_ra>
// kernel: transformer_forward.2
= control target key start
LH: loop header
LB: loop body
LE: loop exit
PB: predicated region body
PF: predicated region fallthrough
CT: control target
= control target key end

     0   :  { %s8266_s0 = inlined_call_operand.vmem [shape: f32[2,10,32], index: 0, kind: input, shape index: {}]   ;;  %s8267_s1 = inlined_call_operand.vmem [shape: f32[2,4,32,8], index: 1, kind: input, shape index: {}]   ;;  %s8268_s2 = inlined_call_operand.vmem [shape: f32[2,4,32,8], index: 2, kind: input, shape index: {}]   ;;  %s8269_s3 = inlined_call_operand.vmem [shape: f32[2,4,32,8], index: 3, kind: input, shape index: {}]   ;;  %s8270_s4 = inlined_call_operand.vmem [shape: f32[2,4,1,8], index: 4, kind: input, shape index: {}]   ;;  %s8271_s5 = inlined_call_operand.vmem [shape: f32[2,4,1,8], index: 5, kind: input, shape index: {}]   ;;  %s8272_s6 = inlined_call_operand.vmem [shape: f32[2,4,1,8], index: 6, kind: input, shape index: {}]   ;;  %s8273_s7 = inlined_call_operand.vmem [shape: f32[2,4,8,32], index: 7, kind: input, shape index: {}]   ;;  %s8274_s8 = inlined_call_operand.vmem [shape: f32[2,1,32], index: 8, kind: input, shape index: {}]   ;;  %s8275_s9 = inlined_call_operand.vmem [shape: f32[2,1,32], index: 9, kind: input, shape index: {}]   ;;  %s8276_s10 = inlined_call_operand.vmem [shape: f32[2,1,32], index: 10, kind: input, shape index: {}]   ;;  %s8277_s11 = inlined_call_operand.vmem [shape: f32[2,32,64], index: 11, kind: input, shape index: {}]   ;;  %s8278_s12 = inlined_call_operand.vmem [shape: f32[2,1,64], index: 12, kind: input, shape index: {}]   ;;  %s8279_s13 = inlined_call_operand.vmem [shape: f32[2,64,32], index: 13, kind: input, shape index: {}]   ;;  %s8280_s14 = inlined_call_operand.vmem [shape: f32[2,1,32], index: 14, kind: input, shape index: {}]   ;;  %s8281_s15 = inlined_call_operand.vmem [shape: f32[2,1,32], index: 15, kind: input, shape index: {}]   ;;  %s8282_s16 = inlined_call_operand.vmem [shape: f32[2,1,32], index: 16, kind: input, shape index: {}]   ;;  %s8283_s17 = inlined_call_operand.vmem [shape: f32[1,32], index: 17, kind: input, shape index: {}]   ;;  %s8284_s18 = inlined_call_operand.vmem [shape: f32[1,32], index: 18, kind: input, shape index: {}]   ;;  %s8285_s19 = inlined_call_operand.vmem [shape: f32[2,10,32], index: 19, kind: output, shape index: {}]  }
   0x1   :  { %8292 = sst [smem:[#allocation7_spill]] %s8266_s0  ;;  %s7381_s0 = smov 0  }
   0x2   :  { %8293 = sst [smem:[#allocation8_spill]] %s8267_s1 }
   0x3   :  { %8294 = sst [smem:[#allocation9_spill]] %s8268_s2 }
   0x4   :  { %8295 = sst [smem:[#allocation10_spill]] %s8269_s3 }
   0x5   :  { %8296 = sst [smem:[#allocation11_spill]] %s8270_s4 }
   0x6   :  { %8297 = sst [smem:[#allocation12_spill]] %s8271_s5 }
   0x7   :  { %8298 = sst [smem:[#allocation13_spill]] %s8272_s6 }
   0x8   :  { %8299 = sst [smem:[#allocation14_spill]] %s8273_s7 }
   0x9   :  { %8300 = sst [smem:[#allocation15_spill]] %s8274_s8 }
   0xa   :  { %8301 = sst [smem:[#allocation16_spill]] %s8283_s17 }
   0xb   :  { %8302 = sst [smem:[#allocation17_spill]] %s8284_s18 }
   0xc   :  { %8303 = sst [smem:[#allocation18_spill]] %s8285_s19 }
   0xd LB: > { %8304 = sst [smem:[#allocation3_spill]] %s7277_s0  ;;  %s7387_s30 = sadd.s32 4294967295, %s7277_s0   ;;  %s7277_s0 = sphi %s7381_s0, %s29_s0  }
   0xe   : > { %p5860_p0 = scmp.ge.s32.totalorder %s7277_s0, 1  ;;  %p665_p1 = scmp.lt.s32.totalorder %s7277_s0, 3 }
  0x10   : > { %p666_p2 = pnand %p5860_p0, %p665_p1 }
  0x12   : > { %669 = sbr.rel (%p666_p2) target bundleno = 9612 (0x258c), region = 96 }
  0x19   : > { %p774_p3 = scmp.lt.s32.totalorder %s7387_s30, 1  ;;  %v837_v0 = vlaneseq  ;;  %s8305_s23 = sld [smem:[#allocation8_spill]]  ;;  %v7279_v4 = vmov 0.0  }
  0x1a   : > { %s8306_s26 = sld [smem:[#allocation9_spill]]  ;;  %s8307_s0 = sld [smem:[#allocation10_spill]] }
  0x1b   : > { %s7393_s20 = scalar_select %p774_p3, %s7387_s30, 1  ;;  %v838_v1 = vshrl.u32 %v837_v0, 7  ;;  %v841_v2 = vand.u32 127, %v837_v0 }
  0x1c   : > { %s8309_s4 = sld [smem:[#allocation11_spill]]  ;;  %s8310_s5 = sld [smem:[#allocation12_spill]] }
  0x1d   : > { %s6079_s21 = sshll.u32 %s7393_s20, 7  ;;  %s5867_s1 = sshll.u32 %s7393_s20, 2  ;;  %v839_v3 = vadd.s32 8, %v838_v1  ;;  %vm842_vm0 = vcmp.gt.s32.totalorder %v841_v2, %v838_v1 }
  0x1e   : > { %v7407_v5 = vsel %vm842_vm0, -1e+30, %v7279_v4  ;;  %s8312_s6 = sld [smem:[#allocation13_spill]]  ;;  %s8315_s7 = sld [smem:[#allocation14_spill]] }
  0x1f   : > { %s7400_s24 = scalar_lea.vmem %s8305_s23, %s6079_s21  ;;  %vm843_vm1 = vcmp.gt.s32.totalorder %v841_v2, %v839_v3  ;;  %s822_s29 = scalar_lea.vmem %s8278_s12, %s7393_s20 }
  0x20   : > { %s7405_s27 = scalar_lea.vmem %s8306_s26, %s6079_s21  ;;  %s7412_s19 = scalar_lea.vmem %s8307_s0, %s6079_s21  ;;  %v7429_v6 = vsel %vm843_vm1, -1e+30, %v7279_v4 }
  0x21   : > { %8308 = sst [smem:[#allocation4_spill]] %s7412_s19  ;;  %s6082_s0 = sshll.u32 %s7393_s20, 5 }
  0x22   : > { %s7417_s2 = scalar_lea.vmem %s8309_s4, %s5867_s1  ;;  %s7422_s3 = scalar_lea.vmem %s8310_s5, %s5867_s1 }
  0x23   : > { %8311 = sst [smem:[#allocation5_spill]] %s7422_s3  ;;  %s6084_s4 = sshll.u32 %s7393_s20, 6 }
  0x24   : > { %s7427_s28 = scalar_lea.vmem %s8312_s6, %s5867_s1  ;;  %s7439_s19 = scalar_lea.vmem %s8315_s7, %s6082_s0 }
  0x25   : > { %8313 = sst [smem:[#allocation6_spill]] %s7427_s28  ;;  %s7452_s28 = scalar_lea.vmem %s8277_s11, %s6082_s0 }
  0x26   : > { %s7462_s8 = scalar_lea.vmem %s8279_s13, %s6084_s4  ;;  %s830_s3 = scalar_lea.vmem %s8280_s14, %s7393_s20 }
  0x27   : > { %s833_s6 = scalar_lea.vmem %s8281_s15, %s7393_s20  ;;  %s836_s5 = scalar_lea.vmem %s8282_s16, %s7393_s20 }
  0x28   : > { %p5876_p4 = scmp.ne.s32.totalorder %s7387_s30, 0 }
  0x29   : > { %s8316_s7 = sld [smem:[#allocation7_spill]] (!%p5876_p4)  ;;  %vm854_vm2 = vcmask (!%p5876_p4), 261120   ;;  %vm856_vm3 = vcmask (!%p5876_p4), 254976  }
  0x2a   : > { %849 = sbr.rel (%p5876_p4) target bundleno = 50 (0x32), region = 100 }
  0x2f   : > { %v850_v7 = vld [vmem:[%s8316_s7] sm:$0xff] (!%p5876_p4)  ;;  %v851_v8 = vld [vmem:[%s8316_s7 + $0x8] sm:$0x3] (!%p5876_p4)  ;;  %v852_v9 = vld [vmem:[%s8316_s7 + $0x10] sm:$0xff] (!%p5876_p4) }
  0x30   : > { %855 = vst.msk [vmem:[#allocation2] sm:$0xff] (!%p5876_p4), %vm854_vm2, %v850_v7  ;;  %858 = vst.msk [vmem:[#allocation2 + $0x10] sm:$0xff] (!%p5876_p4), %vm854_vm2, %v852_v9  ;;  %v853_v10 = vld [vmem:[%s8316_s7 + $0x18] sm:$0x3] (!%p5876_p4) }
  0x31   : > { %857 = vst.msk [vmem:[#allocation2 + $0x8] sm:$0x3] %vm856_vm3, %v851_v8  ;;  %859 = vst.msk [vmem:[#allocation2 + $0x18] sm:$0x3] %vm856_vm3, %v853_v10 }
  0x32 PF: > { %v860_v11 = vld [vmem:[%s7400_s24] sm:$0xff]  ;;  %v861_v12 = vld [vmem:[%s7400_s24 + $0x8] sm:$0xff]  ;;  %v862_v13 = vld [vmem:[%s7400_s24 + $0x10] sm:$0xff]  ;;  %vm972_vm4 = vcmask 261120   ;;  %s8317_s0 = sld [smem:[#allocation5_spill]]  ;;  %vm1218_vm5 = vcmask 64512   ;;  %s8326_s4 = scalar_lea.vmem %s8275_s9, %s7393_s20 }
  0x33   : > { %v7492_v14 = vpack.c.bf16 %v861_v12, %v860_v11  ;;  %v863_v15 = vld [vmem:[%s7400_s24 + $0x18] sm:$0xff]  ;;  %v879_v18 = vld [vmem:[%s7405_s27] sm:$0xff]  ;;  %v880_v19 = vld [vmem:[%s7405_s27 + $0x8] sm:$0xff]  ;;  %s8318_s26 = sld [smem:[#allocation4_spill]]  ;;  %vm1306_vm7 = vcmask 80896   ;;  %vm1310_vm8 = vcmask 74752   ;;  %s8327_s1 = scalar_lea.vmem %s8276_s10, %s7393_s20 }
  0x34   : > { %v7497_v17 = vpack.c.bf16 %v863_v15, %v862_v13  ;;  %v7508_v20 = vpack.c.bf16 %v880_v19, %v879_v18  ;;  %v881_v21 = vld [vmem:[%s7405_s27 + $0x10] sm:$0xff]  ;;  %v882_v22 = vld [vmem:[%s7405_s27 + $0x18] sm:$0xff]  ;;  %v7528_v25 = vld [vmem:[%s7417_s2] ss:$0 sm:$0xff]  ;;  %s8321_s21 = sld [smem:[#allocation6_spill]]  ;;  %vm1336_vm9 = vcmask 1041408  }
  0x35   : > { %6826 = vmatprep.subr.bf16.mxu1 %v7492_v14  ;;  %v7516_v24 = vpack.c.bf16 %v882_v22, %v881_v21  ;;  %vm7539_vm6 = vmpackc.low %vm1218_vm5, %vm1218_vm5  ;;  %vm7280_vm10 = vmmov 1   ;;  %v5889_v4 = vld [vmem:[%s7405_s27 + $0x20] sm:$0xff]  ;;  %v5890_v7 = vld [vmem:[%s7405_s27 + $0x28] sm:$0xff]  ;;  %vm3070_vm12 = vcmask 254976   ;;  %vm3206_vm13 = vcmask 523264   ;;  %p6072_p5 = scmp.ne.s32.totalorder %s7387_s30, 1 }
  0x36   : > { %6828 = vmatpush3.bf16.msra.mxu1 %v7492_v14  ;;  %vm7576_vm11 = vmpackc.low %vm1336_vm9, %vm7280_vm10  ;;  %v7586_v8 = vpack.c.bf16 %v5890_v7, %v5889_v4  ;;  %v5877_v9 = vld [vmem:[%s7400_s24 + $0x20] sm:$0xff]  ;;  %v5878_v10 = vld [vmem:[%s7400_s24 + $0x28] sm:$0xff] }
  0x37   : > { %6830 = vmatprep.subr.bf16.mxu1 %v7497_v17  ;;  %v7591_v11 = vpack.c.bf16 %v5878_v10, %v5877_v9  ;;  %v5879_v12 = vld [vmem:[%s7400_s24 + $0x30] sm:$0xff]  ;;  %v5880_v13 = vld [vmem:[%s7400_s24 + $0x38] sm:$0xff] }
  0x38   : > { %v7495_v16 = vld [vmem:[#allocation2] sm:$0xff]  ;;  %v7513_v23 = vld [vmem:[#allocation2 + $0x8] sm:$0x3]  ;;  %v7597_v15 = vpack.c.bf16 %v5880_v13, %v5879_v12 }
  0x39   : > { %6357 = vmatprep.mubr.msk.f32.mxu1 %vm972_vm4, %v7495_v16  ;;  %6379 = vmatprep.mubr.msk.f32.mxu0 %vm972_vm4, %v7495_v16  ;;  %v7533_v30 = vld [vmem:[%s8317_s0] ss:$0 sm:$0xff]  ;;  %v899_v40 = vld [vmem:[%s8318_s26 + $0x8] sm:$0xff]  ;;  %v900_v41 = vld [vmem:[%s8318_s26 + $0x10] sm:$0xff] }
  0x3a   : > { %6832 = vmatpush3.bf16.msra.mxu1 %v7497_v17  ;;  %v898_v39 = vld [vmem:[%s8318_s26] sm:$0xff]  ;;  %v901_v43 = vld [vmem:[%s8318_s26 + $0x18] sm:$0xff] }
  0x3b   : > { %6834 = vmatprep.subr.bf16.mxu1 %v7508_v20  ;;  %v7554_v42 = vpack.c.bf16 %v899_v40, %v898_v39  ;;  %v7557_v44 = vpack.c.bf16 %v901_v43, %v900_v41  ;;  %v7572_v62 = vld [vmem:[%s8321_s21] ss:$0 sm:$0xff]  ;;  %v7628_v40 = vld [vmem:[%s8317_s0 + $0x1] ss:$0 sm:$0xff] }
  0x3d   : > { %6358 = vmatmul.mubr.msk.f32.vlgmr.msra.gmra.mrb[0].mxu1 %vm972_vm4, %v7513_v23  ;;  %6842 = vmatprep.subr.bf16.mxu0 %v7554_v42 }
  0x3e   : > { %6836 = vmatpush3.bf16.msra.mxu1 %v7508_v20  ;;  %6368 = vmatprep.mubr.msk.f32.mxu1 %vm972_vm4, %v7495_v16 }
  0x3f   : > { %6838 = vmatprep.subr.bf16.mxu1 %v7516_v24  ;;  %6844 = vmatpush3.bf16.msra.mxu0 %v7554_v42 }
  0x40   : > { %6846 = vmatprep.subr.bf16.mxu0 %v7557_v44 }
  0x42   : > { %6840 = vmatpush3.bf16.msra.mxu1 %v7516_v24 }
  0x43   : > { %6848 = vmatpush3.bf16.msra.mxu0 %v7557_v44 }
  0x45   : > { %6369 = vmatmul.mubr.msk.f32.vlgmr.msra.gmra.mrb[2].mxu1 %vm972_vm4, %v7513_v23 }
  0x46   : > { %6380 = vmatmul.mubr.msk.f32.vlgmr.msra.gmra.mrb[0].mxu0 %vm972_vm4, %v7513_v23 }
 0x110   : > { %v6359_v26 = vpop.f32.mrb[0].mxu1 }
 0x111   : > { %v1045_v27 = vpop.f32.mrb[1].mxu1  ;;  %v1051_v37 = vadd.f32 %v6359_v26, %v7528_v25  ;;  %v5891_v26 = vld [vmem:[%s7405_s27 + $0x30] sm:$0xff] }
 0x112   : > { %v1046_v28 = vadd.f32 %v7528_v25, %v1045_v27  ;;  %v5892_v27 = vld [vmem:[%s7405_s27 + $0x38] sm:$0xff] }
 0x113   : > { %v1217_v38 = vmul.f32 0.35355338, %v1051_v37 }
 0x114   : > { %v1216_v29 = vmul.f32 0.35355338, %v1046_v28 }
 0x116   : > { %6386 = vmatprep.mubr.msk.f32.mxu1 %vm1218_vm5, %v1216_v29 }
 0x118   : > { %v6370_v31 = vpop.f32.mrb[2].mxu1 }
 0x119   : > { %v1132_v32 = vadd.f32 %v6370_v31, %v7533_v30  ;;  %v1126_v33 = vpop.f32.mrb[3].mxu1  ;;  %v6381_v61 = vpop.f32.mrb[0].mxu0  ;;  %v7608_v31 = vpack.c.bf16 %v5892_v27, %v5891_v26 }
 0x11a   : > { %v1127_v34 = vadd.f32 %v7533_v30, %v1126_v33  ;;  %v1207_v63 = vpop.f32.mrb[1].mxu0  ;;  %v1213_v0 = vadd.f32 %v6381_v61, %v7572_v62 }
 0x11b   : > { %v1208_v1 = vadd.f32 %v7572_v62, %v1207_v63 }
 0x11c   : > { %v6849_v36 = vpack.c.bf16 %v1132_v32, %v1127_v34  ;;  %v7619_v32 = vld [vmem:[%s7417_s2 + $0x1] ss:$0 sm:$0xff] }
 0x11d   : > { %v6855_v2 = vpack.c.bf16 %v1213_v0, %v1208_v1 }
 0x11e   : > { %6851 = vmatprep.subr.msk.bf16.mxu1 %vm7539_vm6, %v6849_v36 }
 0x11f   : > { %6854 = vmatpush3.bf16.xpose.msk.msra.mxu1 %vm7539_vm6, %v6849_v36  ;;  %6857 = vmatprep.subr.msk.bf16.mxu0 %vm7576_vm11, %v6855_v2 }
 0x120   : > { %6860 = vmatpush3.bf16.msk.msra.mxu0 %vm7576_vm11, %v6855_v2  ;;  %6862 = vmatprep.subr.bf16.mxu1 %v7591_v11 }
 0x121   : > { %6870 = vmatprep.subr.bf16.mxu0 %v7586_v8 }
 0x126   : > { %6387 = vmatmul.mubr.msk.f32.vlgmr.msra.gmra.mrb[4].mxu1 %vm1218_vm5, %v1217_v38 }
 0x127   : > { %6404 = vmatprep.mubr.msk.f32.mxu1 %vm972_vm4, %v7495_v16  ;;  %6864 = vmatpush3.bf16.msra.mxu1 %v7591_v11 }
 0x128   : > { %6866 = vmatprep.subr.bf16.mxu1 %v7597_v15 }
 0x12b   : > { %6868 = vmatpush3.bf16.msra.mxu1 %v7597_v15 }
 0x12e   : > { %6405 = vmatmul.mubr.msk.f32.vlgmr.msra.gmra.mrb[6].mxu1 %vm972_vm4, %v7513_v23 }
 0x12f   : > { %6426 = vmatprep.mubr.msk.f32.mxu1 %vm972_vm4, %v7495_v16 }
 0x1f9   : > { %v6388_v45 = vpop.f32.mrb[4].mxu1 }
 0x1fa   : > { %v1297_v46 = vpop.f32.mrb[5].mxu1  ;;  %v1303_v48 = vadd.f32 %v6388_v45, %v7429_v6 }
 0x1fb   : > { %v1298_v47 = vadd.f32 %v1297_v46, %v7407_v5 }
 0x1fc   : > { %v1311_v50 = vsel %vm1310_vm8, %v1303_v48, -inf }
 0x1fd   : > { %v1307_v49 = vsel %vm1306_vm7, %v1298_v47, -inf }
 0x1fe   : > { %1308 = vmax.xlane.f32.xlu0 %v1307_v49 }
 0x201   : > { %v6406_v33 = vpop.f32.mrb[6].mxu1 }
 0x202   : > { %1312 = vmax.xlane.f32.xlu0 %v1311_v50  ;;  %v1487_v34 = vpop.f32.mrb[7].mxu1  ;;  %v5901_v50 = vld [vmem:[%s8318_s26 + $0x20] sm:$0xff] }
 0x203   : > { %v1488_v36 = vadd.f32 %v7619_v32, %v1487_v34 }
 0x205   : > { %v1658_v37 = vmul.f32 0.35355338, %v1488_v36 }
 0x28b   : > { %v1309_v51 = vpop.xlane.xlu0 %1308 }
 0x28c   : > { %v1314_v52 = vsub.f32 %v1298_v47, %v1309_v51  ;;  %v5902_v51 = vld [vmem:[%s8318_s26 + $0x28] sm:$0xff] }
 0x28e   : > { %v1316_v53 = vmul.f32 1.442695, %v1314_v52  ;;  %v5903_v52 = vld [vmem:[%s8318_s26 + $0x30] sm:$0xff] }
 0x28f   : > { %v1313_v54 = vpop.xlane.xlu0 %1312 }
 0x290   : > { %7183 = vpow2.f32 %v1316_v53  ;;  %v1315_v55 = vsub.f32 %v1303_v48, %v1313_v54  ;;  %v1493_v48 = vadd.f32 %v6406_v33, %v7619_v32  ;;  %v7641_v53 = vpack.c.bf16 %v5902_v51, %v5901_v50  ;;  %v5904_v54 = vld [vmem:[%s8318_s26 + $0x38] sm:$0xff]  ;;  %v5893_v51 = vld [vmem:[%s7405_s27 + $0x40] sm:$0xff] }
 0x292   : > { %v1318_v56 = vmul.f32 1.442695, %v1315_v55  ;;  %v1659_v49 = vmul.f32 0.35355338, %v1493_v48  ;;  %v7644_v55 = vpack.c.bf16 %v5904_v54, %v5903_v52  ;;  %6878 = vmatprep.subr.bf16.mxu1 %v7641_v53  ;;  %v5883_v48 = vld [vmem:[%s7400_s24 + $0x50] sm:$0xff]  ;;  %v5894_v52 = vld [vmem:[%s7405_s27 + $0x48] sm:$0xff] }
 0x293   : > { %6880 = vmatpush3.bf16.msra.mxu1 %v7641_v53 }
 0x294   : > { %7185 = vpow2.f32 %v1318_v56  ;;  %6882 = vmatprep.subr.bf16.mxu1 %v7644_v55 }
 0x297   : > { %6884 = vmatpush3.bf16.msra.mxu1 %v7644_v55 }
 0x29a   : > { %v7184_v57 = vpop.eup %7183  ;;  %6427 = vmatmul.mubr.msk.f32.vlgmr.msra.gmra.mrb[8].mxu1 %vm972_vm4, %v7513_v23 }
 0x29b   : > { %v1320_v58 = vsel %vm1306_vm7, %v7184_v57, 0.0 }
 0x29c   : > { %1321 = vadd.xlane.f32.xlu1 %v1320_v58 }
 0x29e   : > { %v7186_v59 = vpop.eup %7185 }
 0x29f   : > { %v1323_v60 = vsel %vm1310_vm8, %v7186_v59, 0.0 }
 0x2a0   : > { %1324 = vadd.xlane.f32.xlu1 %v1323_v60 }
 0x329   : > { %v1322_v18 = vpop.xlane.xlu1 %1321 }
 0x32a   : > { %7187 = vrcp.f32 %v1322_v18 }
 0x32d   : > { %v1325_v19 = vpop.xlane.xlu1 %1324 }
 0x32e   : > { %7189 = vrcp.f32 %v1325_v19  ;;  %v7659_v19 = vld [vmem:[%s8321_s21 + $0x1] ss:$0 sm:$0xff] }
 0x334   : > { %v7188_v21 = vpop.eup %7187 }
 0x335   : > { %v1328_v22 = vmul.f32 %v7188_v21, %v7184_v57 }
 0x337   : > { %6393 = vmatprep.mubr.msk.f32.mxu0 %vm1306_vm7, %v1328_v22 }
 0x338   : > { %v7190_v28 = vpop.eup %7189 }
 0x339   : > { %v1329_v29 = vmul.f32 %v7190_v28, %v7186_v59  ;;  %v7668_v28 = vld [vmem:[%s7439_s19 + $0x8] sm:$0xff] }
 0x33b   : > { %6394 = vmatmul.mubr.msk.f32.vlgmr.msra.gmra.mrb[2].mxu0 %vm1306_vm7, %v1329_v29 }
 0x33c   : > { %6872 = vmatpush3.bf16.msra.mxu0 %v7586_v8  ;;  %6415 = vmatprep.mubr.msk.f32.mxu0 %vm972_vm4, %v7495_v16 }
 0x33d   : > { %6874 = vmatprep.subr.bf16.mxu0 %v7608_v31 }
 0x340   : > { %6876 = vmatpush3.bf16.msra.mxu0 %v7608_v31 }
 0x343   : > { %6416 = vmatmul.mubr.msk.f32.vlgmr.msra.gmra.mrb[4].mxu0 %vm972_vm4, %v7513_v23 }
 0x344   : > { %6433 = vmatprep.mubr.msk.f32.mxu0 %vm1218_vm5, %v1658_v37 }
 0x36d   : > { %v6428_v18 = vpop.f32.mrb[8].mxu1 }
 0x36e   : > { %v1649_v21 = vpop.f32.mrb[9].mxu1  ;;  %v1655_v22 = vadd.f32 %v6428_v18, %v7659_v19  ;;  %v5905_v18 = vld [vmem:[%s8318_s26 + $0x40] sm:$0xff] }
 0x36f   : > { %v1650_v26 = vadd.f32 %v7659_v19, %v1649_v21  ;;  %v5906_v21 = vld [vmem:[%s8318_s26 + $0x48] sm:$0xff] }
 0x371   : > { %v6891_v27 = vpack.c.bf16 %v1655_v22, %v1650_v26  ;;  %v5907_v22 = vld [vmem:[%s8318_s26 + $0x50] sm:$0xff]  ;;  %v7738_v26 = vpack.c.bf16 %v5906_v21, %v5905_v18 }
 0x373   : > { %6893 = vmatprep.subr.msk.bf16.mxu1 %vm7576_vm11, %v6891_v27 }
 0x374   : > { %6896 = vmatpush3.bf16.msk.msra.mxu1 %vm7576_vm11, %v6891_v27  ;;  %v5908_v27 = vld [vmem:[%s8318_s26 + $0x58] sm:$0xff] }
 0x40e   : > { %v7623_v38 = vpop.f32.mrb[2].mxu0 }
 0x40f   : > { %v7625_v39 = vpop.f32.mrb[3].mxu0 }
 0x416   : > { %v6417_v41 = vpop.f32.mrb[4].mxu0 }
 0x417   : > { %v1574_v43 = vadd.f32 %v6417_v41, %v7628_v40  ;;  %v1568_v45 = vpop.f32.mrb[5].mxu0 }
 0x418   : > { %v1569_v46 = vadd.f32 %v7628_v40, %v1568_v45  ;;  %v5881_v45 = vld [vmem:[%s7400_s24 + $0x40] sm:$0xff] }
 0x41a   : > { %v6885_v47 = vpack.c.bf16 %v1574_v43, %v1569_v46  ;;  %v7677_v43 = vld [vmem:[%s7439_s19] sm:$0xff]  ;;  %v5882_v46 = vld [vmem:[%s7400_s24 + $0x48] sm:$0xff] }
 0x41c   : > { %6887 = vmatprep.subr.msk.bf16.mxu0 %vm7539_vm6, %v6885_v47 }
 0x41d   : > { %6890 = vmatpush3.bf16.xpose.msk.msra.mxu0 %vm7539_vm6, %v6885_v47  ;;  %v7682_v47 = vpack.c.bf16 %v5882_v46, %v5881_v45 }
 0x41e   : > { %6443 = vmatprep.subr.mxu0 %v7668_v28 }
 0x41f   : > { %6898 = vmatprep.subr.bf16.mxu1 %v7682_v47 }
 0x424   : > { %6434 = vmatmul.mubr.msk.f32.vlgmr.msra.gmra.mrb[6].mxu0 %vm1218_vm5, %v1659_v49  ;;  %v5884_v49 = vld [vmem:[%s7400_s24 + $0x58] sm:$0xff] }
 0x425   : > { %6444 = vmatpush3.msra.mxu0 %v7668_v28  ;;  %v7688_v50 = vpack.c.bf16 %v5884_v49, %v5883_v48 }
 0x426   : > { %6448 = vmatprep.subr.mxu0 %v7677_v43 }
 0x4f7   : > { %v6435_v56 = vpop.f32.mrb[6].mxu0 }
 0x4f8   : > { %v1744_v57 = vadd.f32 %v6435_v56, %v7429_v6  ;;  %v1738_v58 = vpop.f32.mrb[7].mxu0 }
 0x4f9   : > { %v1739_v59 = vadd.f32 %v1738_v58, %v7407_v5  ;;  %v5895_v58 = vld [vmem:[%s7405_s27 + $0x50] sm:$0xff] }
 0x4fa   : > { %v1750_v60 = vsel %vm1310_vm8, %v1744_v57, -inf }
 0x4fb   : > { %1751 = vmax.xlane.f32.xlu1 %v1750_v60  ;;  %v1747_v61 = vsel %vm1306_vm7, %v1739_v59, -inf }
 0x4fc   : > { %1748 = vmax.xlane.f32.xlu0 %v1747_v61 }
 0x588   : > { %v1752_v63 = vpop.xlane.xlu1 %1751 }
 0x589   : > { %v1754_v0 = vsub.f32 %v1744_v57, %v1752_v63  ;;  %v1749_v1 = vpop.xlane.xlu0 %1748  ;;  %v7698_v57 = vpack.c.bf16 %v5894_v52, %v5893_v51 }
 0x58a   : > { %v1753_v2 = vsub.f32 %v1739_v59, %v1749_v1  ;;  %v5896_v59 = vld [vmem:[%s7405_s27 + $0x58] sm:$0xff]  ;;  %v7725_v1 = vld [vmem:[%s8317_s0 + $0x2] ss:$0 sm:$0xff] }
 0x58b   : > { %v1757_v4 = vmul.f32 1.442695, %v1754_v0  ;;  %v7708_v60 = vpack.c.bf16 %v5896_v59, %v5895_v58 }
 0x58c   : > { %v1755_v7 = vmul.f32 1.442695, %v1753_v2 }
 0x58d   : > { %7191 = vpow2.f32 %v1757_v4 }
 0x58e   : > { %7193 = vpow2.f32 %v1755_v7 }
 0x597   : > { %v7192_v9 = vpop.eup %7191 }
 0x598   : > { %v7194_v10 = vpop.eup %7193  ;;  %v1762_v12 = vsel %vm1310_vm8, %v7192_v9, 0.0 }
 0x599   : > { %1763 = vadd.xlane.f32.xlu1 %v1762_v12  ;;  %v1759_v13 = vsel %vm1306_vm7, %v7194_v10, 0.0 }
 0x59a   : > { %1760 = vadd.xlane.f32.xlu0 %v1759_v13 }
 0x626   : > { %v1764_v29 = vpop.xlane.xlu1 %1763 }
 0x627   : > { %7195 = vrcp.f32 %v1764_v29  ;;  %v1761_v33 = vpop.xlane.xlu0 %1760  ;;  %v7741_v29 = vpack.c.bf16 %v5908_v27, %v5907_v22  ;;  %v5897_v27 = vld [vmem:[%s7405_s27 + $0x60] sm:$0xff] }
 0x628   : > { %7197 = vrcp.f32 %v1761_v33 }
 0x631   : > { %v7196_v34 = vpop.eup %7195 }
 0x632   : > { %v7198_v36 = vpop.eup %7197  ;;  %v1768_v41 = vmul.f32 %v7196_v34, %v7192_v9 }
 0x633   : > { %v1767_v37 = vmul.f32 %v7198_v36, %v7194_v10 }
 0x635   : > { %6440 = vmatprep.mubr.msk.f32.mxu1 %vm1306_vm7, %v1767_v37 }
 0x636   : > { %6441 = vmatmul.mubr.msk.f32.vlgmr.msra.gmra.mrb[10].mxu1 %vm1306_vm7, %v1768_v41 }
 0x637   : > { %6461 = vmatprep.mubr.msk.f32.mxu1 %vm972_vm4, %v7495_v16  ;;  %6900 = vmatpush3.bf16.msra.mxu1 %v7682_v47 }
 0x638   : > { %6902 = vmatprep.subr.bf16.mxu1 %v7688_v50 }
 0x63b   : > { %6904 = vmatpush3.bf16.msra.mxu1 %v7688_v50 }
 0x63c   : > { %6914 = vmatprep.subr.bf16.mxu1 %v7738_v26 }
 0x63e   : > { %6462 = vmatmul.mubr.msk.f32.vlgmr.msra.gmra.mrb[12].mxu1 %vm972_vm4, %v7513_v23 }
 0x63f   : > { %6483 = vmatprep.mubr.msk.f32.mxu1 %vm972_vm4, %v7495_v16  ;;  %6916 = vmatpush3.bf16.msra.mxu1 %v7738_v26 }
 0x640   : > { %6918 = vmatprep.subr.bf16.mxu1 %v7741_v29 }
 0x643   : > { %6920 = vmatpush3.bf16.msra.mxu1 %v7741_v29 }
 0x646   : > { %6484 = vmatmul.mubr.msk.f32.vlgmr.msra.gmra.mrb[14].mxu1 %vm972_vm4, %v7513_v23 }
 0x709   : > { %v6442_v54 = vpop.f32.mrb[10].mxu1 }
 0x70a   : > { %v1844_v56 = vpop.f32.mrb[11].mxu1 }
 0x70b   : > { %6445 = vmatprep.mubr.msk.f32.mxu0 %vm1218_vm5, %v1844_v56 }
 0x70c   : > { %6446 = vmatmul.mubr.msk.f32.vlgmr.msra.gmra.mrb[8].mxu0 %vm1218_vm5, %v6442_v54 }
 0x70d   : > { %6449 = vmatpush3.msra.mxu0 %v7677_v43  ;;  %6450 = vmatprep.mubr.msk.f32.mxu0 %vm1218_vm5, %v7625_v39  ;;  %v7720_v39 = vld [vmem:[%s7417_s2 + $0x2] ss:$0 sm:$0xff] }
 0x70e   : > { %6906 = vmatprep.subr.bf16.mxu0 %v7698_v57 }
 0x711   : > { %v6463_v61 = vpop.f32.mrb[12].mxu1 }
 0x712   : > { %v2087_v63 = vpop.f32.mrb[13].mxu1  ;;  %v2093_v12 = vadd.f32 %v6463_v61, %v7720_v39 }
 0x714   : > { %6451 = vmatmul.mubr.msk.f32.vlgmr.msra.gmra.mrb[8].mxu0 %vm1218_vm5, %v7623_v38  ;;  %v2088_v38 = vadd.f32 %v7720_v39, %v2087_v63  ;;  %v2259_v13 = vmul.f32 0.35355338, %v2093_v12 }
 0x715   : > { %6908 = vmatpush3.bf16.msra.mxu0 %v7698_v57  ;;  %6472 = vmatprep.mubr.msk.f32.mxu0 %vm972_vm4, %v7495_v16 }
 0x716   : > { %6910 = vmatprep.subr.bf16.mxu0 %v7708_v60  ;;  %v2258_v0 = vmul.f32 0.35355338, %v2088_v38  ;;  %v7756_v38 = vld [vmem:[%s8321_s21 + $0x2] ss:$0 sm:$0xff] }
 0x719   : > { %6912 = vmatpush3.bf16.msra.mxu0 %v7708_v60  ;;  %v6485_v63 = vpop.f32.mrb[14].mxu1 }
 0x71c   : > { %6473 = vmatmul.mubr.msk.f32.vlgmr.msra.gmra.mrb[10].mxu0 %vm972_vm4, %v7513_v23 }
 0x71d   : > { %6490 = vmatprep.mubr.msk.f32.mxu0 %vm1218_vm5, %v2258_v0  ;;  %v2249_v0 = vpop.f32.mrb[15].mxu1 }
 0x7ef   : > { %v6474_v2 = vpop.f32.mrb[10].mxu0 }
 0x7f0   : > { %v2174_v4 = vadd.f32 %v6474_v2, %v7725_v1  ;;  %v2168_v7 = vpop.f32.mrb[11].mxu0  ;;  %v2255_v2 = vadd.f32 %v6485_v63, %v7756_v38 }
 0x7f1   : > { %v2169_v9 = vadd.f32 %v7725_v1, %v2168_v7 }
 0x7f3   : > { %v6921_v10 = vpack.c.bf16 %v2174_v4, %v2169_v9  ;;  %v2250_v4 = vadd.f32 %v7756_v38, %v2249_v0  ;;  %v7765_v9 = vld [vmem:[%s7439_s19 + $0x10] sm:$0xff] }
 0x7f5   : > { %6923 = vmatprep.subr.msk.bf16.mxu0 %vm7539_vm6, %v6921_v10  ;;  %v6927_v7 = vpack.c.bf16 %v2255_v2, %v2250_v4  ;;  %v7813_v2 = vld [vmem:[%s8317_s0 + $0x3] ss:$0 sm:$0xff] }
 0x7f6   : > { %6926 = vmatpush3.bf16.xpose.msk.msra.mxu0 %vm7539_vm6, %v6921_v10 }
 0x7f7   : > { %6929 = vmatprep.subr.msk.bf16.mxu1 %vm7576_vm11, %v6927_v7  ;;  %6500 = vmatprep.subr.mxu0 %v7765_v9 }
 0x7f8   : > { %6932 = vmatpush3.bf16.msk.msra.mxu1 %vm7576_vm11, %v6927_v7 }
 0x7fd   : > { %6491 = vmatmul.mubr.msk.f32.vlgmr.msra.gmra.mrb[12].mxu0 %vm1218_vm5, %v2259_v13 }
 0x7fe   : > { %6501 = vmatpush3.msra.mxu0 %v7765_v9 }
 0x8d0   : > { %v6492_v33 = vpop.f32.mrb[12].mxu0 }
 0x8d1   : > { %v2344_v34 = vadd.f32 %v6492_v33, %v7429_v6  ;;  %v2338_v36 = vpop.f32.mrb[13].mxu0  ;;  %v5898_v33 = vld [vmem:[%s7405_s27 + $0x68] sm:$0xff] }
 0x8d2   : > { %v2339_v37 = vadd.f32 %v2338_v36, %v7407_v5  ;;  %v5885_v36 = vld [vmem:[%s7400_s24 + $0x60] sm:$0xff] }
 0x8d3   : > { %v2350_v41 = vsel %vm1310_vm8, %v2344_v34, -inf }
 0x8d4   : > { %2351 = vmax.xlane.f32.xlu1 %v2350_v41  ;;  %v2347_v45 = vsel %vm1306_vm7, %v2339_v37, -inf }
 0x8d5   : > { %2348 = vmax.xlane.f32.xlu0 %v2347_v45  ;;  %v5887_v45 = vld [vmem:[%s7400_s24 + $0x70] sm:$0xff] }
 0x961   : > { %v2352_v46 = vpop.xlane.xlu1 %2351 }
 0x962   : > { %v2354_v48 = vsub.f32 %v2344_v34, %v2352_v46  ;;  %v2349_v49 = vpop.xlane.xlu0 %2348  ;;  %v7775_v34 = vpack.c.bf16 %v5898_v33, %v5897_v27  ;;  %v5888_v46 = vld [vmem:[%s7400_s24 + $0x78] sm:$0xff]  ;;  %v5910_v27 = vld [vmem:[%s8318_s26 + $0x68] sm:$0xff]  ;;  %v5911_v33 = vld [vmem:[%s8318_s26 + $0x70] sm:$0xff] }
 0x963   : > { %v2353_v51 = vsub.f32 %v2339_v37, %v2349_v49  ;;  %v5886_v37 = vld [vmem:[%s7400_s24 + $0x68] sm:$0xff]  ;;  %v5899_v49 = vld [vmem:[%s7405_s27 + $0x70] sm:$0xff]  ;;  %s8329_s24 = sld [smem:[#allocation17_spill]] (!%p6072_p5) }
 0x964   : > { %v2357_v52 = vmul.f32 1.442695, %v2354_v48  ;;  %6942 = vmatprep.subr.bf16.mxu0 %v7775_v34  ;;  %v7780_v41 = vpack.c.bf16 %v5886_v37, %v5885_v36  ;;  %v7786_v48 = vpack.c.bf16 %v5888_v46, %v5887_v45  ;;  %v5912_v37 = vld [vmem:[%s8318_s26 + $0x78] sm:$0xff] }
 0x965   : > { %v2355_v54 = vmul.f32 1.442695, %v2353_v51  ;;  %v5900_v51 = vld [vmem:[%s7405_s27 + $0x78] sm:$0xff]  ;;  %v7829_v45 = vpack.c.bf16 %v5912_v37, %v5911_v33  ;;  %s8324_s27 = sld [smem:[#allocation15_spill]] }
 0x966   : > { %7199 = vpow2.f32 %v2357_v52  ;;  %6934 = vmatprep.subr.bf16.mxu1 %v7780_v41 }
 0x967   : > { %7201 = vpow2.f32 %v2355_v54 }
 0x970   : > { %v7200_v56 = vpop.eup %7199 }
 0x971   : > { %v7202_v58 = vpop.eup %7201  ;;  %v2362_v59 = vsel %vm1310_vm8, %v7200_v56, 0.0 }
 0x972   : > { %2363 = vadd.xlane.f32.xlu1 %v2362_v59  ;;  %v2359_v61 = vsel %vm1306_vm7, %v7202_v58, 0.0 }
 0x973   : > { %2360 = vadd.xlane.f32.xlu0 %v2359_v61 }
 0x9ff   : > { %v2364_v10 = vpop.xlane.xlu1 %2363 }
 0xa00   : > { %7203 = vrcp.f32 %v2364_v10  ;;  %v2361_v12 = vpop.xlane.xlu0 %2360 }
 0xa01   : > { %7205 = vrcp.f32 %v2361_v12 }
 0xa0a   : > { %v7204_v13 = vpop.eup %7203 }
 0xa0b   : > { %v7206_v18 = vpop.eup %7205  ;;  %v2368_v22 = vmul.f32 %v7204_v13, %v7200_v56  ;;  %v7796_v56 = vpack.c.bf16 %v5900_v51, %v5899_v49 }
 0xa0c   : > { %v2367_v21 = vmul.f32 %v7206_v18, %v7202_v58  ;;  %v7808_v58 = vld [vmem:[%s7417_s2 + $0x3] ss:$0 sm:$0xff]  ;;  %s8325_s2 = scalar_lea.vmem %s8324_s27, %s7393_s20  ;;  %s8328_s20 = sld [smem:[#allocation16_spill]] (!%p6072_p5) }
 0xa0e   : > { %6497 = vmatprep.mubr.msk.f32.mxu1 %vm1306_vm7, %v2367_v21 }
 0xa0f   : > { %6498 = vmatmul.mubr.msk.f32.vlgmr.msra.gmra.mrb[16].mxu1 %vm1306_vm7, %v2368_v22  ;;  %v5909_v22 = vld [vmem:[%s8318_s26 + $0x60] sm:$0xff] }
 0xa10   : > { %6513 = vmatprep.mubr.msk.f32.mxu1 %vm972_vm4, %v7495_v16  ;;  %6936 = vmatpush3.bf16.msra.mxu1 %v7780_v41  ;;  %v7826_v36 = vpack.c.bf16 %v5910_v27, %v5909_v22  ;;  %v7844_v27 = vld [vmem:[%s8321_s21 + $0x3] ss:$0 sm:$0xff] }
 0xa11   : > { %6938 = vmatprep.subr.bf16.mxu1 %v7786_v48 }
 0xa14   : > { %6940 = vmatpush3.bf16.msra.mxu1 %v7786_v48 }
 0xa15   : > { %6950 = vmatprep.subr.bf16.mxu1 %v7826_v36 }
 0xa17   : > { %6514 = vmatmul.mubr.msk.f32.vlgmr.msra.gmra.mrb[18].mxu1 %vm972_vm4, %v7513_v23 }
 0xa18   : > { %6535 = vmatprep.mubr.msk.f32.mxu1 %vm972_vm4, %v7495_v16  ;;  %6952 = vmatpush3.bf16.msra.mxu1 %v7826_v36 }
 0xa19   : > { %6954 = vmatprep.subr.bf16.mxu1 %v7829_v45 }
 0xa1c   : > { %6956 = vmatpush3.bf16.msra.mxu1 %v7829_v45 }
 0xa1f   : > { %6536 = vmatmul.mubr.msk.f32.vlgmr.msra.gmra.mrb[20].mxu1 %vm972_vm4, %v7513_v23 }
 0xae2   : > { %v6499_v52 = vpop.f32.mrb[16].mxu1 }
 0xae3   : > { %v2444_v54 = vpop.f32.mrb[17].mxu1 }
 0xae4   : > { %6502 = vmatprep.mubr.msk.f32.mxu0 %vm1218_vm5, %v2444_v54 }
 0xae5   : > { %6503 = vmatmul.mubr.msk.f32.vlgmr.msra.gmra.mrb[8].mxu0 %vm1218_vm5, %v6499_v52 }
 0xae6   : > { %6944 = vmatpush3.bf16.msra.mxu0 %v7775_v34  ;;  %6524 = vmatprep.mubr.msk.f32.mxu0 %vm972_vm4, %v7495_v16 }
 0xae7   : > { %6946 = vmatprep.subr.bf16.mxu0 %v7796_v56 }
 0xaea   : > { %6948 = vmatpush3.bf16.msra.mxu0 %v7796_v56  ;;  %v6515_v59 = vpop.f32.mrb[18].mxu1 }
 0xaeb   : > { %v2608_v61 = vpop.f32.mrb[19].mxu1  ;;  %v2614_v18 = vadd.f32 %v6515_v59, %v7808_v58 }
 0xaec   : > { %v2609_v63 = vadd.f32 %v7808_v58, %v2608_v61 }
 0xaed   : > { %6525 = vmatmul.mubr.msk.f32.vlgmr.msra.gmra.mrb[14].mxu0 %vm972_vm4, %v7513_v23  ;;  %v2780_v21 = vmul.f32 0.35355338, %v2614_v18 }
 0xaee   : > { %v2779_v0 = vmul.f32 0.35355338, %v2609_v63 }
 0xaf0   : > { %6542 = vmatprep.mubr.msk.f32.mxu0 %vm1218_vm5, %v2779_v0 }
 0xaf2   : > { %v6537_v22 = vpop.f32.mrb[20].mxu1 }
 0xaf3   : > { %v2770_v33 = vpop.f32.mrb[21].mxu1  ;;  %v2776_v37 = vadd.f32 %v6537_v22, %v7844_v27 }
 0xbc0   : > { %v6526_v4 = vpop.f32.mrb[14].mxu0 }
 0xbc1   : > { %v2695_v7 = vadd.f32 %v6526_v4, %v7813_v2  ;;  %v2689_v10 = vpop.f32.mrb[15].mxu0 }
 0xbc2   : > { %v2690_v12 = vadd.f32 %v7813_v2, %v2689_v10 }
 0xbc4   : > { %v6957_v13 = vpack.c.bf16 %v2695_v7, %v2690_v12 }
 0xbc6   : > { %6959 = vmatprep.subr.msk.bf16.mxu0 %vm7539_vm6, %v6957_v13 }
 0xbc7   : > { %6962 = vmatpush3.bf16.xpose.msk.msra.mxu0 %vm7539_vm6, %v6957_v13 }
 0xbce   : > { %6543 = vmatmul.mubr.msk.f32.vlgmr.msra.gmra.mrb[16].mxu0 %vm1218_vm5, %v2780_v21 }
 0xca1   : > { %v6544_v46 = vpop.f32.mrb[16].mxu0 }
 0xca2   : > { %v2865_v49 = vadd.f32 %v6544_v46, %v7429_v6  ;;  %v2859_v51 = vpop.f32.mrb[17].mxu0  ;;  %v2771_v46 = vadd.f32 %v7844_v27, %v2770_v33 }
 0xca3   : > { %v2860_v52 = vadd.f32 %v2859_v51, %v7407_v5  ;;  %v7853_v51 = vld [vmem:[%s7439_s19 + $0x18] sm:$0xff] }
 0xca4   : > { %v2871_v54 = vsel %vm1310_vm8, %v2865_v49, -inf  ;;  %6552 = vmatprep.subr.mxu0 %v7853_v51 }
 0xca5   : > { %2872 = vmax.xlane.f32.xlu1 %v2871_v54  ;;  %v2868_v59 = vsel %vm1306_vm7, %v2860_v52, -inf  ;;  %6553 = vmatpush3.msra.mxu0 %v7853_v51 }
 0xca6   : > { %2869 = vmax.xlane.f32.xlu0 %v2868_v59 }
 0xd32   : > { %v2873_v61 = vpop.xlane.xlu1 %2872 }
 0xd33   : > { %v2875_v63 = vsub.f32 %v2865_v49, %v2873_v61  ;;  %v2870_v0 = vpop.xlane.xlu0 %2869  ;;  %v6963_v49 = vpack.c.bf16 %v2776_v37, %v2771_v46 }
 0xd34   : > { %v2874_v4 = vsub.f32 %v2860_v52, %v2870_v0 }
 0xd35   : > { %v2878_v7 = vmul.f32 1.442695, %v2875_v63  ;;  %6965 = vmatprep.subr.msk.bf16.mxu1 %vm7576_vm11, %v6963_v49 }
 0xd36   : > { %v2876_v10 = vmul.f32 1.442695, %v2874_v4  ;;  %6968 = vmatpush3.bf16.msk.msra.mxu1 %vm7576_vm11, %v6963_v49 }
 0xd37   : > { %7207 = vpow2.f32 %v2878_v7 }
 0xd38   : > { %7209 = vpow2.f32 %v2876_v10  ;;  %v7866_v10 = vld [vmem:[%s8325_s2] ss:$0 sm:$0xff] }
 0xd41   : > { %v7208_v12 = vpop.eup %7207 }
 0xd42   : > { %v7210_v13 = vpop.eup %7209  ;;  %v2883_v18 = vsel %vm1310_vm8, %v7208_v12, 0.0 }
 0xd43   : > { %2884 = vadd.xlane.f32.xlu1 %v2883_v18  ;;  %v2880_v21 = vsel %vm1306_vm7, %v7210_v13, 0.0 }
 0xd44   : > { %2881 = vadd.xlane.f32.xlu0 %v2880_v21 }
 0xdd0   : > { %v2885_v52 = vpop.xlane.xlu1 %2884 }
 0xdd1   : > { %7211 = vrcp.f32 %v2885_v52  ;;  %v2882_v54 = vpop.xlane.xlu0 %2881 }
 0xdd2   : > { %7213 = vrcp.f32 %v2882_v54 }
 0xddb   : > { %v7212_v59 = vpop.eup %7211 }
 0xddc   : > { %v7214_v61 = vpop.eup %7213  ;;  %v2889_v0 = vmul.f32 %v7212_v59, %v7208_v12 }
 0xddd   : > { %v2888_v63 = vmul.f32 %v7214_v61, %v7210_v13 }
 0xddf   : > { %6549 = vmatprep.mubr.msk.f32.mxu1 %vm1306_vm7, %v2888_v63 }
 0xde0   : > { %6550 = vmatmul.mubr.msk.f32.vlgmr.msra.gmra.mrb[22].mxu1 %vm1306_vm7, %v2889_v0 }
 0xeb3   : > { %v6551_v4 = vpop.f32.mrb[22].mxu1 }
 0xeb4   : > { %v2965_v7 = vpop.f32.mrb[23].mxu1 }
 0xeb5   : > { %6554 = vmatprep.mubr.msk.f32.mxu0 %vm1218_vm5, %v2965_v7  ;;  %v950_v7 = vld [vmem:[%s7452_s28] sm:$0xff] }
 0xeb6   : > { %6555 = vmatmul.mubr.msk.f32.vlgmr.msra.gmra.mrb[8].mxu0 %vm1218_vm5, %v6551_v4 }
 0xf89   : > { %v6556_v18 = vpop.f32.mrb[8].mxu0 }
 0xf8a   : > { %v3064_v13 = vadd.f32 %v6556_v18, %v7866_v10  ;;  %v3046_v12 = vpop.f32.mrb[9].mxu0  ;;  %v951_v18 = vld [vmem:[%s7452_s28 + $0x8] sm:$0xff] }
 0xf8b   : > { %v3063_v21 = vadd.f32 %v7866_v10, %v3046_v12  ;;  %v952_v12 = vld [vmem:[%s7452_s28 + $0x10] sm:$0xff] }
 0xf8c   : > { %v3066_v22 = vadd.f32 %v3064_v13, %v7513_v23  ;;  %v7878_v13 = vpack.c.bf16 %v951_v18, %v950_v7 }
 0xf8d   : > { %v3065_v33 = vadd.f32 %v3063_v21, %v7495_v16  ;;  %v953_v21 = vld [vmem:[%s7452_s28 + $0x18] sm:$0xff]  ;;  %s8330_s28 = sld [smem:[#allocation18_spill]] (!%p6072_p5) }
 0xf8e   : > { %v3071_v37 = vsel %vm3070_vm12, %v3066_v22, 0.0  ;;  %6970 = vmatprep.subr.bf16.mxu1 %v7878_v13 }
 0xf8f   : > { %3072 = vadd.xlane.f32.xlu1 %v3071_v37  ;;  %v3067_v46 = vsel %vm972_vm4, %v3065_v33, 0.0  ;;  %6972 = vmatpush3.bf16.msra.mxu1 %v7878_v13  ;;  %v956_v37 = vld [vmem:[%s7462_s8 + $0x8] sm:$0xff] }
 0xf90   : > { %3068 = vadd.xlane.f32.xlu0 %v3067_v46  ;;  %v957_v46 = vld [vmem:[%s7462_s8 + $0x10] sm:$0xff] }
0x101c   : > { %v3073_v49 = vpop.xlane.xlu1 %3072 }
0x101d   : > { %v3076_v52 = vmul.f32 0.03125, %v3073_v49  ;;  %v3069_v54 = vpop.xlane.xlu0 %3068 }
0x101e   : > { %v3075_v59 = vmul.f32 0.03125, %v3069_v54 }
0x101f   : > { %v3078_v61 = vsub.f32 %v3066_v22, %v3076_v52  ;;  %v7884_v22 = vpack.c.bf16 %v953_v21, %v952_v12  ;;  %v958_v52 = vld [vmem:[%s7462_s8 + $0x18] sm:$0xff] }
0x1020   : > { %v3077_v63 = vsub.f32 %v3065_v33, %v3075_v59  ;;  %v955_v33 = vld [vmem:[%s7462_s8] sm:$0xff]  ;;  %v7895_v54 = vpack.c.bf16 %v958_v52, %v957_v46 }
0x1021   : > { %v3080_v0 = vmul.f32 %v3078_v61, %v3078_v61  ;;  %6974 = vmatprep.subr.bf16.mxu1 %v7884_v22  ;;  %v7892_v49 = vpack.c.bf16 %v956_v37, %v955_v33  ;;  %v959_v59 = vld [vmem:[%s7462_s8 + $0x20] sm:$0xff] }
0x1022   : > { %v3079_v23 = vmul.f32 %v3077_v63, %v3077_v63  ;;  %6976 = vmatpush3.bf16.msra.mxu1 %v7884_v22  ;;  %v7912_v37 = vld [vmem:[%s8326_s4] ss:$0 sm:$0xff] }
0x1023   : > { %v3084_v16 = vsel %vm3070_vm12, %v3080_v0, 0.0  ;;  %6994 = vmatprep.subr.bf16.mxu1 %v7492_v14  ;;  %v960_v0 = vld [vmem:[%s7462_s8 + $0x28] sm:$0xff]  ;;  %6978 = vmatprep.subr.bf16.mxu0 %v7892_v49 }
0x1024   : > { %3085 = vadd.xlane.f32.xlu1 %v3084_v16  ;;  %v3081_v4 = vsel %vm972_vm4, %v3079_v23, 0.0  ;;  %6980 = vmatpush3.bf16.msra.mxu0 %v7892_v49  ;;  %v7902_v23 = vpack.c.bf16 %v960_v0, %v959_v59  ;;  %v7919_v0 = vld [vmem:[%s8327_s1] ss:$0 sm:$0xff] }
0x1025   : > { %3082 = vadd.xlane.f32.xlu0 %v3081_v4  ;;  %6982 = vmatprep.subr.bf16.mxu0 %v7895_v54 }
0x1028   : > { %6984 = vmatpush3.bf16.msra.mxu0 %v7895_v54 }
0x1029   : > { %6986 = vmatprep.subr.bf16.mxu0 %v7902_v23 }
0x102c   : > { %6988 = vmatpush3.bf16.msra.mxu0 %v7902_v23 }
0x10b1   : > { %v3086_v16 = vpop.xlane.xlu1 %3085 }
0x10b2   : > { %v3088_v4 = vmul.f32 0.03125, %v3086_v16  ;;  %v3083_v7 = vpop.xlane.xlu0 %3082 }
0x10b3   : > { %v3087_v18 = vmul.f32 0.03125, %v3083_v7 }
0x10b4   : > { %v3090_v12 = vadd.f32 1e-05, %v3088_v4 }
0x10b5   : > { %v3089_v21 = vadd.f32 1e-05, %v3087_v18 }
0x10b6   : > { %7215 = vrsqrt.f32 %v3090_v12  ;;  %v7929_v12 = vld [vmem:[#allocation2 + $0x10] sm:$0xff] }
0x10b7   : > { %7217 = vrsqrt.f32 %v3089_v21 }
0x10c0   : > { %v7216_v33 = vpop.eup %7215 }
0x10c1   : > { %v7218_v46 = vpop.eup %7217  ;;  %v3094_v52 = vmul.f32 %v7216_v33, %v3078_v61  ;;  %v7940_v61 = vld [vmem:[#allocation2 + $0x18] sm:$0x3] }
0x10c2   : > { %v3093_v59 = vmul.f32 %v7218_v46, %v3077_v63 }
0x10c3   : > { %v3102_v16 = vmul.f32 %v7912_v37, %v3094_v52 }
0x10c4   : > { %v3101_v4 = vmul.f32 %v7912_v37, %v3093_v59 }
0x10c5   : > { %v7927_v18 = vadd.f32 %v7919_v0, %v3102_v16 }
0x10c6   : > { %v7924_v7 = vadd.f32 %v7919_v0, %v3101_v4 }
0x10c8   : > { %6565 = vmatprep.mubr.msk.f32.mxu1 %vm972_vm4, %v7924_v7 }
0x10c9   : > { %6566 = vmatmul.mubr.msk.f32.vlgmr.msra.gmra.mrb[24].mxu1 %vm972_vm4, %v7927_v18 }
0x10ca   : > { %6996 = vmatpush3.bf16.msra.mxu1 %v7492_v14  ;;  %6595 = vmatprep.mubr.msk.f32.mxu1 %vm972_vm4, %v7929_v12  ;;  %v961_v14 = vld [vmem:[%s7462_s8 + $0x30] sm:$0xff] }
0x10cb   : > { %6998 = vmatprep.subr.bf16.mxu1 %v7497_v17 }
0x10ce   : > { %7000 = vmatpush3.bf16.msra.mxu1 %v7497_v17  ;;  %v962_v17 = vld [vmem:[%s7462_s8 + $0x38] sm:$0xff] }
0x10cf   : > { %7002 = vmatprep.subr.bf16.mxu1 %v7508_v20  ;;  %v7954_v63 = vpack.c.bf16 %v962_v17, %v961_v14 }
0x10d1   : > { %6596 = vmatmul.mubr.msk.f32.vlgmr.msra.gmra.mrb[26].mxu1 %vm972_vm4, %v7940_v61  ;;  %6990 = vmatprep.subr.bf16.mxu0 %v7954_v63 }
0x10d2   : > { %7004 = vmatpush3.bf16.msra.mxu1 %v7508_v20  ;;  %6606 = vmatprep.mubr.msk.f32.mxu1 %vm972_vm4, %v7929_v12  ;;  %v7964_v20 = vld [vmem:[%s822_s29] ss:$0 sm:$0xff] }
0x10d3   : > { %7006 = vmatprep.subr.bf16.mxu1 %v7516_v24  ;;  %6992 = vmatpush3.bf16.msra.mxu0 %v7954_v63 }
0x10d4   : > { %7010 = vmatprep.subr.bf16.mxu0 %v7554_v42 }
0x10d6   : > { %7008 = vmatpush3.bf16.msra.mxu1 %v7516_v24 }
0x10d9   : > { %6607 = vmatmul.mubr.msk.f32.vlgmr.msra.gmra.mrb[28].mxu1 %vm972_vm4, %v7940_v61 }
0x119c   : > { %v6567_v24 = vpop.f32.mrb[24].mxu1 }
0x119d   : > { %v3195_v21 = vadd.f32 %v6567_v24, %v7964_v20  ;;  %v3189_v33 = vpop.f32.mrb[25].mxu1 }
0x119e   : > { %v3190_v46 = vadd.f32 %v7964_v20, %v3189_v33 }
0x119f   : > { %v3199_v59 = vmax.f32 %v3195_v21, 0.0 }
0x11a0   : > { %v3198_v52 = vmax.f32 %v3190_v46, 0.0 }
0x11a2   : > { %6584 = vmatprep.mubr.msk.f32.mxu0 %vm3206_vm13, %v3198_v52 }
0x11a3   : > { %6585 = vmatmul.mubr.msk.f32.vlgmr.msra.gmra.mrb[18].mxu0 %vm3206_vm13, %v3199_v59 }
0x11a4   : > { %v6597_v16 = vpop.f32.mrb[26].mxu1  ;;  %7012 = vmatpush3.bf16.msra.mxu0 %v7554_v42  ;;  %6617 = vmatprep.mubr.msk.f32.mxu0 %vm972_vm4, %v7929_v12 }
0x11a5   : > { %v3409_v4 = vpop.f32.mrb[27].mxu1  ;;  %7014 = vmatprep.subr.bf16.mxu0 %v7557_v44 }
0x11a6   : > { %v3410_v14 = vadd.f32 %v7528_v25, %v3409_v4 }
0x11a8   : > { %v3568_v17 = vmul.f32 0.35355338, %v3410_v14  ;;  %7016 = vmatpush3.bf16.msra.mxu0 %v7557_v44  ;;  %v3415_v44 = vadd.f32 %v6597_v16, %v7528_v25 }
0x11aa   : > { %6624 = vmatprep.mubr.msk.f32.mxu1 %vm1218_vm5, %v3568_v17  ;;  %v3569_v52 = vmul.f32 0.35355338, %v3415_v44 }
0x11ab   : > { %6618 = vmatmul.mubr.msk.f32.vlgmr.msra.gmra.mrb[20].mxu0 %vm972_vm4, %v7940_v61 }
0x11ac   : > { %v6608_v24 = vpop.f32.mrb[28].mxu1 }
0x11ad   : > { %v3490_v21 = vadd.f32 %v6608_v24, %v7533_v30  ;;  %v3484_v42 = vpop.f32.mrb[29].mxu1 }
0x11ae   : > { %v3485_v33 = vadd.f32 %v7533_v30, %v3484_v42 }
0x11b0   : > { %v7017_v46 = vpack.c.bf16 %v3490_v21, %v3485_v33 }
0x11b2   : > { %7019 = vmatprep.subr.msk.bf16.mxu1 %vm7539_vm6, %v7017_v46 }
0x11b3   : > { %7022 = vmatpush3.bf16.xpose.msk.msra.mxu1 %vm7539_vm6, %v7017_v46 }
0x11b4   : > { %7030 = vmatprep.subr.bf16.mxu1 %v7591_v11 }
0x11ba   : > { %6625 = vmatmul.mubr.msk.f32.vlgmr.msra.gmra.mrb[30].mxu1 %vm1218_vm5, %v3569_v52 }
0x11bb   : > { %7032 = vmatpush3.bf16.msra.mxu1 %v7591_v11  ;;  %6642 = vmatprep.mubr.msk.f32.mxu1 %vm972_vm4, %v7929_v12 }
0x11bc   : > { %7034 = vmatprep.subr.bf16.mxu1 %v7597_v15 }
0x11bf   : > { %7036 = vmatpush3.bf16.msra.mxu1 %v7597_v15 }
0x11c0   : > { %7046 = vmatprep.subr.bf16.mxu1 %v7641_v53 }
0x11c2   : > { %6643 = vmatmul.mubr.msk.f32.vlgmr.msra.gmra.mrb[32].mxu1 %vm972_vm4, %v7940_v61 }
0x11c3   : > { %7048 = vmatpush3.bf16.msra.mxu1 %v7641_v53  ;;  %6664 = vmatprep.mubr.msk.f32.mxu1 %vm972_vm4, %v7929_v12 }
0x11c4   : > { %7050 = vmatprep.subr.bf16.mxu1 %v7644_v55 }
0x11c7   : > { %7052 = vmatpush3.bf16.msra.mxu1 %v7644_v55 }
0x11ca   : > { %6665 = vmatmul.mubr.msk.f32.vlgmr.msra.gmra.mrb[34].mxu1 %vm972_vm4, %v7940_v61 }
0x1276   : > { %v8003_v25 = vpop.f32.mrb[18].mxu0 }
0x1277   : > { %v8005_v30 = vpop.f32.mrb[19].mxu0 }
0x128d   : > { %v6626_v11 = vpop.f32.mrb[30].mxu1 }
0x128e   : > { %v3654_v15 = vadd.f32 %v6626_v11, %v7429_v6  ;;  %v3648_v59 = vpop.f32.mrb[31].mxu1  ;;  %v6619_v11 = vpop.f32.mrb[20].mxu0 }
0x128f   : > { %v3649_v53 = vadd.f32 %v3648_v59, %v7407_v5  ;;  %v3559_v59 = vpop.f32.mrb[21].mxu0 }
0x1290   : > { %v3660_v16 = vsel %vm1310_vm8, %v3654_v15, -inf }
0x1291   : > { %3661 = vmax.xlane.f32.xlu1 %v3660_v16  ;;  %v3657_v4 = vsel %vm1306_vm7, %v3649_v53, -inf  ;;  %v3565_v16 = vadd.f32 %v6619_v11, %v7572_v62 }
0x1292   : > { %3658 = vmax.xlane.f32.xlu0 %v3657_v4 }
0x131e   : > { %v3662_v55 = vpop.xlane.xlu1 %3661 }
0x131f   : > { %v3664_v14 = vsub.f32 %v3654_v15, %v3662_v55  ;;  %v3659_v17 = vpop.xlane.xlu0 %3658  ;;  %v3560_v15 = vadd.f32 %v7572_v62, %v3559_v59  ;;  %v6644_v62 = vpop.f32.mrb[32].mxu1 }
0x1320   : > { %v3663_v24 = vsub.f32 %v3649_v53, %v3659_v17 }
0x1321   : > { %v3667_v21 = vmul.f32 1.442695, %v3664_v14  ;;  %v7023_v4 = vpack.c.bf16 %v3565_v16, %v3560_v15  ;;  %v3835_v15 = vadd.f32 %v6644_v62, %v7619_v32 }
0x1322   : > { %v3665_v42 = vmul.f32 1.442695, %v3663_v24 }
0x1323   : > { %7219 = vpow2.f32 %v3667_v21  ;;  %7025 = vmatprep.subr.msk.bf16.mxu0 %vm7576_vm11, %v7023_v4 }
0x1324   : > { %7221 = vpow2.f32 %v3665_v42  ;;  %7028 = vmatpush3.bf16.msk.msra.mxu0 %vm7576_vm11, %v7023_v4  ;;  %v3829_v42 = vpop.f32.mrb[33].mxu1  ;;  %v3989_v4 = vmul.f32 0.35355338, %v3835_v15 }
0x1325   : > { %7038 = vmatprep.subr.bf16.mxu0 %v7586_v8 }
0x132d   : > { %v7220_v33 = vpop.eup %7219 }
0x132e   : > { %v7222_v46 = vpop.eup %7221  ;;  %v3672_v44 = vsel %vm1310_vm8, %v7220_v33, 0.0 }
0x132f   : > { %3673 = vadd.xlane.f32.xlu1 %v3672_v44  ;;  %v3669_v52 = vsel %vm1306_vm7, %v7222_v46, 0.0 }
0x1330   : > { %3670 = vadd.xlane.f32.xlu0 %v3669_v52 }
0x13bc   : > { %v3674_v53 = vpop.xlane.xlu1 %3673 }
0x13bd   : > { %7223 = vrcp.f32 %v3674_v53  ;;  %v3671_v55 = vpop.xlane.xlu0 %3670 }
0x13be   : > { %7225 = vrcp.f32 %v3671_v55 }
0x13c7   : > { %v7224_v14 = vpop.eup %7223 }
0x13c8   : > { %v7226_v17 = vpop.eup %7225  ;;  %v3678_v21 = vmul.f32 %v7224_v14, %v7220_v33  ;;  %v3830_v33 = vadd.f32 %v7619_v32, %v3829_v42 }
0x13c9   : > { %v3677_v24 = vmul.f32 %v7226_v17, %v7222_v46 }
0x13ca   : > { %v3988_v46 = vmul.f32 0.35355338, %v3830_v33 }
0x13cb   : > { %6631 = vmatprep.mubr.msk.f32.mxu0 %vm1306_vm7, %v3677_v24 }
0x13cc   : > { %6632 = vmatmul.mubr.msk.f32.vlgmr.msra.gmra.mrb[22].mxu0 %vm1306_vm7, %v3678_v21 }
0x13cd   : > { %7040 = vmatpush3.bf16.msra.mxu0 %v7586_v8  ;;  %6653 = vmatprep.mubr.msk.f32.mxu0 %vm972_vm4, %v7929_v12 }
0x13ce   : > { %7042 = vmatprep.subr.bf16.mxu0 %v7608_v31 }
0x13d1   : > { %7044 = vmatpush3.bf16.msra.mxu0 %v7608_v31 }
0x13d4   : > { %6654 = vmatmul.mubr.msk.f32.vlgmr.msra.gmra.mrb[24].mxu0 %vm972_vm4, %v7940_v61 }
0x13d5   : > { %6671 = vmatprep.mubr.msk.f32.mxu0 %vm1218_vm5, %v3988_v46 }
0x149f   : > { %v8031_v44 = vpop.f32.mrb[22].mxu0 }
0x14a0   : > { %v8033_v8 = vpop.f32.mrb[23].mxu0 }
0x14a7   : > { %v6655_v52 = vpop.f32.mrb[24].mxu0 }
0x14a8   : > { %v3910_v11 = vadd.f32 %v6655_v52, %v7628_v40  ;;  %v3904_v59 = vpop.f32.mrb[25].mxu0 }
0x14a9   : > { %v3905_v31 = vadd.f32 %v7628_v40, %v3904_v59 }
0x14ab   : > { %v7053_v16 = vpack.c.bf16 %v3910_v11, %v3905_v31  ;;  %v6666_v31 = vpop.f32.mrb[34].mxu1 }
0x14ac   : > { %v3985_v15 = vadd.f32 %v6666_v31, %v7659_v19 }
0x14ad   : > { %7055 = vmatprep.subr.msk.bf16.mxu0 %vm7539_vm6, %v7053_v16 }
0x14ae   : > { %7058 = vmatpush3.bf16.xpose.msk.msra.mxu0 %vm7539_vm6, %v7053_v16  ;;  %v3979_v16 = vpop.f32.mrb[35].mxu1 }
0x14af   : > { %6681 = vmatprep.subr.mxu0 %v7668_v28 }
0x14b5   : > { %6672 = vmatmul.mubr.msk.f32.vlgmr.msra.gmra.mrb[26].mxu0 %vm1218_vm5, %v3989_v4  ;;  %v3980_v4 = vadd.f32 %v7659_v19, %v3979_v16 }
0x14b6   : > { %6682 = vmatpush3.msra.mxu0 %v7668_v28 }
0x14b7   : > { %6686 = vmatprep.subr.mxu0 %v7677_v43 }
0x1588   : > { %v6673_v53 = vpop.f32.mrb[26].mxu0 }
0x1589   : > { %v4074_v40 = vadd.f32 %v6673_v53, %v7429_v6  ;;  %v4068_v55 = vpop.f32.mrb[27].mxu0  ;;  %v7059_v53 = vpack.c.bf16 %v3985_v15, %v3980_v4 }
0x158a   : > { %v4069_v14 = vadd.f32 %v4068_v55, %v7407_v5 }
0x158b   : > { %v4080_v17 = vsel %vm1310_vm8, %v4074_v40, -inf  ;;  %7061 = vmatprep.subr.msk.bf16.mxu1 %vm7576_vm11, %v7059_v53 }
0x158c   : > { %4081 = vmax.xlane.f32.xlu1 %v4080_v17  ;;  %v4077_v32 = vsel %vm1306_vm7, %v4069_v14, -inf  ;;  %7064 = vmatpush3.bf16.msk.msra.mxu1 %vm7576_vm11, %v7059_v53 }
0x158d   : > { %4078 = vmax.xlane.f32.xlu0 %v4077_v32  ;;  %7066 = vmatprep.subr.bf16.mxu1 %v7682_v47 }
0x1619   : > { %v4082_v24 = vpop.xlane.xlu1 %4081 }
0x161a   : > { %v4084_v21 = vsub.f32 %v4074_v40, %v4082_v24  ;;  %v4079_v62 = vpop.xlane.xlu0 %4078 }
0x161b   : > { %v4083_v42 = vsub.f32 %v4069_v14, %v4079_v62 }
0x161c   : > { %v4087_v33 = vmul.f32 1.442695, %v4084_v21 }
0x161d   : > { %v4085_v28 = vmul.f32 1.442695, %v4083_v42 }
0x161e   : > { %7227 = vpow2.f32 %v4087_v33 }
0x161f   : > { %7229 = vpow2.f32 %v4085_v28 }
0x1628   : > { %v7228_v46 = vpop.eup %7227 }
0x1629   : > { %v7230_v52 = vpop.eup %7229  ;;  %v4092_v11 = vsel %vm1310_vm8, %v7228_v46, 0.0 }
0x162a   : > { %4093 = vadd.xlane.f32.xlu1 %v4092_v11  ;;  %v4089_v59 = vsel %vm1306_vm7, %v7230_v52, 0.0 }
0x162b   : > { %4090 = vadd.xlane.f32.xlu0 %v4089_v59 }
0x16b7   : > { %v4094_v40 = vpop.xlane.xlu1 %4093 }
0x16b8   : > { %7231 = vrcp.f32 %v4094_v40  ;;  %v4091_v55 = vpop.xlane.xlu0 %4090 }
0x16b9   : > { %7233 = vrcp.f32 %v4091_v55 }
0x16c2   : > { %v7232_v14 = vpop.eup %7231 }
0x16c3   : > { %v7234_v17 = vpop.eup %7233  ;;  %v4098_v24 = vmul.f32 %v7232_v14, %v7228_v46 }
0x16c4   : > { %v4097_v32 = vmul.f32 %v7234_v17, %v7230_v52 }
0x16c6   : > { %6678 = vmatprep.mubr.msk.f32.mxu1 %vm1306_vm7, %v4097_v32 }
0x16c7   : > { %6679 = vmatmul.mubr.msk.f32.vlgmr.msra.gmra.mrb[36].mxu1 %vm1306_vm7, %v4098_v24 }
0x16c8   : > { %7068 = vmatpush3.bf16.msra.mxu1 %v7682_v47  ;;  %6699 = vmatprep.mubr.msk.f32.mxu1 %vm972_vm4, %v7929_v12 }
0x16c9   : > { %7070 = vmatprep.subr.bf16.mxu1 %v7688_v50 }
0x16cc   : > { %7072 = vmatpush3.bf16.msra.mxu1 %v7688_v50 }
0x16cd   : > { %7082 = vmatprep.subr.bf16.mxu1 %v7738_v26 }
0x16cf   : > { %6700 = vmatmul.mubr.msk.f32.vlgmr.msra.gmra.mrb[38].mxu1 %vm972_vm4, %v7940_v61 }
0x16d0   : > { %7084 = vmatpush3.bf16.msra.mxu1 %v7738_v26  ;;  %6721 = vmatprep.mubr.msk.f32.mxu1 %vm972_vm4, %v7929_v12 }
0x16d1   : > { %7086 = vmatprep.subr.bf16.mxu1 %v7741_v29 }
0x16d4   : > { %7088 = vmatpush3.bf16.msra.mxu1 %v7741_v29 }
0x16d7   : > { %6722 = vmatmul.mubr.msk.f32.vlgmr.msra.gmra.mrb[40].mxu1 %vm972_vm4, %v7940_v61 }
0x179a   : > { %v6680_v19 = vpop.f32.mrb[36].mxu1 }
0x179b   : > { %v4174_v47 = vpop.f32.mrb[37].mxu1 }
0x179c   : > { %6683 = vmatprep.mubr.msk.f32.mxu0 %vm1218_vm5, %v4174_v47 }
0x179d   : > { %6684 = vmatmul.mubr.msk.f32.vlgmr.msra.gmra.mrb[28].mxu0 %vm1218_vm5, %v6680_v19 }
0x179e   : > { %6687 = vmatpush3.msra.mxu0 %v7677_v43  ;;  %6688 = vmatprep.mubr.msk.f32.mxu0 %vm1218_vm5, %v8033_v8 }
0x179f   : > { %7074 = vmatprep.subr.bf16.mxu0 %v7698_v57 }
0x17a2   : > { %v6701_v43 = vpop.f32.mrb[38].mxu1 }
0x17a3   : > { %v4411_v50 = vpop.f32.mrb[39].mxu1 }
0x17a4   : > { %v4412_v26 = vadd.f32 %v7720_v39, %v4411_v50 }
0x17a5   : > { %6689 = vmatmul.mubr.msk.f32.vlgmr.msra.gmra.mrb[28].mxu0 %vm1218_vm5, %v8031_v44 }
0x17a6   : > { %7076 = vmatpush3.bf16.msra.mxu0 %v7698_v57  ;;  %6710 = vmatprep.mubr.msk.f32.mxu0 %vm972_vm4, %v7929_v12  ;;  %v4570_v29 = vmul.f32 0.35355338, %v4412_v26 }
0x17a7   : > { %7078 = vmatprep.subr.bf16.mxu0 %v7708_v60 }
0x17aa   : > { %7080 = vmatpush3.bf16.msra.mxu0 %v7708_v60  ;;  %v4417_v60 = vadd.f32 %v6701_v43, %v7720_v39  ;;  %v6723_v14 = vpop.f32.mrb[40].mxu1 }
0x17ab   : > { %v4561_v17 = vpop.f32.mrb[41].mxu1  ;;  %v4567_v32 = vadd.f32 %v6723_v14, %v7756_v38 }
0x17ac   : > { %v4571_v42 = vmul.f32 0.35355338, %v4417_v60  ;;  %v4562_v24 = vadd.f32 %v7756_v38, %v4561_v17 }
0x17ad   : > { %6711 = vmatmul.mubr.msk.f32.vlgmr.msra.gmra.mrb[30].mxu0 %vm972_vm4, %v7940_v61 }
0x17ae   : > { %6728 = vmatprep.mubr.msk.f32.mxu0 %vm1218_vm5, %v4570_v29  ;;  %v7095_v19 = vpack.c.bf16 %v4567_v32, %v4562_v24 }
0x17b0   : > { %7097 = vmatprep.subr.msk.bf16.mxu1 %vm7576_vm11, %v7095_v19 }
0x17b1   : > { %7100 = vmatpush3.bf16.msk.msra.mxu1 %vm7576_vm11, %v7095_v19 }
0x17b2   : > { %7102 = vmatprep.subr.bf16.mxu1 %v7780_v41 }
0x1880   : > { %v6712_v44 = vpop.f32.mrb[30].mxu0 }
0x1881   : > { %v4492_v57 = vadd.f32 %v6712_v44, %v7725_v1  ;;  %v4486_v8 = vpop.f32.mrb[31].mxu0 }
0x1882   : > { %v4487_v21 = vadd.f32 %v7725_v1, %v4486_v8 }
0x1884   : > { %v7089_v62 = vpack.c.bf16 %v4492_v57, %v4487_v21 }
0x1886   : > { %7091 = vmatprep.subr.msk.bf16.mxu0 %vm7539_vm6, %v7089_v62 }
0x1887   : > { %7094 = vmatpush3.bf16.xpose.msk.msra.mxu0 %vm7539_vm6, %v7089_v62 }
0x1888   : > { %6738 = vmatprep.subr.mxu0 %v7765_v9 }
0x188e   : > { %6729 = vmatmul.mubr.msk.f32.vlgmr.msra.gmra.mrb[32].mxu0 %vm1218_vm5, %v4571_v42 }
0x188f   : > { %6739 = vmatpush3.msra.mxu0 %v7765_v9 }
0x1890   : > { %7110 = vmatprep.subr.bf16.mxu0 %v7775_v34 }
0x1961   : > { %v6730_v33 = vpop.f32.mrb[32].mxu0 }
0x1962   : > { %v4656_v1 = vadd.f32 %v6730_v33, %v7429_v6  ;;  %v4650_v28 = vpop.f32.mrb[33].mxu0 }
0x1963   : > { %v4651_v46 = vadd.f32 %v4650_v28, %v7407_v5 }
0x1964   : > { %v4662_v52 = vsel %vm1310_vm8, %v4656_v1, -inf }
0x1965   : > { %4663 = vmax.xlane.f32.xlu1 %v4662_v52  ;;  %v4659_v39 = vsel %vm1306_vm7, %v4651_v46, -inf }
0x1966   : > { %4660 = vmax.xlane.f32.xlu0 %v4659_v39 }
0x19f2   : > { %v4664_v11 = vpop.xlane.xlu1 %4663 }
0x19f3   : > { %v4666_v59 = vsub.f32 %v4656_v1, %v4664_v11  ;;  %v4661_v31 = vpop.xlane.xlu0 %4660 }
0x19f4   : > { %v4665_v16 = vsub.f32 %v4651_v46, %v4661_v31 }
0x19f5   : > { %v4669_v15 = vmul.f32 1.442695, %v4666_v59 }
0x19f6   : > { %v4667_v9 = vmul.f32 1.442695, %v4665_v16 }
0x19f7   : > { %7235 = vpow2.f32 %v4669_v15 }
0x19f8   : > { %7237 = vpow2.f32 %v4667_v9 }
0x1a01   : > { %v7236_v4 = vpop.eup %7235 }
0x1a02   : > { %v7238_v53 = vpop.eup %7237  ;;  %v4674_v40 = vsel %vm1310_vm8, %v7236_v4, 0.0 }
0x1a03   : > { %4675 = vadd.xlane.f32.xlu1 %v4674_v40  ;;  %v4671_v55 = vsel %vm1306_vm7, %v7238_v53, 0.0 }
0x1a04   : > { %4672 = vadd.xlane.f32.xlu0 %v4671_v55 }
0x1a90   : > { %v4676_v47 = vpop.xlane.xlu1 %4675 }
0x1a91   : > { %7239 = vrcp.f32 %v4676_v47  ;;  %v4673_v43 = vpop.xlane.xlu0 %4672 }
0x1a92   : > { %7241 = vrcp.f32 %v4673_v43 }
0x1a9b   : > { %v7240_v50 = vpop.eup %7239 }
0x1a9c   : > { %v7242_v26 = vpop.eup %7241  ;;  %v4680_v44 = vmul.f32 %v7240_v50, %v7236_v4 }
0x1a9d   : > { %v4679_v29 = vmul.f32 %v7242_v26, %v7238_v53 }
0x1a9f   : > { %6735 = vmatprep.mubr.msk.f32.mxu1 %vm1306_vm7, %v4679_v29 }
0x1aa0   : > { %6736 = vmatmul.mubr.msk.f32.vlgmr.msra.gmra.mrb[42].mxu1 %vm1306_vm7, %v4680_v44 }
0x1aa1   : > { %7104 = vmatpush3.bf16.msra.mxu1 %v7780_v41  ;;  %6751 = vmatprep.mubr.msk.f32.mxu1 %vm972_vm4, %v7929_v12 }
0x1aa2   : > { %7106 = vmatprep.subr.bf16.mxu1 %v7786_v48 }
0x1aa5   : > { %7108 = vmatpush3.bf16.msra.mxu1 %v7786_v48 }
0x1aa6   : > { %7118 = vmatprep.subr.bf16.mxu1 %v7826_v36 }
0x1aa8   : > { %6752 = vmatmul.mubr.msk.f32.vlgmr.msra.gmra.mrb[44].mxu1 %vm972_vm4, %v7940_v61 }
0x1aa9   : > { %7120 = vmatpush3.bf16.msra.mxu1 %v7826_v36  ;;  %6773 = vmatprep.mubr.msk.f32.mxu1 %vm972_vm4, %v7929_v12 }
0x1aaa   : > { %7122 = vmatprep.subr.bf16.mxu1 %v7829_v45 }
0x1aad   : > { %7124 = vmatpush3.bf16.msra.mxu1 %v7829_v45 }
0x1ab0   : > { %6774 = vmatmul.mubr.msk.f32.vlgmr.msra.gmra.mrb[46].mxu1 %vm972_vm4, %v7940_v61 }
0x1b73   : > { %v6737_v38 = vpop.f32.mrb[42].mxu1 }
0x1b74   : > { %v4756_v41 = vpop.f32.mrb[43].mxu1 }
0x1b75   : > { %6740 = vmatprep.mubr.msk.f32.mxu0 %vm1218_vm5, %v4756_v41 }
0x1b76   : > { %6741 = vmatmul.mubr.msk.f32.vlgmr.msra.gmra.mrb[28].mxu0 %vm1218_vm5, %v6737_v38 }
0x1b77   : > { %7112 = vmatpush3.bf16.msra.mxu0 %v7775_v34  ;;  %6762 = vmatprep.mubr.msk.f32.mxu0 %vm972_vm4, %v7929_v12 }
0x1b78   : > { %7114 = vmatprep.subr.bf16.mxu0 %v7796_v56 }
0x1b7b   : > { %7116 = vmatpush3.bf16.msra.mxu0 %v7796_v56  ;;  %v6753_v48 = vpop.f32.mrb[44].mxu1 }
0x1b7c   : > { %v4914_v36 = vpop.f32.mrb[45].mxu1  ;;  %v4920_v56 = vadd.f32 %v6753_v48, %v7808_v58 }
0x1b7d   : > { %v4915_v45 = vadd.f32 %v7808_v58, %v4914_v36 }
0x1b7e   : > { %6763 = vmatmul.mubr.msk.f32.vlgmr.msra.gmra.mrb[34].mxu0 %vm972_vm4, %v7940_v61  ;;  %v5074_v42 = vmul.f32 0.35355338, %v4920_v56 }
0x1b7f   : > { %v5073_v57 = vmul.f32 0.35355338, %v4915_v45 }
0x1b81   : > { %6780 = vmatprep.mubr.msk.f32.mxu0 %vm1218_vm5, %v5073_v57 }
0x1b83   : > { %v6775_v15 = vpop.f32.mrb[46].mxu1 }
0x1b84   : > { %v5064_v9 = vpop.f32.mrb[47].mxu1  ;;  %v5070_v4 = vadd.f32 %v6775_v15, %v7844_v27 }
0x1b85   : > { %v5065_v53 = vadd.f32 %v7844_v27, %v5064_v9 }
0x1b87   : > { %v7131_v40 = vpack.c.bf16 %v5070_v4, %v5065_v53 }
0x1b89   : > { %7133 = vmatprep.subr.msk.bf16.mxu1 %vm7576_vm11, %v7131_v40 }
0x1b8a   : > { %7136 = vmatpush3.bf16.msk.msra.mxu1 %vm7576_vm11, %v7131_v40 }
0x1b8b   : > { %7138 = vmatprep.subr.bf16.mxu1 %v7878_v13 }
0x1c51   : > { %v6764_v8 = vpop.f32.mrb[34].mxu0 }
0x1c52   : > { %v4995_v34 = vadd.f32 %v6764_v8, %v7813_v2  ;;  %v4989_v21 = vpop.f32.mrb[35].mxu0 }
0x1c53   : > { %v4990_v62 = vadd.f32 %v7813_v2, %v4989_v21 }
0x1c55   : > { %v7125_v60 = vpack.c.bf16 %v4995_v34, %v4990_v62 }
0x1c57   : > { %7127 = vmatprep.subr.msk.bf16.mxu0 %vm7539_vm6, %v7125_v60 }
0x1c58   : > { %7130 = vmatpush3.bf16.xpose.msk.msra.mxu0 %vm7539_vm6, %v7125_v60 }
0x1c59   : > { %6790 = vmatprep.subr.mxu0 %v7853_v51 }
0x1c5f   : > { %6781 = vmatmul.mubr.msk.f32.vlgmr.msra.gmra.mrb[36].mxu0 %vm1218_vm5, %v5074_v42 }
0x1c60   : > { %6791 = vmatpush3.msra.mxu0 %v7853_v51 }
0x1c61   : > { %7146 = vmatprep.subr.bf16.mxu0 %v7892_v49 }
0x1d32   : > { %v6782_v33 = vpop.f32.mrb[36].mxu0 }
0x1d33   : > { %v5159_v2 = vadd.f32 %v6782_v33, %v7429_v6  ;;  %v5153_v1 = vpop.f32.mrb[37].mxu0 }
0x1d34   : > { %v5154_v28 = vadd.f32 %v5153_v1, %v7407_v5 }
0x1d35   : > { %v5165_v35 = vsel %vm1310_vm8, %v5159_v2, -inf }
0x1d36   : > { %5166 = vmax.xlane.f32.xlu1 %v5165_v35  ;;  %v5162_v58 = vsel %vm1306_vm7, %v5154_v28, -inf }
0x1d37   : > { %5163 = vmax.xlane.f32.xlu0 %v5162_v58 }
0x1dc3   : > { %v5167_v46 = vpop.xlane.xlu1 %5166 }
0x1dc4   : > { %v5169_v52 = vsub.f32 %v5159_v2, %v5167_v46  ;;  %v5164_v39 = vpop.xlane.xlu0 %5163 }
0x1dc5   : > { %v5168_v11 = vsub.f32 %v5154_v28, %v5164_v39 }
0x1dc6   : > { %v5172_v59 = vmul.f32 1.442695, %v5169_v52 }
0x1dc7   : > { %v5170_v51 = vmul.f32 1.442695, %v5168_v11 }
0x1dc8   : > { %7243 = vpow2.f32 %v5172_v59 }
0x1dc9   : > { %7245 = vpow2.f32 %v5170_v51 }
0x1dd2   : > { %v7244_v31 = vpop.eup %7243 }
0x1dd3   : > { %v7246_v16 = vpop.eup %7245  ;;  %v5177_v6 = vsel %vm1310_vm8, %v7244_v31, 0.0 }
0x1dd4   : > { %5178 = vadd.xlane.f32.xlu1 %v5177_v6  ;;  %v5174_v5 = vsel %vm1306_vm7, %v7246_v16, 0.0 }
0x1dd5   : > { %5175 = vadd.xlane.f32.xlu0 %v5174_v5 }
0x1e61   : > { %v5179_v55 = vpop.xlane.xlu1 %5178 }
0x1e62   : > { %7247 = vrcp.f32 %v5179_v55  ;;  %v5176_v14 = vpop.xlane.xlu0 %5175 }
0x1e63   : > { %7249 = vrcp.f32 %v5176_v14 }
0x1e6c   : > { %v7248_v17 = vpop.eup %7247 }
0x1e6d   : > { %v7250_v32 = vpop.eup %7249  ;;  %v5183_v19 = vmul.f32 %v7248_v17, %v7244_v31 }
0x1e6e   : > { %v5182_v24 = vmul.f32 %v7250_v32, %v7246_v16 }
0x1e70   : > { %6787 = vmatprep.mubr.msk.f32.mxu1 %vm1306_vm7, %v5182_v24 }
0x1e71   : > { %6788 = vmatmul.mubr.msk.f32.vlgmr.msra.gmra.mrb[48].mxu1 %vm1306_vm7, %v5183_v19 }
0x1e72   : > { %7140 = vmatpush3.bf16.msra.mxu1 %v7878_v13 }
0x1e73   : > { %7142 = vmatprep.subr.bf16.mxu1 %v7884_v22 }
0x1e76   : > { %7144 = vmatpush3.bf16.msra.mxu1 %v7884_v22 }
0x1f44   : > { %v6789_v3 = vpop.f32.mrb[48].mxu1 }
0x1f45   : > { %v5259_v27 = vpop.f32.mrb[49].mxu1 }
0x1f46   : > { %6792 = vmatprep.mubr.msk.f32.mxu0 %vm1218_vm5, %v5259_v27 }
0x1f47   : > { %6793 = vmatmul.mubr.msk.f32.vlgmr.msra.gmra.mrb[28].mxu0 %vm1218_vm5, %v6789_v3 }
0x1f48   : > { %7148 = vmatpush3.bf16.msra.mxu0 %v7892_v49 }
0x1f49   : > { %7150 = vmatprep.subr.bf16.mxu0 %v7895_v54 }
0x1f4c   : > { %7152 = vmatpush3.bf16.msra.mxu0 %v7895_v54 }
0x1f4d   : > { %7154 = vmatprep.subr.bf16.mxu0 %v7902_v23 }
0x1f50   : > { %7156 = vmatpush3.bf16.msra.mxu0 %v7902_v23  ;;  %v6003_v23 = vld [vmem:[%s830_s3] ss:$0 sm:$0xff] }
0x1f51   : > { %7158 = vmatprep.subr.bf16.mxu0 %v7954_v63 }
0x1f54   : > { %7160 = vmatpush3.bf16.msra.mxu0 %v7954_v63 }
0x201a   : > { %v6794_v13 = vpop.f32.mrb[28].mxu0 }
0x201b   : > { %v5352_v22 = vadd.f32 %v6794_v13, %v7866_v10  ;;  %v5340_v47 = vpop.f32.mrb[29].mxu0 }
0x201c   : > { %v5351_v43 = vadd.f32 %v7866_v10, %v5340_v47  ;;  %v3285_v10 = vadd.f32 %v8003_v25, %v6003_v23 }
0x201d   : > { %v5354_v49 = vadd.f32 %v5352_v22, %v7940_v61 }
0x201e   : > { %v5353_v50 = vadd.f32 %v5351_v43, %v7929_v12  ;;  %v3280_v12 = vadd.f32 %v6003_v23, %v8005_v30  ;;  %v3289_v57 = vadd.f32 %v3285_v10, %v7927_v18 }
0x201f   : > { %v5358_v54 = vsel %vm3070_vm12, %v5354_v49, 0.0 }
0x2020   : > { %5359 = vadd.xlane.f32.xlu1 %v5358_v54  ;;  %v5355_v26 = vsel %vm972_vm4, %v5353_v50, 0.0  ;;  %v3288_v34 = vadd.f32 %v3280_v12, %v7924_v7  ;;  %v3293_v21 = vsel %vm3070_vm12, %v3289_v57, 0.0 }
0x2021   : > { %5356 = vadd.xlane.f32.xlu0 %v5355_v26 }
0x2022   : > { %v3290_v25 = vsel %vm972_vm4, %v3288_v34, 0.0 }
0x20ad   : > { %v5360_v63 = vpop.xlane.xlu1 %5359 }
0x20ae   : > { %v5362_v29 = vmul.f32 0.03125, %v5360_v63  ;;  %v5357_v44 = vpop.xlane.xlu0 %5356 }
0x20af   : > { %v5361_v38 = vmul.f32 0.03125, %v5357_v44 }
0x20b0   : > { %v5364_v61 = vsub.f32 %v5354_v49, %v5362_v29 }
0x20b1   : > { %v5363_v41 = vsub.f32 %v5353_v50, %v5361_v38 }
0x20b2   : > { %v5366_v48 = vmul.f32 %v5364_v61, %v5364_v61 }
0x20b3   : > { %v5365_v36 = vmul.f32 %v5363_v41, %v5363_v41 }
0x20b4   : > { %v5370_v45 = vsel %vm3070_vm12, %v5366_v48, 0.0 }
0x20b5   : > { %5371 = vadd.xlane.f32.xlu1 %v5370_v45  ;;  %v5367_v8 = vsel %vm972_vm4, %v5365_v36, 0.0  ;;  %v6007_v45 = vld [vmem:[%s836_s5] ss:$0 sm:$0xff] }
0x20b6   : > { %5368 = vadd.xlane.f32.xlu0 %v5367_v8 }
0x20b9   : > { %3294 = vadd.xlane.f32.xlu1 %v3293_v21 }
0x20ba   : > { %3291 = vadd.xlane.f32.xlu0 %v3290_v25 }
0x2142   : > { %v5372_v30 = vpop.xlane.xlu1 %5371 }
0x2143   : > { %v5374_v62 = vmul.f32 0.03125, %v5372_v30  ;;  %v5369_v60 = vpop.xlane.xlu0 %5368 }
0x2144   : > { %v5373_v56 = vmul.f32 0.03125, %v5369_v60 }
0x2145   : > { %v5376_v42 = vadd.f32 1e-05, %v5374_v62 }
0x2146   : > { %v5375_v33 = vadd.f32 1e-05, %v5373_v56 }
0x2147   : > { %7251 = vrsqrt.f32 %v5376_v42  ;;  %v3292_v16 = vpop.xlane.xlu0 %3291 }
0x2148   : > { %7253 = vrsqrt.f32 %v5375_v33 }
0x2151   : > { %v7252_v18 = vpop.eup %7251 }
0x2152   : > { %v7254_v2 = vpop.eup %7253  ;;  %v5380_v1 = vmul.f32 %v7252_v18, %v5364_v61 }
0x2153   : > { %v5379_v28 = vmul.f32 %v7254_v2, %v5363_v41  ;;  %v6006_v41 = vld [vmem:[%s833_s6] ss:$0 sm:$0xff] }
0x2154   : > { %v5382_v7 = vmul.f32 %v7912_v37, %v5380_v1 }
0x2155   : > { %v5381_v35 = vmul.f32 %v7912_v37, %v5379_v28  ;;  %v3295_v37 = vpop.xlane.xlu1 %3294 }
0x2156   : > { %v5384_v46 = vadd.f32 %v7919_v0, %v5382_v7  ;;  %v3297_v6 = vmul.f32 0.03125, %v3295_v37 }
0x2157   : > { %v5383_v58 = vadd.f32 %v7919_v0, %v5381_v35  ;;  %v3296_v0 = vmul.f32 0.03125, %v3292_v16 }
0x2158   : > { %v3299_v15 = vsub.f32 %v3289_v57, %v3297_v6 }
0x2159   : > { %6803 = vmatprep.mubr.msk.f32.mxu1 %vm972_vm4, %v5383_v58  ;;  %v3298_v53 = vsub.f32 %v3288_v34, %v3296_v0 }
0x215a   : > { %6804 = vmatmul.mubr.msk.f32.vlgmr.msra.gmra.mrb[50].mxu1 %vm972_vm4, %v5384_v46  ;;  %v3301_v17 = vmul.f32 %v3299_v15, %v3299_v15 }
0x215b   : > { %v3300_v24 = vmul.f32 %v3298_v53, %v3298_v53 }
0x215c   : > { %v3305_v19 = vsel %vm3070_vm12, %v3301_v17, 0.0 }
0x215d   : > { %v3302_v3 = vsel %vm972_vm4, %v3300_v24, 0.0 }
0x222d   : > { %v6805_v52 = vpop.f32.mrb[50].mxu1 }
0x222e   : > { %v5463_v39 = vadd.f32 %v6805_v52, %v7964_v20  ;;  %v5457_v11 = vpop.f32.mrb[51].mxu1 }
0x222f   : > { %v5458_v59 = vadd.f32 %v7964_v20, %v5457_v11 }
0x2230   : > { %v5467_v31 = vmax.f32 %v5463_v39, 0.0 }
0x2231   : > { %v5466_v51 = vmax.f32 %v5458_v59, 0.0 }
0x2233   : > { %6822 = vmatprep.mubr.msk.f32.mxu0 %vm3206_vm13, %v5466_v51 }
0x2234   : > { %6823 = vmatmul.mubr.msk.f32.vlgmr.msra.gmra.mrb[38].mxu0 %vm3206_vm13, %v5467_v31 }
0x2307   : > { %v6824_v5 = vpop.f32.mrb[38].mxu0 }
0x2308   : > { %v5546_v9 = vadd.f32 %v6824_v5, %v6003_v23  ;;  %v5540_v4 = vpop.f32.mrb[39].mxu0 }
0x2309   : > { %v5541_v40 = vadd.f32 %v6003_v23, %v5540_v4 }
0x230a   : > { %v5550_v55 = vadd.f32 %v5546_v9, %v5384_v46 }
0x230b   : > { %v5549_v14 = vadd.f32 %v5541_v40, %v5383_v58 }
0x230c   : > { %v5554_v20 = vsel %vm3070_vm12, %v5550_v55, 0.0 }
0x230d   : > { %5555 = vadd.xlane.f32.xlu1 %v5554_v20  ;;  %v5551_v32 = vsel %vm972_vm4, %v5549_v14, 0.0 }
0x230e   : > { %5552 = vadd.xlane.f32.xlu0 %v5551_v32 }
0x2311   : > { %3306 = vadd.xlane.f32.xlu1 %v3305_v19 }
0x2312   : > { %3303 = vadd.xlane.f32.xlu0 %v3302_v3 }
0x239a   : > { %v5556_v27 = vpop.xlane.xlu1 %5555 }
0x239b   : > { %v5558_v13 = vmul.f32 0.03125, %v5556_v27  ;;  %v5553_v22 = vpop.xlane.xlu0 %5552 }
0x239c   : > { %v5557_v47 = vmul.f32 0.03125, %v5553_v22 }
0x239d   : > { %v5560_v43 = vsub.f32 %v5550_v55, %v5558_v13 }
0x239e   : > { %v5559_v49 = vsub.f32 %v5549_v14, %v5557_v47  ;;  %v3307_v50 = vpop.xlane.xlu1 %3306 }
0x239f   : > { %v3309_v54 = vmul.f32 0.03125, %v3307_v50  ;;  %v3304_v26 = vpop.xlane.xlu0 %3303  ;;  %v5562_v23 = vmul.f32 %v5560_v43, %v5560_v43 }
0x23a0   : > { %v3308_v63 = vmul.f32 0.03125, %v3304_v26  ;;  %v5561_v29 = vmul.f32 %v5559_v49, %v5559_v49 }
0x23a1   : > { %v3311_v44 = vadd.f32 1e-05, %v3309_v54  ;;  %v5566_v38 = vsel %vm3070_vm12, %v5562_v23, 0.0 }
0x23a2   : > { %v3310_v10 = vadd.f32 1e-05, %v3308_v63  ;;  %5567 = vadd.xlane.f32.xlu1 %v5566_v38  ;;  %v5563_v61 = vsel %vm972_vm4, %v5561_v29, 0.0 }
0x23a3   : > { %7255 = vrsqrt.f32 %v3311_v44  ;;  %5564 = vadd.xlane.f32.xlu0 %v5563_v61 }
0x23a4   : > { %7257 = vrsqrt.f32 %v3310_v10 }
0x23ad   : > { %v7256_v12 = vpop.eup %7255 }
0x23ae   : > { %v7258_v48 = vpop.eup %7257  ;;  %v3315_v36 = vmul.f32 %v7256_v12, %v3299_v15 }
0x23af   : > { %v3314_v57 = vmul.f32 %v7258_v48, %v3298_v53 }
0x23b0   : > { %v3323_v8 = vmul.f32 %v6006_v41, %v3315_v36  ;;  %v6074_v36 = vld [vmem:[%s8329_s24] ss:$0 sm:$0xff] (!%p6072_p5) }
0x23b1   : > { %v3322_v34 = vmul.f32 %v6006_v41, %v3314_v57 }
0x23b2   : > { %v3331_v21 = vadd.f32 %v6007_v45, %v3323_v8 }
0x23b3   : > { %v3330_v25 = vadd.f32 %v6007_v45, %v3322_v34 }
0x23b4   : > { %3333 = vst.msk [vmem:[#allocation2 + $0x8] sm:$0x3] %vm3070_vm12, %v3331_v21 }
0x23b5   : > { %3332 = vst.msk [vmem:[#allocation2] sm:$0xff] %vm972_vm4, %v3330_v25 }
0x23bb   : > { %v5590_v11 = vld [vmem:[#allocation2 + $0x8] sm:$0x3] (!%p6072_p5) }
0x23bc   : > { %v5589_v52 = vld [vmem:[#allocation2] sm:$0xff] (!%p6072_p5)  ;;  %v5594_v37 = vsel (!%p6072_p5), %vm3070_vm12, %v5590_v11, 0.0 }
0x23bd   : > { %v5591_v59 = vsel (!%p6072_p5), %vm972_vm4, %v5589_v52, 0.0 }
0x23be   : > { %5592 = vadd.xlane.f32.xlu0 (!%p6072_p5), %v5591_v59 }
0x23c2   : > { %5595 = vadd.xlane.f32.xlu0 (!%p6072_p5), %v5594_v37 }
0x242f   : > { %v5568_v30 = vpop.xlane.xlu1 %5567 }
0x2430   : > { %v5570_v62 = vmul.f32 0.03125, %v5568_v30  ;;  %v5565_v60 = vpop.xlane.xlu0 %5564 }
0x2431   : > { %v5569_v56 = vmul.f32 0.03125, %v5565_v60 }
0x2432   : > { %v5572_v42 = vadd.f32 1e-05, %v5570_v62 }
0x2433   : > { %v5571_v33 = vadd.f32 1e-05, %v5569_v56 }
0x2434   : > { %7259 = vrsqrt.f32 %v5572_v42 }
0x2435   : > { %7261 = vrsqrt.f32 %v5571_v33 }
0x243e   : > { %v7260_v18 = vpop.eup %7259 }
0x243f   : > { %v7262_v2 = vpop.eup %7261  ;;  %v5576_v1 = vmul.f32 %v7260_v18, %v5560_v43 }
0x2440   : > { %v5575_v28 = vmul.f32 %v7262_v2, %v5559_v49  ;;  %5586 = sbr.rel (%p6072_p5) target bundleno = 9612 (0x258c), region = 104 }
0x2441   : > { %v5578_v7 = vmul.f32 %v6006_v41, %v5576_v1 }
0x2442   : > { %v5577_v35 = vmul.f32 %v6006_v41, %v5575_v28  ;;  %v6073_v41 = vld [vmem:[%s8328_s20] ss:$0 sm:$0xff] (!%p6072_p5) }
0x2443   : > { %v5580_v58 = vadd.f32 %v6007_v45, %v5578_v7 }
0x2444   : > { %v5579_v46 = vadd.f32 %v6007_v45, %v5577_v35 }
0x2445   : > { %5582 = vst.msk [vmem:[#allocation2 + $0x18] sm:$0x3] %vm3070_vm12, %v5580_v58 }
0x2446   : > { %5581 = vst.msk [vmem:[#allocation2 + $0x10] sm:$0xff] %vm972_vm4, %v5579_v46 }
0x244b   : > { %v5593_v6 = vpop.xlane.xlu0 %5592 }
0x244c   : > { %v5636_v31 = vld [vmem:[#allocation2 + $0x18] sm:$0x3]  ;;  %v5597_v5 = vmul.f32 0.03125, %v5593_v6 }
0x244d   : > { %v5635_v39 = vld [vmem:[#allocation2 + $0x10] sm:$0xff]  ;;  %v5640_v16 = vsel %vm3070_vm12, %v5636_v31, 0.0 }
0x244e   : > { %v5637_v51 = vsel %vm972_vm4, %v5635_v39, 0.0  ;;  %v5599_v9 = vsub.f32 %v5589_v52, %v5597_v5 }
0x244f   : > { %5638 = vadd.xlane.f32.xlu1 %v5637_v51  ;;  %v5596_v53 = vpop.xlane.xlu0 %5595 }
0x2450   : > { %v5598_v55 = vmul.f32 0.03125, %v5596_v53  ;;  %v5601_v20 = vmul.f32 %v5599_v9, %v5599_v9 }
0x2452   : > { %v5600_v32 = vsub.f32 %v5590_v11, %v5598_v55  ;;  %v5603_v19 = vsel %vm972_vm4, %v5601_v20, 0.0 }
0x2453   : > { %5641 = vadd.xlane.f32.xlu1 %v5640_v16  ;;  %5604 = vadd.xlane.f32.xlu0 %v5603_v19 }
0x2454   : > { %v5602_v27 = vmul.f32 %v5600_v32, %v5600_v32 }
0x2456   : > { %v5606_v22 = vsel %vm3070_vm12, %v5602_v27, 0.0 }
0x2457   : > { %5607 = vadd.xlane.f32.xlu1 %v5606_v22 }
0x24dc   : > { %v5639_v0 = vpop.xlane.xlu1 %5638 }
0x24dd   : > { %v5643_v15 = vmul.f32 0.03125, %v5639_v0 }
0x24df   : > { %v5645_v4 = vsub.f32 %v5635_v39, %v5643_v15 }
0x24e0   : > { %v5642_v40 = vpop.xlane.xlu1 %5641  ;;  %v5605_v43 = vpop.xlane.xlu0 %5604 }
0x24e1   : > { %v5644_v14 = vmul.f32 0.03125, %v5642_v40  ;;  %v5647_v17 = vmul.f32 %v5645_v4, %v5645_v4  ;;  %v5609_v49 = vmul.f32 0.03125, %v5605_v43 }
0x24e3   : > { %v5646_v24 = vsub.f32 %v5636_v31, %v5644_v14  ;;  %v5649_v3 = vsel %vm972_vm4, %v5647_v17, 0.0  ;;  %v5611_v50 = vadd.f32 1e-05, %v5609_v49 }
0x24e4   : > { %5650 = vadd.xlane.f32.xlu0 %v5649_v3  ;;  %v5608_v54 = vpop.xlane.xlu1 %5607 }
0x24e5   : > { %v5648_v13 = vmul.f32 %v5646_v24, %v5646_v24  ;;  %7263 = vrsqrt.f32 %v5611_v50  ;;  %v5610_v23 = vmul.f32 0.03125, %v5608_v54 }
0x24e7   : > { %v5652_v47 = vsel %vm3070_vm12, %v5648_v13, 0.0  ;;  %v5612_v29 = vadd.f32 1e-05, %v5610_v23 }
0x24e8   : > { %5653 = vadd.xlane.f32.xlu1 %v5652_v47 }
0x24e9   : > { %7265 = vrsqrt.f32 %v5612_v29 }
0x24ef   : > { %v7264_v12 = vpop.eup %7263 }
0x24f0   : > { %v5615_v48 = vmul.f32 %v7264_v12, %v5599_v9 }
0x24f2   : > { %v5623_v45 = vmul.f32 %v6073_v41, %v5615_v48 }
0x24f3   : > { %v7266_v57 = vpop.eup %7265 }
0x24f4   : > { %v5631_v34 = vadd.f32 %v6074_v36, %v5623_v45  ;;  %v5616_v21 = vmul.f32 %v7266_v57, %v5600_v32 }
0x24f6   : > { %5633 = vst.msk [vmem:[%s8330_s28] sm:$0xff] %vm972_vm4, %v5631_v34  ;;  %v5624_v30 = vmul.f32 %v6073_v41, %v5616_v21 }
0x24f8   : > { %v5632_v56 = vadd.f32 %v6074_v36, %v5624_v30 }
0x24fa   : > { %5634 = vst.msk [vmem:[%s8330_s28 + $0x8] sm:$0x3] %vm3070_vm12, %v5632_v56 }
0x2571   : > { %v5651_v26 = vpop.xlane.xlu0 %5650 }
0x2572   : > { %v5655_v63 = vmul.f32 0.03125, %v5651_v26 }
0x2574   : > { %v5657_v44 = vadd.f32 1e-05, %v5655_v63 }
0x2575   : > { %v5654_v38 = vpop.xlane.xlu1 %5653 }
0x2576   : > { %v5656_v10 = vmul.f32 0.03125, %v5654_v38  ;;  %7267 = vrsqrt.f32 %v5657_v44 }
0x2578   : > { %v5658_v61 = vadd.f32 1e-05, %v5656_v10 }
0x257a   : > { %7269 = vrsqrt.f32 %v5658_v61 }
0x2580   : > { %v7268_v8 = vpop.eup %7267 }
0x2581   : > { %v5661_v25 = vmul.f32 %v7268_v8, %v5645_v4 }
0x2583   : > { %v5663_v60 = vmul.f32 %v6073_v41, %v5661_v25 }
0x2584   : > { %v7270_v62 = vpop.eup %7269 }
0x2585   : > { %v5662_v42 = vmul.f32 %v7270_v62, %v5646_v24  ;;  %v5665_v33 = vadd.f32 %v6074_v36, %v5663_v60 }
0x2587   : > { %v5664_v18 = vmul.f32 %v6073_v41, %v5662_v42  ;;  %6075 = vst.msk [vmem:[%s8330_s28 + $0x10] sm:$0xff] %vm972_vm4, %v5665_v33 }
0x2589   : > { %v5666_v2 = vadd.f32 %v6074_v36, %v5664_v18 }
0x258b   : > { %6076 = vst.msk [vmem:[%s8330_s28 + $0x18] sm:$0x3] %vm3070_vm12, %v5666_v2 }
0x258c PF: > { %s8331_s17 = sld [smem:[#allocation3_spill]] }
0x2592   : > { %s29_s0 = sadd.s32 1, %s8331_s17  }
0x2593   : > { %p26_p6 = scmp.ge.s32.totalorder %s29_s0, 4  }
0x2595   :  { %28 = sbr.rel (!%p26_p6) target bundleno = 13 (0xd), region = 198 }

// kernel: transformer_forward.3
= control target key start
LH: loop header
LB: loop body
LE: loop exit
PB: predicated region body
PF: predicated region fallthrough
CT: control target
= control target key end

     0   :  { %s12065_s6 = smov 1   ;;  %s12066_s10 = smov 2   ;;  %s13463_s0 = inlined_call_operand.smem [shape: u32[33], index: -1, kind: input, shape index: {}] }
   0x1   :  { %s12109_s5 = sld [smem:[%s13463_s0]]   ;;  %s12067_s14 = smov 3  }
   0x2   :  { %s12114_s9 = sld [smem:[%s13463_s0 + %s12065_s6]]   ;;  %s12068_s18 = smov 4  }
   0x3   :  { %s12119_s13 = sld [smem:[%s13463_s0 + %s12066_s10]]   ;;  %s12069_s22 = smov 5  }
   0x4   :  { %s12124_s17 = sld [smem:[%s13463_s0 + %s12067_s14]]   ;;  %s12070_s26 = smov 6  }
   0x5   :  { %s12129_s21 = sld [smem:[%s13463_s0 + %s12068_s18]]   ;;  %s12071_s30 = smov 7  }
   0x6   :  { %s12134_s25 = sld [smem:[%s13463_s0 + %s12069_s22]]   ;;  %s12072_s4 = smov 8  }
   0x7   :  { %13493 = sst [smem:[#allocation4_spill]] %s12109_s5  ;;  %s12073_s10 = smov 9  }
   0x8   :  { %13494 = sst [smem:[#allocation5_spill]] %s12114_s9  ;;  %s12074_s15 = smov 10  }
   0x9   :  { %13495 = sst [smem:[#allocation6_spill]] %s12119_s13  ;;  %s12075_s20 = smov 11  }
   0xa   :  { %13496 = sst [smem:[#allocation7_spill]] %s12124_s17  ;;  %s12077_s1 = smov 13  }
   0xb   :  { %13497 = sst [smem:[#allocation8_spill]] %s12129_s21  ;;  %s12078_s7 = smov 14  }
   0xc   :  { %13498 = sst [smem:[#allocation9_spill]] %s12134_s25  ;;  %s12080_s22 = smov 16  }
   0xd   :  { %s12139_s29 = sld [smem:[%s13463_s0 + %s12070_s26]]   ;;  %s12076_s26 = smov 12  }
   0xe   :  { %s12144_s3 = sld [smem:[%s13463_s0 + %s12071_s30]]   ;;  %s12081_s28 = smov 17  }
   0xf   :  { %s12149_s8 = sld [smem:[%s13463_s0 + %s12072_s4]]   ;;  %s12096_s23 = smov 32  }
  0x10   :  { %s12154_s14 = sld [smem:[%s13463_s0 + %s12073_s10]]  }
  0x11   :  { %s12159_s19 = sld [smem:[%s13463_s0 + %s12074_s15]]   ;;  %s12079_s15 = smov 15  }
  0x12   :  { %s12164_s24 = sld [smem:[%s13463_s0 + %s12075_s20]]  }
  0x13   :  { %13499 = sst [smem:[#allocation10_spill]] %s12139_s29 }
  0x14   :  { %13500 = sst [smem:[#allocation11_spill]] %s12144_s3 }
  0x15   :  { %13501 = sst [smem:[#allocation12_spill]] %s12149_s8 }
  0x16   :  { %13502 = sst [smem:[#allocation13_spill]] %s12154_s14 }
  0x17   :  { %13503 = sst [smem:[#allocation14_spill]] %s12159_s19 }
  0x18   :  { %13504 = sst [smem:[#allocation15_spill]] %s12164_s24 }
  0x19   :  { %s12169_s30 = sld [smem:[%s13463_s0 + %s12076_s26]]  }
  0x1a   :  { %s12174_s6 = sld [smem:[%s13463_s0 + %s12077_s1]]  }
  0x1b   :  { %s12179_s12 = sld [smem:[%s13463_s0 + %s12078_s7]]   ;;  %s12082_s7 = smov 18  }
  0x1c   :  { %s12184_s20 = sld [smem:[%s13463_s0 + %s12079_s15]]   ;;  %s12083_s15 = smov 19  }
  0x1d   :  { %s12189_s27 = sld [smem:[%s13463_s0 + %s12080_s22]]   ;;  %s12084_s22 = smov 20  }
  0x1e   :  { %s12194_s4 = sld [smem:[%s13463_s0 + %s12081_s28]]   ;;  %s12085_s28 = smov 21  }
  0x1f   :  { %13505 = sst [smem:[#allocation16_spill]] %s12169_s30 }
  0x20   :  { %13506 = sst [smem:[#allocation17_spill]] %s12174_s6 }
  0x21   :  { %13507 = sst [smem:[#allocation18_spill]] %s12179_s12 }
  0x22   :  { %13508 = sst [smem:[#allocation19_spill]] %s12184_s20 }
  0x23   :  { %13509 = sst [smem:[#allocation20_spill]] %s12189_s27 }
  0x24   :  { %13510 = sst [smem:[#allocation21_spill]] %s12194_s4 }
  0x25   :  { %s12199_s9 = sld [smem:[%s13463_s0 + %s12082_s7]]   ;;  %s12086_s7 = smov 22  }
  0x26   :  { %s12204_s5 = sld [smem:[%s13463_s0 + %s12083_s15]]   ;;  %s12087_s15 = smov 23  }
  0x27   :  { %s12209_s27 = sld [smem:[%s13463_s0 + %s12084_s22]]   ;;  %s12088_s22 = smov 24  }
  0x28   :  { %s12214_s4 = sld [smem:[%s13463_s0 + %s12085_s28]]   ;;  %s12089_s28 = smov 25  }
  0x2b   :  { %13511 = sst [smem:[#allocation22_spill]] %s12199_s9 }
  0x2c   :  { %13512 = sst [smem:[#allocation23_spill]] %s12204_s5 }
  0x2d   :  { %13513 = sst [smem:[#allocation24_spill]] %s12209_s27 }
  0x2e   :  { %13514 = sst [smem:[#allocation25_spill]] %s12214_s4 }
  0x2f   :  { %s12219_s9 = sld [smem:[%s13463_s0 + %s12086_s7]]   ;;  %s12090_s7 = smov 26  }
  0x30   :  { %s12224_s5 = sld [smem:[%s13463_s0 + %s12087_s15]]   ;;  %s12091_s15 = smov 27  }
  0x31   :  { %s12229_s27 = sld [smem:[%s13463_s0 + %s12088_s22]]   ;;  %s12092_s22 = smov 28  }
  0x32   :  { %s12234_s4 = sld [smem:[%s13463_s0 + %s12089_s28]]   ;;  %s12093_s28 = smov 29  }
  0x35   :  { %13515 = sst [smem:[#allocation26_spill]] %s12219_s9 }
  0x36   :  { %13516 = sst [smem:[#allocation27_spill]] %s12224_s5 }
  0x37   :  { %13517 = sst [smem:[#allocation28_spill]] %s12229_s27 }
  0x38   :  { %13518 = sst [smem:[#allocation29_spill]] %s12234_s4 }
  0x39   :  { %s12239_s9 = sld [smem:[%s13463_s0 + %s12090_s7]]   ;;  %s12094_s7 = smov 30  }
  0x3a   :  { %s12244_s5 = sld [smem:[%s13463_s0 + %s12091_s15]]   ;;  %s12095_s15 = smov 31  }
  0x3b   :  { %s12249_s27 = sld [smem:[%s13463_s0 + %s12092_s22]]  }
  0x3c   :  { %s12254_s4 = sld [smem:[%s13463_s0 + %s12093_s28]]   ;;  %s12269_s28 = smov 0  }
  0x3f   :  { %13519 = sst [smem:[#allocation30_spill]] %s12239_s9 }
  0x40   :  { %13520 = sst [smem:[#allocation31_spill]] %s12244_s5 }
  0x41   :  { %13521 = sst [smem:[#allocation32_spill]] %s12249_s27 }
  0x42   :  { %13522 = sst [smem:[#allocation33_spill]] %s12254_s4 }
  0x43   :  { %s12259_s9 = sld [smem:[%s13463_s0 + %s12094_s7]]  }
  0x44   :  { %s9887_s5 = sld [smem:[%s13463_s0 + %s12095_s15]]  }
  0x45   :  { %s12267_s27 = sld [smem:[%s13463_s0 + %s12096_s23]]  }
  0x49   :  { %13523 = sst [smem:[#allocation34_spill]] %s12259_s9 }
  0x4a   :  { %v70_v0 = vstv %s9887_s5 }
  0x4b   :  { %13524 = sst [smem:[#allocation35_spill]] %s12267_s27  ;;  %71 = vst [vmem:[#allocation3] sm:$0x1] %v70_v0 }
  0x4c LB: > { %13525 = sst [smem:[#allocation36_spill]] %s12063_s28  ;;  %s12275_s1 = sadd.s32 4294967295, %s12063_s28   ;;  %s12063_s28 = sphi %s12269_s28, %s77_s28  }
  0x4d   : > { %p9892_p0 = scmp.ge.s32.totalorder %s12063_s28, 1  ;;  %p1116_p1 = scmp.lt.s32.totalorder %s12063_s28, 3 }
  0x4f   : > { %p1117_p2 = pnand %p9892_p0, %p1116_p1 }
  0x51   : > { %1120 = sbr.rel (%p1117_p2) target bundleno = 18085 (0x46a5), region = 148 }
  0x58   : > { %s13526_s13 = sld [smem:[#allocation6_spill]]  ;;  %s13527_s17 = sld [smem:[#allocation7_spill]]  ;;  %v1396_v1 = vlaneseq  ;;  %v13481_v4 = vmov 0.0  }
  0x59   : > { %s13528_s21 = sld [smem:[#allocation8_spill]]  ;;  %s13529_s25 = sld [smem:[#allocation9_spill]] }
  0x5a   : > { %s13530_s29 = sld [smem:[#allocation10_spill]]  ;;  %s13531_s3 = sld [smem:[#allocation11_spill]]  ;;  %v1397_v2 = vshrl.u32 %v1396_v1, 7  ;;  %v1399_v3 = vand.u32 127, %v1396_v1 }
  0x5b   : > { %p1292_p3 = scmp.lt.s32.totalorder %s12275_s1, 1  ;;  %s13532_s14 = sld [smem:[#allocation13_spill]] }
  0x5c   : > { %s13533_s8 = sld [smem:[#allocation12_spill]]  ;;  %s13534_s19 = sld [smem:[#allocation14_spill]]  ;;  %vm1400_vm0 = vcmp.gt.s32.totalorder %v1399_v3, %v1397_v2 }
  0x5d   : > { %s12281_s0 = scalar_select %p1292_p3, %s12275_s1, 1  ;;  %v12292_v5 = vsel %vm1400_vm0, -1e+30, %v13481_v4 }
  0x5e   : > { %s13535_s24 = sld [smem:[#allocation15_spill]]  ;;  %s13536_s30 = sld [smem:[#allocation16_spill]] }
  0x5f   : > { %s10208_s5 = sshll.u32 %s12281_s0, 7  ;;  %s9899_s2 = sshll.u32 %s12281_s0, 2 }
  0x60   : > { %s13537_s6 = sld [smem:[#allocation17_spill]]  ;;  %s13538_s12 = sld [smem:[#allocation18_spill]] }
  0x61   : > { %s12286_s7 = scalar_lea.vmem %s13526_s13, %s10208_s5  ;;  %s13540_s20 = sld [smem:[#allocation19_spill]] }
  0x62   : > { %13539 = sst [smem:[#allocation37_spill]] %s12286_s7  ;;  %s12289_s10 = scalar_lea.vmem %s13527_s17, %s10208_s5 }
  0x63   : > { %13541 = sst [smem:[#allocation38_spill]] %s12289_s10  ;;  %s13542_s11 = sld [smem:[#allocation20_spill]] }
  0x64   : > { %s13543_s15 = sld [smem:[#allocation21_spill]]  ;;  %s13544_s16 = sld [smem:[#allocation22_spill]] }
  0x65   : > { %s12295_s18 = scalar_lea.vmem %s13528_s21, %s10208_s5  ;;  %s13546_s23 = sld [smem:[#allocation23_spill]] }
  0x66   : > { %13545 = sst [smem:[#allocation39_spill]] %s12295_s18  ;;  %s12298_s22 = scalar_lea.vmem %s13529_s25, %s9899_s2 }
  0x67   : > { %13547 = sst [smem:[#allocation40_spill]] %s12298_s22  ;;  %s12301_s13 = scalar_lea.vmem %s13530_s29, %s9899_s2 }
  0x68   : > { %s13548_s26 = sld [smem:[#allocation24_spill]]  ;;  %13549 = sst [smem:[#allocation41_spill]] %s12301_s13 }
  0x69   : > { %s13550_s17 = sld [smem:[#allocation25_spill]]  ;;  %s12304_s28 = scalar_lea.vmem %s13531_s3, %s9899_s2 }
  0x6a   : > { %13551 = sst [smem:[#allocation42_spill]] %s12304_s28  ;;  %s10211_s9 = sshll.u32 %s12281_s0, 5 }
  0x6b   : > { %s13552_s27 = sld [smem:[#allocation26_spill]]  ;;  %s13553_s4 = sld [smem:[#allocation27_spill]] }
  0x6c   : > { %s12309_s10 = scalar_lea.vmem %s13532_s14, %s12281_s0  ;;  %s12312_s21 = scalar_lea.vmem %s13533_s8, %s10211_s9 }
  0x6d   : > { %13554 = sst [smem:[#allocation43_spill]] %s12309_s10  ;;  %s13555_s18 = sld [smem:[#allocation28_spill]] }
  0x6e   : > { %s12316_s25 = scalar_lea.vmem %s13534_s19, %s12281_s0  ;;  %s13557_s22 = sld [smem:[#allocation29_spill]] }
  0x6f   : > { %13556 = sst [smem:[#allocation44_spill]] %s12316_s25  ;;  %s12320_s29 = scalar_lea.vmem %s13535_s24, %s12281_s0 }
  0x70   : > { %13558 = sst [smem:[#allocation45_spill]] %s12320_s29  ;;  %s13559_s13 = sld [smem:[#allocation30_spill]] }
  0x71   : > { %s12323_s3 = scalar_lea.vmem %s13536_s30, %s10208_s5  ;;  %s13561_s28 = sld [smem:[#allocation31_spill]] }
  0x72   : > { %13560 = sst [smem:[#allocation46_spill]] %s12323_s3  ;;  %s12326_s7 = scalar_lea.vmem %s13537_s6, %s10208_s5 }
  0x73   : > { %s12329_s14 = scalar_lea.vmem %s13538_s12, %s10208_s5  ;;  %s12332_s10 = scalar_lea.vmem %s13540_s20, %s9899_s2 }
  0x74   : > { %13562 = sst [smem:[#allocation47_spill]] %s12329_s14  ;;  %s12335_s8 = scalar_lea.vmem %s13542_s11, %s9899_s2 }
  0x75   : > { %s12338_s19 = scalar_lea.vmem %s13543_s15, %s9899_s2  ;;  %s12341_s25 = scalar_lea.vmem %s13544_s16, %s10211_s9 }
  0x76   : > { %s12345_s24 = scalar_lea.vmem %s13546_s23, %s12281_s0  ;;  %s12349_s29 = scalar_lea.vmem %s13548_s26, %s12281_s0 }
  0x77   : > { %s12353_s30 = scalar_lea.vmem %s13550_s17, %s12281_s0  ;;  %s12356_s3 = scalar_lea.vmem %s13552_s27, %s10211_s9 }
  0x78   : > { %s12360_s6 = scalar_lea.vmem %s13553_s4, %s12281_s0  ;;  %s10217_s5 = sshll.u32 %s12281_s0, 6 }
  0x79   : > { %s12364_s12 = scalar_lea.vmem %s13555_s18, %s10217_s5  ;;  %s1389_s20 = scalar_lea.vmem %s13557_s22, %s12281_s0 }
  0x7a   : > { %s1392_s11 = scalar_lea.vmem %s13559_s13, %s12281_s0  ;;  %s1395_s14 = scalar_lea.vmem %s13561_s28, %s12281_s0 }
  0x7b   : > { %p9919_p4 = scmp.ne.s32.totalorder %s12275_s1, 0 }
  0x7c   : > { %s13563_s2 = sld [smem:[#allocation4_spill]] (!%p9919_p4)  ;;  %vm1408_vm1 = vcmask (!%p9919_p4), 261120  }
  0x7d   : > { %1405 = sbr.rel (%p9919_p4) target bundleno = 132 (0x84), region = 152 }
  0x82   : > { %v1406_v6 = vld [vmem:[%s13563_s2] sm:$0xff] (!%p9919_p4)  ;;  %v1407_v7 = vld [vmem:[%s13563_s2 + $0x8] sm:$0xff] (!%p9919_p4) }
  0x83   : > { %1409 = vst.msk [vmem:[#allocation2] sm:$0xff] (!%p9919_p4), %vm1408_vm1, %v1406_v6  ;;  %1410 = vst.msk [vmem:[#allocation2 + $0x8] sm:$0xff] (!%p9919_p4), %vm1408_vm1, %v1407_v7 }
  0x84 PF: > { %s13564_s9 = sld [smem:[#allocation37_spill]]  ;;  %s13565_s17 = sld [smem:[#allocation38_spill]]  ;;  %v13479_v11 = vmov 0.0|0.0   ;;  %vm12099_vm2 = vmmov 0   ;;  %vm1612_vm3 = vcmask 261120   ;;  %vm1839_vm4 = vcmask 64512  }
  0x85   : > { %11474 = vmatprep.subr.bf16.mxu0 %v13479_v11  ;;  %11480 = vmatprep.subr.bf16.mxu1 %v13479_v11  ;;  %s13566_s13 = sld [smem:[#allocation39_spill]]  ;;  %s13567_s27 = sld [smem:[#allocation40_spill]]  ;;  %vm12706_vm5 = vmpackc.low %vm1839_vm4, %vm1839_vm4  ;;  %vm3824_vm6 = vcmask 80896   ;;  %vm3839_vm7 = vcmask 1041408   ;;  %vm12100_vm8 = vmmov 1   ;;  %vm5543_vm10 = vcmask 523264  }
  0x86   : > { %10622 = vmatprep.mubr.msk.f32.mxu0 %vm12099_vm2, %v13481_v4  ;;  %10633 = vmatprep.mubr.msk.f32.mxu1 %vm12099_vm2, %v13481_v4  ;;  %s13568_s4 = sld [smem:[#allocation41_spill]]  ;;  %s13569_s28 = sld [smem:[#allocation42_spill]]  ;;  %vm12753_vm9 = vmpackc.low %vm3839_vm7, %vm12100_vm8 }
  0x87   : > { %s13570_s15 = sld [smem:[#allocation43_spill]]  ;;  %s13571_s16 = sld [smem:[#allocation5_spill]] }
  0x88   : > { %s13572_s18 = sld [smem:[#allocation46_spill]]  ;;  %s13573_s23 = sld [smem:[#allocation44_spill]] }
  0x89   : > { %s13574_s22 = sld [smem:[#allocation45_spill]]  ;;  %s13577_s26 = sld [smem:[#allocation47_spill]] }
  0x8a   : > { %v1411_v8 = vld [vmem:[%s13564_s9] sm:$0xff]  ;;  %v1412_v9 = vld [vmem:[%s13564_s9 + $0x8] sm:$0xff]  ;;  %v1413_v14 = vld [vmem:[%s13564_s9 + $0x10] sm:$0xff]  ;;  %p10200_p5 = scmp.ne.s32.totalorder %s12275_s1, 1 }
  0x8b   : > { %v1430_v10 = vld [vmem:[%s13565_s17] sm:$0xff]  ;;  %v12380_v12 = vpack.c.bf16 %v1412_v9, %v1411_v8  ;;  %v1431_v13 = vld [vmem:[%s13565_s17 + $0x8] sm:$0xff]  ;;  %v1414_v15 = vld [vmem:[%s13564_s9 + $0x18] sm:$0xff]  ;;  %vm9534_vm11 = vcmask (!%p10200_p5), 7168  }
  0x8c   : > { %v12385_v16 = vpack.c.bf16 %v1431_v13, %v1430_v10  ;;  %v1432_v17 = vld [vmem:[%s13565_s17 + $0x10] sm:$0xff]  ;;  %v1433_v18 = vld [vmem:[%s13565_s17 + $0x18] sm:$0xff]  ;;  %v12394_v19 = vpack.c.bf16 %v1414_v15, %v1413_v14  ;;  %v1449_v21 = vld [vmem:[%s13566_s13] sm:$0xff] }
  0x8d   : > { %11476 = vmatpush3.bf16.msra.mxu0 %v12380_v12  ;;  %v12398_v20 = vpack.c.bf16 %v1433_v18, %v1432_v17  ;;  %v1450_v22 = vld [vmem:[%s13566_s13 + $0x8] sm:$0xff]  ;;  %v12404_v23 = vld [vmem:[#allocation2] sm:$0xff]  ;;  %v1451_v25 = vld [vmem:[%s13566_s13 + $0x10] sm:$0xff] }
  0x8e   : > { %11482 = vmatpush3.bf16.msra.mxu1 %v12385_v16  ;;  %11477 = vmatprep.subr.bf16.mxu0 %v13479_v11  ;;  %v12406_v24 = vpack.c.bf16 %v1450_v22, %v1449_v21  ;;  %v1452_v26 = vld [vmem:[%s13566_s13 + $0x18] sm:$0xff]  ;;  %v10016_v28 = vld [vmem:[%s13567_s27] ss:$0 sm:$0xff]  ;;  %v9921_v51 = vld [vmem:[%s13564_s9 + $0x28] sm:$0xff] }
  0x8f   : > { %11483 = vmatprep.subr.bf16.mxu1 %v13479_v11  ;;  %v12418_v27 = vpack.c.bf16 %v1452_v26, %v1451_v25  ;;  %v10018_v29 = vld [vmem:[%s13568_s4] ss:$0 sm:$0xff]  ;;  %v9922_v53 = vld [vmem:[%s13564_s9 + $0x30] sm:$0xff]  ;;  %v9923_v54 = vld [vmem:[%s13564_s9 + $0x38] sm:$0xff] }
  0x90   : > { %v10020_v37 = vld [vmem:[%s13569_s28] ss:$0 sm:$0xff]  ;;  %v12451_v55 = vpack.c.bf16 %v9923_v54, %v9922_v53  ;;  %v9933_v58 = vld [vmem:[%s13565_s17 + $0x28] sm:$0xff]  ;;  %v9934_v62 = vld [vmem:[%s13565_s17 + $0x30] sm:$0xff] }
  0x91   : > { %11479 = vmatpush3.bf16.msra.mxu0 %v12394_v19  ;;  %v9920_v50 = vld [vmem:[%s13564_s9 + $0x20] sm:$0xff]  ;;  %v9935_v63 = vld [vmem:[%s13565_s17 + $0x38] sm:$0xff]  ;;  %v9945_v18 = vld [vmem:[%s13566_s13 + $0x28] sm:$0xff] }
  0x92   : > { %11485 = vmatpush3.bf16.msra.mxu1 %v12398_v20  ;;  %11486 = vmatprep.subr.bf16.mxu0 %v13479_v11  ;;  %v12445_v52 = vpack.c.bf16 %v9921_v51, %v9920_v50  ;;  %v9932_v57 = vld [vmem:[%s13565_s17 + $0x20] sm:$0xff]  ;;  %v12467_v0 = vpack.c.bf16 %v9935_v63, %v9934_v62  ;;  %v9946_v21 = vld [vmem:[%s13566_s13 + $0x30] sm:$0xff]  ;;  %v9947_v25 = vld [vmem:[%s13566_s13 + $0x38] sm:$0xff] }
  0x93   : > { %10652 = vmatprep.subr.mxu1 %v13481_v4  ;;  %v12461_v60 = vpack.c.bf16 %v9933_v58, %v9932_v57  ;;  %v10025_v7 = vld [vmem:[%s13567_s27 + $0x1] ss:$0 sm:$0xff]  ;;  %v12492_v26 = vpack.c.bf16 %v9947_v25, %v9946_v21  ;;  %v9939_v50 = vld [vmem:[%s13565_s17 + $0x58] sm:$0xff]  ;;  %v9925_v54 = vld [vmem:[%s13564_s9 + $0x48] sm:$0xff] }
  0x94   : > { %10623 = vmatmul.mubr.msk.f32.vlgmr.msra.gmra.mrb[0].mxu0 %vm1612_vm3, %v12404_v23  ;;  %v10027_v9 = vld [vmem:[%s13568_s4 + $0x1] ss:$0 sm:$0xff]  ;;  %v9926_v57 = vld [vmem:[%s13564_s9 + $0x50] sm:$0xff]  ;;  %v9927_v58 = vld [vmem:[%s13564_s9 + $0x58] sm:$0xff] }
  0x95   : > { %10634 = vmatmul.mubr.msk.f32.vlgmr.msra.gmra.mrb[0].mxu1 %vm1612_vm3, %v12404_v23  ;;  %11488 = vmatpush3.bf16.msra.mxu0 %v12406_v24  ;;  %v9944_v17 = vld [vmem:[%s13566_s13 + $0x20] sm:$0xff]  ;;  %v12540_v62 = vpack.c.bf16 %v9927_v58, %v9926_v57  ;;  %v9949_v25 = vld [vmem:[%s13566_s13 + $0x48] sm:$0xff]  ;;  %v9930_v57 = vld [vmem:[%s13564_s9 + $0x70] sm:$0xff] }
  0x96   : > { %11489 = vmatprep.subr.bf16.mxu0 %v13479_v11  ;;  %10644 = vmatprep.mubr.msk.f32.mxu0 %vm12099_vm2, %v13481_v4  ;;  %v12488_v22 = vpack.c.bf16 %v9945_v18, %v9944_v17  ;;  %v9924_v53 = vld [vmem:[%s13564_s9 + $0x40] sm:$0xff]  ;;  %v9931_v58 = vld [vmem:[%s13564_s9 + $0x78] sm:$0xff] }
  0x97   : > { %10654 = vmatprep.mubr.msk.f32.mxu1 %vm12099_vm2, %v13481_v4  ;;  %v9948_v21 = vld [vmem:[%s13566_s13 + $0x40] sm:$0xff] }
  0x99   : > { %11491 = vmatpush3.bf16.msra.mxu0 %v12418_v27 }
  0x9a   : > { %10647 = vmatprep.subr.mxu0 %v13481_v4 }
  0x9c   : > { %10645 = vmatmul.mubr.msk.f32.vlgmr.msra.gmra.mrb[2].mxu0 %vm1612_vm3, %v12404_v23 }
  0x9d   : > { %10649 = vmatprep.mubr.msk.f32.mxu0 %vm12099_vm2, %v13481_v4 }
 0x167   : > { %v1682_v30 = vpop.f32.mrb[0].mxu0 }
 0x168   : > { %v1683_v31 = vadd.f32 %v10016_v28, %v1682_v30  ;;  %v1758_v32 = vpop.f32.mrb[0].mxu1  ;;  %v10624_v33 = vpop.f32.mrb[1].mxu0 }
 0x169   : > { %v1759_v34 = vadd.f32 %v10018_v29, %v1758_v32  ;;  %v10635_v35 = vpop.f32.mrb[1].mxu1 }
 0x16a   : > { %v1838_v36 = vmul.f32 0.35355338, %v1683_v31 }
 0x16b   : > { %10648 = vmatpush3.xpose.msk.msra.mxu0 %vm1839_vm4, %v1759_v34 }
 0x16c   : > { %11492 = vmatprep.subr.bf16.mxu0 %v13479_v11 }
 0x16e   : > { %10650 = vmatmul.mubr.msk.f32.vlgmr.msra.gmra.mrb[4].mxu0 %vm1839_vm4, %v1838_v36 }
 0x16f   : > { %v1834_v38 = vpop.f32.mrb[2].mxu0  ;;  %10665 = vmatprep.mubr.msk.f32.mxu0 %vm12099_vm2, %v13481_v4  ;;  %11494 = vmatpush3.bf16.msra.mxu0 %v12445_v52 }
 0x170   : > { %v1835_v39 = vadd.f32 %v10020_v37, %v1834_v38  ;;  %v10646_v40 = vpop.f32.mrb[3].mxu0  ;;  %11495 = vmatprep.subr.bf16.mxu0 %v13479_v11  ;;  %v10029_v38 = vld [vmem:[%s13569_s28 + $0x1] ss:$0 sm:$0xff] }
 0x172   : > { %10653 = vmatpush3.msra.mxu1 %v1835_v39 }
 0x173   : > { %11498 = vmatprep.subr.bf16.mxu1 %v13479_v11  ;;  %11497 = vmatpush3.bf16.msra.mxu0 %v12451_v55 }
 0x174   : > { %11504 = vmatprep.subr.bf16.mxu0 %v13479_v11 }
 0x176   : > { %10666 = vmatmul.mubr.msk.f32.vlgmr.msra.gmra.mrb[6].mxu0 %vm1612_vm3, %v12404_v23 }
 0x177   : > { %10687 = vmatprep.mubr.msk.f32.mxu0 %vm12099_vm2, %v13481_v4  ;;  %11506 = vmatpush3.bf16.msra.mxu0 %v12488_v22 }
 0x178   : > { %11507 = vmatprep.subr.bf16.mxu0 %v13479_v11 }
 0x17b   : > { %11509 = vmatpush3.bf16.msra.mxu0 %v12492_v26 }
 0x17c   : > { %10700 = vmatprep.subr.mxu0 %v13481_v4 }
 0x17e   : > { %10688 = vmatmul.mubr.msk.f32.vlgmr.msra.gmra.mrb[8].mxu0 %vm1612_vm3, %v12404_v23 }
 0x17f   : > { %10702 = vmatprep.mubr.msk.f32.mxu0 %vm12099_vm2, %v13481_v4 }
 0x241   : > { %v1912_v41 = vpop.f32.mrb[4].mxu0 }
 0x242   : > { %v1913_v42 = vadd.f32 %v1912_v41, %v12292_v5  ;;  %v10651_v43 = vpop.f32.mrb[5].mxu0  ;;  %v9965_v41 = vld [vmem:[%s12312_s21 + $0x8] sm:$0xff] }
 0x243   : > { %10701 = vmatpush3.msra.mxu0 %v9965_v41 }
 0x244   : > { %v1916_v44 = vsel %vm1839_vm4, %v1913_v42, -inf  ;;  %11510 = vmatprep.subr.bf16.mxu0 %v13479_v11 }
 0x245   : > { %1917 = vmax.xlane.f32.xlu0 %v1916_v44 }
 0x249   : > { %v2072_v1 = vpop.f32.mrb[6].mxu0 }
 0x24a   : > { %v10667_v2 = vpop.f32.mrb[7].mxu0  ;;  %v2073_v8 = vadd.f32 %v10025_v7, %v2072_v1 }
 0x24b   : > { %v10038_v2 = vld [vmem:[%s13568_s4 + $0x2] ss:$0 sm:$0xff] }
 0x24c   : > { %v2228_v15 = vmul.f32 0.35355338, %v2073_v8 }
 0x251   : > { %v2224_v37 = vpop.f32.mrb[8].mxu0 }
 0x252   : > { %v10689_v39 = vpop.f32.mrb[9].mxu0  ;;  %v2225_v40 = vadd.f32 %v10029_v38, %v2224_v37 }
 0x2d2   : > { %v1918_v45 = vpop.xlane.xlu0 %1917 }
 0x2d3   : > { %v1919_v46 = vsub.f32 %v1913_v42, %v1918_v45  ;;  %v1489_v45 = vld [vmem:[%s12312_s21] sm:$0xff] }
 0x2d5   : > { %v1920_v47 = vmul.f32 1.442695, %v1919_v46  ;;  %v9936_v46 = vld [vmem:[%s13565_s17 + $0x40] sm:$0xff] }
 0x2d7   : > { %11938 = vpow2.f32 %v1920_v47  ;;  %v9937_v47 = vld [vmem:[%s13565_s17 + $0x48] sm:$0xff] }
 0x2e1   : > { %v11939_v48 = vpop.eup %11938 }
 0x2e2   : > { %v1922_v49 = vsel %vm1839_vm4, %v11939_v48, 0.0 }
 0x2e3   : > { %1923 = vadd.xlane.f32.xlu0 %v1922_v49  ;;  %v9938_v49 = vld [vmem:[%s13565_s17 + $0x50] sm:$0xff] }
 0x2e4   : > { %v12524_v51 = vpack.c.bf16 %v9939_v50, %v9938_v49  ;;  %v9928_v50 = vld [vmem:[%s13564_s9 + $0x60] sm:$0xff] }
 0x370   : > { %v1924_v56 = vpop.xlane.xlu0 %1923 }
 0x371   : > { %11940 = vrcp.f32 %v1924_v56  ;;  %v12534_v56 = vpack.c.bf16 %v9925_v54, %v9924_v53  ;;  %v9929_v53 = vld [vmem:[%s13564_s9 + $0x68] sm:$0xff] }
 0x372   : > { %v12588_v54 = vpack.c.bf16 %v9929_v53, %v9928_v50  ;;  %v10050_v50 = vld [vmem:[%s13569_s28 + $0x3] ss:$0 sm:$0xff] }
 0x37b   : > { %v11941_v59 = vpop.eup %11940 }
 0x37c   : > { %v1926_v61 = vmul.f32 %v11941_v59, %v11939_v48  ;;  %v12514_v48 = vpack.c.bf16 %v9937_v47, %v9936_v46 }
 0x37e   : > { %10655 = vmatmul.mubr.msk.f32.vlgmr.msra.gmra.mrb[2].mxu1 %vm1839_vm4, %v1926_v61 }
 0x37f   : > { %11500 = vmatpush3.bf16.msra.mxu1 %v12461_v60  ;;  %10676 = vmatprep.mubr.msk.f32.mxu1 %vm12099_vm2, %v13481_v4 }
 0x380   : > { %11501 = vmatprep.subr.bf16.mxu1 %v13479_v11 }
 0x383   : > { %11503 = vmatpush3.bf16.msra.mxu1 %v12467_v0 }
 0x384   : > { %10690 = vmatprep.subr.mxu1 %v13481_v4 }
 0x386   : > { %10677 = vmatmul.mubr.msk.f32.vlgmr.msra.gmra.mrb[4].mxu1 %vm1612_vm3, %v12404_v23 }
 0x387   : > { %10692 = vmatprep.mubr.msk.f32.mxu1 %vm12099_vm2, %v13481_v4 }
 0x451   : > { %v1996_v3 = vpop.f32.mrb[2].mxu1 }
 0x452   : > { %v10656_v6 = vpop.f32.mrb[3].mxu1 }
 0x459   : > { %v2148_v10 = vpop.f32.mrb[4].mxu1 }
 0x45a   : > { %v2149_v13 = vadd.f32 %v10027_v9, %v2148_v10  ;;  %v10678_v14 = vpop.f32.mrb[5].mxu1 }
 0x45c   : > { %10691 = vmatpush3.xpose.msk.msra.mxu1 %vm1839_vm4, %v2149_v13  ;;  %v10036_v13 = vld [vmem:[%s13567_s27 + $0x2] ss:$0 sm:$0xff] }
 0x45d   : > { %10695 = vmatprep.subr.mxu1 %v13481_v4 }
 0x45f   : > { %10693 = vmatmul.mubr.msk.f32.vlgmr.msra.gmra.mrb[6].mxu1 %vm1839_vm4, %v2228_v15 }
 0x460   : > { %10697 = vmatprep.mubr.msk.f32.mxu1 %vm12099_vm2, %v13481_v4  ;;  %10696 = vmatpush3.msra.mxu1 %v2225_v40 }
 0x461   : > { %10705 = vmatprep.subr.mxu1 %v13481_v4 }
 0x532   : > { %v2301_v28 = vpop.f32.mrb[6].mxu1 }
 0x533   : > { %v2302_v29 = vadd.f32 %v2301_v28, %v12292_v5  ;;  %v10694_v30 = vpop.f32.mrb[7].mxu1  ;;  %v9950_v28 = vld [vmem:[%s13566_s13 + $0x50] sm:$0xff] }
 0x534   : > { %v9951_v30 = vld [vmem:[%s13566_s13 + $0x58] sm:$0xff] }
 0x535   : > { %v2305_v31 = vsel %vm1839_vm4, %v2302_v29, -inf }
 0x536   : > { %2306 = vmax.xlane.f32.xlu1 %v2305_v31  ;;  %v12567_v31 = vpack.c.bf16 %v9951_v30, %v9950_v28 }
 0x5c3   : > { %v2307_v32 = vpop.xlane.xlu1 %2306 }
 0x5c4   : > { %v2308_v33 = vsub.f32 %v2302_v29, %v2307_v32  ;;  %v12563_v29 = vpack.c.bf16 %v9949_v25, %v9948_v21  ;;  %v10048_v25 = vld [vmem:[%s13568_s4 + $0x3] ss:$0 sm:$0xff] }
 0x5c6   : > { %v2309_v34 = vmul.f32 1.442695, %v2308_v33 }
 0x5c8   : > { %11942 = vpow2.f32 %v2309_v34 }
 0x5d2   : > { %v11943_v35 = vpop.eup %11942 }
 0x5d3   : > { %v2311_v36 = vsel %vm1839_vm4, %v11943_v35, 0.0 }
 0x5d4   : > { %2312 = vadd.xlane.f32.xlu1 %v2311_v36 }
 0x661   : > { %v2313_v42 = vpop.xlane.xlu1 %2312 }
 0x662   : > { %11944 = vrcp.f32 %v2313_v42  ;;  %v10040_v42 = vld [vmem:[%s13569_s28 + $0x2] ss:$0 sm:$0xff] }
 0x66c   : > { %v11945_v43 = vpop.eup %11944 }
 0x66d   : > { %v2315_v44 = vmul.f32 %v11945_v43, %v11943_v35 }
 0x66f   : > { %10698 = vmatmul.mubr.msk.f32.vlgmr.msra.gmra.mrb[8].mxu1 %vm1839_vm4, %v2315_v44 }
 0x670   : > { %10706 = vmatpush3.msra.mxu1 %v1489_v45  ;;  %10707 = vmatprep.mubr.msk.f32.mxu1 %vm12099_vm2, %v13481_v4  ;;  %v9966_v45 = vld [vmem:[%s12312_s21 + $0x10] sm:$0xff] }
 0x671   : > { %11516 = vmatprep.subr.bf16.mxu1 %v13479_v11 }
 0x673   : > { %10708 = vmatmul.mubr.msk.f32.vlgmr.msra.gmra.mrb[10].mxu1 %vm1839_vm4, %v1996_v3 }
 0x674   : > { %11518 = vmatpush3.bf16.msra.mxu1 %v12514_v48  ;;  %10729 = vmatprep.mubr.msk.f32.mxu1 %vm12099_vm2, %v13481_v4 }
 0x675   : > { %11519 = vmatprep.subr.bf16.mxu1 %v13479_v11 }
 0x678   : > { %11521 = vmatpush3.bf16.msra.mxu1 %v12524_v51 }
 0x679   : > { %10743 = vmatprep.subr.mxu1 %v13481_v4 }
 0x67b   : > { %10730 = vmatmul.mubr.msk.f32.vlgmr.msra.gmra.mrb[12].mxu1 %vm1612_vm3, %v12404_v23 }
 0x67c   : > { %10745 = vmatprep.mubr.msk.f32.mxu1 %vm12099_vm2, %v13481_v4 }
 0x742   : > { %v2385_v59 = vpop.f32.mrb[8].mxu1 }
 0x743   : > { %v10699_v61 = vpop.f32.mrb[9].mxu1  ;;  %10703 = vmatmul.mubr.msk.f32.vlgmr.msra.gmra.mrb[10].mxu0 %vm1839_vm4, %v2385_v59  ;;  %v12594_v59 = vpack.c.bf16 %v9931_v58, %v9930_v57  ;;  %v9967_v58 = vld [vmem:[%s12312_s21 + $0x18] sm:$0xff] }
 0x744   : > { %11512 = vmatpush3.bf16.msra.mxu0 %v12534_v56  ;;  %10718 = vmatprep.mubr.msk.f32.mxu0 %vm12099_vm2, %v13481_v4  ;;  %v9940_v61 = vld [vmem:[%s13565_s17 + $0x60] sm:$0xff] }
 0x745   : > { %11513 = vmatprep.subr.bf16.mxu0 %v13479_v11 }
 0x746   : > { %v2531_v63 = vpop.f32.mrb[10].mxu1 }
 0x747   : > { %v10709_v1 = vpop.f32.mrb[11].mxu1 }
 0x748   : > { %11515 = vmatpush3.bf16.msra.mxu0 %v12540_v62 }
 0x749   : > { %11522 = vmatprep.subr.bf16.mxu0 %v13479_v11 }
 0x74b   : > { %10719 = vmatmul.mubr.msk.f32.vlgmr.msra.gmra.mrb[12].mxu0 %vm1612_vm3, %v12404_v23 }
 0x74c   : > { %10740 = vmatprep.mubr.msk.f32.mxu0 %vm12099_vm2, %v13481_v4  ;;  %11524 = vmatpush3.bf16.msra.mxu0 %v12563_v29 }
 0x74d   : > { %11525 = vmatprep.subr.bf16.mxu0 %v13479_v11 }
 0x74e   : > { %v2683_v3 = vpop.f32.mrb[12].mxu1 }
 0x74f   : > { %v2684_v6 = vadd.f32 %v10038_v2, %v2683_v3  ;;  %v10731_v7 = vpop.f32.mrb[13].mxu1  ;;  %v9942_v2 = vld [vmem:[%s13565_s17 + $0x70] sm:$0xff]  ;;  %v9943_v3 = vld [vmem:[%s13565_s17 + $0x78] sm:$0xff] }
 0x750   : > { %11527 = vmatpush3.bf16.msra.mxu0 %v12567_v31 }
 0x751   : > { %10744 = vmatpush3.xpose.msk.msra.mxu1 %vm1839_vm4, %v2684_v6  ;;  %10753 = vmatprep.subr.mxu0 %v13481_v4 }
 0x752   : > { %10748 = vmatprep.subr.mxu1 %v13481_v4 }
 0x753   : > { %10741 = vmatmul.mubr.msk.f32.vlgmr.msra.gmra.mrb[14].mxu0 %vm1612_vm3, %v12404_v23 }
 0x754   : > { %10755 = vmatprep.mubr.msk.f32.mxu0 %vm12099_vm2, %v13481_v4  ;;  %10754 = vmatpush3.msra.mxu0 %v9966_v45 }
 0x755   : > { %11534 = vmatprep.subr.bf16.mxu0 %v13479_v11 }
 0x816   : > { %v2458_v8 = vpop.f32.mrb[10].mxu0 }
 0x817   : > { %v12554_v9 = vadd.f32 %v2531_v63, %v2458_v8  ;;  %v10704_v10 = vpop.f32.mrb[11].mxu0  ;;  %v9941_v63 = vld [vmem:[%s13565_s17 + $0x68] sm:$0xff]  ;;  %v12610_v8 = vpack.c.bf16 %v9943_v3, %v9942_v2 }
 0x818   : > { %v12604_v1 = vpack.c.bf16 %v9941_v63, %v9940_v61 }
 0x81e   : > { %v2607_v14 = vpop.f32.mrb[12].mxu0 }
 0x81f   : > { %v2608_v15 = vadd.f32 %v10036_v13, %v2607_v14  ;;  %v10720_v17 = vpop.f32.mrb[13].mxu0 }
 0x821   : > { %v2763_v18 = vmul.f32 0.35355338, %v2608_v15 }
 0x823   : > { %10746 = vmatmul.mubr.msk.f32.vlgmr.msra.gmra.mrb[14].mxu1 %vm1839_vm4, %v2763_v18  ;;  %v10046_v18 = vld [vmem:[%s13567_s27 + $0x3] ss:$0 sm:$0xff] }
 0x824   : > { %10750 = vmatprep.mubr.msk.f32.mxu1 %vm12099_vm2, %v13481_v4 }
 0x826   : > { %v2759_v41 = vpop.f32.mrb[14].mxu0 }
 0x827   : > { %v10742_v43 = vpop.f32.mrb[15].mxu0  ;;  %v2760_v44 = vadd.f32 %v10040_v42, %v2759_v41 }
 0x829   : > { %10749 = vmatpush3.msra.mxu1 %v2760_v44 }
 0x82a   : > { %11528 = vmatprep.subr.bf16.mxu1 %v13479_v11 }
 0x8f6   : > { %v2836_v32 = vpop.f32.mrb[14].mxu1 }
 0x8f7   : > { %v2837_v33 = vadd.f32 %v2836_v32, %v12292_v5  ;;  %v10747_v34 = vpop.f32.mrb[15].mxu1 }
 0x8f8   : > { %v9952_v34 = vld [vmem:[%s13566_s13 + $0x60] sm:$0xff] }
 0x8f9   : > { %v2840_v35 = vsel %vm1839_vm4, %v2837_v33, -inf }
 0x8fa   : > { %2841 = vmax.xlane.f32.xlu0 %v2840_v35  ;;  %v9954_v35 = vld [vmem:[%s13566_s13 + $0x70] sm:$0xff] }
 0x987   : > { %v2842_v36 = vpop.xlane.xlu0 %2841 }
 0x988   : > { %v2843_v37 = vsub.f32 %v2837_v33, %v2842_v36 }
 0x98a   : > { %v2844_v38 = vmul.f32 1.442695, %v2843_v37  ;;  %v9955_v37 = vld [vmem:[%s13566_s13 + $0x78] sm:$0xff] }
 0x98c   : > { %11946 = vpow2.f32 %v2844_v38  ;;  %v12636_v38 = vpack.c.bf16 %v9955_v37, %v9954_v35  ;;  %v1519_v35 = vld [vmem:[%s12326_s7 + $0x18] sm:$0xff] }
 0x996   : > { %v11947_v39 = vpop.eup %11946 }
 0x997   : > { %v2846_v40 = vsel %vm1839_vm4, %v11947_v39, 0.0 }
 0x998   : > { %2847 = vadd.xlane.f32.xlu1 %v2846_v40 }
 0xa25   : > { %v2848_v46 = vpop.xlane.xlu1 %2847 }
 0xa26   : > { %11948 = vrcp.f32 %v2848_v46 }
 0xa30   : > { %v11949_v47 = vpop.eup %11948 }
 0xa31   : > { %v2850_v49 = vmul.f32 %v11949_v47, %v11947_v39 }
 0xa33   : > { %10751 = vmatmul.mubr.msk.f32.vlgmr.msra.gmra.mrb[16].mxu1 %vm1839_vm4, %v2850_v49 }
 0xa34   : > { %10766 = vmatprep.mubr.msk.f32.mxu1 %vm12099_vm2, %v13481_v4  ;;  %11530 = vmatpush3.bf16.msra.mxu1 %v12588_v54 }
 0xa35   : > { %11531 = vmatprep.subr.bf16.mxu1 %v13479_v11 }
 0xa38   : > { %11533 = vmatpush3.bf16.msra.mxu1 %v12594_v59 }
 0xa39   : > { %11540 = vmatprep.subr.bf16.mxu1 %v13479_v11 }
 0xa3b   : > { %10767 = vmatmul.mubr.msk.f32.vlgmr.msra.gmra.mrb[18].mxu1 %vm1612_vm3, %v12404_v23 }
 0xa3c   : > { %10788 = vmatprep.mubr.msk.f32.mxu1 %vm12099_vm2, %v13481_v4 }
 0xb06   : > { %v2920_v6 = vpop.f32.mrb[16].mxu1 }
 0xb07   : > { %v10752_v7 = vpop.f32.mrb[17].mxu1  ;;  %10756 = vmatmul.mubr.msk.f32.vlgmr.msra.gmra.mrb[16].mxu0 %vm1839_vm4, %v2920_v6 }
 0xb08   : > { %11536 = vmatpush3.bf16.msra.mxu0 %v12604_v1  ;;  %10777 = vmatprep.mubr.msk.f32.mxu0 %vm12099_vm2, %v13481_v4  ;;  %v10056_v7 = vld [vmem:[%s13570_s15] ss:$0 sm:$0xff] }
 0xb09   : > { %11537 = vmatprep.subr.bf16.mxu0 %v13479_v11 }
 0xb0c   : > { %11539 = vmatpush3.bf16.msra.mxu0 %v12610_v8 }
 0xb0d   : > { %10791 = vmatprep.subr.mxu0 %v13481_v4 }
 0xb0e   : > { %v3070_v10 = vpop.f32.mrb[18].mxu1 }
 0xb0f   : > { %10778 = vmatmul.mubr.msk.f32.vlgmr.msra.gmra.mrb[18].mxu0 %vm1612_vm3, %v12404_v23  ;;  %v10768_v13 = vpop.f32.mrb[19].mxu1  ;;  %v3071_v21 = vadd.f32 %v10046_v18, %v3070_v10 }
 0xb10   : > { %10793 = vmatprep.mubr.msk.f32.mxu0 %vm12099_vm2, %v13481_v4 }
 0xb11   : > { %v3226_v33 = vmul.f32 0.35355338, %v3071_v21 }
 0xbda   : > { %v2993_v14 = vpop.f32.mrb[16].mxu0 }
 0xbdb   : > { %v2997_v15 = vadd.f32 %v2993_v14, %v12554_v9  ;;  %v10757_v17 = vpop.f32.mrb[17].mxu0  ;;  %v9953_v9 = vld [vmem:[%s13566_s13 + $0x68] sm:$0xff] }
 0xbdc   : > { %v12632_v36 = vpack.c.bf16 %v9953_v9, %v9952_v34  ;;  %v1517_v34 = vld [vmem:[%s12326_s7 + $0x8] sm:$0xff] }
 0xbde   : > { %11542 = vmatpush3.bf16.msra.mxu1 %v12632_v36 }
 0xbdf   : > { %11543 = vmatprep.subr.bf16.mxu1 %v13479_v11 }
 0xbe2   : > { %v3146_v28 = vpop.f32.mrb[18].mxu0  ;;  %11545 = vmatpush3.bf16.msra.mxu1 %v12636_v38 }
 0xbe3   : > { %v3147_v30 = vadd.f32 %v10048_v25, %v3146_v28  ;;  %v10779_v32 = vpop.f32.mrb[19].mxu0  ;;  %10801 = vmatprep.subr.mxu1 %v13481_v4 }
 0xbe5   : > { %10792 = vmatpush3.xpose.msk.msra.mxu0 %vm1839_vm4, %v3147_v30  ;;  %10789 = vmatmul.mubr.msk.f32.vlgmr.msra.gmra.mrb[20].mxu1 %vm1612_vm3, %v12404_v23 }
 0xbe6   : > { %10796 = vmatprep.subr.mxu0 %v13481_v4  ;;  %10803 = vmatprep.mubr.msk.f32.mxu1 %vm12099_vm2, %v13481_v4 }
 0xbe7   : > { %10802 = vmatpush3.msra.mxu1 %v9967_v58 }
 0xbe8   : > { %10794 = vmatmul.mubr.msk.f32.vlgmr.msra.gmra.mrb[20].mxu0 %vm1839_vm4, %v3226_v33 }
 0xbe9   : > { %10798 = vmatprep.mubr.msk.f32.mxu0 %vm12099_vm2, %v13481_v4 }
 0xcb8   : > { %v3222_v49 = vpop.f32.mrb[20].mxu1 }
 0xcb9   : > { %v10790_v53 = vpop.f32.mrb[21].mxu1  ;;  %v3223_v57 = vadd.f32 %v10050_v50, %v3222_v49 }
 0xcbb   : > { %v3299_v39 = vpop.f32.mrb[20].mxu0  ;;  %10797 = vmatpush3.msra.mxu0 %v3223_v57  ;;  %v10057_v57 = vld [vmem:[%s13573_s23] ss:$0 sm:$0xff] }
 0xcbc   : > { %v3300_v40 = vadd.f32 %v3299_v39, %v12292_v5  ;;  %v10795_v41 = vpop.f32.mrb[21].mxu0  ;;  %11546 = vmatprep.subr.bf16.mxu0 %v13479_v11  ;;  %v12672_v39 = vld [vmem:[%s13571_s16] sm:$0xff] }
 0xcbd   : > { %v1497_v41 = vld [vmem:[%s13572_s18] sm:$0xff] }
 0xcbe   : > { %v3303_v42 = vsel %vm1839_vm4, %v3300_v40, -inf }
 0xcbf   : > { %3304 = vmax.xlane.f32.xlu0 %v3303_v42  ;;  %v1498_v42 = vld [vmem:[%s13572_s18 + $0x8] sm:$0xff] }
 0xd4c   : > { %v3305_v43 = vpop.xlane.xlu0 %3304 }
 0xd4d   : > { %v3306_v44 = vsub.f32 %v3300_v40, %v3305_v43  ;;  %v12678_v40 = vld [vmem:[%s13571_s16 + $0x8] sm:$0x3]  ;;  %v12684_v43 = vpack.c.bf16 %v1498_v42, %v1497_v41  ;;  %v1535_v41 = vld [vmem:[%s13577_s26] sm:$0xff] }
 0xd4e   : > { %v1536_v42 = vld [vmem:[%s13577_s26 + $0x8] sm:$0xff] }
 0xd4f   : > { %v3307_v45 = vmul.f32 1.442695, %v3306_v44  ;;  %v1499_v44 = vld [vmem:[%s13572_s18 + $0x10] sm:$0xff] }
 0xd51   : > { %11950 = vpow2.f32 %v3307_v45  ;;  %v1500_v45 = vld [vmem:[%s13572_s18 + $0x18] sm:$0xff] }
 0xd5b   : > { %v11951_v46 = vpop.eup %11950 }
 0xd5c   : > { %v3309_v47 = vsel %vm1839_vm4, %v11951_v46, 0.0 }
 0xd5d   : > { %3310 = vadd.xlane.f32.xlu1 %v3309_v47 }
 0xdea   : > { %v3311_v61 = vpop.xlane.xlu1 %3310 }
 0xdeb   : > { %11952 = vrcp.f32 %v3311_v61  ;;  %v10058_v61 = vld [vmem:[%s13574_s22] ss:$0 sm:$0xff] }
 0xdf5   : > { %v11953_v63 = vpop.eup %11952 }
 0xdf6   : > { %v3313_v2 = vmul.f32 %v11953_v63, %v11951_v46  ;;  %v12692_v46 = vpack.c.bf16 %v1500_v45, %v1499_v44  ;;  %v1537_v44 = vld [vmem:[%s13577_s26 + $0x10] sm:$0xff]  ;;  %v12735_v45 = vpack.c.bf16 %v1536_v42, %v1535_v41 }
 0xdf7   : > { %v9982_v42 = vld [vmem:[%s12326_s7 + $0x30] sm:$0xff] }
 0xdf8   : > { %10799 = vmatmul.mubr.msk.f32.vlgmr.msra.gmra.mrb[22].mxu0 %vm1839_vm4, %v3313_v2 }
 0xdf9   : > { %10814 = vmatprep.mubr.msk.f32.mxu0 %vm12099_vm2, %v13481_v4  ;;  %11548 = vmatpush3.bf16.msra.mxu0 %v12684_v43 }
 0xdfa   : > { %11549 = vmatprep.subr.bf16.mxu0 %v13479_v11 }
 0xdfd   : > { %11551 = vmatpush3.bf16.msra.mxu0 %v12692_v46 }
 0xdfe   : > { %11561 = vmatprep.subr.bf16.mxu0 %v12735_v45 }
 0xecb   : > { %v3383_v3 = vpop.f32.mrb[22].mxu0 }
 0xecc   : > { %v10800_v6 = vpop.f32.mrb[23].mxu0  ;;  %10804 = vmatmul.mubr.msk.f32.vlgmr.msra.gmra.mrb[22].mxu1 %vm1839_vm4, %v3383_v3  ;;  %v10061_v3 = vld [vmem:[%s12335_s8] ss:$0 sm:$0xff] }
 0xecd   : > { %10825 = vmatprep.mubr.msk.f32.mxu1 %vm1612_vm3, %v12672_v39 }
 0xf9f   : > { %v3456_v10 = vpop.f32.mrb[22].mxu1 }
 0xfa0   : > { %v3460_v13 = vadd.f32 %v3456_v10, %v2997_v15  ;;  %v10805_v14 = vpop.f32.mrb[23].mxu1  ;;  %v1516_v15 = vld [vmem:[%s12326_s7] sm:$0xff] }
 0xfa1   : > { %v12661_v9 = vpack.c.bf16 %v1517_v34, %v1516_v15  ;;  %v9970_v34 = vld [vmem:[%s13572_s18 + $0x30] sm:$0xff] }
 0xfa2   : > { %v3467_v17 = vadd.f32 %v10056_v7, %v3460_v13 }
 0xfa3   : > { %11553 = vmatprep.subr.bf16.mxu1 %v12661_v9 }
 0xfa4   : > { %v3468_v18 = vadd.f32 %v3467_v17, %v12404_v23  ;;  %11555 = vmatpush3.bf16.msra.mxu1 %v12661_v9  ;;  %v1518_v23 = vld [vmem:[%s12326_s7 + $0x10] sm:$0xff] }
 0xfa5   : > { %v12667_v37 = vpack.c.bf16 %v1519_v35, %v1518_v23  ;;  %v9971_v23 = vld [vmem:[%s13572_s18 + $0x38] sm:$0xff] }
 0xfa6   : > { %v3469_v21 = vsel %vm1612_vm3, %v3468_v18, 0.0  ;;  %v12722_v35 = vpack.c.bf16 %v9971_v23, %v9970_v34  ;;  %v9981_v34 = vld [vmem:[%s12326_s7 + $0x28] sm:$0xff] }
 0xfa7   : > { %3470 = vadd.xlane.f32.xlu0 %v3469_v21  ;;  %11557 = vmatprep.subr.bf16.mxu1 %v12667_v37  ;;  %v9968_v21 = vld [vmem:[%s13572_s18 + $0x20] sm:$0xff] }
 0xfa8   : > { %11559 = vmatpush3.bf16.msra.mxu1 %v12667_v37 }
 0xfa9   : > { %11568 = vmatprep.subr.bf16.mxu1 %v13479_v11 }
 0xfab   : > { %10826 = vmatmul.mubr.msk.f32.vlgmr.msra.gmra.mrb[24].mxu1 %vm1612_vm3, %v12678_v40 }
 0xfac   : > { %10843 = vmatprep.mubr.msk.f32.mxu1 %vm12099_vm2, %v13481_v4 }
0x1034   : > { %v3471_v25 = vpop.xlane.xlu0 %3470 }
0x1035   : > { %v3473_v28 = vmul.f32 0.03125, %v3471_v25  ;;  %v9969_v25 = vld [vmem:[%s13572_s18 + $0x28] sm:$0xff] }
0x1037   : > { %v3474_v30 = vsub.f32 %v3468_v18, %v3473_v28  ;;  %v10059_v18 = vld [vmem:[%s12332_s10] ss:$0 sm:$0xff] }
0x1039   : > { %v3475_v32 = vmul.f32 %v3474_v30, %v3474_v30 }
0x103b   : > { %v3476_v33 = vsel %vm1612_vm3, %v3475_v32, 0.0 }
0x103c   : > { %3477 = vadd.xlane.f32.xlu1 %v3476_v33  ;;  %v12716_v33 = vpack.c.bf16 %v9969_v25, %v9968_v21 }
0x107e   : > { %v10827_v6 = vpop.f32.mrb[24].mxu1 }
0x107f   : > { %v3660_v7 = vadd.f32 %v10827_v6, %v10061_v3  ;;  %v3654_v10 = vpop.f32.mrb[25].mxu1 }
0x1080   : > { %v3655_v13 = vadd.f32 %v10061_v3, %v3654_v10 }
0x1082   : > { %v11569_v17 = vpack.c.bf16 %v3660_v7, %v3655_v13 }
0x1084   : > { %11571 = vmatpush3.bf16.xpose.msk.msra.mxu1 %vm12706_vm5, %v11569_v17 }
0x1085   : > { %11576 = vmatprep.subr.bf16.mxu1 %v13479_v11 }
0x10c9   : > { %v3478_v47 = vpop.xlane.xlu1 %3477 }
0x10ca   : > { %v3479_v49 = vmul.f32 0.03125, %v3478_v47  ;;  %v1538_v47 = vld [vmem:[%s13577_s26 + $0x18] sm:$0xff] }
0x10cc   : > { %v3480_v50 = vadd.f32 1e-05, %v3479_v49  ;;  %v12738_v49 = vpack.c.bf16 %v1538_v47, %v1537_v44  ;;  %v9983_v44 = vld [vmem:[%s12326_s7 + $0x38] sm:$0xff] }
0x10ce   : > { %11954 = vrsqrt.f32 %v3480_v50 }
0x10d8   : > { %v11955_v53 = vpop.eup %11954 }
0x10d9   : > { %v3482_v58 = vmul.f32 %v11955_v53, %v3474_v30 }
0x10db   : > { %v3489_v63 = vmul.f32 %v10057_v57, %v3482_v58 }
0x10dd   : > { %v12697_v2 = vadd.f32 %v10058_v61, %v3489_v63 }
0x10df   : > { %10815 = vmatmul.mubr.msk.f32.vlgmr.msra.gmra.mrb[24].mxu0 %vm1612_vm3, %v12697_v2 }
0x10e0   : > { %10836 = vmatprep.mubr.msk.f32.mxu0 %vm1612_vm3, %v12672_v39  ;;  %11563 = vmatpush3.bf16.msra.mxu0 %v12735_v45 }
0x10e1   : > { %11565 = vmatprep.subr.bf16.mxu0 %v12738_v49 }
0x10e4   : > { %11567 = vmatpush3.bf16.msra.mxu0 %v12738_v49 }
0x10e5   : > { %11572 = vmatprep.subr.bf16.mxu0 %v13479_v11 }
0x10e7   : > { %10837 = vmatmul.mubr.msk.f32.vlgmr.msra.gmra.mrb[26].mxu0 %vm1612_vm3, %v12678_v40 }
0x10e8   : > { %10850 = vmatprep.mubr.msk.f32.mxu0 %vm12099_vm2, %v13481_v4 }
0x11b2   : > { %v3572_v28 = vpop.f32.mrb[24].mxu0 }
0x11b3   : > { %v3573_v30 = vadd.f32 %v10059_v18, %v3572_v28  ;;  %v10816_v32 = vpop.f32.mrb[25].mxu0  ;;  %v10064_v18 = vld [vmem:[%s12338_s19] ss:$0 sm:$0xff] }
0x11b5   : > { %v3744_v15 = vmul.f32 0.35355338, %v3573_v30 }
0x11b7   : > { %10844 = vmatmul.mubr.msk.f32.vlgmr.msra.gmra.mrb[26].mxu1 %vm1839_vm4, %v3744_v15  ;;  %v9980_v15 = vld [vmem:[%s12326_s7 + $0x20] sm:$0xff] }
0x11b8   : > { %11578 = vmatpush3.bf16.msra.mxu1 %v12716_v33  ;;  %10861 = vmatprep.mubr.msk.f32.mxu1 %vm12099_vm2, %v13481_v4  ;;  %v12761_v23 = vpack.c.bf16 %v9981_v34, %v9980_v15  ;;  %v9995_v34 = vld [vmem:[%s13577_s26 + $0x38] sm:$0xff] }
0x11b9   : > { %11579 = vmatprep.subr.bf16.mxu1 %v13479_v11 }
0x11ba   : > { %v10838_v17 = vpop.f32.mrb[26].mxu0 }
0x11bb   : > { %v3735_v21 = vpop.f32.mrb[27].mxu0  ;;  %v3741_v25 = vadd.f32 %v10838_v17, %v10064_v18 }
0x11bc   : > { %11581 = vmatpush3.bf16.msra.mxu1 %v12722_v35  ;;  %v3736_v28 = vadd.f32 %v10064_v18, %v3735_v21 }
0x11be   : > { %v11573_v30 = vpack.c.bf16 %v3741_v25, %v3736_v28  ;;  %v9992_v25 = vld [vmem:[%s13577_s26 + $0x20] sm:$0xff]  ;;  %v9993_v28 = vld [vmem:[%s13577_s26 + $0x28] sm:$0xff] }
0x11bf   : > { %10862 = vmatmul.mubr.msk.f32.vlgmr.msra.gmra.mrb[28].mxu1 %vm1612_vm3, %v12697_v2  ;;  %v12792_v15 = vpack.c.bf16 %v9993_v28, %v9992_v25  ;;  %v10013_v25 = vld [vmem:[%s12341_s25 + $0x8] sm:$0xff] }
0x11c0   : > { %10883 = vmatprep.mubr.msk.f32.mxu1 %vm1612_vm3, %v12672_v39  ;;  %11575 = vmatpush3.bf16.msk.msra.mxu0 %vm12753_vm9, %v11573_v30  ;;  %v9994_v30 = vld [vmem:[%s13577_s26 + $0x30] sm:$0xff] }
0x11c1   : > { %11583 = vmatprep.subr.bf16.mxu0 %v12761_v23  ;;  %11591 = vmatprep.subr.bf16.mxu1 %v12792_v15 }
0x11c2   : > { %11593 = vmatpush3.bf16.msra.mxu1 %v12792_v15 }
0x128a   : > { %v3820_v50 = vpop.f32.mrb[26].mxu1 }
0x128b   : > { %v3821_v53 = vadd.f32 %v3820_v50, %v12292_v5  ;;  %v10845_v57 = vpop.f32.mrb[27].mxu1 }
0x128d   : > { %v3825_v58 = vsel %vm3824_vm6, %v3821_v53, -inf }
0x128e   : > { %3826 = vmax.xlane.f32.xlu0 %v3825_v58 }
0x1292   : > { %v3985_v61 = vpop.f32.mrb[28].mxu1 }
0x1293   : > { %v10863_v63 = vpop.f32.mrb[29].mxu1 }
0x1294   : > { %v10074_v63 = vld [vmem:[%s12335_s8 + $0x1] ss:$0 sm:$0xff] }
0x131b   : > { %v3827_v3 = vpop.xlane.xlu0 %3826 }
0x131c   : > { %v3828_v6 = vsub.f32 %v3821_v53, %v3827_v3  ;;  %v12766_v53 = vpack.c.bf16 %v9983_v44, %v9982_v42 }
0x131e   : > { %v3829_v7 = vmul.f32 1.442695, %v3828_v6 }
0x1320   : > { %11956 = vpow2.f32 %v3829_v7 }
0x132a   : > { %v11957_v10 = vpop.eup %11956 }
0x132b   : > { %v3831_v13 = vsel %vm3824_vm6, %v11957_v10, 0.0 }
0x132c   : > { %3832 = vadd.xlane.f32.xlu1 %v3831_v13  ;;  %v10072_v13 = vld [vmem:[%s12332_s10 + $0x1] ss:$0 sm:$0xff] }
0x132d   : > { %v3986_v18 = vadd.f32 %v10072_v13, %v3985_v61 }
0x132f   : > { %v4151_v21 = vmul.f32 0.35355338, %v3986_v18 }
0x13b9   : > { %v3833_v41 = vpop.xlane.xlu1 %3832 }
0x13ba   : > { %11958 = vrcp.f32 %v3833_v41  ;;  %v12795_v41 = vpack.c.bf16 %v9995_v34, %v9994_v30  ;;  %v9984_v30 = vld [vmem:[%s12326_s7 + $0x40] sm:$0xff]  ;;  %v9985_v34 = vld [vmem:[%s12326_s7 + $0x48] sm:$0xff] }
0x13bc   : > { %11595 = vmatprep.subr.bf16.mxu1 %v12795_v41 }
0x13bd   : > { %11597 = vmatpush3.bf16.msra.mxu1 %v12795_v41 }
0x13be   : > { %11602 = vmatprep.subr.bf16.mxu1 %v13479_v11 }
0x13c0   : > { %10884 = vmatmul.mubr.msk.f32.vlgmr.msra.gmra.mrb[30].mxu1 %vm1612_vm3, %v12678_v40 }
0x13c1   : > { %10897 = vmatprep.mubr.msk.f32.mxu1 %vm12099_vm2, %v13481_v4 }
0x13c4   : > { %v11959_v47 = vpop.eup %11958 }
0x13c5   : > { %v3835_v50 = vmul.f32 %v11959_v47, %v11957_v10 }
0x13c7   : > { %10851 = vmatmul.mubr.msk.f32.vlgmr.msra.gmra.mrb[28].mxu0 %vm3824_vm6, %v3835_v50 }
0x13c8   : > { %11585 = vmatpush3.bf16.msra.mxu0 %v12761_v23  ;;  %10872 = vmatprep.mubr.msk.f32.mxu0 %vm1612_vm3, %v12672_v39 }
0x13c9   : > { %11587 = vmatprep.subr.bf16.mxu0 %v12766_v53 }
0x13cc   : > { %11589 = vmatpush3.bf16.msra.mxu0 %v12766_v53 }
0x13cd   : > { %11598 = vmatprep.subr.bf16.mxu0 %v13479_v11 }
0x13cf   : > { %10873 = vmatmul.mubr.msk.f32.vlgmr.msra.gmra.mrb[30].mxu0 %vm1612_vm3, %v12678_v40 }
0x13d0   : > { %10890 = vmatprep.mubr.msk.f32.mxu0 %vm12099_vm2, %v13481_v4 }
0x149a   : > { %v12779_v57 = vpop.f32.mrb[28].mxu0 }
0x149b   : > { %v10852_v58 = vpop.f32.mrb[29].mxu0 }
0x14a2   : > { %v10874_v3 = vpop.f32.mrb[30].mxu0 }
0x14a3   : > { %v4067_v6 = vadd.f32 %v10874_v3, %v10074_v63  ;;  %v4061_v7 = vpop.f32.mrb[31].mxu0 }
0x14a4   : > { %v4062_v10 = vadd.f32 %v10074_v63, %v4061_v7  ;;  %v10885_v7 = vpop.f32.mrb[30].mxu1 }
0x14a5   : > { %v4142_v13 = vpop.f32.mrb[31].mxu1 }
0x14a6   : > { %v11599_v17 = vpack.c.bf16 %v4067_v6, %v4062_v10  ;;  %v10077_v10 = vld [vmem:[%s12338_s19 + $0x1] ss:$0 sm:$0xff] }
0x14a7   : > { %v4143_v18 = vadd.f32 %v10077_v10, %v4142_v13 }
0x14a8   : > { %11601 = vmatpush3.bf16.xpose.msk.msra.mxu0 %vm12706_vm5, %v11599_v17  ;;  %v4148_v17 = vadd.f32 %v10885_v7, %v10077_v10  ;;  %v9974_v7 = vld [vmem:[%s13572_s18 + $0x50] sm:$0xff]  ;;  %v9975_v10 = vld [vmem:[%s13572_s18 + $0x58] sm:$0xff] }
0x14a9   : > { %10900 = vmatprep.subr.mxu0 %v13481_v4 }
0x14af   : > { %10891 = vmatmul.mubr.msk.f32.vlgmr.msra.gmra.mrb[32].mxu0 %vm1839_vm4, %v4151_v21  ;;  %v11603_v21 = vpack.c.bf16 %v4148_v17, %v4143_v18  ;;  %v12848_v18 = vpack.c.bf16 %v9975_v10, %v9974_v7 }
0x14b0   : > { %10902 = vmatprep.mubr.msk.f32.mxu0 %vm12099_vm2, %v13481_v4  ;;  %10901 = vmatpush3.msra.mxu0 %v10013_v25 }
0x14b1   : > { %11605 = vmatpush3.bf16.msk.msra.mxu1 %vm12753_vm9, %v11603_v21  ;;  %11606 = vmatprep.subr.bf16.mxu0 %v13479_v11 }
0x14b2   : > { %10905 = vmatprep.subr.mxu1 %v13481_v4 }
0x1582   : > { %v4227_v61 = vpop.f32.mrb[32].mxu0 }
0x1583   : > { %v4228_v42 = vadd.f32 %v4227_v61, %v12292_v5  ;;  %v10892_v44 = vpop.f32.mrb[33].mxu0 }
0x1584   : > { %v1575_v44 = vld [vmem:[%s12341_s25] sm:$0xff] }
0x1585   : > { %v4231_v47 = vsel %vm3824_vm6, %v4228_v42, -inf }
0x1586   : > { %4232 = vmax.xlane.f32.xlu0 %v4231_v47  ;;  %v12818_v47 = vpack.c.bf16 %v9985_v34, %v9984_v30 }
0x1613   : > { %v4233_v50 = vpop.xlane.xlu0 %4232 }
0x1614   : > { %v4234_v58 = vsub.f32 %v4228_v42, %v4233_v50  ;;  %v9986_v50 = vld [vmem:[%s12326_s7 + $0x50] sm:$0xff] }
0x1616   : > { %v4235_v63 = vmul.f32 1.442695, %v4234_v58  ;;  %v9987_v58 = vld [vmem:[%s12326_s7 + $0x58] sm:$0xff] }
0x1618   : > { %11960 = vpow2.f32 %v4235_v63  ;;  %v12826_v63 = vpack.c.bf16 %v9987_v58, %v9986_v50 }
0x1622   : > { %v11961_v3 = vpop.eup %11960 }
0x1623   : > { %v4237_v6 = vsel %vm3824_vm6, %v11961_v3, 0.0 }
0x1624   : > { %4238 = vadd.xlane.f32.xlu1 %v4237_v6 }
0x16b1   : > { %v4239_v28 = vpop.xlane.xlu1 %4238 }
0x16b2   : > { %11962 = vrcp.f32 %v4239_v28  ;;  %v10089_v28 = vld [vmem:[%s12335_s8 + $0x2] ss:$0 sm:$0xff] }
0x16bc   : > { %v11963_v61 = vpop.eup %11962 }
0x16bd   : > { %v4241_v42 = vmul.f32 %v11963_v61, %v11961_v3  ;;  %v9972_v3 = vld [vmem:[%s13572_s18 + $0x40] sm:$0xff] }
0x16bf   : > { %10898 = vmatmul.mubr.msk.f32.vlgmr.msra.gmra.mrb[32].mxu1 %vm3824_vm6, %v4241_v42 }
0x16c0   : > { %10906 = vmatpush3.msra.mxu1 %v1575_v44  ;;  %10907 = vmatprep.mubr.msk.f32.mxu1 %vm12099_vm2, %v13481_v4 }
0x16c1   : > { %11613 = vmatprep.subr.bf16.mxu1 %v12818_v47 }
0x16c3   : > { %10908 = vmatmul.mubr.msk.f32.vlgmr.msra.gmra.mrb[34].mxu1 %vm1839_vm4, %v12779_v57  ;;  %v9973_v57 = vld [vmem:[%s13572_s18 + $0x48] sm:$0xff] }
0x16c4   : > { %11615 = vmatpush3.bf16.msra.mxu1 %v12818_v47  ;;  %10929 = vmatprep.mubr.msk.f32.mxu1 %vm1612_vm3, %v12672_v39  ;;  %v12842_v6 = vpack.c.bf16 %v9973_v57, %v9972_v3  ;;  %v10087_v57 = vld [vmem:[%s12332_s10 + $0x2] ss:$0 sm:$0xff] }
0x16c5   : > { %11617 = vmatprep.subr.bf16.mxu1 %v12826_v63 }
0x16c8   : > { %11619 = vmatpush3.bf16.msra.mxu1 %v12826_v63 }
0x16c9   : > { %11628 = vmatprep.subr.bf16.mxu1 %v13479_v11 }
0x16cb   : > { %10930 = vmatmul.mubr.msk.f32.vlgmr.msra.gmra.mrb[36].mxu1 %vm1612_vm3, %v12678_v40 }
0x16cc   : > { %10947 = vmatprep.mubr.msk.f32.mxu1 %vm12099_vm2, %v13481_v4 }
0x1792   : > { %v4314_v13 = vpop.f32.mrb[32].mxu1 }
0x1793   : > { %v10899_v17 = vpop.f32.mrb[33].mxu1  ;;  %10903 = vmatmul.mubr.msk.f32.vlgmr.msra.gmra.mrb[34].mxu0 %vm1839_vm4, %v4314_v13 }
0x1794   : > { %11608 = vmatpush3.bf16.msra.mxu0 %v12842_v6  ;;  %10918 = vmatprep.mubr.msk.f32.mxu0 %vm12099_vm2, %v13481_v4 }
0x1795   : > { %11609 = vmatprep.subr.bf16.mxu0 %v13479_v11 }
0x1796   : > { %v4460_v21 = vpop.f32.mrb[34].mxu1 }
0x1797   : > { %v10909_v25 = vpop.f32.mrb[35].mxu1 }
0x1798   : > { %11611 = vmatpush3.bf16.msra.mxu0 %v12848_v18  ;;  %v9996_v25 = vld [vmem:[%s13577_s26 + $0x40] sm:$0xff] }
0x179b   : > { %10919 = vmatmul.mubr.msk.f32.vlgmr.msra.gmra.mrb[36].mxu0 %vm1612_vm3, %v12697_v2 }
0x179c   : > { %10940 = vmatprep.mubr.msk.f32.mxu0 %vm1612_vm3, %v12672_v39 }
0x179e   : > { %v10931_v30 = vpop.f32.mrb[36].mxu1 }
0x179f   : > { %v4618_v34 = vadd.f32 %v10931_v30, %v10089_v28  ;;  %v4612_v61 = vpop.f32.mrb[37].mxu1  ;;  %v9998_v30 = vld [vmem:[%s13577_s26 + $0x50] sm:$0xff] }
0x17a0   : > { %v4613_v42 = vadd.f32 %v10089_v28, %v4612_v61  ;;  %v9997_v28 = vld [vmem:[%s13577_s26 + $0x48] sm:$0xff]  ;;  %v9999_v61 = vld [vmem:[%s13577_s26 + $0x58] sm:$0xff] }
0x17a2   : > { %v11629_v44 = vpack.c.bf16 %v4618_v34, %v4613_v42  ;;  %v12871_v34 = vpack.c.bf16 %v9997_v28, %v9996_v25  ;;  %v12874_v42 = vpack.c.bf16 %v9999_v61, %v9998_v30  ;;  %v10092_v28 = vld [vmem:[%s12338_s19 + $0x2] ss:$0 sm:$0xff] }
0x17a4   : > { %11631 = vmatpush3.bf16.xpose.msk.msra.mxu1 %vm12706_vm5, %v11629_v44  ;;  %11621 = vmatprep.subr.bf16.mxu0 %v12871_v34 }
0x17a5   : > { %10957 = vmatprep.subr.mxu1 %v13481_v4  ;;  %11623 = vmatpush3.bf16.msra.mxu0 %v12871_v34 }
0x17a6   : > { %11625 = vmatprep.subr.bf16.mxu0 %v12874_v42 }
0x17a9   : > { %11627 = vmatpush3.bf16.msra.mxu0 %v12874_v42 }
0x17aa   : > { %11632 = vmatprep.subr.bf16.mxu0 %v13479_v11 }
0x17ac   : > { %10941 = vmatmul.mubr.msk.f32.vlgmr.msra.gmra.mrb[38].mxu0 %vm1612_vm3, %v12678_v40 }
0x17ad   : > { %10954 = vmatprep.mubr.msk.f32.mxu0 %vm12099_vm2, %v13481_v4 }
0x1866   : > { %v4387_v50 = vpop.f32.mrb[34].mxu0 }
0x1867   : > { %v12862_v58 = vadd.f32 %v4460_v21, %v4387_v50  ;;  %v10904_v3 = vpop.f32.mrb[35].mxu0 }
0x186e   : > { %v4536_v7 = vpop.f32.mrb[36].mxu0 }
0x186f   : > { %v4537_v10 = vadd.f32 %v10087_v57, %v4536_v7  ;;  %v10920_v13 = vpop.f32.mrb[37].mxu0 }
0x1871   : > { %v4702_v17 = vmul.f32 0.35355338, %v4537_v10 }
0x1873   : > { %10948 = vmatmul.mubr.msk.f32.vlgmr.msra.gmra.mrb[38].mxu1 %vm1839_vm4, %v4702_v17 }
0x1874   : > { %10959 = vmatprep.mubr.msk.f32.mxu1 %vm12099_vm2, %v13481_v4 }
0x187f   : > { %v10942_v25 = vpop.f32.mrb[38].mxu0 }
0x1880   : > { %v4693_v30 = vpop.f32.mrb[39].mxu0  ;;  %v4699_v61 = vadd.f32 %v10942_v25, %v10092_v28 }
0x1946   : > { %v4778_v21 = vpop.f32.mrb[38].mxu1 }
0x1947   : > { %v4779_v44 = vadd.f32 %v4778_v21, %v12292_v5  ;;  %v10949_v50 = vpop.f32.mrb[39].mxu1  ;;  %v4694_v21 = vadd.f32 %v10092_v28, %v4693_v30  ;;  %v9978_v28 = vld [vmem:[%s13572_s18 + $0x70] sm:$0xff]  ;;  %v9979_v30 = vld [vmem:[%s13572_s18 + $0x78] sm:$0xff] }
0x1949   : > { %v4782_v3 = vsel %vm3824_vm6, %v4779_v44, -inf  ;;  %v11633_v50 = vpack.c.bf16 %v4699_v61, %v4694_v21  ;;  %v12901_v61 = vpack.c.bf16 %v9979_v30, %v9978_v28  ;;  %v9989_v21 = vld [vmem:[%s12326_s7 + $0x68] sm:$0xff] }
0x194a   : > { %4783 = vmax.xlane.f32.xlu0 %v4782_v3 }
0x194b   : > { %11635 = vmatpush3.bf16.msk.msra.mxu0 %vm12753_vm9, %v11633_v50  ;;  %13581 = vst [vmem:[#allocation49_spill] sm:$0xff] %v12901_v61 }
0x194c   : > { %11636 = vmatprep.subr.bf16.mxu0 %v13479_v11 }
0x19d7   : > { %v4784_v57 = vpop.xlane.xlu0 %4783 }
0x19d8   : > { %v4785_v7 = vsub.f32 %v4779_v44, %v4784_v57  ;;  %v10014_v44 = vld [vmem:[%s12341_s25 + $0x10] sm:$0xff]  ;;  %v9976_v57 = vld [vmem:[%s13572_s18 + $0x60] sm:$0xff] }
0x19d9   : > { %10958 = vmatpush3.msra.mxu1 %v10014_v44  ;;  %v9990_v44 = vld [vmem:[%s12326_s7 + $0x70] sm:$0xff] }
0x19da   : > { %v4786_v10 = vmul.f32 1.442695, %v4785_v7  ;;  %v9977_v7 = vld [vmem:[%s13572_s18 + $0x68] sm:$0xff] }
0x19dc   : > { %11964 = vpow2.f32 %v4786_v10 }
0x19e6   : > { %v11965_v13 = vpop.eup %11964 }
0x19e7   : > { %v4788_v17 = vsel %vm3824_vm6, %v11965_v13, 0.0 }
0x19e8   : > { %4789 = vadd.xlane.f32.xlu1 %v4788_v17  ;;  %v12895_v17 = vpack.c.bf16 %v9977_v7, %v9976_v57 }
0x19ea   : > { %13580 = vst [vmem:[#allocation48_spill] sm:$0xff] %v12895_v17 }
0x1a75   : > { %v4790_v3 = vpop.xlane.xlu1 %4789 }
0x1a76   : > { %11966 = vrcp.f32 %v4790_v3  ;;  %v9991_v3 = vld [vmem:[%s12326_s7 + $0x78] sm:$0xff] }
0x1a77   : > { %v12918_v57 = vpack.c.bf16 %v9991_v3, %v9990_v44 }
0x1a79   : > { %13583 = vst [vmem:[#allocation51_spill] sm:$0xff] %v12918_v57 }
0x1a80   : > { %v11967_v10 = vpop.eup %11966 }
0x1a81   : > { %v4792_v25 = vmul.f32 %v11967_v10, %v11965_v13  ;;  %v9988_v13 = vld [vmem:[%s12326_s7 + $0x60] sm:$0xff] }
0x1a82   : > { %v12913_v50 = vpack.c.bf16 %v9989_v21, %v9988_v13  ;;  %v10103_v21 = vld [vmem:[%s12335_s8 + $0x3] ss:$0 sm:$0xff] }
0x1a83   : > { %10955 = vmatmul.mubr.msk.f32.vlgmr.msra.gmra.mrb[40].mxu0 %vm3824_vm6, %v4792_v25 }
0x1a84   : > { %11638 = vmatpush3.bf16.msra.mxu0 %v12895_v17  ;;  %10970 = vmatprep.mubr.msk.f32.mxu0 %vm12099_vm2, %v13481_v4  ;;  %13582 = vst [vmem:[#allocation50_spill] sm:$0xff] %v12913_v50 }
0x1a85   : > { %11639 = vmatprep.subr.bf16.mxu0 %v13479_v11  ;;  %11643 = vmatprep.subr.bf16.mxu1 %v12913_v50 }
0x1a88   : > { %11641 = vmatpush3.bf16.msra.mxu0 %v12901_v61 }
0x1a8b   : > { %10971 = vmatmul.mubr.msk.f32.vlgmr.msra.gmra.mrb[42].mxu0 %vm1612_vm3, %v12697_v2 }
0x1a8c   : > { %10992 = vmatprep.mubr.msk.f32.mxu0 %vm1612_vm3, %v12672_v39 }
0x1b56   : > { %v4865_v7 = vpop.f32.mrb[40].mxu0 }
0x1b57   : > { %v10956_v10 = vpop.f32.mrb[41].mxu0  ;;  %10960 = vmatmul.mubr.msk.f32.vlgmr.msra.gmra.mrb[40].mxu1 %vm1839_vm4, %v4865_v7 }
0x1b58   : > { %11645 = vmatpush3.bf16.msra.mxu1 %v12913_v50  ;;  %10981 = vmatprep.mubr.msk.f32.mxu1 %vm1612_vm3, %v12672_v39 }
0x1b59   : > { %11647 = vmatprep.subr.bf16.mxu1 %v12918_v57 }
0x1b5c   : > { %11649 = vmatpush3.bf16.msra.mxu1 %v12918_v57  ;;  %v13584_v57 = vmov 0.0  }
0x1b5d   : > { %11658 = vmatprep.subr.bf16.mxu1 %v13479_v11 }
0x1b5e   : > { %v5015_v25 = vpop.f32.mrb[42].mxu0 }
0x1b5f   : > { %v10972_v28 = vpop.f32.mrb[43].mxu0  ;;  %10982 = vmatmul.mubr.msk.f32.vlgmr.msra.gmra.mrb[42].mxu1 %vm1612_vm3, %v12678_v40 }
0x1b60   : > { %10999 = vmatprep.mubr.msk.f32.mxu1 %vm12099_vm2, %v13481_v4  ;;  %v10101_v28 = vld [vmem:[%s12332_s10 + $0x3] ss:$0 sm:$0xff] }
0x1b61   : > { %v5016_v4 = vadd.f32 %v10101_v28, %v5015_v25 }
0x1b63   : > { %v5181_v61 = vmul.f32 0.35355338, %v5016_v4  ;;  %v13587_v4 = vmov 0.0|0.0  }
0x1c2a   : > { %v4938_v30 = vpop.f32.mrb[40].mxu1 }
0x1c2b   : > { %v12932_v13 = vadd.f32 %v4938_v30, %v12862_v58  ;;  %v10961_v39 = vpop.f32.mrb[41].mxu1  ;;  %v10000_v58 = vld [vmem:[%s13577_s26 + $0x60] sm:$0xff]  ;;  %v10001_v30 = vld [vmem:[%s13577_s26 + $0x68] sm:$0xff] }
0x1c2c   : > { %v10002_v39 = vld [vmem:[%s13577_s26 + $0x70] sm:$0xff] }
0x1c32   : > { %v10983_v44 = vpop.f32.mrb[42].mxu1 }
0x1c33   : > { %v5097_v3 = vadd.f32 %v10983_v44, %v10103_v21  ;;  %v5091_v7 = vpop.f32.mrb[43].mxu1  ;;  %v12945_v44 = vpack.c.bf16 %v10001_v30, %v10000_v58 }
0x1c34   : > { %v5092_v10 = vadd.f32 %v10103_v21, %v5091_v7  ;;  %v10003_v21 = vld [vmem:[%s13577_s26 + $0x78] sm:$0xff] }
0x1c35   : > { %13585 = vst [vmem:[#allocation52_spill] sm:$0xff] %v12945_v44  ;;  %v12948_v7 = vpack.c.bf16 %v10003_v21, %v10002_v39  ;;  %11651 = vmatprep.subr.bf16.mxu0 %v12945_v44  ;;  %v10106_v21 = vld [vmem:[%s12338_s19 + $0x3] ss:$0 sm:$0xff] }
0x1c36   : > { %v11659_v11 = vpack.c.bf16 %v5097_v3, %v5092_v10  ;;  %11653 = vmatpush3.bf16.msra.mxu0 %v12945_v44 }
0x1c37   : > { %13586 = vst [vmem:[#allocation53_spill] sm:$0xff] %v12948_v7  ;;  %11655 = vmatprep.subr.bf16.mxu0 %v12948_v7 }
0x1c38   : > { %11661 = vmatpush3.bf16.xpose.msk.msra.mxu1 %vm12706_vm5, %v11659_v11 }
0x1c39   : > { %11009 = vmatprep.subr.mxu1 %v13584_v57 }
0x1c3a   : > { %11657 = vmatpush3.bf16.msra.mxu0 %v12948_v7 }
0x1c3b   : > { %11662 = vmatprep.subr.bf16.mxu0 %v13587_v4 }
0x1c3d   : > { %10993 = vmatmul.mubr.msk.f32.vlgmr.msra.gmra.mrb[44].mxu0 %vm1612_vm3, %v12678_v40 }
0x1c3e   : > { %11006 = vmatprep.mubr.msk.f32.mxu0 %vm12099_vm2, %v13584_v57 }
0x1c3f   : > { %11000 = vmatmul.mubr.msk.f32.vlgmr.msra.gmra.mrb[44].mxu1 %vm1839_vm4, %v5181_v61 }
0x1c40   : > { %11011 = vmatprep.mubr.msk.f32.mxu1 %vm12099_vm2, %v13584_v57 }
0x1d10   : > { %v10994_v40 = vpop.f32.mrb[44].mxu0 }
0x1d11   : > { %v5172_v7 = vpop.f32.mrb[45].mxu0  ;;  %v5178_v44 = vadd.f32 %v10994_v40, %v10106_v21 }
0x1d12   : > { %v5257_v11 = vpop.f32.mrb[44].mxu1  ;;  %v5173_v17 = vadd.f32 %v10106_v21, %v5172_v7 }
0x1d13   : > { %v5258_v61 = vadd.f32 %v5257_v11, %v12292_v5  ;;  %v11001_v25 = vpop.f32.mrb[45].mxu1  ;;  %v10015_v11 = vld [vmem:[%s12341_s25 + $0x18] sm:$0xff] }
0x1d14   : > { %v11663_v50 = vpack.c.bf16 %v5178_v44, %v5173_v17  ;;  %11010 = vmatpush3.msra.mxu1 %v10015_v11 }
0x1d15   : > { %v5261_v3 = vsel %vm3824_vm6, %v5258_v61, -inf  ;;  %11672 = vmatprep.subr.bf16.mxu1 %v13587_v4 }
0x1d16   : > { %5262 = vmax.xlane.f32.xlu0 %v5261_v3  ;;  %11665 = vmatpush3.bf16.msk.msra.mxu0 %vm12753_vm9, %v11663_v50  ;;  %v10115_v50 = vld [vmem:[%s12345_s24] ss:$0 sm:$0xff] }
0x1d17   : > { %11666 = vmatprep.subr.bf16.mxu0 %v13587_v4 }
0x1da3   : > { %v5263_v10 = vpop.xlane.xlu0 %5262 }
0x1da4   : > { %v5264_v28 = vsub.f32 %v5258_v61, %v5263_v10 }
0x1da6   : > { %v5265_v58 = vmul.f32 1.442695, %v5264_v28 }
0x1da8   : > { %11968 = vpow2.f32 %v5265_v58 }
0x1db2   : > { %v11969_v30 = vpop.eup %11968 }
0x1db3   : > { %v5267_v39 = vsel %vm3824_vm6, %v11969_v30, 0.0 }
0x1db4   : > { %5268 = vadd.xlane.f32.xlu1 %v5267_v39 }
0x1e41   : > { %v5269_v61 = vpop.xlane.xlu1 %5268 }
0x1e42   : > { %11970 = vrcp.f32 %v5269_v61 }
0x1e4c   : > { %v11971_v25 = vpop.eup %11970 }
0x1e4d   : > { %v5271_v3 = vmul.f32 %v11971_v25, %v11969_v30 }
0x1e4f   : > { %11007 = vmatmul.mubr.msk.f32.vlgmr.msra.gmra.mrb[46].mxu0 %vm3824_vm6, %v5271_v3  ;;  %v1590_v3 = vld [vmem:[%s12356_s3 + $0x8] sm:$0xff] }
0x1e50   : > { %11022 = vmatprep.mubr.msk.f32.mxu0 %vm12099_vm2, %v13584_v57 }
0x1f22   : > { %v5344_v17 = vpop.f32.mrb[46].mxu0 }
0x1f23   : > { %v11008_v44 = vpop.f32.mrb[47].mxu0  ;;  %11012 = vmatmul.mubr.msk.f32.vlgmr.msra.gmra.mrb[46].mxu1 %vm1839_vm4, %v5344_v17 }
0x1f24   : > { %11041 = vmatprep.mubr.msk.f32.mxu1 %vm12099_vm2, %v13584_v57  ;;  %v1592_v44 = vld [vmem:[%s12356_s3 + $0x18] sm:$0xff] }
0x1ff6   : > { %v5417_v7 = vpop.f32.mrb[46].mxu1 }
0x1ff7   : > { %v5421_v10 = vadd.f32 %v5417_v7, %v12932_v13  ;;  %v11013_v28 = vpop.f32.mrb[47].mxu1  ;;  %v1589_v13 = vld [vmem:[%s12356_s3] sm:$0xff] }
0x1ff8   : > { %v12981_v17 = vpack.c.bf16 %v1590_v3, %v1589_v13  ;;  %v1594_v7 = vld [vmem:[%s12364_s12] sm:$0xff]  ;;  %v1596_v28 = vld [vmem:[%s12364_s12 + $0x10] sm:$0xff] }
0x1ff9   : > { %v5428_v58 = vadd.f32 %v10115_v50, %v5421_v10  ;;  %v1595_v10 = vld [vmem:[%s12364_s12 + $0x8] sm:$0xff] }
0x1ffa   : > { %11668 = vmatpush3.bf16.msra.mxu0 %v12981_v17 }
0x1ffb   : > { %v5429_v30 = vadd.f32 %v5428_v58, %v12697_v2  ;;  %11669 = vmatprep.subr.bf16.mxu0 %v13587_v4  ;;  %v1591_v2 = vld [vmem:[%s12356_s3 + $0x10] sm:$0xff]  ;;  %v12994_v58 = vpack.c.bf16 %v1595_v10, %v1594_v7  ;;  %v10117_v10 = vld [vmem:[%s12353_s30] ss:$0 sm:$0xff] }
0x1ffc   : > { %v12987_v50 = vpack.c.bf16 %v1592_v44, %v1591_v2  ;;  %v10116_v44 = vld [vmem:[%s12349_s29] ss:$0 sm:$0xff] }
0x1ffd   : > { %v5430_v39 = vsel %vm1612_vm3, %v5429_v30, 0.0  ;;  %11674 = vmatpush3.bf16.msra.mxu1 %v12994_v58 }
0x1ffe   : > { %5431 = vadd.xlane.f32.xlu0 %v5430_v39  ;;  %11671 = vmatpush3.bf16.msra.mxu0 %v12987_v50 }
0x1fff   : > { %11684 = vmatprep.subr.bf16.mxu0 %v13587_v4  ;;  %11675 = vmatprep.subr.bf16.mxu1 %v13587_v4 }
0x208b   : > { %v5432_v40 = vpop.xlane.xlu0 %5431 }
0x208c   : > { %v5433_v21 = vmul.f32 0.03125, %v5432_v40  ;;  %v1598_v40 = vld [vmem:[%s12364_s12 + $0x20] sm:$0xff] }
0x208e   : > { %v5434_v11 = vsub.f32 %v5429_v30, %v5433_v21  ;;  %v1597_v30 = vld [vmem:[%s12364_s12 + $0x18] sm:$0xff]  ;;  %v1599_v21 = vld [vmem:[%s12364_s12 + $0x28] sm:$0xff] }
0x208f   : > { %v12998_v39 = vpack.c.bf16 %v1597_v30, %v1596_v28 }
0x2090   : > { %v5435_v61 = vmul.f32 %v5434_v11, %v5434_v11 }
0x2091   : > { %11677 = vmatpush3.bf16.msra.mxu1 %v12998_v39 }
0x2092   : > { %v5436_v25 = vsel %vm1612_vm3, %v5435_v61, 0.0  ;;  %v13004_v61 = vpack.c.bf16 %v1599_v21, %v1598_v40  ;;  %11678 = vmatprep.subr.bf16.mxu1 %v13587_v4 }
0x2093   : > { %5437 = vadd.xlane.f32.xlu1 %v5436_v25 }
0x2095   : > { %11680 = vmatpush3.bf16.msra.mxu1 %v13004_v61 }
0x2096   : > { %11681 = vmatprep.subr.bf16.mxu1 %v13587_v4 }
0x2120   : > { %v5438_v25 = vpop.xlane.xlu1 %5437 }
0x2121   : > { %v5439_v13 = vmul.f32 0.03125, %v5438_v25 }
0x2123   : > { %v5440_v3 = vadd.f32 1e-05, %v5439_v13 }
0x2125   : > { %11972 = vrsqrt.f32 %v5440_v3 }
0x212f   : > { %v11973_v2 = vpop.eup %11972 }
0x2130   : > { %v5442_v7 = vmul.f32 %v11973_v2, %v5434_v11  ;;  %v13020_v11 = vld [vmem:[#allocation2 + $0x8] sm:$0xff] }
0x2132   : > { %v5449_v28 = vmul.f32 %v10116_v44, %v5442_v7  ;;  %v12014_v44 = vld [vmem:[%s13567_s27] ss:$0 sm:$0xff] }
0x2134   : > { %v13011_v30 = vadd.f32 %v10117_v10, %v5449_v28  ;;  %v12015_v10 = vld [vmem:[%s13568_s4] ss:$0 sm:$0xff] }
0x2136   : > { %11023 = vmatmul.mubr.msk.f32.vlgmr.msra.gmra.mrb[48].mxu0 %vm1612_vm3, %v13011_v30 }
0x2137   : > { %11686 = vmatpush3.bf16.msra.mxu0 %v12380_v12  ;;  %11052 = vmatprep.mubr.msk.f32.mxu0 %vm12099_vm2, %v13584_v57  ;;  %v1600_v12 = vld [vmem:[%s12364_s12 + $0x30] sm:$0xff] }
0x2138   : > { %11687 = vmatprep.subr.bf16.mxu0 %v13587_v4 }
0x213b   : > { %11689 = vmatpush3.bf16.msra.mxu0 %v12394_v19  ;;  %v1601_v19 = vld [vmem:[%s12364_s12 + $0x38] sm:$0xff] }
0x213c   : > { %11690 = vmatprep.subr.bf16.mxu0 %v13587_v4  ;;  %v13037_v40 = vpack.c.bf16 %v1601_v19, %v1600_v12 }
0x213e   : > { %11053 = vmatmul.mubr.msk.f32.vlgmr.msra.gmra.mrb[50].mxu0 %vm1612_vm3, %v13020_v11  ;;  %11683 = vmatpush3.bf16.msra.mxu1 %v13037_v40 }
0x213f   : > { %11692 = vmatpush3.bf16.msra.mxu0 %v12385_v16  ;;  %11063 = vmatprep.mubr.msk.f32.mxu0 %vm12099_vm2, %v13584_v57  ;;  %v10118_v16 = vld [vmem:[%s12360_s6] ss:$0 sm:$0xff] }
0x2140   : > { %11693 = vmatprep.subr.bf16.mxu0 %v13587_v4  ;;  %11696 = vmatprep.subr.bf16.mxu1 %v13587_v4 }
0x2143   : > { %11695 = vmatpush3.bf16.msra.mxu0 %v12398_v20 }
0x2144   : > { %11077 = vmatprep.subr.mxu0 %v13584_v57 }
0x2146   : > { %11064 = vmatmul.mubr.msk.f32.vlgmr.msra.gmra.mrb[52].mxu0 %vm1612_vm3, %v13020_v11 }
0x2147   : > { %11079 = vmatprep.mubr.msk.f32.mxu0 %vm12099_vm2, %v13584_v57 }
0x2209   : > { %v5532_v21 = vpop.f32.mrb[48].mxu0 }
0x220a   : > { %v5533_v20 = vadd.f32 %v10118_v16, %v5532_v21  ;;  %v11024_v25 = vpop.f32.mrb[49].mxu0 }
0x220c   : > { %v5536_v13 = vmax.f32 %v5533_v20, 0.0 }
0x220e   : > { %11042 = vmatmul.mubr.msk.f32.vlgmr.msra.gmra.mrb[48].mxu1 %vm5543_vm10, %v5536_v13 }
0x220f   : > { %11698 = vmatpush3.bf16.msra.mxu1 %v12406_v24  ;;  %11074 = vmatprep.mubr.msk.f32.mxu1 %vm12099_vm2, %v13584_v57 }
0x2210   : > { %11699 = vmatprep.subr.bf16.mxu1 %v13587_v4 }
0x2211   : > { %v5720_v3 = vpop.f32.mrb[50].mxu0 }
0x2212   : > { %v11054_v2 = vpop.f32.mrb[51].mxu0  ;;  %v5721_v7 = vadd.f32 %v12014_v44, %v5720_v3 }
0x2213   : > { %11701 = vmatpush3.bf16.msra.mxu1 %v12418_v27  ;;  %v12016_v27 = vld [vmem:[%s12312_s21 + $0x8] sm:$0xff] }
0x2214   : > { %11082 = vmatprep.subr.mxu1 %v13584_v57  ;;  %v5864_v19 = vmul.f32 0.35355338, %v5721_v7 }
0x2216   : > { %11075 = vmatmul.mubr.msk.f32.vlgmr.msra.gmra.mrb[50].mxu1 %vm1612_vm3, %v13020_v11 }
0x2217   : > { %11084 = vmatprep.mubr.msk.f32.mxu1 %vm12099_vm2, %v13584_v57 }
0x2219   : > { %v5790_v24 = vpop.f32.mrb[52].mxu0 }
0x221a   : > { %v5791_v28 = vadd.f32 %v12015_v10, %v5790_v24  ;;  %v11065_v12 = vpop.f32.mrb[53].mxu0  ;;  %v12017_v24 = vld [vmem:[%s13569_s28] ss:$0 sm:$0xff] }
0x221c   : > { %11078 = vmatpush3.xpose.msk.msra.mxu0 %vm1839_vm4, %v5791_v28 }
0x221d   : > { %11702 = vmatprep.subr.bf16.mxu0 %v13587_v4 }
0x221f   : > { %11080 = vmatmul.mubr.msk.f32.vlgmr.msra.gmra.mrb[54].mxu0 %vm1839_vm4, %v5864_v19 }
0x2220   : > { %11704 = vmatpush3.bf16.msra.mxu0 %v12445_v52  ;;  %11095 = vmatprep.mubr.msk.f32.mxu0 %vm12099_vm2, %v13584_v57 }
0x2221   : > { %11705 = vmatprep.subr.bf16.mxu0 %v13587_v4 }
0x2224   : > { %11707 = vmatpush3.bf16.msra.mxu0 %v12451_v55 }
0x2225   : > { %11714 = vmatprep.subr.bf16.mxu0 %v13587_v4 }
0x2227   : > { %11096 = vmatmul.mubr.msk.f32.vlgmr.msra.gmra.mrb[56].mxu0 %vm1612_vm3, %v13020_v11 }
0x2228   : > { %11716 = vmatpush3.bf16.msra.mxu0 %v12488_v22  ;;  %11117 = vmatprep.mubr.msk.f32.mxu0 %vm12099_vm2, %v13584_v57 }
0x2229   : > { %11717 = vmatprep.subr.bf16.mxu0 %v13587_v4 }
0x222c   : > { %11719 = vmatpush3.bf16.msra.mxu0 %v12492_v26 }
0x222d   : > { %11130 = vmatprep.subr.mxu0 %v13584_v57 }
0x222f   : > { %11118 = vmatmul.mubr.msk.f32.vlgmr.msra.gmra.mrb[58].mxu0 %vm1612_vm3, %v13020_v11 }
0x2230   : > { %11131 = vmatpush3.msra.mxu0 %v12016_v27  ;;  %11132 = vmatprep.mubr.msk.f32.mxu0 %vm12099_vm2, %v13584_v57 }
0x2231   : > { %11720 = vmatprep.subr.bf16.mxu0 %v13587_v4 }
0x22e1   : > { %v13078_v52 = vpop.f32.mrb[48].mxu1 }
0x22e2   : > { %v11043_v55 = vpop.f32.mrb[49].mxu1 }
0x22e9   : > { %v5860_v44 = vpop.f32.mrb[50].mxu1 }
0x22ea   : > { %v11076_v7 = vpop.f32.mrb[51].mxu1  ;;  %v5861_v10 = vadd.f32 %v12017_v24, %v5860_v44 }
0x22ec   : > { %11083 = vmatpush3.msra.mxu1 %v5861_v10 }
0x22ed   : > { %11708 = vmatprep.subr.bf16.mxu1 %v13587_v4 }
0x22f2   : > { %v5937_v22 = vpop.f32.mrb[54].mxu0 }
0x22f3   : > { %v5938_v16 = vadd.f32 %v5937_v22, %v12292_v5  ;;  %v11081_v26 = vpop.f32.mrb[55].mxu0 }
0x22f5   : > { %v5941_v21 = vsel %vm1839_vm4, %v5938_v16, -inf }
0x22f6   : > { %5942 = vmax.xlane.f32.xlu0 %v5941_v21 }
0x22fa   : > { %v6091_v27 = vpop.f32.mrb[56].mxu0 }
0x22fb   : > { %v11097_v55 = vpop.f32.mrb[57].mxu0 }
0x2383   : > { %v5943_v20 = vpop.xlane.xlu0 %5942 }
0x2384   : > { %v5944_v25 = vsub.f32 %v5938_v16, %v5943_v20  ;;  %v12019_v20 = vld [vmem:[%s13568_s4 + $0x1] ss:$0 sm:$0xff] }
0x2386   : > { %v5945_v13 = vmul.f32 1.442695, %v5944_v25 }
0x2388   : > { %11974 = vpow2.f32 %v5945_v13 }
0x2392   : > { %v11975_v3 = vpop.eup %11974 }
0x2393   : > { %v5947_v2 = vsel %vm1839_vm4, %v11975_v3, 0.0 }
0x2394   : > { %5948 = vadd.xlane.f32.xlu1 %v5947_v2 }
0x2421   : > { %v5949_v28 = vpop.xlane.xlu1 %5948 }
0x2422   : > { %11976 = vrcp.f32 %v5949_v28 }
0x242c   : > { %v11977_v12 = vpop.eup %11976 }
0x242d   : > { %v5951_v19 = vmul.f32 %v11977_v12, %v11975_v3 }
0x242f   : > { %11085 = vmatmul.mubr.msk.f32.vlgmr.msra.gmra.mrb[52].mxu1 %vm1839_vm4, %v5951_v19 }
0x2430   : > { %11710 = vmatpush3.bf16.msra.mxu1 %v12461_v60  ;;  %11106 = vmatprep.mubr.msk.f32.mxu1 %vm12099_vm2, %v13584_v57  ;;  %v12018_v60 = vld [vmem:[%s13567_s27 + $0x1] ss:$0 sm:$0xff] }
0x2431   : > { %11711 = vmatprep.subr.bf16.mxu1 %v13587_v4  ;;  %v6092_v26 = vadd.f32 %v12018_v60, %v6091_v27  ;;  %v6231_v27 = vpop.f32.mrb[58].mxu0 }
0x2432   : > { %v11119_v55 = vpop.f32.mrb[59].mxu0 }
0x2433   : > { %v6235_v3 = vmul.f32 0.35355338, %v6092_v26 }
0x2434   : > { %11713 = vmatpush3.bf16.msra.mxu1 %v12467_v0 }
0x2435   : > { %11120 = vmatprep.subr.mxu1 %v13584_v57 }
0x2437   : > { %11107 = vmatmul.mubr.msk.f32.vlgmr.msra.gmra.mrb[54].mxu1 %vm1612_vm3, %v13020_v11 }
0x2438   : > { %11122 = vmatprep.mubr.msk.f32.mxu1 %vm12099_vm2, %v13584_v57 }
0x2502   : > { %v6021_v22 = vpop.f32.mrb[52].mxu1 }
0x2503   : > { %v11086_v16 = vpop.f32.mrb[53].mxu1 }
0x2504   : > { %v12020_v16 = vld [vmem:[%s13569_s28 + $0x1] ss:$0 sm:$0xff] }
0x2505   : > { %v6232_v60 = vadd.f32 %v12020_v16, %v6231_v27 }
0x250a   : > { %v6161_v21 = vpop.f32.mrb[54].mxu1 }
0x250b   : > { %v6162_v25 = vadd.f32 %v12019_v20, %v6161_v21  ;;  %v11108_v13 = vpop.f32.mrb[55].mxu1 }
0x250d   : > { %11121 = vmatpush3.xpose.msk.msra.mxu1 %vm1839_vm4, %v6162_v25  ;;  %v12021_v25 = vld [vmem:[%s12312_s21] sm:$0xff] }
0x250e   : > { %11125 = vmatprep.subr.mxu1 %v13584_v57 }
0x2510   : > { %11123 = vmatmul.mubr.msk.f32.vlgmr.msra.gmra.mrb[56].mxu1 %vm1839_vm4, %v6235_v3 }
0x2511   : > { %11127 = vmatprep.mubr.msk.f32.mxu1 %vm12099_vm2, %v13584_v57  ;;  %11126 = vmatpush3.msra.mxu1 %v6232_v60 }
0x2512   : > { %11135 = vmatprep.subr.mxu1 %v13584_v57 }
0x25e3   : > { %v6308_v0 = vpop.f32.mrb[56].mxu1 }
0x25e4   : > { %v6309_v2 = vadd.f32 %v6308_v0, %v12292_v5  ;;  %v11124_v44 = vpop.f32.mrb[57].mxu1 }
0x25e6   : > { %v6312_v7 = vsel %vm1839_vm4, %v6309_v2, -inf }
0x25e7   : > { %6313 = vmax.xlane.f32.xlu0 %v6312_v7 }
0x2674   : > { %v6314_v24 = vpop.xlane.xlu0 %6313 }
0x2675   : > { %v6315_v10 = vsub.f32 %v6309_v2, %v6314_v24  ;;  %v12024_v24 = vld [vmem:[%s13567_s27 + $0x2] ss:$0 sm:$0xff] }
0x2677   : > { %v6316_v28 = vmul.f32 1.442695, %v6315_v10 }
0x2679   : > { %11978 = vpow2.f32 %v6316_v28 }
0x2683   : > { %v11979_v12 = vpop.eup %11978 }
0x2684   : > { %v6318_v19 = vsel %vm1839_vm4, %v11979_v12, 0.0 }
0x2685   : > { %6319 = vadd.xlane.f32.xlu1 %v6318_v19 }
0x2712   : > { %v6320_v26 = vpop.xlane.xlu1 %6319 }
0x2713   : > { %11980 = vrcp.f32 %v6320_v26 }
0x271d   : > { %v11981_v21 = vpop.eup %11980 }
0x271e   : > { %v6322_v20 = vmul.f32 %v11981_v21, %v11979_v12 }
0x2720   : > { %11128 = vmatmul.mubr.msk.f32.vlgmr.msra.gmra.mrb[58].mxu1 %vm1839_vm4, %v6322_v20 }
0x2721   : > { %11136 = vmatpush3.msra.mxu1 %v12021_v25  ;;  %11137 = vmatprep.mubr.msk.f32.mxu1 %vm12099_vm2, %v13584_v57 }
0x2722   : > { %11726 = vmatprep.subr.bf16.mxu1 %v13587_v4 }
0x2724   : > { %11138 = vmatmul.mubr.msk.f32.vlgmr.msra.gmra.mrb[60].mxu1 %vm1839_vm4, %v6021_v22 }
0x2725   : > { %11728 = vmatpush3.bf16.msra.mxu1 %v12514_v48  ;;  %11159 = vmatprep.mubr.msk.f32.mxu1 %vm12099_vm2, %v13584_v57 }
0x2726   : > { %11729 = vmatprep.subr.bf16.mxu1 %v13587_v4 }
0x2729   : > { %11731 = vmatpush3.bf16.msra.mxu1 %v12524_v51 }
0x272a   : > { %11173 = vmatprep.subr.mxu1 %v13584_v57 }
0x272c   : > { %11160 = vmatmul.mubr.msk.f32.vlgmr.msra.gmra.mrb[62].mxu1 %vm1612_vm3, %v13020_v11 }
0x272d   : > { %11175 = vmatprep.mubr.msk.f32.mxu1 %vm12099_vm2, %v13584_v57 }
0x27f3   : > { %v6392_v13 = vpop.f32.mrb[58].mxu1 }
0x27f4   : > { %v11129_v3 = vpop.f32.mrb[59].mxu1  ;;  %11133 = vmatmul.mubr.msk.f32.vlgmr.msra.gmra.mrb[60].mxu0 %vm1839_vm4, %v6392_v13 }
0x27f5   : > { %11722 = vmatpush3.bf16.msra.mxu0 %v12534_v56  ;;  %11148 = vmatprep.mubr.msk.f32.mxu0 %vm12099_vm2, %v13584_v57  ;;  %v12022_v56 = vld [vmem:[%s12312_s21 + $0x10] sm:$0xff] }
0x27f6   : > { %11723 = vmatprep.subr.bf16.mxu0 %v13587_v4 }
0x27f7   : > { %v6538_v48 = vpop.f32.mrb[60].mxu1 }
0x27f8   : > { %v11139_v51 = vpop.f32.mrb[61].mxu1 }
0x27f9   : > { %11725 = vmatpush3.bf16.msra.mxu0 %v12540_v62 }
0x27fa   : > { %11732 = vmatprep.subr.bf16.mxu0 %v13587_v4 }
0x27fc   : > { %11149 = vmatmul.mubr.msk.f32.vlgmr.msra.gmra.mrb[62].mxu0 %vm1612_vm3, %v13020_v11 }
0x27fd   : > { %11734 = vmatpush3.bf16.msra.mxu0 %v12563_v29  ;;  %11170 = vmatprep.mubr.msk.f32.mxu0 %vm12099_vm2, %v13584_v57  ;;  %v12023_v29 = vld [vmem:[%s13568_s4 + $0x2] ss:$0 sm:$0xff] }
0x27fe   : > { %11735 = vmatprep.subr.bf16.mxu0 %v13587_v4 }
0x27ff   : > { %v6678_v62 = vpop.f32.mrb[62].mxu1 }
0x2800   : > { %v6679_v22 = vadd.f32 %v12023_v29, %v6678_v62  ;;  %v11161_v0 = vpop.f32.mrb[63].mxu1 }
0x2801   : > { %11737 = vmatpush3.bf16.msra.mxu0 %v12567_v31 }
0x2802   : > { %11183 = vmatprep.subr.mxu0 %v13584_v57  ;;  %11174 = vmatpush3.xpose.msk.msra.mxu1 %vm1839_vm4, %v6679_v22 }
0x2803   : > { %11178 = vmatprep.subr.mxu1 %v13584_v57 }
0x2804   : > { %11171 = vmatmul.mubr.msk.f32.vlgmr.msra.gmra.mrb[64].mxu0 %vm1612_vm3, %v13020_v11 }
0x2805   : > { %11184 = vmatpush3.msra.mxu0 %v12022_v56  ;;  %11185 = vmatprep.mubr.msk.f32.mxu0 %vm12099_vm2, %v13584_v57 }
0x2806   : > { %11744 = vmatprep.subr.bf16.mxu0 %v13587_v4 }
0x28c7   : > { %v6465_v31 = vpop.f32.mrb[60].mxu0 }
0x28c8   : > { %v6539_v2 = vadd.f32 %v6538_v48, %v6465_v31  ;;  %v11134_v44 = vpop.f32.mrb[61].mxu0  ;;  %v12025_v48 = vld [vmem:[%s13569_s28 + $0x2] ss:$0 sm:$0xff] }
0x28c9   : > { %v12027_v44 = vld [vmem:[%s13567_s27 + $0x3] ss:$0 sm:$0xff] }
0x28cf   : > { %v6608_v7 = vpop.f32.mrb[62].mxu0 }
0x28d0   : > { %v6609_v10 = vadd.f32 %v12024_v24, %v6608_v7  ;;  %v11150_v28 = vpop.f32.mrb[63].mxu0 }
0x28d2   : > { %v6752_v12 = vmul.f32 0.35355338, %v6609_v10  ;;  %v12028_v10 = vld [vmem:[%s13568_s4 + $0x3] ss:$0 sm:$0xff] }
0x28d4   : > { %11176 = vmatmul.mubr.msk.f32.vlgmr.msra.gmra.mrb[64].mxu1 %vm1839_vm4, %v6752_v12 }
0x28d5   : > { %11180 = vmatprep.mubr.msk.f32.mxu1 %vm12099_vm2, %v13584_v57 }
0x28d7   : > { %v6748_v13 = vpop.f32.mrb[64].mxu0 }
0x28d8   : > { %v11172_v3 = vpop.f32.mrb[65].mxu0  ;;  %v6749_v51 = vadd.f32 %v12025_v48, %v6748_v13 }
0x28d9   : > { %v12029_v3 = vld [vmem:[%s13569_s28 + $0x3] ss:$0 sm:$0xff] }
0x28da   : > { %11179 = vmatpush3.msra.mxu1 %v6749_v51 }
0x28db   : > { %11738 = vmatprep.subr.bf16.mxu1 %v13587_v4 }
0x29a7   : > { %v6825_v19 = vpop.f32.mrb[64].mxu1 }
0x29a8   : > { %v6826_v27 = vadd.f32 %v6825_v19, %v12292_v5  ;;  %v11177_v55 = vpop.f32.mrb[65].mxu1 }
0x29aa   : > { %v6829_v16 = vsel %vm1839_vm4, %v6826_v27, -inf }
0x29ab   : > { %6830 = vmax.xlane.f32.xlu0 %v6829_v16 }
0x2a38   : > { %v6831_v60 = vpop.xlane.xlu0 %6830 }
0x2a39   : > { %v6832_v26 = vsub.f32 %v6826_v27, %v6831_v60 }
0x2a3b   : > { %v6833_v21 = vmul.f32 1.442695, %v6832_v26 }
0x2a3d   : > { %11982 = vpow2.f32 %v6833_v21 }
0x2a47   : > { %v11983_v20 = vpop.eup %11982 }
0x2a48   : > { %v6835_v25 = vsel %vm1839_vm4, %v11983_v20, 0.0 }
0x2a49   : > { %6836 = vadd.xlane.f32.xlu1 %v6835_v25 }
0x2ad6   : > { %v6837_v56 = vpop.xlane.xlu1 %6836 }
0x2ad7   : > { %11984 = vrcp.f32 %v6837_v56 }
0x2ae1   : > { %v11985_v62 = vpop.eup %11984 }
0x2ae2   : > { %v6839_v29 = vmul.f32 %v11985_v62, %v11983_v20 }
0x2ae4   : > { %11181 = vmatmul.mubr.msk.f32.vlgmr.msra.gmra.mrb[66].mxu1 %vm1839_vm4, %v6839_v29 }
0x2ae5   : > { %11740 = vmatpush3.bf16.msra.mxu1 %v12588_v54  ;;  %11196 = vmatprep.mubr.msk.f32.mxu1 %vm12099_vm2, %v13584_v57  ;;  %v12026_v54 = vld [vmem:[%s12312_s21 + $0x18] sm:$0xff] }
0x2ae6   : > { %11741 = vmatprep.subr.bf16.mxu1 %v13587_v4 }
0x2ae9   : > { %11743 = vmatpush3.bf16.msra.mxu1 %v12594_v59 }
0x2aea   : > { %11750 = vmatprep.subr.bf16.mxu1 %v13587_v4 }
0x2aec   : > { %11197 = vmatmul.mubr.msk.f32.vlgmr.msra.gmra.mrb[68].mxu1 %vm1612_vm3, %v13020_v11 }
0x2aed   : > { %11752 = vmatpush3.bf16.msra.mxu1 %v12632_v36  ;;  %11218 = vmatprep.mubr.msk.f32.mxu1 %vm12099_vm2, %v13584_v57 }
0x2aee   : > { %11753 = vmatprep.subr.bf16.mxu1 %v13587_v4 }
0x2af1   : > { %11755 = vmatpush3.bf16.msra.mxu1 %v12636_v38 }
0x2af2   : > { %11231 = vmatprep.subr.mxu1 %v13584_v57 }
0x2af4   : > { %11219 = vmatmul.mubr.msk.f32.vlgmr.msra.gmra.mrb[70].mxu1 %vm1612_vm3, %v13020_v11 }
0x2af5   : > { %11232 = vmatpush3.msra.mxu1 %v12026_v54  ;;  %11233 = vmatprep.mubr.msk.f32.mxu1 %vm12099_vm2, %v13584_v57 }
0x2af6   : > { %11763 = vmatprep.subr.bf16.mxu1 %v12661_v9 }
0x2bb7   : > { %v6909_v59 = vpop.f32.mrb[66].mxu1 }
0x2bb8   : > { %v11182_v36 = vpop.f32.mrb[67].mxu1  ;;  %11186 = vmatmul.mubr.msk.f32.vlgmr.msra.gmra.mrb[66].mxu0 %vm1839_vm4, %v6909_v59 }
0x2bb9   : > { %11746 = vmatpush3.bf16.msra.mxu0 %v12604_v1  ;;  %11207 = vmatprep.mubr.msk.f32.mxu0 %vm12099_vm2, %v13584_v57 }
0x2bba   : > { %11747 = vmatprep.subr.bf16.mxu0 %v13587_v4 }
0x2bbd   : > { %11749 = vmatpush3.bf16.msra.mxu0 %v12610_v8 }
0x2bbe   : > { %11221 = vmatprep.subr.mxu0 %v13584_v57 }
0x2bbf   : > { %v7053_v38 = vpop.f32.mrb[68].mxu1 }
0x2bc0   : > { %11208 = vmatmul.mubr.msk.f32.vlgmr.msra.gmra.mrb[68].mxu0 %vm1612_vm3, %v13020_v11  ;;  %v11198_v22 = vpop.f32.mrb[69].mxu1  ;;  %v7054_v7 = vadd.f32 %v12027_v44, %v7053_v38 }
0x2bc1   : > { %11223 = vmatprep.mubr.msk.f32.mxu0 %vm12099_vm2, %v13584_v57 }
0x2bc2   : > { %v7197_v8 = vmul.f32 0.35355338, %v7054_v7 }
0x2bc7   : > { %v7193_v25 = vpop.f32.mrb[70].mxu1 }
0x2bc8   : > { %v11220_v13 = vpop.f32.mrb[71].mxu1  ;;  %v7194_v48 = vadd.f32 %v12029_v3, %v7193_v25  ;;  %v12034_v25 = vld [vmem:[%s12332_s10] ss:$0 sm:$0xff] }
0x2c8b   : > { %v6982_v0 = vpop.f32.mrb[66].mxu0 }
0x2c8c   : > { %v6986_v31 = vadd.f32 %v6982_v0, %v6539_v2  ;;  %v11187_v1 = vpop.f32.mrb[67].mxu0 }
0x2c93   : > { %v7123_v24 = vpop.f32.mrb[68].mxu0 }
0x2c94   : > { %v7124_v28 = vadd.f32 %v12028_v10, %v7123_v24  ;;  %v11209_v12 = vpop.f32.mrb[69].mxu0  ;;  %v13218_v24 = vld [vmem:[%s13571_s16 + $0x10] sm:$0xff] }
0x2c96   : > { %11222 = vmatpush3.xpose.msk.msra.mxu0 %vm1839_vm4, %v7124_v28 }
0x2c97   : > { %11226 = vmatprep.subr.mxu0 %v13584_v57 }
0x2c99   : > { %11224 = vmatmul.mubr.msk.f32.vlgmr.msra.gmra.mrb[70].mxu0 %vm1839_vm4, %v7197_v8 }
0x2c9a   : > { %11228 = vmatprep.mubr.msk.f32.mxu0 %vm12099_vm2, %v13584_v57  ;;  %11227 = vmatpush3.msra.mxu0 %v7194_v48 }
0x2c9b   : > { %11756 = vmatprep.subr.bf16.mxu0 %v13587_v4 }
0x2d6c   : > { %v7270_v19 = vpop.f32.mrb[70].mxu0 }
0x2d6d   : > { %v7271_v2 = vadd.f32 %v7270_v19, %v12292_v5  ;;  %v11225_v27 = vpop.f32.mrb[71].mxu0  ;;  %v12031_v19 = vld [vmem:[%s13573_s23] ss:$0 sm:$0xff] }
0x2d6e   : > { %v12032_v27 = vld [vmem:[%s13574_s22] ss:$0 sm:$0xff] }
0x2d6f   : > { %v7274_v55 = vsel %vm1839_vm4, %v7271_v2, -inf }
0x2d70   : > { %7275 = vmax.xlane.f32.xlu0 %v7274_v55 }
0x2dfd   : > { %v7276_v16 = vpop.xlane.xlu0 %7275 }
0x2dfe   : > { %v7277_v60 = vsub.f32 %v7271_v2, %v7276_v16 }
0x2e00   : > { %v7278_v26 = vmul.f32 1.442695, %v7277_v60  ;;  %v12033_v60 = vld [vmem:[%s12335_s8] ss:$0 sm:$0xff] }
0x2e02   : > { %11986 = vpow2.f32 %v7278_v26 }
0x2e0c   : > { %v11987_v21 = vpop.eup %11986 }
0x2e0d   : > { %v7280_v20 = vsel %vm1839_vm4, %v11987_v21, 0.0 }
0x2e0e   : > { %7281 = vadd.xlane.f32.xlu1 %v7280_v20 }
0x2e9b   : > { %v7282_v51 = vpop.xlane.xlu1 %7281 }
0x2e9c   : > { %11988 = vrcp.f32 %v7282_v51 }
0x2ea6   : > { %v11989_v56 = vpop.eup %11988 }
0x2ea7   : > { %v7284_v62 = vmul.f32 %v11989_v56, %v11987_v21 }
0x2ea9   : > { %11229 = vmatmul.mubr.msk.f32.vlgmr.msra.gmra.mrb[72].mxu0 %vm1839_vm4, %v7284_v62 }
0x2eaa   : > { %11758 = vmatpush3.bf16.msra.mxu0 %v12684_v43  ;;  %11244 = vmatprep.mubr.msk.f32.mxu0 %vm12099_vm2, %v13584_v57 }
0x2eab   : > { %11759 = vmatprep.subr.bf16.mxu0 %v13587_v4 }
0x2eae   : > { %11761 = vmatpush3.bf16.msra.mxu0 %v12692_v46  ;;  %v12030_v46 = vld [vmem:[%s13570_s15] ss:$0 sm:$0xff] }
0x2eaf   : > { %11771 = vmatprep.subr.bf16.mxu0 %v12735_v45 }
0x2f7c   : > { %v7354_v29 = vpop.f32.mrb[72].mxu0 }
0x2f7d   : > { %v11230_v54 = vpop.f32.mrb[73].mxu0  ;;  %11234 = vmatmul.mubr.msk.f32.vlgmr.msra.gmra.mrb[72].mxu1 %vm1839_vm4, %v7354_v29 }
0x2f7e   : > { %11765 = vmatpush3.bf16.msra.mxu1 %v12661_v9  ;;  %11255 = vmatprep.mubr.msk.f32.mxu1 %vm1612_vm3, %v13218_v24 }
0x2f7f   : > { %11767 = vmatprep.subr.bf16.mxu1 %v12667_v37 }
0x2f82   : > { %11769 = vmatpush3.bf16.msra.mxu1 %v12667_v37 }
0x2f83   : > { %11778 = vmatprep.subr.bf16.mxu1 %v13587_v4 }
0x3050   : > { %v7427_v43 = vpop.f32.mrb[72].mxu1 }
0x3051   : > { %v7431_v59 = vadd.f32 %v7427_v43, %v6986_v31  ;;  %v11235_v36 = vpop.f32.mrb[73].mxu1  ;;  %v13223_v31 = vld [vmem:[%s13571_s16 + $0x18] sm:$0x3] }
0x3052   : > { %11256 = vmatmul.mubr.msk.f32.vlgmr.msra.gmra.mrb[74].mxu1 %vm1612_vm3, %v13223_v31 }
0x3053   : > { %v7432_v38 = vadd.f32 %v12030_v46, %v7431_v59  ;;  %11273 = vmatprep.mubr.msk.f32.mxu1 %vm12099_vm2, %v13584_v57 }
0x3055   : > { %v7433_v22 = vadd.f32 %v7432_v38, %v13020_v11  ;;  %v12035_v38 = vld [vmem:[%s12338_s19] ss:$0 sm:$0xff] }
0x3057   : > { %v7434_v0 = vsel %vm1612_vm3, %v7433_v22, 0.0 }
0x3058   : > { %7435 = vadd.xlane.f32.xlu0 %v7434_v0 }
0x30e5   : > { %v7436_v1 = vpop.xlane.xlu0 %7435 }
0x30e6   : > { %v7437_v9 = vmul.f32 0.03125, %v7436_v1 }
0x30e8   : > { %v7438_v44 = vsub.f32 %v7433_v22, %v7437_v9 }
0x30ea   : > { %v7439_v7 = vmul.f32 %v7438_v44, %v7438_v44 }
0x30ec   : > { %v7440_v37 = vsel %vm1612_vm3, %v7439_v7, 0.0 }
0x30ed   : > { %7441 = vadd.xlane.f32.xlu1 %v7440_v37 }
0x3125   : > { %v11257_v16 = vpop.f32.mrb[74].mxu1 }
0x3126   : > { %v7600_v26 = vadd.f32 %v12033_v60, %v11257_v16  ;;  %v12038_v16 = vld [vmem:[%s12341_s25 + $0x8] sm:$0xff] }
0x317a   : > { %v7442_v11 = vpop.xlane.xlu1 %7441 }
0x317b   : > { %v7443_v10 = vmul.f32 0.03125, %v7442_v11 }
0x317d   : > { %v7444_v28 = vadd.f32 1e-05, %v7443_v10  ;;  %v12036_v10 = vld [vmem:[%s12335_s8 + $0x1] ss:$0 sm:$0xff] }
0x317f   : > { %11990 = vrsqrt.f32 %v7444_v28 }
0x3189   : > { %v11991_v12 = vpop.eup %11990 }
0x318a   : > { %v7446_v8 = vmul.f32 %v11991_v12, %v7438_v44 }
0x318c   : > { %v7447_v2 = vmul.f32 %v12031_v19, %v7446_v8 }
0x318e   : > { %v13231_v55 = vadd.f32 %v12032_v27, %v7447_v2 }
0x3190   : > { %11245 = vmatmul.mubr.msk.f32.vlgmr.msra.gmra.mrb[74].mxu0 %vm1612_vm3, %v13231_v55 }
0x3191   : > { %11773 = vmatpush3.bf16.msra.mxu0 %v12735_v45  ;;  %11266 = vmatprep.mubr.msk.f32.mxu0 %vm1612_vm3, %v13218_v24  ;;  %v7594_v45 = vpop.f32.mrb[75].mxu1 }
0x3192   : > { %11775 = vmatprep.subr.bf16.mxu0 %v12738_v49  ;;  %v7595_v21 = vadd.f32 %v12033_v60, %v7594_v45 }
0x3194   : > { %v11779_v20 = vpack.c.bf16 %v7600_v26, %v7595_v21 }
0x3195   : > { %11777 = vmatpush3.bf16.msra.mxu0 %v12738_v49 }
0x3196   : > { %11782 = vmatprep.subr.bf16.mxu0 %v13587_v4  ;;  %11781 = vmatpush3.bf16.xpose.msk.msra.mxu1 %vm12706_vm5, %v11779_v20 }
0x3197   : > { %11786 = vmatprep.subr.bf16.mxu1 %v13587_v4 }
0x3198   : > { %11267 = vmatmul.mubr.msk.f32.vlgmr.msra.gmra.mrb[76].mxu0 %vm1612_vm3, %v13223_v31 }
0x3199   : > { %11280 = vmatprep.mubr.msk.f32.mxu0 %vm12099_vm2, %v13584_v57 }
0x3263   : > { %v7518_v49 = vpop.f32.mrb[74].mxu0 }
0x3264   : > { %v7519_v13 = vadd.f32 %v12034_v25, %v7518_v49  ;;  %v11246_v3 = vpop.f32.mrb[75].mxu0 }
0x3266   : > { %v7678_v48 = vmul.f32 0.35355338, %v7519_v13 }
0x3268   : > { %11274 = vmatmul.mubr.msk.f32.vlgmr.msra.gmra.mrb[76].mxu1 %vm1839_vm4, %v7678_v48 }
0x3269   : > { %11788 = vmatpush3.bf16.msra.mxu1 %v12716_v33  ;;  %11291 = vmatprep.mubr.msk.f32.mxu1 %vm12099_vm2, %v13584_v57 }
0x326a   : > { %11789 = vmatprep.subr.bf16.mxu1 %v13587_v4 }
0x326b   : > { %v11268_v36 = vpop.f32.mrb[76].mxu0 }
0x326c   : > { %v7669_v46 = vpop.f32.mrb[77].mxu0  ;;  %v7675_v22 = vadd.f32 %v12035_v38, %v11268_v36 }
0x326d   : > { %11791 = vmatpush3.bf16.msra.mxu1 %v12722_v35  ;;  %v7670_v0 = vadd.f32 %v12035_v38, %v7669_v46 }
0x326e   : > { %11801 = vmatprep.subr.bf16.mxu1 %v12792_v15 }
0x326f   : > { %v11783_v1 = vpack.c.bf16 %v7675_v22, %v7670_v0 }
0x3270   : > { %11292 = vmatmul.mubr.msk.f32.vlgmr.msra.gmra.mrb[78].mxu1 %vm1612_vm3, %v13231_v55 }
0x3271   : > { %11803 = vmatpush3.bf16.msra.mxu1 %v12792_v15  ;;  %11313 = vmatprep.mubr.msk.f32.mxu1 %vm1612_vm3, %v13218_v24 }
0x3272   : > { %11805 = vmatprep.subr.bf16.mxu1 %v12795_v41  ;;  %11785 = vmatpush3.bf16.msk.msra.mxu0 %vm12753_vm9, %v11783_v1 }
0x3273   : > { %11793 = vmatprep.subr.bf16.mxu0 %v12761_v23 }
0x3275   : > { %11807 = vmatpush3.bf16.msra.mxu1 %v12795_v41 }
0x3276   : > { %11812 = vmatprep.subr.bf16.mxu1 %v13587_v4 }
0x3278   : > { %11314 = vmatmul.mubr.msk.f32.vlgmr.msra.gmra.mrb[80].mxu1 %vm1612_vm3, %v13223_v31 }
0x3279   : > { %11327 = vmatprep.mubr.msk.f32.mxu1 %vm12099_vm2, %v13584_v57 }
0x333b   : > { %v7754_v33 = vpop.f32.mrb[76].mxu1 }
0x333c   : > { %v7755_v35 = vadd.f32 %v7754_v33, %v12292_v5  ;;  %v11275_v15 = vpop.f32.mrb[77].mxu1 }
0x333e   : > { %v7758_v51 = vsel %vm3824_vm6, %v7755_v35, -inf }
0x333f   : > { %7759 = vmax.xlane.f32.xlu0 %v7758_v51 }
0x3343   : > { %v7911_v56 = vpop.f32.mrb[78].mxu1 }
0x3344   : > { %v11293_v62 = vpop.f32.mrb[79].mxu1 }
0x334b   : > { %v11315_v48 = vpop.f32.mrb[80].mxu1 }
0x334c   : > { %v8056_v33 = vpop.f32.mrb[81].mxu1 }
0x33cc   : > { %v7760_v29 = vpop.xlane.xlu0 %7759 }
0x33cd   : > { %v7761_v41 = vsub.f32 %v7755_v35, %v7760_v29  ;;  %v12039_v35 = vld [vmem:[%s12338_s19 + $0x1] ss:$0 sm:$0xff] }
0x33ce   : > { %v8062_v15 = vadd.f32 %v12039_v35, %v11315_v48  ;;  %v8057_v51 = vadd.f32 %v12039_v35, %v8056_v33  ;;  %v13589_v48 = vld [vmem:[#allocation48_spill] sm:$0xff]  ;;  %v13590_v33 = vld [vmem:[#allocation49_spill] sm:$0xff] }
0x33cf   : > { %v7762_v54 = vmul.f32 1.442695, %v7761_v41  ;;  %v13591_v35 = vld [vmem:[#allocation52_spill] sm:$0xff] }
0x33d1   : > { %11992 = vpow2.f32 %v7762_v54  ;;  %v12040_v54 = vld [vmem:[%s12341_s25] sm:$0xff] }
0x33db   : > { %v11993_v43 = vpop.eup %11992 }
0x33dc   : > { %v7764_v59 = vsel %vm3824_vm6, %v11993_v43, 0.0 }
0x33dd   : > { %7765 = vadd.xlane.f32.xlu1 %v7764_v59 }
0x346a   : > { %v7766_v9 = vpop.xlane.xlu1 %7765 }
0x346b   : > { %11994 = vrcp.f32 %v7766_v9  ;;  %v12042_v9 = vld [vmem:[%s12332_s10 + $0x2] ss:$0 sm:$0xff] }
0x3475   : > { %v11995_v44 = vpop.eup %11994 }
0x3476   : > { %v7768_v7 = vmul.f32 %v11995_v44, %v11993_v43 }
0x3478   : > { %11281 = vmatmul.mubr.msk.f32.vlgmr.msra.gmra.mrb[78].mxu0 %vm3824_vm6, %v7768_v7 }
0x3479   : > { %11795 = vmatpush3.bf16.msra.mxu0 %v12761_v23  ;;  %11302 = vmatprep.mubr.msk.f32.mxu0 %vm1612_vm3, %v13218_v24 }
0x347a   : > { %11797 = vmatprep.subr.bf16.mxu0 %v12766_v53 }
0x347d   : > { %11799 = vmatpush3.bf16.msra.mxu0 %v12766_v53  ;;  %v12037_v53 = vld [vmem:[%s12332_s10 + $0x1] ss:$0 sm:$0xff] }
0x347e   : > { %11808 = vmatprep.subr.bf16.mxu0 %v13587_v4  ;;  %v7912_v2 = vadd.f32 %v12037_v53, %v7911_v56  ;;  %v11813_v56 = vpack.c.bf16 %v8062_v15, %v8057_v51  ;;  %v13592_v15 = vld [vmem:[#allocation53_spill] sm:$0xff] }
0x3480   : > { %11303 = vmatmul.mubr.msk.f32.vlgmr.msra.gmra.mrb[80].mxu0 %vm1612_vm3, %v13223_v31  ;;  %v8065_v27 = vmul.f32 0.35355338, %v7912_v2  ;;  %11815 = vmatpush3.bf16.msk.msra.mxu1 %vm12753_vm9, %v11813_v56 }
0x3481   : > { %11320 = vmatprep.mubr.msk.f32.mxu0 %vm12099_vm2, %v13584_v57  ;;  %11335 = vmatprep.subr.mxu1 %v13584_v57 }
0x354b   : > { %v7841_v37 = vpop.f32.mrb[78].mxu0 }
0x354c   : > { %v11282_v11 = vpop.f32.mrb[79].mxu0 }
0x354d   : > { %v12043_v11 = vld [vmem:[%s12341_s25 + $0x10] sm:$0xff] }
0x3553   : > { %v11304_v23 = vpop.f32.mrb[80].mxu0 }
0x3554   : > { %v7987_v28 = vadd.f32 %v12036_v10, %v11304_v23  ;;  %v7981_v12 = vpop.f32.mrb[81].mxu0  ;;  %v13588_v23 = vld [vmem:[#allocation50_spill] sm:$0xff] }
0x3555   : > { %v7982_v8 = vadd.f32 %v12036_v10, %v7981_v12 }
0x3557   : > { %v11809_v19 = vpack.c.bf16 %v7987_v28, %v7982_v8 }
0x3559   : > { %11811 = vmatpush3.bf16.xpose.msk.msra.mxu0 %vm12706_vm5, %v11809_v19 }
0x355a   : > { %11330 = vmatprep.subr.mxu0 %v13584_v57 }
0x3560   : > { %11321 = vmatmul.mubr.msk.f32.vlgmr.msra.gmra.mrb[82].mxu0 %vm1839_vm4, %v8065_v27 }
0x3561   : > { %11331 = vmatpush3.msra.mxu0 %v12038_v16  ;;  %11332 = vmatprep.mubr.msk.f32.mxu0 %vm12099_vm2, %v13584_v57 }
0x3562   : > { %11816 = vmatprep.subr.bf16.mxu0 %v13587_v4 }
0x3633   : > { %v8141_v60 = vpop.f32.mrb[82].mxu0 }
0x3634   : > { %v8142_v26 = vadd.f32 %v8141_v60, %v12292_v5  ;;  %v11322_v45 = vpop.f32.mrb[83].mxu0 }
0x3635   : > { %v12044_v45 = vld [vmem:[%s12338_s19 + $0x2] ss:$0 sm:$0xff] }
0x3636   : > { %v8145_v21 = vsel %vm3824_vm6, %v8142_v26, -inf }
0x3637   : > { %8146 = vmax.xlane.f32.xlu0 %v8145_v21 }
0x36c4   : > { %v8147_v20 = vpop.xlane.xlu0 %8146 }
0x36c5   : > { %v8148_v49 = vsub.f32 %v8142_v26, %v8147_v20 }
0x36c7   : > { %v8149_v25 = vmul.f32 1.442695, %v8148_v49 }
0x36c9   : > { %11996 = vpow2.f32 %v8149_v25 }
0x36d3   : > { %v11997_v13 = vpop.eup %11996 }
0x36d4   : > { %v8151_v3 = vsel %vm3824_vm6, %v11997_v13, 0.0 }
0x36d5   : > { %8152 = vadd.xlane.f32.xlu1 %v8151_v3 }
0x3762   : > { %v8153_v62 = vpop.xlane.xlu1 %8152 }
0x3763   : > { %11998 = vrcp.f32 %v8153_v62  ;;  %v13593_v62 = vld [vmem:[#allocation51_spill] sm:$0xff] }
0x376d   : > { %v11999_v29 = vpop.eup %11998 }
0x376e   : > { %v8155_v41 = vmul.f32 %v11999_v29, %v11997_v13 }
0x3770   : > { %11328 = vmatmul.mubr.msk.f32.vlgmr.msra.gmra.mrb[82].mxu1 %vm3824_vm6, %v8155_v41 }
0x3771   : > { %11336 = vmatpush3.msra.mxu1 %v12040_v54  ;;  %11337 = vmatprep.mubr.msk.f32.mxu1 %vm12099_vm2, %v13584_v57 }
0x3772   : > { %11823 = vmatprep.subr.bf16.mxu1 %v12818_v47 }
0x3774   : > { %11338 = vmatmul.mubr.msk.f32.vlgmr.msra.gmra.mrb[84].mxu1 %vm1839_vm4, %v7841_v37 }
0x3775   : > { %11825 = vmatpush3.bf16.msra.mxu1 %v12818_v47  ;;  %11359 = vmatprep.mubr.msk.f32.mxu1 %vm1612_vm3, %v13218_v24 }
0x3776   : > { %11827 = vmatprep.subr.bf16.mxu1 %v12826_v63 }
0x3779   : > { %11829 = vmatpush3.bf16.msra.mxu1 %v12826_v63 }
0x377a   : > { %11838 = vmatprep.subr.bf16.mxu1 %v13587_v4 }
0x377c   : > { %11360 = vmatmul.mubr.msk.f32.vlgmr.msra.gmra.mrb[86].mxu1 %vm1612_vm3, %v13223_v31 }
0x377d   : > { %11377 = vmatprep.mubr.msk.f32.mxu1 %vm12099_vm2, %v13584_v57 }
0x3843   : > { %v8228_v43 = vpop.f32.mrb[82].mxu1 }
0x3844   : > { %v11329_v59 = vpop.f32.mrb[83].mxu1  ;;  %11333 = vmatmul.mubr.msk.f32.vlgmr.msra.gmra.mrb[84].mxu0 %vm1839_vm4, %v8228_v43 }
0x3845   : > { %11818 = vmatpush3.bf16.msra.mxu0 %v12842_v6  ;;  %11348 = vmatprep.mubr.msk.f32.mxu0 %vm12099_vm2, %v13584_v57 }
0x3846   : > { %11819 = vmatprep.subr.bf16.mxu0 %v13587_v4 }
0x3847   : > { %v8374_v47 = vpop.f32.mrb[84].mxu1 }
0x3848   : > { %v11339_v63 = vpop.f32.mrb[85].mxu1 }
0x3849   : > { %11821 = vmatpush3.bf16.msra.mxu0 %v12848_v18  ;;  %v12041_v18 = vld [vmem:[%s12335_s8 + $0x2] ss:$0 sm:$0xff] }
0x384a   : > { %11831 = vmatprep.subr.bf16.mxu0 %v12871_v34 }
0x384c   : > { %11349 = vmatmul.mubr.msk.f32.vlgmr.msra.gmra.mrb[86].mxu0 %vm1612_vm3, %v13231_v55 }
0x384d   : > { %11833 = vmatpush3.bf16.msra.mxu0 %v12871_v34  ;;  %11370 = vmatprep.mubr.msk.f32.mxu0 %vm1612_vm3, %v13218_v24 }
0x384e   : > { %11835 = vmatprep.subr.bf16.mxu0 %v12874_v42 }
0x384f   : > { %v11361_v6 = vpop.f32.mrb[86].mxu1 }
0x3850   : > { %v8520_v34 = vadd.f32 %v12041_v18, %v11361_v6  ;;  %v8514_v36 = vpop.f32.mrb[87].mxu1 }
0x3851   : > { %11837 = vmatpush3.bf16.msra.mxu0 %v12874_v42  ;;  %v8515_v46 = vadd.f32 %v12041_v18, %v8514_v36  ;;  %v12046_v36 = vld [vmem:[%s12332_s10 + $0x3] ss:$0 sm:$0xff] }
0x3852   : > { %11842 = vmatprep.subr.bf16.mxu0 %v13587_v4 }
0x3853   : > { %v11839_v38 = vpack.c.bf16 %v8520_v34, %v8515_v46 }
0x3854   : > { %11371 = vmatmul.mubr.msk.f32.vlgmr.msra.gmra.mrb[88].mxu0 %vm1612_vm3, %v13223_v31 }
0x3855   : > { %11384 = vmatprep.mubr.msk.f32.mxu0 %vm12099_vm2, %v13584_v57  ;;  %11841 = vmatpush3.bf16.xpose.msk.msra.mxu1 %vm12706_vm5, %v11839_v38  ;;  %v12047_v38 = vld [vmem:[%s12341_s25 + $0x18] sm:$0xff] }
0x3856   : > { %11387 = vmatprep.subr.mxu1 %v13584_v57 }
0x3917   : > { %v8301_v42 = vpop.f32.mrb[84].mxu0 }
0x3918   : > { %v13343_v22 = vadd.f32 %v8374_v47, %v8301_v42  ;;  %v11334_v0 = vpop.f32.mrb[85].mxu0  ;;  %v12045_v47 = vld [vmem:[%s12335_s8 + $0x3] ss:$0 sm:$0xff]  ;;  %s13598_s8 = sld [smem:[#allocation33_spill]] (!%p10200_p5) }
0x391f   : > { %v8444_v1 = vpop.f32.mrb[86].mxu0 }
0x3920   : > { %v8445_v44 = vadd.f32 %v12042_v9, %v8444_v1  ;;  %v11350_v7 = vpop.f32.mrb[87].mxu0 }
0x3922   : > { %v8598_v37 = vmul.f32 0.35355338, %v8445_v44 }
0x3924   : > { %11378 = vmatmul.mubr.msk.f32.vlgmr.msra.gmra.mrb[88].mxu1 %vm1839_vm4, %v8598_v37 }
0x3925   : > { %11388 = vmatpush3.msra.mxu1 %v12043_v11  ;;  %11389 = vmatprep.mubr.msk.f32.mxu1 %vm12099_vm2, %v13584_v57 }
0x3926   : > { %11853 = vmatprep.subr.bf16.mxu1 %v13588_v23 }
0x3927   : > { %v11372_v60 = vpop.f32.mrb[88].mxu0 }
0x3928   : > { %v8589_v26 = vpop.f32.mrb[89].mxu0  ;;  %v8595_v21 = vadd.f32 %v12044_v45, %v11372_v60 }
0x3929   : > { %v8590_v20 = vadd.f32 %v12044_v45, %v8589_v26 }
0x392b   : > { %v11843_v49 = vpack.c.bf16 %v8595_v21, %v8590_v20 }
0x392d   : > { %11845 = vmatpush3.bf16.msk.msra.mxu0 %vm12753_vm9, %v11843_v49 }
0x392e   : > { %11846 = vmatprep.subr.bf16.mxu0 %v13587_v4 }
0x39f7   : > { %v8674_v10 = vpop.f32.mrb[88].mxu1 }
0x39f8   : > { %v8675_v28 = vadd.f32 %v8674_v10, %v12292_v5  ;;  %v11379_v12 = vpop.f32.mrb[89].mxu1  ;;  %v12048_v10 = vld [vmem:[%s12338_s19 + $0x3] ss:$0 sm:$0xff]  ;;  %s13600_s19 = sld [smem:[#allocation35_spill]] (!%p10200_p5) }
0x39fa   : > { %v8678_v8 = vsel %vm3824_vm6, %v8675_v28, -inf }
0x39fb   : > { %8679 = vmax.xlane.f32.xlu0 %v8678_v8 }
0x3a88   : > { %v8680_v19 = vpop.xlane.xlu0 %8679 }
0x3a89   : > { %v8681_v53 = vsub.f32 %v8675_v28, %v8680_v19 }
0x3a8b   : > { %v8682_v2 = vmul.f32 1.442695, %v8681_v53 }
0x3a8d   : > { %12000 = vpow2.f32 %v8682_v2 }
0x3a97   : > { %v12001_v27 = vpop.eup %12000 }
0x3a98   : > { %v8684_v16 = vsel %vm3824_vm6, %v12001_v27, 0.0 }
0x3a99   : > { %8685 = vadd.xlane.f32.xlu1 %v8684_v16 }
0x3b26   : > { %v8686_v25 = vpop.xlane.xlu1 %8685 }
0x3b27   : > { %12002 = vrcp.f32 %v8686_v25 }
0x3b31   : > { %v12003_v13 = vpop.eup %12002 }
0x3b32   : > { %v8688_v3 = vmul.f32 %v12003_v13, %v12001_v27 }
0x3b34   : > { %11385 = vmatmul.mubr.msk.f32.vlgmr.msra.gmra.mrb[90].mxu0 %vm3824_vm6, %v8688_v3 }
0x3b35   : > { %11848 = vmatpush3.bf16.msra.mxu0 %v13589_v48  ;;  %11400 = vmatprep.mubr.msk.f32.mxu0 %vm12099_vm2, %v13584_v57 }
0x3b36   : > { %11849 = vmatprep.subr.bf16.mxu0 %v13587_v4 }
0x3b39   : > { %11851 = vmatpush3.bf16.msra.mxu0 %v13590_v33 }
0x3b3a   : > { %11861 = vmatprep.subr.bf16.mxu0 %v13591_v35 }
0x3b3c   : > { %11401 = vmatmul.mubr.msk.f32.vlgmr.msra.gmra.mrb[92].mxu0 %vm1612_vm3, %v13231_v55 }
0x3b3d   : > { %11863 = vmatpush3.bf16.msra.mxu0 %v13591_v35  ;;  %11422 = vmatprep.mubr.msk.f32.mxu0 %vm1612_vm3, %v13218_v24 }
0x3b3e   : > { %11865 = vmatprep.subr.bf16.mxu0 %v13592_v15 }
0x3b41   : > { %11867 = vmatpush3.bf16.msra.mxu0 %v13592_v15 }
0x3b42   : > { %11872 = vmatprep.subr.bf16.mxu0 %v13587_v4 }
0x3b44   : > { %11423 = vmatmul.mubr.msk.f32.vlgmr.msra.gmra.mrb[94].mxu0 %vm1612_vm3, %v13223_v31 }
0x3b45   : > { %11436 = vmatprep.mubr.msk.f32.mxu0 %vm12099_vm2, %v13584_v57 }
0x3c07   : > { %v8761_v51 = vpop.f32.mrb[90].mxu0 }
0x3c08   : > { %v11386_v56 = vpop.f32.mrb[91].mxu0  ;;  %11390 = vmatmul.mubr.msk.f32.vlgmr.msra.gmra.mrb[90].mxu1 %vm1839_vm4, %v8761_v51 }
0x3c09   : > { %11855 = vmatpush3.bf16.msra.mxu1 %v13588_v23  ;;  %11411 = vmatprep.mubr.msk.f32.mxu1 %vm1612_vm3, %v13218_v24 }
0x3c0a   : > { %11857 = vmatprep.subr.bf16.mxu1 %v13593_v62 }
0x3c0d   : > { %11859 = vmatpush3.bf16.msra.mxu1 %v13593_v62 }
0x3c0e   : > { %11868 = vmatprep.subr.bf16.mxu1 %v13587_v4 }
0x3c0f   : > { %v8905_v29 = vpop.f32.mrb[92].mxu0 }
0x3c10   : > { %v11402_v41 = vpop.f32.mrb[93].mxu0  ;;  %11412 = vmatmul.mubr.msk.f32.vlgmr.msra.gmra.mrb[92].mxu1 %vm1612_vm3, %v13223_v31  ;;  %v8906_v46 = vadd.f32 %v12046_v36, %v8905_v29  ;;  %v12050_v29 = vld [vmem:[%s12349_s29] ss:$0 sm:$0xff]  ;;  %s13597_s29 = sld [smem:[#allocation32_spill]] (!%p10200_p5) }
0x3c11   : > { %11429 = vmatprep.mubr.msk.f32.mxu1 %vm12099_vm2, %v13584_v57  ;;  %v12052_v36 = vld [vmem:[%s12360_s6] ss:$0 sm:$0xff] }
0x3c12   : > { %v9059_v31 = vmul.f32 0.35355338, %v8906_v46 }
0x3c17   : > { %v11424_v11 = vpop.f32.mrb[94].mxu0 }
0x3c18   : > { %v9050_v23 = vpop.f32.mrb[95].mxu0  ;;  %v9056_v28 = vadd.f32 %v12048_v10, %v11424_v11 }
0x3c19   : > { %v9051_v12 = vadd.f32 %v12048_v10, %v9050_v23 }
0x3c1b   : > { %v11873_v8 = vpack.c.bf16 %v9056_v28, %v9051_v12 }
0x3c1d   : > { %11875 = vmatpush3.bf16.msk.msra.mxu0 %vm12753_vm9, %v11873_v8 }
0x3c1e   : > { %11876 = vmatprep.subr.bf16.mxu0 %v13587_v4 }
0x3cdb   : > { %v8834_v54 = vpop.f32.mrb[90].mxu1 }
0x3cdc   : > { %v8838_v43 = vadd.f32 %v8834_v54, %v13343_v22  ;;  %v11391_v24 = vpop.f32.mrb[91].mxu1 }
0x3ce3   : > { %v11413_v59 = vpop.f32.mrb[92].mxu1 }
0x3ce4   : > { %v8981_v63 = vadd.f32 %v12045_v47, %v11413_v59  ;;  %v8975_v6 = vpop.f32.mrb[93].mxu1  ;;  %v12051_v59 = vld [vmem:[%s12353_s30] ss:$0 sm:$0xff] }
0x3ce5   : > { %v8976_v18 = vadd.f32 %v12045_v47, %v8975_v6 }
0x3ce7   : > { %v11869_v34 = vpack.c.bf16 %v8981_v63, %v8976_v18  ;;  %v10123_v63 = vld [vmem:[%s1395_s14] ss:$0 sm:$0xff]  ;;  %s13599_s14 = sld [smem:[#allocation34_spill]] (!%p10200_p5) }
0x3ce9   : > { %11871 = vmatpush3.bf16.xpose.msk.msra.mxu1 %vm12706_vm5, %v11869_v34 }
0x3cea   : > { %11439 = vmatprep.subr.mxu1 %v13584_v57 }
0x3cf0   : > { %11430 = vmatmul.mubr.msk.f32.vlgmr.msra.gmra.mrb[94].mxu1 %vm1839_vm4, %v9059_v31 }
0x3cf1   : > { %11440 = vmatpush3.msra.mxu1 %v12047_v38  ;;  %11441 = vmatprep.mubr.msk.f32.mxu1 %vm12099_vm2, %v13584_v57 }
0x3cf2   : > { %11882 = vmatprep.subr.bf16.mxu1 %v13587_v4 }
0x3dc3   : > { %v9135_v42 = vpop.f32.mrb[94].mxu1 }
0x3dc4   : > { %v9136_v22 = vadd.f32 %v9135_v42, %v12292_v5  ;;  %v11431_v14 = vpop.f32.mrb[95].mxu1 }
0x3dc6   : > { %v9139_v0 = vsel %vm3824_vm6, %v9136_v22, -inf }
0x3dc7   : > { %9140 = vmax.xlane.f32.xlu0 %v9139_v0 }
0x3e54   : > { %v9141_v1 = vpop.xlane.xlu0 %9140 }
0x3e55   : > { %v9142_v9 = vsub.f32 %v9136_v22, %v9141_v1 }
0x3e57   : > { %v9143_v44 = vmul.f32 1.442695, %v9142_v9 }
0x3e59   : > { %12004 = vpow2.f32 %v9143_v44 }
0x3e63   : > { %v12005_v7 = vpop.eup %12004 }
0x3e64   : > { %v9145_v37 = vsel %vm3824_vm6, %v12005_v7, 0.0 }
0x3e65   : > { %9146 = vadd.xlane.f32.xlu1 %v9145_v37 }
0x3ef2   : > { %v9147_v5 = vpop.xlane.xlu1 %9146 }
0x3ef3   : > { %12006 = vrcp.f32 %v9147_v5 }
0x3efd   : > { %v12007_v19 = vpop.eup %12006 }
0x3efe   : > { %v9149_v53 = vmul.f32 %v12007_v19, %v12005_v7 }
0x3f00   : > { %11437 = vmatmul.mubr.msk.f32.vlgmr.msra.gmra.mrb[96].mxu0 %vm3824_vm6, %v9149_v53 }
0x3f01   : > { %11878 = vmatpush3.bf16.msra.mxu0 %v12981_v17  ;;  %11452 = vmatprep.mubr.msk.f32.mxu0 %vm12099_vm2, %v13584_v57  ;;  %v10120_v17 = vld [vmem:[%s1389_s20] ss:$0 sm:$0xff] }
0x3f02   : > { %11879 = vmatprep.subr.bf16.mxu0 %v13587_v4  ;;  %v5614_v16 = vadd.f32 %v10120_v17, %v13078_v52 }
0x3f04   : > { %v5617_v45 = vadd.f32 %v5614_v16, %v13011_v30 }
0x3f05   : > { %11881 = vmatpush3.bf16.msra.mxu0 %v12987_v50 }
0x3fd3   : > { %v9222_v32 = vpop.f32.mrb[96].mxu0 }
0x3fd4   : > { %v11438_v2 = vpop.f32.mrb[97].mxu0  ;;  %11442 = vmatmul.mubr.msk.f32.vlgmr.msra.gmra.mrb[96].mxu1 %vm1839_vm4, %v9222_v32 }
0x3fd5   : > { %11884 = vmatpush3.bf16.msra.mxu1 %v12994_v58  ;;  %11471 = vmatprep.mubr.msk.f32.mxu1 %vm12099_vm2, %v13584_v57  ;;  %v12049_v57 = vld [vmem:[%s12345_s24] ss:$0 sm:$0xff] }
0x3fd6   : > { %11885 = vmatprep.subr.bf16.mxu1 %v13587_v4 }
0x3fd9   : > { %11887 = vmatpush3.bf16.msra.mxu1 %v12998_v39 }
0x3fda   : > { %11888 = vmatprep.subr.bf16.mxu1 %v13587_v4 }
0x3fdd   : > { %11890 = vmatpush3.bf16.msra.mxu1 %v13004_v61 }
0x3fde   : > { %11891 = vmatprep.subr.bf16.mxu1 %v13587_v4  ;;  %v5618_v4 = vsel %vm1612_vm3, %v5617_v45, 0.0 }
0x3fe1   : > { %11893 = vmatpush3.bf16.msra.mxu1 %v13037_v40 }
0x40a7   : > { %v9295_v50 = vpop.f32.mrb[96].mxu1 }
0x40a8   : > { %v9299_v27 = vadd.f32 %v9295_v50, %v8838_v43  ;;  %v11443_v58 = vpop.f32.mrb[97].mxu1  ;;  %v10122_v43 = vld [vmem:[%s1392_s11] ss:$0 sm:$0xff] }
0x40aa   : > { %v9300_v60 = vadd.f32 %v12049_v57, %v9299_v27 }
0x40ac   : > { %v9301_v26 = vadd.f32 %v9300_v60, %v13231_v55 }
0x40ae   : > { %v9302_v39 = vsel %vm1612_vm3, %v9301_v26, 0.0 }
0x40af   : > { %9303 = vadd.xlane.f32.xlu0 %v9302_v39 }
0x40b3   : > { %5619 = vadd.xlane.f32.xlu0 %v5618_v4 }
0x413c   : > { %v9304_v61 = vpop.xlane.xlu0 %9303 }
0x413d   : > { %v9305_v40 = vmul.f32 0.03125, %v9304_v61 }
0x413f   : > { %v9306_v21 = vsub.f32 %v9301_v26, %v9305_v40 }
0x4140   : > { %v5620_v20 = vpop.xlane.xlu0 %5619 }
0x4141   : > { %v5621_v49 = vmul.f32 0.03125, %v5620_v20  ;;  %v9307_v25 = vmul.f32 %v9306_v21, %v9306_v21 }
0x4143   : > { %v5622_v13 = vsub.f32 %v5617_v45, %v5621_v49  ;;  %v9308_v52 = vsel %vm1612_vm3, %v9307_v25, 0.0 }
0x4144   : > { %9309 = vadd.xlane.f32.xlu1 %v9308_v52  ;;  %v10201_v52 = vld [vmem:[%s13597_s29] ss:$0 sm:$0xff] (!%p10200_p5) }
0x4145   : > { %v5623_v55 = vmul.f32 %v5622_v13, %v5622_v13 }
0x4147   : > { %v5624_v30 = vsel %vm1612_vm3, %v5623_v55, 0.0 }
0x4148   : > { %5625 = vadd.xlane.f32.xlu0 %v5624_v30  ;;  %v10202_v30 = vld [vmem:[%s13598_s8] ss:$0 sm:$0xff] (!%p10200_p5) }
0x41d1   : > { %v9310_v3 = vpop.xlane.xlu1 %9309 }
0x41d2   : > { %v9311_v48 = vmul.f32 0.03125, %v9310_v3 }
0x41d4   : > { %v9312_v33 = vadd.f32 1e-05, %v9311_v48 }
0x41d5   : > { %v5626_v35 = vpop.xlane.xlu0 %5625 }
0x41d6   : > { %12008 = vrsqrt.f32 %v9312_v33  ;;  %v5627_v15 = vmul.f32 0.03125, %v5626_v35  ;;  %v10203_v33 = vld [vmem:[%s13599_s14] ss:$0 sm:$0xff] (!%p10200_p5) }
0x41d8   : > { %v5628_v51 = vadd.f32 1e-05, %v5627_v15 }
0x41da   : > { %12010 = vrsqrt.f32 %v5628_v51 }
0x41e0   : > { %v12009_v56 = vpop.eup %12008 }
0x41e1   : > { %v9314_v62 = vmul.f32 %v12009_v56, %v9306_v21 }
0x41e3   : > { %v9315_v41 = vmul.f32 %v12050_v29, %v9314_v62 }
0x41e4   : > { %v12011_v54 = vpop.eup %12010 }
0x41e5   : > { %v5630_v24 = vmul.f32 %v12011_v54, %v5622_v13  ;;  %v9316_v47 = vadd.f32 %v12051_v59, %v9315_v41 }
0x41e7   : > { %v5637_v6 = vmul.f32 %v10122_v43, %v5630_v24  ;;  %11453 = vmatmul.mubr.msk.f32.vlgmr.msra.gmra.mrb[98].mxu0 %vm1612_vm3, %v9316_v47 }
0x41e9   : > { %v5644_v18 = vadd.f32 %v10123_v63, %v5637_v6 }
0x41eb   : > { %5645 = vst.msk [vmem:[#allocation2] sm:$0xff] %vm1612_vm3, %v5644_v18 }
0x41f2   : > { %v9489_v53 = vld [vmem:[#allocation2] sm:$0xff] (!%p10200_p5) }
0x41f3   : > { %v9490_v2 = vsel (!%p10200_p5), %vm1612_vm3, %v9489_v53, 0.0 }
0x41f4   : > { %9491 = vadd.xlane.f32.xlu0 (!%p10200_p5), %v9490_v2 }
0x4281   : > { %v9492_v50 = vpop.xlane.xlu0 (!%p10200_p5), %9491 }
0x4282   : > { %v9493_v27 = vmul.f32 (!%p10200_p5), 0.03125, %v9492_v50 }
0x4284   : > { %v9494_v58 = vsub.f32 (!%p10200_p5), %v9489_v53, %v9493_v27 }
0x4286   : > { %v9495_v60 = vmul.f32 (!%p10200_p5), %v9494_v58, %v9494_v58 }
0x4288   : > { %v9496_v39 = vsel (!%p10200_p5), %vm1612_vm3, %v9495_v60, 0.0 }
0x42ba   : > { %v9386_v34 = vpop.f32.mrb[98].mxu0 }
0x42bb   : > { %v9387_v46 = vadd.f32 %v12052_v36, %v9386_v34  ;;  %v11454_v31 = vpop.f32.mrb[99].mxu0 }
0x42bd   : > { %v9390_v38 = vmax.f32 %v9387_v46, 0.0 }
0x42bf   : > { %11472 = vmatmul.mubr.msk.f32.vlgmr.msra.gmra.mrb[98].mxu1 %vm5543_vm10, %v9390_v38 }
0x4392   : > { %v9460_v42 = vpop.f32.mrb[98].mxu1 }
0x4393   : > { %v9461_v22 = vadd.f32 %v10120_v17, %v9460_v42  ;;  %v11473_v14 = vpop.f32.mrb[99].mxu1 }
0x4395   : > { %v9464_v0 = vadd.f32 %v9461_v22, %v9316_v47 }
0x4397   : > { %v9465_v1 = vsel %vm1612_vm3, %v9464_v0, 0.0 }
0x4398   : > { %9466 = vadd.xlane.f32.xlu1 %v9465_v1 }
0x4425   : > { %v9467_v9 = vpop.xlane.xlu1 %9466 }
0x4426   : > { %v9468_v44 = vmul.f32 0.03125, %v9467_v9 }
0x4428   : > { %v9469_v7 = vsub.f32 %v9464_v0, %v9468_v44 }
0x442a   : > { %v9470_v37 = vmul.f32 %v9469_v7, %v9469_v7 }
0x442c   : > { %v9471_v11 = vsel %vm1612_vm3, %v9470_v37, 0.0 }
0x442d   : > { %9472 = vadd.xlane.f32.xlu1 %v9471_v11 }
0x4431   : > { %9497 = vadd.xlane.f32.xlu1 (!%p10200_p5), %v9496_v39 }
0x44ba   : > { %v9473_v23 = vpop.xlane.xlu1 %9472 }
0x44bb   : > { %v9474_v10 = vmul.f32 0.03125, %v9473_v23 }
0x44bd   : > { %v9475_v28 = vadd.f32 1e-05, %v9474_v10 }
0x44be   : > { %v9498_v61 = vpop.xlane.xlu1 (!%p10200_p5), %9497 }
0x44bf   : > { %12012 = vrsqrt.f32 %v9475_v28  ;;  %v9499_v40 = vmul.f32 (!%p10200_p5), 0.03125, %v9498_v61 }
0x44c1   : > { %v9500_v21 = vadd.f32 (!%p10200_p5), 1e-05, %v9499_v40 }
0x44c3   : > { %12053 = vrsqrt.f32 (!%p10200_p5), %v9500_v21 }
0x44c9   : > { %v12013_v12 = vpop.eup %12012 }
0x44ca   : > { %v9477_v8 = vmul.f32 %v12013_v12, %v9469_v7  ;;  %9484 = sbr.rel (%p10200_p5) target bundleno = 18085 (0x46a5), region = 156 }
0x44cc   : > { %v9478_v5 = vmul.f32 %v10122_v43, %v9477_v8  ;;  %v10204_v43 = vld [vmem:[#allocation3] ss:$0 sm:$0xff] (!%p10200_p5) }
0x44cd   : > { %v12054_v13 = vpop.eup (!%p10200_p5), %12053 }
0x44ce   : > { %v9479_v19 = vadd.f32 %v10123_v63, %v9478_v5  ;;  %v9502_v55 = vmul.f32 (!%p10200_p5), %v12054_v13, %v9494_v58 }
0x44d0   : > { %9480 = vst.msk [vmem:[#allocation2 + $0x8] sm:$0xff] %vm1612_vm3, %v9479_v19  ;;  %v9509_v3 = vmul.f32 (!%p10200_p5), %v10201_v52, %v9502_v55 }
0x44d2   : > { %v9516_v35 = vadd.f32 %v10202_v30, %v9509_v3 }
0x44d4   : > { %v9523_v51 = vmul.f32 %v10203_v33, %v9516_v35 }
0x44d6   : > { %v9524_v62 = vsel %vm1612_vm3, %v9523_v51, 0.0 }
0x44d7   : > { %v9536_v32 = vld [vmem:[#allocation2 + $0x8] sm:$0xff] }
0x44d8   : > { %v9537_v17 = vsel %vm1612_vm3, %v9536_v32, 0.0 }
0x44d9   : > { %9538 = vadd.xlane.f32.xlu0 %v9537_v17 }
0x44dd   : > { %9525 = vadd.xlane.f32.xlu0 %v9524_v62 }
0x4566   : > { %v9539_v16 = vpop.xlane.xlu0 %9538 }
0x4567   : > { %v9540_v57 = vmul.f32 0.03125, %v9539_v16 }
0x4569   : > { %v9541_v26 = vsub.f32 %v9536_v32, %v9540_v57 }
0x456a   : > { %v9526_v24 = vpop.xlane.xlu0 %9525 }
0x456b   : > { %v9542_v45 = vmul.f32 %v9541_v26, %v9541_v26  ;;  %v9533_v59 = vadd.f32 %v10204_v43, %v9526_v24 }
0x456d   : > { %v9543_v4 = vsel %vm1612_vm3, %v9542_v45, 0.0  ;;  %9535 = vst.msk [vmem:[%s13600_s19] sm:$0xff] %vm9534_vm11, %v9533_v59 }
0x456e   : > { %9544 = vadd.xlane.f32.xlu1 %v9543_v4 }
0x45fb   : > { %v9545_v20 = vpop.xlane.xlu1 %9544 }
0x45fc   : > { %v9546_v49 = vmul.f32 0.03125, %v9545_v20 }
0x45fe   : > { %v9547_v25 = vadd.f32 1e-05, %v9546_v49 }
0x4600   : > { %12055 = vrsqrt.f32 %v9547_v25 }
0x460a   : > { %v12056_v48 = vpop.eup %12055 }
0x460b   : > { %v9549_v15 = vmul.f32 %v12056_v48, %v9541_v26 }
0x460d   : > { %v9550_v56 = vmul.f32 %v10201_v52, %v9549_v15 }
0x460f   : > { %v9551_v29 = vadd.f32 %v10202_v30, %v9550_v56 }
0x4611   : > { %v9552_v41 = vmul.f32 %v10203_v33, %v9551_v29 }
0x4613   : > { %v9553_v54 = vsel %vm1612_vm3, %v9552_v41, 0.0 }
0x4614   : > { %9554 = vadd.xlane.f32.xlu1 %v9553_v54 }
0x46a1   : > { %v9555_v47 = vpop.xlane.xlu1 %9554 }
0x46a2   : > { %v9556_v63 = vadd.f32 %v10204_v43, %v9555_v47 }
0x46a4   : > { %10205 = vst.msk [vmem:[%s13600_s19 + $0x8] sm:$0xff] %vm9534_vm11, %v9556_v63 }
0x46a5 PF: > { %s13601_s24 = sld [smem:[#allocation36_spill]] }
0x46ab   : > { %s77_s28 = sadd.s32 1, %s13601_s24  }
0x46ac   : > { %p74_p6 = scmp.ge.s32.totalorder %s77_s28, 4  }
0x46ae   :  { %76 = sbr.rel (!%p74_p6) target bundleno = 76 (0x4c), region = 334 }

</bundles_post_ra>
